<compile_context>
chip_gen: v6e
topology: v6e:2x2x1
jax: 0.10.0
libtpu: 0.0.40
codegen_flags: <defaults>
</compile_context>

<pallas_src>
import numpy as np
import jax
import jax.numpy as jnp
from jax import lax
from jax.experimental import pallas as pl
from jax.experimental.pallas import tpu as pltpu

LANE = 128
SUBLANE = 8


def _round_up(x, m):
    return (x + m - 1) // m * m


def _pick_row_tile(ho, wo8, target_m=256):
    """Largest divisor of ho such that tile_rows * wo8 <= target_m."""
    cap = max(1, target_m // max(wo8, 1))
    tr = 1
    for d in range(1, ho + 1):
        if ho % d == 0 and d <= cap:
            tr = d
    return tr


# ----------------------------------------------------------------------------
# Fused conv3x3 (as 9 accumulating K=Cin matmuls) + folded BN + ReLU kernel.
# ----------------------------------------------------------------------------
def _make_conv_kernel(taps, tr, wo8, wo_valid, cp, cop):
    m = tr * wo8

    def kernel(x0_ref, x1_ref, x2_ref, w_ref, s_ref, b_ref, o_ref):
        # x{0,1,2}_ref: (1, tr, Wblk, Ctot) bf16   row-shifted (dy) input views
        # w_ref       : (9, cp, cop)        bf16   tap-major reshaped weights
        # s_ref, b_ref: (1, cop)            f32    folded BatchNorm affine
        # o_ref       : (1, tr, wo8, cop)   bf16
        xs = (x0_ref[0], x1_ref[0], x2_ref[0])      # load each dy block once
        acc = jnp.zeros((m, cop), jnp.float32)
        for (di, coff, choff, wi) in taps:          # static 9-tap unrolled loop
            patch = xs[di][:, coff:coff + wo8, choff:choff + cp]
            acc = acc + jnp.dot(patch.reshape(m, cp), w_ref[wi],
                                preferred_element_type=jnp.float32)
        y = jnp.maximum(acc * s_ref[...] + b_ref[...], 0.0)
        if wo_valid < wo8:
            # zero the padded output columns so they can serve as the next
            # layer's zero padding
            col = lax.broadcasted_iota(jnp.int32, (m, cop), 0) % wo8
            y = jnp.where(col < wo_valid, y, 0.0)
        o_ref[0] = y.reshape(tr, wo8, cop).astype(o_ref.dtype)

    return kernel


def conv3x3_bn_relu(x, w_true, w9, scale, bias, stride):
    """One RPN layer on channel-padded, width-padded NHWC bf16 activations.

    x      : (N, H, Wstore, Cp) bf16; columns >= w_true are exact zeros.
    w_true : true (unpadded) spatial width of x.
    w9     : (9, Cp, Cop) bf16 tap-major conv weights (zero-padded channels).
    scale  : (1, Cop) f32 folded BN scale, bias: (1, Cop) f32 folded BN bias.
    Returns (y, new_w_true): y is (N, Ho, Wo8, Cop) bf16, cols >= Wo zeroed.
    """
    N, H, Wstore, Cp = x.shape
    Cop = w9.shape[-1]
    s = stride

    Ho = (H - 1) // s + 1
    Wo = (w_true - 1) // s + 1
    Wo8 = _round_up(Wo, SUBLANE)

    # Padded input width so every tap's length-Wo8 column slice is in range.
    w_target = (Wo8 + 2) if s == 1 else 2 * (Wo8 + 1)
    padded_W = max(w_target, 1 + Wstore)
    if s == 2 and padded_W % 2 == 1:
        padded_W += 1
    right = padded_W - 1 - Wstore

    # Spatial zero padding (left col of 1; stored zero cols already cover part
    # of the right padding).
    xp = jnp.pad(x, ((0, 0), (1, 1), (1, right), (0, 0)))

    # Three row-shifted / row-strided (dy) views: the only activation
    # duplication that ever reaches HBM (3x instead of the old 9x im2col).
    xds = [xp[:, dy:dy + s * (Ho - 1) + 1:s, :, :] for dy in range(3)]
    if s == 1:
        taps = [(dy, dx, 0, dy * 3 + dx) for dy in range(3) for dx in range(3)]
    else:
        # Pack adjacent column pairs into channels: pair p = padded cols
        # (2p, 2p+1).  Output col c uses pair c (halves 0,1) and pair c+1
        # (half 0) -> all in-kernel slices are contiguous.
        xds = [xd.reshape(N, Ho, padded_W // 2, 2 * Cp) for xd in xds]
        taps = []
        for dy in range(3):
            taps += [(dy, 0, 0, dy * 3 + 0),
                     (dy, 0, Cp, dy * 3 + 1),
                     (dy, 1, 0, dy * 3 + 2)]

    wblk = xds[0].shape[2]
    ctot = xds[0].shape[3]

    tr = _pick_row_tile(Ho, Wo8)
    grid = (N, Ho // tr)

    kernel = _make_conv_kernel(taps, tr, Wo8, Wo, Cp, Cop)
    x_spec = pl.BlockSpec((1, tr, wblk, ctot), lambda n, t: (n, t, 0, 0))

    flops = 2 * N * Ho * Wo8 * Cp * Cop * len(taps)
    bytes_acc = (sum(int(np.prod(xd.shape)) for xd in xds) * 2
                 + int(np.prod(w9.shape)) * 2
                 + 2 * Cop * 4
                 + N * Ho * Wo8 * Cop * 2)

    y = pl.pallas_call(
        kernel,
        out_shape=jax.ShapeDtypeStruct((N, Ho, Wo8, Cop), jnp.bfloat16),
        grid=grid,
        in_specs=[
            x_spec, x_spec, x_spec,
            pl.BlockSpec((9, Cp, Cop), lambda n, t: (0, 0, 0)),   # resident
            pl.BlockSpec((1, Cop), lambda n, t: (0, 0)),          # resident
            pl.BlockSpec((1, Cop), lambda n, t: (0, 0)),          # resident
        ],
        out_specs=pl.BlockSpec((1, tr, Wo8, Cop), lambda n, t: (n, t, 0, 0)),
        compiler_params=pltpu.CompilerParams(
            dimension_semantics=("parallel", "parallel"),
            vmem_limit_bytes=64 * 1024 * 1024),
        cost_estimate=pl.CostEstimate(flops=flops, transcendentals=0,
                                      bytes_accessed=bytes_acc),
    )(xds[0], xds[1], xds[2], w9, scale, bias)

    return y, Wo


# ----------------------------------------------------------------------------
# Parameter construction mirroring RPN.__init__ (blocks 1-3, BN folded).
# ----------------------------------------------------------------------------
def init_rpn_params(key, num_input_filters, num_filters, layer_nums,
                    layer_strides, feature_blocks=3):
    assert len(layer_nums) == 3
    layer_defs = []
    cin = num_input_filters
    for b in range(feature_blocks):
        cout = num_filters[b]
        layer_defs.append((cin, cout, layer_strides[b]))   # ZeroPad+Conv stride s
        for _ in range(layer_nums[b]):
            layer_defs.append((cout, cout, 1))             # Conv pad=1 stride 1
        cin = cout

    eps = 1e-3  # BatchNorm2d eps used by the module
    params = []
    for (ci, co, s) in layer_defs:
        key, kw, kg, kb, km, kv = jax.random.split(key, 6)
        w = jax.random.normal(kw, (3, 3, ci, co), jnp.float32) / np.sqrt(9 * ci)
        gamma = 1.4 + 0.05 * jax.random.normal(kg, (co,), jnp.float32)
        beta = 0.05 * jax.random.normal(kb, (co,), jnp.float32)
        rmean = 0.05 * jax.random.normal(km, (co,), jnp.float32)
        rvar = 1.0 + 0.1 * jnp.abs(jax.random.normal(kv, (co,), jnp.float32))
        scale = gamma / jnp.sqrt(rvar + eps)      # folded inference-mode BN
        bias = beta - rmean * scale

        cp = _round_up(ci, LANE)
        cop = _round_up(co, LANE)
        w_pad = jnp.zeros((3, 3, cp, cop), jnp.float32).at[:, :, :ci, :co].set(w)
        w9 = w_pad.reshape(9, cp, cop).astype(jnp.bfloat16)
        scale_p = jnp.ones((cop,), jnp.float32).at[:co].set(scale).reshape(1, cop)
        bias_p = jnp.zeros((cop,), jnp.float32).at[:co].set(bias).reshape(1, cop)

        params.append({
            "w9": w9, "scale_p": scale_p, "bias_p": bias_p,
            "stride": int(s), "cout": int(co),
            # unpadded f32 copies kept for the pure-JAX reference path
            "w_raw": w, "scale_raw": scale, "bias_raw": bias,
        })
    return params


def rpn_forward(x_nchw, params):
    """RPN.forward with upscaling_mode='none', bof_mode='none', feature_blocks=3."""
    x = jnp.transpose(x_nchw, (0, 2, 3, 1))                 # NCHW -> NHWC once
    N, H, W, C = x.shape
    cp0 = _round_up(C, LANE)
    x = jnp.pad(x, ((0, 0), (0, 0), (0, 0), (0, cp0 - C))).astype(jnp.bfloat16)
    w_true = W
    for p in params:
        x, w_true = conv3x3_bn_relu(x, w_true, p["w9"], p["scale_p"],
                                    p["bias_p"], p["stride"])
    cout = params[-1]["cout"]
    x = x[:, :, :w_true, :cout].astype(jnp.float32)
    return jnp.transpose(x, (0, 3, 1, 2))                   # back to NCHW


def rpn_forward_reference(x_nchw, params):
    """Pure-JAX f32 reference (conv + folded BN + ReLU chain)."""
    x = jnp.transpose(x_nchw, (0, 2, 3, 1)).astype(jnp.float32)
    for p in params:
        s = p["stride"]
        y = lax.conv_general_dilated(
            x, p["w_raw"], window_strides=(s, s), padding=((1, 1), (1, 1)),
            dimension_numbers=("NHWC", "HWIO", "NHWC"))
        x = jnp.maximum(y * p["scale_raw"] + p["bias_raw"], 0.0)
    return jnp.transpose(x, (0, 3, 1, 2))


if __name__ == "__main__":
    key = jax.random.PRNGKey(0)
    k_x, k_p = jax.random.split(key)

    # Small config consistent with the module structure.
    N, C, H, W = 2, 32, 16, 16
    num_filters = [32, 32, 64]
    layer_nums = [3, 5, 5]
    layer_strides = [2, 2, 2]

    x = jax.random.normal(k_x, (N, C, H, W), jnp.float32)
    params = init_rpn_params(k_p, num_input_filters=C, num_filters=num_filters,
                             layer_nums=layer_nums, layer_strides=layer_strides,
                             feature_blocks=3)

    fwd = jax.jit(lambda inp: rpn_forward(inp, params))
    out = jax.block_until_ready(fwd(x))

    # 16 -> 8 -> 4 -> 2 spatial, final channels = num_filters[2]
    assert out.shape == (N, num_filters[2], H // 8, W // 8), out.shape
    assert out.dtype == jnp.float32

    # Loose numeric check vs pure-JAX f32 reference (kernel uses bf16 MXU).
    ref = jax.block_until_ready(rpn_forward_reference(x, params))
    err = float(jnp.max(jnp.abs(out - ref)))
    ref_scale = float(jnp.max(jnp.abs(ref))) + 1e-6
    assert err / ref_scale < 0.15, (err, ref_scale)

    print("KERNEL_OK")
</pallas_src>

<mosaic_0001>
module attributes {stable_mosaic.version = 11 : i64} {
  func.func @kernel(%arg0: i32, %arg1: i32, %arg2: memref<1x8x9x256xbf16, #tpu.memory_space<vmem>>, %arg3: memref<1x8x9x256xbf16, #tpu.memory_space<vmem>>, %arg4: memref<1x8x9x256xbf16, #tpu.memory_space<vmem>>, %arg5: memref<9x128x128xbf16, #tpu.memory_space<vmem>>, %arg6: memref<1x128xf32, #tpu.memory_space<vmem>>, %arg7: memref<1x128xf32, #tpu.memory_space<vmem>>, %arg8: memref<1x8x8x128xbf16, #tpu.memory_space<vmem>>) attributes {dimension_semantics = [#tpu.dimension_semantics<parallel>, #tpu.dimension_semantics<parallel>], iteration_bounds = array<i64: 2, 1>, scalar_prefetch = 0 : i64, scratch_operands = 0 : i64, tpu.core_type = #tpu.core_type<tc>, window_params = [{transform_indices = @transform_0, window_bounds = array<i64: 1, 8, 9, 256>}, {transform_indices = @transform_1, window_bounds = array<i64: 1, 8, 9, 256>}, {transform_indices = @transform_2, window_bounds = array<i64: 1, 8, 9, 256>}, {pipeline_mode = #tpu.pipeline_mode<synchronous>, transform_indices = @transform_3, window_bounds = array<i64: 9, 128, 128>}, {pipeline_mode = #tpu.pipeline_mode<synchronous>, transform_indices = @transform_4, window_bounds = array<i64: 1, 128>}, {pipeline_mode = #tpu.pipeline_mode<synchronous>, transform_indices = @transform_5, window_bounds = array<i64: 1, 128>}, {transform_indices = @transform_6, window_bounds = array<i64: 1, 8, 8, 128>}]} {
    %c0 = arith.constant 0 : index
    %c0_0 = arith.constant 0 : index
    %c0_1 = arith.constant 0 : index
    %c0_2 = arith.constant 0 : index
    %0 = vector.load %arg2[%c0, %c0_0, %c0_1, %c0_2] : memref<1x8x9x256xbf16, #tpu.memory_space<vmem>>, vector<1x8x9x256xbf16>
    %1 = vector.shape_cast %0 : vector<1x8x9x256xbf16> to vector<8x9x256xbf16>
    %c0_3 = arith.constant 0 : index
    %c0_4 = arith.constant 0 : index
    %c0_5 = arith.constant 0 : index
    %c0_6 = arith.constant 0 : index
    %2 = vector.load %arg3[%c0_3, %c0_4, %c0_5, %c0_6] : memref<1x8x9x256xbf16, #tpu.memory_space<vmem>>, vector<1x8x9x256xbf16>
    %3 = vector.shape_cast %2 : vector<1x8x9x256xbf16> to vector<8x9x256xbf16>
    %c0_7 = arith.constant 0 : index
    %c0_8 = arith.constant 0 : index
    %c0_9 = arith.constant 0 : index
    %c0_10 = arith.constant 0 : index
    %4 = vector.load %arg4[%c0_7, %c0_8, %c0_9, %c0_10] : memref<1x8x9x256xbf16, #tpu.memory_space<vmem>>, vector<1x8x9x256xbf16>
    %5 = vector.shape_cast %4 : vector<1x8x9x256xbf16> to vector<8x9x256xbf16>
    %cst = arith.constant 0.000000e+00 : f32
    %6 = vector.broadcast %cst : f32 to vector<64x128xf32>
    %7 = vector.extract_strided_slice %1 {offsets = [0, 0, 0], sizes = [8, 8, 128], strides = [1, 1, 1]} : vector<8x9x256xbf16> to vector<8x8x128xbf16>
    %8 = vector.shape_cast %7 : vector<8x8x128xbf16> to vector<64x128xbf16>
    %c0_11 = arith.constant 0 : index
    %c0_12 = arith.constant 0 : index
    %c0_13 = arith.constant 0 : index
    %9 = vector.load %arg5[%c0_11, %c0_12, %c0_13] : memref<9x128x128xbf16, #tpu.memory_space<vmem>>, vector<1x128x128xbf16>
    %10 = vector.shape_cast %9 : vector<1x128x128xbf16> to vector<128x128xbf16>
    %cst_14 = arith.constant dense<0.000000e+00> : vector<64x128xf32>
    %11 = tpu.matmul %8, %10, %cst_14 {dimension_numbers = #tpu.dot_dimension_numbers<[1], [0], [0], [1], [0, 0, 1, 1], [], []>} : vector<64x128xbf16>, vector<128x128xbf16>, vector<64x128xf32> -> vector<64x128xf32>
    %12 = arith.addf %6, %11 : vector<64x128xf32>
    %13 = vector.extract_strided_slice %1 {offsets = [0, 0, 128], sizes = [8, 8, 128], strides = [1, 1, 1]} : vector<8x9x256xbf16> to vector<8x8x128xbf16>
    %14 = vector.shape_cast %13 : vector<8x8x128xbf16> to vector<64x128xbf16>
    %c1 = arith.constant 1 : index
    %c0_15 = arith.constant 0 : index
    %c0_16 = arith.constant 0 : index
    %15 = vector.load %arg5[%c1, %c0_15, %c0_16] : memref<9x128x128xbf16, #tpu.memory_space<vmem>>, vector<1x128x128xbf16>
    %16 = vector.shape_cast %15 : vector<1x128x128xbf16> to vector<128x128xbf16>
    %cst_17 = arith.constant dense<0.000000e+00> : vector<64x128xf32>
    %17 = tpu.matmul %14, %16, %cst_17 {dimension_numbers = #tpu.dot_dimension_numbers<[1], [0], [0], [1], [0, 0, 1, 1], [], []>} : vector<64x128xbf16>, vector<128x128xbf16>, vector<64x128xf32> -> vector<64x128xf32>
    %18 = arith.addf %12, %17 : vector<64x128xf32>
    %19 = vector.extract_strided_slice %1 {offsets = [0, 1, 0], sizes = [8, 8, 128], strides = [1, 1, 1]} : vector<8x9x256xbf16> to vector<8x8x128xbf16>
    %20 = vector.shape_cast %19 : vector<8x8x128xbf16> to vector<64x128xbf16>
    %c2 = arith.constant 2 : index
    %c0_18 = arith.constant 0 : index
    %c0_19 = arith.constant 0 : index
    %21 = vector.load %arg5[%c2, %c0_18, %c0_19] : memref<9x128x128xbf16, #tpu.memory_space<vmem>>, vector<1x128x128xbf16>
    %22 = vector.shape_cast %21 : vector<1x128x128xbf16> to vector<128x128xbf16>
    %cst_20 = arith.constant dense<0.000000e+00> : vector<64x128xf32>
    %23 = tpu.matmul %20, %22, %cst_20 {dimension_numbers = #tpu.dot_dimension_numbers<[1], [0], [0], [1], [0, 0, 1, 1], [], []>} : vector<64x128xbf16>, vector<128x128xbf16>, vector<64x128xf32> -> vector<64x128xf32>
    %24 = arith.addf %18, %23 : vector<64x128xf32>
    %25 = vector.extract_strided_slice %3 {offsets = [0, 0, 0], sizes = [8, 8, 128], strides = [1, 1, 1]} : vector<8x9x256xbf16> to vector<8x8x128xbf16>
    %26 = vector.shape_cast %25 : vector<8x8x128xbf16> to vector<64x128xbf16>
    %c3 = arith.constant 3 : index
    %c0_21 = arith.constant 0 : index
    %c0_22 = arith.constant 0 : index
    %27 = vector.load %arg5[%c3, %c0_21, %c0_22] : memref<9x128x128xbf16, #tpu.memory_space<vmem>>, vector<1x128x128xbf16>
    %28 = vector.shape_cast %27 : vector<1x128x128xbf16> to vector<128x128xbf16>
    %cst_23 = arith.constant dense<0.000000e+00> : vector<64x128xf32>
    %29 = tpu.matmul %26, %28, %cst_23 {dimension_numbers = #tpu.dot_dimension_numbers<[1], [0], [0], [1], [0, 0, 1, 1], [], []>} : vector<64x128xbf16>, vector<128x128xbf16>, vector<64x128xf32> -> vector<64x128xf32>
    %30 = arith.addf %24, %29 : vector<64x128xf32>
    %31 = vector.extract_strided_slice %3 {offsets = [0, 0, 128], sizes = [8, 8, 128], strides = [1, 1, 1]} : vector<8x9x256xbf16> to vector<8x8x128xbf16>
    %32 = vector.shape_cast %31 : vector<8x8x128xbf16> to vector<64x128xbf16>
    %c4 = arith.constant 4 : index
    %c0_24 = arith.constant 0 : index
    %c0_25 = arith.constant 0 : index
    %33 = vector.load %arg5[%c4, %c0_24, %c0_25] : memref<9x128x128xbf16, #tpu.memory_space<vmem>>, vector<1x128x128xbf16>
    %34 = vector.shape_cast %33 : vector<1x128x128xbf16> to vector<128x128xbf16>
    %cst_26 = arith.constant dense<0.000000e+00> : vector<64x128xf32>
    %35 = tpu.matmul %32, %34, %cst_26 {dimension_numbers = #tpu.dot_dimension_numbers<[1], [0], [0], [1], [0, 0, 1, 1], [], []>} : vector<64x128xbf16>, vector<128x128xbf16>, vector<64x128xf32> -> vector<64x128xf32>
    %36 = arith.addf %30, %35 : vector<64x128xf32>
    %37 = vector.extract_strided_slice %3 {offsets = [0, 1, 0], sizes = [8, 8, 128], strides = [1, 1, 1]} : vector<8x9x256xbf16> to vector<8x8x128xbf16>
    %38 = vector.shape_cast %37 : vector<8x8x128xbf16> to vector<64x128xbf16>
    %c5 = arith.constant 5 : index
    %c0_27 = arith.constant 0 : index
    %c0_28 = arith.constant 0 : index
    %39 = vector.load %arg5[%c5, %c0_27, %c0_28] : memref<9x128x128xbf16, #tpu.memory_space<vmem>>, vector<1x128x128xbf16>
    %40 = vector.shape_cast %39 : vector<1x128x128xbf16> to vector<128x128xbf16>
    %cst_29 = arith.constant dense<0.000000e+00> : vector<64x128xf32>
    %41 = tpu.matmul %38, %40, %cst_29 {dimension_numbers = #tpu.dot_dimension_numbers<[1], [0], [0], [1], [0, 0, 1, 1], [], []>} : vector<64x128xbf16>, vector<128x128xbf16>, vector<64x128xf32> -> vector<64x128xf32>
    %42 = arith.addf %36, %41 : vector<64x128xf32>
    %43 = vector.extract_strided_slice %5 {offsets = [0, 0, 0], sizes = [8, 8, 128], strides = [1, 1, 1]} : vector<8x9x256xbf16> to vector<8x8x128xbf16>
    %44 = vector.shape_cast %43 : vector<8x8x128xbf16> to vector<64x128xbf16>
    %c6 = arith.constant 6 : index
    %c0_30 = arith.constant 0 : index
    %c0_31 = arith.constant 0 : index
    %45 = vector.load %arg5[%c6, %c0_30, %c0_31] : memref<9x128x128xbf16, #tpu.memory_space<vmem>>, vector<1x128x128xbf16>
    %46 = vector.shape_cast %45 : vector<1x128x128xbf16> to vector<128x128xbf16>
    %cst_32 = arith.constant dense<0.000000e+00> : vector<64x128xf32>
    %47 = tpu.matmul %44, %46, %cst_32 {dimension_numbers = #tpu.dot_dimension_numbers<[1], [0], [0], [1], [0, 0, 1, 1], [], []>} : vector<64x128xbf16>, vector<128x128xbf16>, vector<64x128xf32> -> vector<64x128xf32>
    %48 = arith.addf %42, %47 : vector<64x128xf32>
    %49 = vector.extract_strided_slice %5 {offsets = [0, 0, 128], sizes = [8, 8, 128], strides = [1, 1, 1]} : vector<8x9x256xbf16> to vector<8x8x128xbf16>
    %50 = vector.shape_cast %49 : vector<8x8x128xbf16> to vector<64x128xbf16>
    %c7 = arith.constant 7 : index
    %c0_33 = arith.constant 0 : index
    %c0_34 = arith.constant 0 : index
    %51 = vector.load %arg5[%c7, %c0_33, %c0_34] : memref<9x128x128xbf16, #tpu.memory_space<vmem>>, vector<1x128x128xbf16>
    %52 = vector.shape_cast %51 : vector<1x128x128xbf16> to vector<128x128xbf16>
    %cst_35 = arith.constant dense<0.000000e+00> : vector<64x128xf32>
    %53 = tpu.matmul %50, %52, %cst_35 {dimension_numbers = #tpu.dot_dimension_numbers<[1], [0], [0], [1], [0, 0, 1, 1], [], []>} : vector<64x128xbf16>, vector<128x128xbf16>, vector<64x128xf32> -> vector<64x128xf32>
    %54 = arith.addf %48, %53 : vector<64x128xf32>
    %55 = vector.extract_strided_slice %5 {offsets = [0, 1, 0], sizes = [8, 8, 128], strides = [1, 1, 1]} : vector<8x9x256xbf16> to vector<8x8x128xbf16>
    %56 = vector.shape_cast %55 : vector<8x8x128xbf16> to vector<64x128xbf16>
    %c8 = arith.constant 8 : index
    %c0_36 = arith.constant 0 : index
    %c0_37 = arith.constant 0 : index
    %57 = vector.load %arg5[%c8, %c0_36, %c0_37] : memref<9x128x128xbf16, #tpu.memory_space<vmem>>, vector<1x128x128xbf16>
    %58 = vector.shape_cast %57 : vector<1x128x128xbf16> to vector<128x128xbf16>
    %cst_38 = arith.constant dense<0.000000e+00> : vector<64x128xf32>
    %59 = tpu.matmul %56, %58, %cst_38 {dimension_numbers = #tpu.dot_dimension_numbers<[1], [0], [0], [1], [0, 0, 1, 1], [], []>} : vector<64x128xbf16>, vector<128x128xbf16>, vector<64x128xf32> -> vector<64x128xf32>
    %60 = arith.addf %54, %59 : vector<64x128xf32>
    %c0_39 = arith.constant 0 : index
    %c0_40 = arith.constant 0 : index
    %61 = vector.load %arg6[%c0_39, %c0_40] : memref<1x128xf32, #tpu.memory_space<vmem>>, vector<1x128xf32>
    %62 = vector.broadcast %61 : vector<1x128xf32> to vector<64x128xf32>
    %63 = arith.mulf %60, %62 : vector<64x128xf32>
    %c0_41 = arith.constant 0 : index
    %c0_42 = arith.constant 0 : index
    %64 = vector.load %arg7[%c0_41, %c0_42] : memref<1x128xf32, #tpu.memory_space<vmem>>, vector<1x128xf32>
    %65 = vector.broadcast %64 : vector<1x128xf32> to vector<64x128xf32>
    %66 = arith.addf %63, %65 : vector<64x128xf32>
    %cst_43 = arith.constant 0.000000e+00 : f32
    %67 = vector.broadcast %cst_43 : f32 to vector<64x128xf32>
    %68 = arith.maximumf %66, %67 : vector<64x128xf32>
    %69 = vector.shape_cast %68 : vector<64x128xf32> to vector<8x8x128xf32>
    %70 = arith.truncf %69 : vector<8x8x128xf32> to vector<8x8x128xbf16>
    %c0_44 = arith.constant 0 : index
    %c0_45 = arith.constant 0 : index
    %c0_46 = arith.constant 0 : index
    %c0_47 = arith.constant 0 : index
    %71 = vector.load %arg8[%c0_44, %c0_45, %c0_46, %c0_47] : memref<1x8x8x128xbf16, #tpu.memory_space<vmem>>, vector<1x8x8x128xbf16>
    %72 = vector.shape_cast %71 : vector<1x8x8x128xbf16> to vector<8x8x128xbf16>
    %73 = vector.shape_cast %70 : vector<8x8x128xbf16> to vector<1x8x8x128xbf16>
    tpu.vector_store %arg8[%c0_44, %c0_45, %c0_46, %c0_47], %73 {strides = array<i32>} : memref<1x8x8x128xbf16, #tpu.memory_space<vmem>>, vector<1x8x8x128xbf16>,
    return
  }
  func.func @transform_0(%arg0: i32, %arg1: i32) -> (i32, i32, i32, i32) {
    %c0_i32 = arith.constant 0 : i32
    %c0_i32_0 = arith.constant 0 : i32
    %c0_i32_1 = arith.constant 0 : i32
    return %arg0, %arg1, %c0_i32, %c0_i32_0 : i32, i32, i32, i32
  }
  func.func @transform_1(%arg0: i32, %arg1: i32) -> (i32, i32, i32, i32) {
    %c0_i32 = arith.constant 0 : i32
    %c0_i32_0 = arith.constant 0 : i32
    %c0_i32_1 = arith.constant 0 : i32
    return %arg0, %arg1, %c0_i32, %c0_i32_0 : i32, i32, i32, i32
  }
  func.func @transform_2(%arg0: i32, %arg1: i32) -> (i32, i32, i32, i32) {
    %c0_i32 = arith.constant 0 : i32
    %c0_i32_0 = arith.constant 0 : i32
    %c0_i32_1 = arith.constant 0 : i32
    return %arg0, %arg1, %c0_i32, %c0_i32_0 : i32, i32, i32, i32
  }
  func.func @transform_3(%arg0: i32, %arg1: i32) -> (i32, i32, i32) {
    %c0_i32 = arith.constant 0 : i32
    %c0_i32_0 = arith.constant 0 : i32
    %c0_i32_1 = arith.constant 0 : i32
    %c0_i32_2 = arith.constant 0 : i32
    return %c0_i32, %c0_i32_0, %c0_i32_1 : i32, i32, i32
  }
  func.func @transform_4(%arg0: i32, %arg1: i32) -> (i32, i32) {
    %c0_i32 = arith.constant 0 : i32
    %c0_i32_0 = arith.constant 0 : i32
    %c0_i32_1 = arith.constant 0 : i32
    return %c0_i32, %c0_i32_0 : i32, i32
  }
  func.func @transform_5(%arg0: i32, %arg1: i32) -> (i32, i32) {
    %c0_i32 = arith.constant 0 : i32
    %c0_i32_0 = arith.constant 0 : i32
    %c0_i32_1 = arith.constant 0 : i32
    return %c0_i32, %c0_i32_0 : i32, i32
  }
  func.func @transform_6(%arg0: i32, %arg1: i32) -> (i32, i32, i32, i32) {
    %c0_i32 = arith.constant 0 : i32
    %c0_i32_0 = arith.constant 0 : i32
    %c0_i32_1 = arith.constant 0 : i32
    return %arg0, %arg1, %c0_i32, %c0_i32_0 : i32, i32, i32, i32
  }
}

module attributes {stable_mosaic.version = 11 : i64} {
  func.func @kernel(%arg0: i32, %arg1: i32, %arg2: memref<1x8x10x128xbf16, #tpu.memory_space<vmem>>, %arg3: memref<1x8x10x128xbf16, #tpu.memory_space<vmem>>, %arg4: memref<1x8x10x128xbf16, #tpu.memory_space<vmem>>, %arg5: memref<9x128x128xbf16, #tpu.memory_space<vmem>>, %arg6: memref<1x128xf32, #tpu.memory_space<vmem>>, %arg7: memref<1x128xf32, #tpu.memory_space<vmem>>, %arg8: memref<1x8x8x128xbf16, #tpu.memory_space<vmem>>) attributes {dimension_semantics = [#tpu.dimension_semantics<parallel>, #tpu.dimension_semantics<parallel>], iteration_bounds = array<i64: 2, 1>, scalar_prefetch = 0 : i64, scratch_operands = 0 : i64, tpu.core_type = #tpu.core_type<tc>, window_params = [{transform_indices = @transform_0, window_bounds = array<i64: 1, 8, 10, 128>}, {transform_indices = @transform_1, window_bounds = array<i64: 1, 8, 10, 128>}, {transform_indices = @transform_2, window_bounds = array<i64: 1, 8, 10, 128>}, {pipeline_mode = #tpu.pipeline_mode<synchronous>, transform_indices = @transform_3, window_bounds = array<i64: 9, 128, 128>}, {pipeline_mode = #tpu.pipeline_mode<synchronous>, transform_indices = @transform_4, window_bounds = array<i64: 1, 128>}, {pipeline_mode = #tpu.pipeline_mode<synchronous>, transform_indices = @transform_5, window_bounds = array<i64: 1, 128>}, {transform_indices = @transform_6, window_bounds = array<i64: 1, 8, 8, 128>}]} {
    %c0 = arith.constant 0 : index
    %c0_0 = arith.constant 0 : index
    %c0_1 = arith.constant 0 : index
    %c0_2 = arith.constant 0 : index
    %0 = vector.load %arg2[%c0, %c0_0, %c0_1, %c0_2] : memref<1x8x10x128xbf16, #tpu.memory_space<vmem>>, vector<1x8x10x128xbf16>
    %1 = vector.shape_cast %0 : vector<1x8x10x128xbf16> to vector<8x10x128xbf16>
    %c0_3 = arith.constant 0 : index
    %c0_4 = arith.constant 0 : index
    %c0_5 = arith.constant 0 : index
    %c0_6 = arith.constant 0 : index
    %2 = vector.load %arg3[%c0_3, %c0_4, %c0_5, %c0_6] : memref<1x8x10x128xbf16, #tpu.memory_space<vmem>>, vector<1x8x10x128xbf16>
    %3 = vector.shape_cast %2 : vector<1x8x10x128xbf16> to vector<8x10x128xbf16>
    %c0_7 = arith.constant 0 : index
    %c0_8 = arith.constant 0 : index
    %c0_9 = arith.constant 0 : index
    %c0_10 = arith.constant 0 : index
    %4 = vector.load %arg4[%c0_7, %c0_8, %c0_9, %c0_10] : memref<1x8x10x128xbf16, #tpu.memory_space<vmem>>, vector<1x8x10x128xbf16>
    %5 = vector.shape_cast %4 : vector<1x8x10x128xbf16> to vector<8x10x128xbf16>
    %cst = arith.constant 0.000000e+00 : f32
    %6 = vector.broadcast %cst : f32 to vector<64x128xf32>
    %7 = vector.extract_strided_slice %1 {offsets = [0, 0, 0], sizes = [8, 8, 128], strides = [1, 1, 1]} : vector<8x10x128xbf16> to vector<8x8x128xbf16>
    %8 = vector.shape_cast %7 : vector<8x8x128xbf16> to vector<64x128xbf16>
    %c0_11 = arith.constant 0 : index
    %c0_12 = arith.constant 0 : index
    %c0_13 = arith.constant 0 : index
    %9 = vector.load %arg5[%c0_11, %c0_12, %c0_13] : memref<9x128x128xbf16, #tpu.memory_space<vmem>>, vector<1x128x128xbf16>
    %10 = vector.shape_cast %9 : vector<1x128x128xbf16> to vector<128x128xbf16>
    %cst_14 = arith.constant dense<0.000000e+00> : vector<64x128xf32>
    %11 = tpu.matmul %8, %10, %cst_14 {dimension_numbers = #tpu.dot_dimension_numbers<[1], [0], [0], [1], [0, 0, 1, 1], [], []>} : vector<64x128xbf16>, vector<128x128xbf16>, vector<64x128xf32> -> vector<64x128xf32>
    %12 = arith.addf %6, %11 : vector<64x128xf32>
    %13 = vector.extract_strided_slice %1 {offsets = [0, 1, 0], sizes = [8, 8, 128], strides = [1, 1, 1]} : vector<8x10x128xbf16> to vector<8x8x128xbf16>
    %14 = vector.shape_cast %13 : vector<8x8x128xbf16> to vector<64x128xbf16>
    %c1 = arith.constant 1 : index
    %c0_15 = arith.constant 0 : index
    %c0_16 = arith.constant 0 : index
    %15 = vector.load %arg5[%c1, %c0_15, %c0_16] : memref<9x128x128xbf16, #tpu.memory_space<vmem>>, vector<1x128x128xbf16>
    %16 = vector.shape_cast %15 : vector<1x128x128xbf16> to vector<128x128xbf16>
    %cst_17 = arith.constant dense<0.000000e+00> : vector<64x128xf32>
    %17 = tpu.matmul %14, %16, %cst_17 {dimension_numbers = #tpu.dot_dimension_numbers<[1], [0], [0], [1], [0, 0, 1, 1], [], []>} : vector<64x128xbf16>, vector<128x128xbf16>, vector<64x128xf32> -> vector<64x128xf32>
    %18 = arith.addf %12, %17 : vector<64x128xf32>
    %19 = vector.extract_strided_slice %1 {offsets = [0, 2, 0], sizes = [8, 8, 128], strides = [1, 1, 1]} : vector<8x10x128xbf16> to vector<8x8x128xbf16>
    %20 = vector.shape_cast %19 : vector<8x8x128xbf16> to vector<64x128xbf16>
    %c2 = arith.constant 2 : index
    %c0_18 = arith.constant 0 : index
    %c0_19 = arith.constant 0 : index
    %21 = vector.load %arg5[%c2, %c0_18, %c0_19] : memref<9x128x128xbf16, #tpu.memory_space<vmem>>, vector<1x128x128xbf16>
    %22 = vector.shape_cast %21 : vector<1x128x128xbf16> to vector<128x128xbf16>
    %cst_20 = arith.constant dense<0.000000e+00> : vector<64x128xf32>
    %23 = tpu.matmul %20, %22, %cst_20 {dimension_numbers = #tpu.dot_dimension_numbers<[1], [0], [0], [1], [0, 0, 1, 1], [], []>} : vector<64x128xbf16>, vector<128x128xbf16>, vector<64x128xf32> -> vector<64x128xf32>
    %24 = arith.addf %18, %23 : vector<64x128xf32>
    %25 = vector.extract_strided_slice %3 {offsets = [0, 0, 0], sizes = [8, 8, 128], strides = [1, 1, 1]} : vector<8x10x128xbf16> to vector<8x8x128xbf16>
    %26 = vector.shape_cast %25 : vector<8x8x128xbf16> to vector<64x128xbf16>
    %c3 = arith.constant 3 : index
    %c0_21 = arith.constant 0 : index
    %c0_22 = arith.constant 0 : index
    %27 = vector.load %arg5[%c3, %c0_21, %c0_22] : memref<9x128x128xbf16, #tpu.memory_space<vmem>>, vector<1x128x128xbf16>
    %28 = vector.shape_cast %27 : vector<1x128x128xbf16> to vector<128x128xbf16>
    %cst_23 = arith.constant dense<0.000000e+00> : vector<64x128xf32>
    %29 = tpu.matmul %26, %28, %cst_23 {dimension_numbers = #tpu.dot_dimension_numbers<[1], [0], [0], [1], [0, 0, 1, 1], [], []>} : vector<64x128xbf16>, vector<128x128xbf16>, vector<64x128xf32> -> vector<64x128xf32>
    %30 = arith.addf %24, %29 : vector<64x128xf32>
    %31 = vector.extract_strided_slice %3 {offsets = [0, 1, 0], sizes = [8, 8, 128], strides = [1, 1, 1]} : vector<8x10x128xbf16> to vector<8x8x128xbf16>
    %32 = vector.shape_cast %31 : vector<8x8x128xbf16> to vector<64x128xbf16>
    %c4 = arith.constant 4 : index
    %c0_24 = arith.constant 0 : index
    %c0_25 = arith.constant 0 : index
    %33 = vector.load %arg5[%c4, %c0_24, %c0_25] : memref<9x128x128xbf16, #tpu.memory_space<vmem>>, vector<1x128x128xbf16>
    %34 = vector.shape_cast %33 : vector<1x128x128xbf16> to vector<128x128xbf16>
    %cst_26 = arith.constant dense<0.000000e+00> : vector<64x128xf32>
    %35 = tpu.matmul %32, %34, %cst_26 {dimension_numbers = #tpu.dot_dimension_numbers<[1], [0], [0], [1], [0, 0, 1, 1], [], []>} : vector<64x128xbf16>, vector<128x128xbf16>, vector<64x128xf32> -> vector<64x128xf32>
    %36 = arith.addf %30, %35 : vector<64x128xf32>
    %37 = vector.extract_strided_slice %3 {offsets = [0, 2, 0], sizes = [8, 8, 128], strides = [1, 1, 1]} : vector<8x10x128xbf16> to vector<8x8x128xbf16>
    %38 = vector.shape_cast %37 : vector<8x8x128xbf16> to vector<64x128xbf16>
    %c5 = arith.constant 5 : index
    %c0_27 = arith.constant 0 : index
    %c0_28 = arith.constant 0 : index
    %39 = vector.load %arg5[%c5, %c0_27, %c0_28] : memref<9x128x128xbf16, #tpu.memory_space<vmem>>, vector<1x128x128xbf16>
    %40 = vector.shape_cast %39 : vector<1x128x128xbf16> to vector<128x128xbf16>
    %cst_29 = arith.constant dense<0.000000e+00> : vector<64x128xf32>
    %41 = tpu.matmul %38, %40, %cst_29 {dimension_numbers = #tpu.dot_dimension_numbers<[1], [0], [0], [1], [0, 0, 1, 1], [], []>} : vector<64x128xbf16>, vector<128x128xbf16>, vector<64x128xf32> -> vector<64x128xf32>
    %42 = arith.addf %36, %41 : vector<64x128xf32>
    %43 = vector.extract_strided_slice %5 {offsets = [0, 0, 0], sizes = [8, 8, 128], strides = [1, 1, 1]} : vector<8x10x128xbf16> to vector<8x8x128xbf16>
    %44 = vector.shape_cast %43 : vector<8x8x128xbf16> to vector<64x128xbf16>
    %c6 = arith.constant 6 : index
    %c0_30 = arith.constant 0 : index
    %c0_31 = arith.constant 0 : index
    %45 = vector.load %arg5[%c6, %c0_30, %c0_31] : memref<9x128x128xbf16, #tpu.memory_space<vmem>>, vector<1x128x128xbf16>
    %46 = vector.shape_cast %45 : vector<1x128x128xbf16> to vector<128x128xbf16>
    %cst_32 = arith.constant dense<0.000000e+00> : vector<64x128xf32>
    %47 = tpu.matmul %44, %46, %cst_32 {dimension_numbers = #tpu.dot_dimension_numbers<[1], [0], [0], [1], [0, 0, 1, 1], [], []>} : vector<64x128xbf16>, vector<128x128xbf16>, vector<64x128xf32> -> vector<64x128xf32>
    %48 = arith.addf %42, %47 : vector<64x128xf32>
    %49 = vector.extract_strided_slice %5 {offsets = [0, 1, 0], sizes = [8, 8, 128], strides = [1, 1, 1]} : vector<8x10x128xbf16> to vector<8x8x128xbf16>
    %50 = vector.shape_cast %49 : vector<8x8x128xbf16> to vector<64x128xbf16>
    %c7 = arith.constant 7 : index
    %c0_33 = arith.constant 0 : index
    %c0_34 = arith.constant 0 : index
    %51 = vector.load %arg5[%c7, %c0_33, %c0_34] : memref<9x128x128xbf16, #tpu.memory_space<vmem>>, vector<1x128x128xbf16>
    %52 = vector.shape_cast %51 : vector<1x128x128xbf16> to vector<128x128xbf16>
    %cst_35 = arith.constant dense<0.000000e+00> : vector<64x128xf32>
    %53 = tpu.matmul %50, %52, %cst_35 {dimension_numbers = #tpu.dot_dimension_numbers<[1], [0], [0], [1], [0, 0, 1, 1], [], []>} : vector<64x128xbf16>, vector<128x128xbf16>, vector<64x128xf32> -> vector<64x128xf32>
    %54 = arith.addf %48, %53 : vector<64x128xf32>
    %55 = vector.extract_strided_slice %5 {offsets = [0, 2, 0], sizes = [8, 8, 128], strides = [1, 1, 1]} : vector<8x10x128xbf16> to vector<8x8x128xbf16>
    %56 = vector.shape_cast %55 : vector<8x8x128xbf16> to vector<64x128xbf16>
    %c8 = arith.constant 8 : index
    %c0_36 = arith.constant 0 : index
    %c0_37 = arith.constant 0 : index
    %57 = vector.load %arg5[%c8, %c0_36, %c0_37] : memref<9x128x128xbf16, #tpu.memory_space<vmem>>, vector<1x128x128xbf16>
    %58 = vector.shape_cast %57 : vector<1x128x128xbf16> to vector<128x128xbf16>
    %cst_38 = arith.constant dense<0.000000e+00> : vector<64x128xf32>
    %59 = tpu.matmul %56, %58, %cst_38 {dimension_numbers = #tpu.dot_dimension_numbers<[1], [0], [0], [1], [0, 0, 1, 1], [], []>} : vector<64x128xbf16>, vector<128x128xbf16>, vector<64x128xf32> -> vector<64x128xf32>
    %60 = arith.addf %54, %59 : vector<64x128xf32>
    %c0_39 = arith.constant 0 : index
    %c0_40 = arith.constant 0 : index
    %61 = vector.load %arg6[%c0_39, %c0_40] : memref<1x128xf32, #tpu.memory_space<vmem>>, vector<1x128xf32>
    %62 = vector.broadcast %61 : vector<1x128xf32> to vector<64x128xf32>
    %63 = arith.mulf %60, %62 : vector<64x128xf32>
    %c0_41 = arith.constant 0 : index
    %c0_42 = arith.constant 0 : index
    %64 = vector.load %arg7[%c0_41, %c0_42] : memref<1x128xf32, #tpu.memory_space<vmem>>, vector<1x128xf32>
    %65 = vector.broadcast %64 : vector<1x128xf32> to vector<64x128xf32>
    %66 = arith.addf %63, %65 : vector<64x128xf32>
    %cst_43 = arith.constant 0.000000e+00 : f32
    %67 = vector.broadcast %cst_43 : f32 to vector<64x128xf32>
    %68 = arith.maximumf %66, %67 : vector<64x128xf32>
    %69 = vector.shape_cast %68 : vector<64x128xf32> to vector<8x8x128xf32>
    %70 = arith.truncf %69 : vector<8x8x128xf32> to vector<8x8x128xbf16>
    %c0_44 = arith.constant 0 : index
    %c0_45 = arith.constant 0 : index
    %c0_46 = arith.constant 0 : index
    %c0_47 = arith.constant 0 : index
    %71 = vector.load %arg8[%c0_44, %c0_45, %c0_46, %c0_47] : memref<1x8x8x128xbf16, #tpu.memory_space<vmem>>, vector<1x8x8x128xbf16>
    %72 = vector.shape_cast %71 : vector<1x8x8x128xbf16> to vector<8x8x128xbf16>
    %73 = vector.shape_cast %70 : vector<8x8x128xbf16> to vector<1x8x8x128xbf16>
    tpu.vector_store %arg8[%c0_44, %c0_45, %c0_46, %c0_47], %73 {strides = array<i32>} : memref<1x8x8x128xbf16, #tpu.memory_space<vmem>>, vector<1x8x8x128xbf16>,
    return
  }
  func.func @transform_0(%arg0: i32, %arg1: i32) -> (i32, i32, i32, i32) {
    %c0_i32 = arith.constant 0 : i32
    %c0_i32_0 = arith.constant 0 : i32
    %c0_i32_1 = arith.constant 0 : i32
    return %arg0, %arg1, %c0_i32, %c0_i32_0 : i32, i32, i32, i32
  }
  func.func @transform_1(%arg0: i32, %arg1: i32) -> (i32, i32, i32, i32) {
    %c0_i32 = arith.constant 0 : i32
    %c0_i32_0 = arith.constant 0 : i32
    %c0_i32_1 = arith.constant 0 : i32
    return %arg0, %arg1, %c0_i32, %c0_i32_0 : i32, i32, i32, i32
  }
  func.func @transform_2(%arg0: i32, %arg1: i32) -> (i32, i32, i32, i32) {
    %c0_i32 = arith.constant 0 : i32
    %c0_i32_0 = arith.constant 0 : i32
    %c0_i32_1 = arith.constant 0 : i32
    return %arg0, %arg1, %c0_i32, %c0_i32_0 : i32, i32, i32, i32
  }
  func.func @transform_3(%arg0: i32, %arg1: i32) -> (i32, i32, i32) {
    %c0_i32 = arith.constant 0 : i32
    %c0_i32_0 = arith.constant 0 : i32
    %c0_i32_1 = arith.constant 0 : i32
    %c0_i32_2 = arith.constant 0 : i32
    return %c0_i32, %c0_i32_0, %c0_i32_1 : i32, i32, i32
  }
  func.func @transform_4(%arg0: i32, %arg1: i32) -> (i32, i32) {
    %c0_i32 = arith.constant 0 : i32
    %c0_i32_0 = arith.constant 0 : i32
    %c0_i32_1 = arith.constant 0 : i32
    return %c0_i32, %c0_i32_0 : i32, i32
  }
  func.func @transform_5(%arg0: i32, %arg1: i32) -> (i32, i32) {
    %c0_i32 = arith.constant 0 : i32
    %c0_i32_0 = arith.constant 0 : i32
    %c0_i32_1 = arith.constant 0 : i32
    return %c0_i32, %c0_i32_0 : i32, i32
  }
  func.func @transform_6(%arg0: i32, %arg1: i32) -> (i32, i32, i32, i32) {
    %c0_i32 = arith.constant 0 : i32
    %c0_i32_0 = arith.constant 0 : i32
    %c0_i32_1 = arith.constant 0 : i32
    return %arg0, %arg1, %c0_i32, %c0_i32_0 : i32, i32, i32, i32
  }
}

module attributes {stable_mosaic.version = 11 : i64} {
  func.func @kernel(%arg0: i32, %arg1: i32, %arg2: memref<1x4x9x256xbf16, #tpu.memory_space<vmem>>, %arg3: memref<1x4x9x256xbf16, #tpu.memory_space<vmem>>, %arg4: memref<1x4x9x256xbf16, #tpu.memory_space<vmem>>, %arg5: memref<9x128x128xbf16, #tpu.memory_space<vmem>>, %arg6: memref<1x128xf32, #tpu.memory_space<vmem>>, %arg7: memref<1x128xf32, #tpu.memory_space<vmem>>, %arg8: memref<1x4x8x128xbf16, #tpu.memory_space<vmem>>) attributes {dimension_semantics = [#tpu.dimension_semantics<parallel>, #tpu.dimension_semantics<parallel>], iteration_bounds = array<i64: 2, 1>, scalar_prefetch = 0 : i64, scratch_operands = 0 : i64, tpu.core_type = #tpu.core_type<tc>, window_params = [{transform_indices = @transform_0, window_bounds = array<i64: 1, 4, 9, 256>}, {transform_indices = @transform_1, window_bounds = array<i64: 1, 4, 9, 256>}, {transform_indices = @transform_2, window_bounds = array<i64: 1, 4, 9, 256>}, {pipeline_mode = #tpu.pipeline_mode<synchronous>, transform_indices = @transform_3, window_bounds = array<i64: 9, 128, 128>}, {pipeline_mode = #tpu.pipeline_mode<synchronous>, transform_indices = @transform_4, window_bounds = array<i64: 1, 128>}, {pipeline_mode = #tpu.pipeline_mode<synchronous>, transform_indices = @transform_5, window_bounds = array<i64: 1, 128>}, {transform_indices = @transform_6, window_bounds = array<i64: 1, 4, 8, 128>}]} {
    %c0 = arith.constant 0 : index
    %c0_0 = arith.constant 0 : index
    %c0_1 = arith.constant 0 : index
    %c0_2 = arith.constant 0 : index
    %0 = vector.load %arg2[%c0, %c0_0, %c0_1, %c0_2] : memref<1x4x9x256xbf16, #tpu.memory_space<vmem>>, vector<1x4x9x256xbf16>
    %1 = vector.shape_cast %0 : vector<1x4x9x256xbf16> to vector<4x9x256xbf16>
    %c0_3 = arith.constant 0 : index
    %c0_4 = arith.constant 0 : index
    %c0_5 = arith.constant 0 : index
    %c0_6 = arith.constant 0 : index
    %2 = vector.load %arg3[%c0_3, %c0_4, %c0_5, %c0_6] : memref<1x4x9x256xbf16, #tpu.memory_space<vmem>>, vector<1x4x9x256xbf16>
    %3 = vector.shape_cast %2 : vector<1x4x9x256xbf16> to vector<4x9x256xbf16>
    %c0_7 = arith.constant 0 : index
    %c0_8 = arith.constant 0 : index
    %c0_9 = arith.constant 0 : index
    %c0_10 = arith.constant 0 : index
    %4 = vector.load %arg4[%c0_7, %c0_8, %c0_9, %c0_10] : memref<1x4x9x256xbf16, #tpu.memory_space<vmem>>, vector<1x4x9x256xbf16>
    %5 = vector.shape_cast %4 : vector<1x4x9x256xbf16> to vector<4x9x256xbf16>
    %cst = arith.constant 0.000000e+00 : f32
    %6 = vector.broadcast %cst : f32 to vector<32x128xf32>
    %7 = vector.extract_strided_slice %1 {offsets = [0, 0, 0], sizes = [4, 8, 128], strides = [1, 1, 1]} : vector<4x9x256xbf16> to vector<4x8x128xbf16>
    %8 = vector.shape_cast %7 : vector<4x8x128xbf16> to vector<32x128xbf16>
    %c0_11 = arith.constant 0 : index
    %c0_12 = arith.constant 0 : index
    %c0_13 = arith.constant 0 : index
    %9 = vector.load %arg5[%c0_11, %c0_12, %c0_13] : memref<9x128x128xbf16, #tpu.memory_space<vmem>>, vector<1x128x128xbf16>
    %10 = vector.shape_cast %9 : vector<1x128x128xbf16> to vector<128x128xbf16>
    %cst_14 = arith.constant dense<0.000000e+00> : vector<32x128xf32>
    %11 = tpu.matmul %8, %10, %cst_14 {dimension_numbers = #tpu.dot_dimension_numbers<[1], [0], [0], [1], [0, 0, 1, 1], [], []>} : vector<32x128xbf16>, vector<128x128xbf16>, vector<32x128xf32> -> vector<32x128xf32>
    %12 = arith.addf %6, %11 : vector<32x128xf32>
    %13 = vector.extract_strided_slice %1 {offsets = [0, 0, 128], sizes = [4, 8, 128], strides = [1, 1, 1]} : vector<4x9x256xbf16> to vector<4x8x128xbf16>
    %14 = vector.shape_cast %13 : vector<4x8x128xbf16> to vector<32x128xbf16>
    %c1 = arith.constant 1 : index
    %c0_15 = arith.constant 0 : index
    %c0_16 = arith.constant 0 : index
    %15 = vector.load %arg5[%c1, %c0_15, %c0_16] : memref<9x128x128xbf16, #tpu.memory_space<vmem>>, vector<1x128x128xbf16>
    %16 = vector.shape_cast %15 : vector<1x128x128xbf16> to vector<128x128xbf16>
    %cst_17 = arith.constant dense<0.000000e+00> : vector<32x128xf32>
    %17 = tpu.matmul %14, %16, %cst_17 {dimension_numbers = #tpu.dot_dimension_numbers<[1], [0], [0], [1], [0, 0, 1, 1], [], []>} : vector<32x128xbf16>, vector<128x128xbf16>, vector<32x128xf32> -> vector<32x128xf32>
    %18 = arith.addf %12, %17 : vector<32x128xf32>
    %19 = vector.extract_strided_slice %1 {offsets = [0, 1, 0], sizes = [4, 8, 128], strides = [1, 1, 1]} : vector<4x9x256xbf16> to vector<4x8x128xbf16>
    %20 = vector.shape_cast %19 : vector<4x8x128xbf16> to vector<32x128xbf16>
    %c2 = arith.constant 2 : index
    %c0_18 = arith.constant 0 : index
    %c0_19 = arith.constant 0 : index
    %21 = vector.load %arg5[%c2, %c0_18, %c0_19] : memref<9x128x128xbf16, #tpu.memory_space<vmem>>, vector<1x128x128xbf16>
    %22 = vector.shape_cast %21 : vector<1x128x128xbf16> to vector<128x128xbf16>
    %cst_20 = arith.constant dense<0.000000e+00> : vector<32x128xf32>
    %23 = tpu.matmul %20, %22, %cst_20 {dimension_numbers = #tpu.dot_dimension_numbers<[1], [0], [0], [1], [0, 0, 1, 1], [], []>} : vector<32x128xbf16>, vector<128x128xbf16>, vector<32x128xf32> -> vector<32x128xf32>
    %24 = arith.addf %18, %23 : vector<32x128xf32>
    %25 = vector.extract_strided_slice %3 {offsets = [0, 0, 0], sizes = [4, 8, 128], strides = [1, 1, 1]} : vector<4x9x256xbf16> to vector<4x8x128xbf16>
    %26 = vector.shape_cast %25 : vector<4x8x128xbf16> to vector<32x128xbf16>
    %c3 = arith.constant 3 : index
    %c0_21 = arith.constant 0 : index
    %c0_22 = arith.constant 0 : index
    %27 = vector.load %arg5[%c3, %c0_21, %c0_22] : memref<9x128x128xbf16, #tpu.memory_space<vmem>>, vector<1x128x128xbf16>
    %28 = vector.shape_cast %27 : vector<1x128x128xbf16> to vector<128x128xbf16>
    %cst_23 = arith.constant dense<0.000000e+00> : vector<32x128xf32>
    %29 = tpu.matmul %26, %28, %cst_23 {dimension_numbers = #tpu.dot_dimension_numbers<[1], [0], [0], [1], [0, 0, 1, 1], [], []>} : vector<32x128xbf16>, vector<128x128xbf16>, vector<32x128xf32> -> vector<32x128xf32>
    %30 = arith.addf %24, %29 : vector<32x128xf32>
    %31 = vector.extract_strided_slice %3 {offsets = [0, 0, 128], sizes = [4, 8, 128], strides = [1, 1, 1]} : vector<4x9x256xbf16> to vector<4x8x128xbf16>
    %32 = vector.shape_cast %31 : vector<4x8x128xbf16> to vector<32x128xbf16>
    %c4 = arith.constant 4 : index
    %c0_24 = arith.constant 0 : index
    %c0_25 = arith.constant 0 : index
    %33 = vector.load %arg5[%c4, %c0_24, %c0_25] : memref<9x128x128xbf16, #tpu.memory_space<vmem>>, vector<1x128x128xbf16>
    %34 = vector.shape_cast %33 : vector<1x128x128xbf16> to vector<128x128xbf16>
    %cst_26 = arith.constant dense<0.000000e+00> : vector<32x128xf32>
    %35 = tpu.matmul %32, %34, %cst_26 {dimension_numbers = #tpu.dot_dimension_numbers<[1], [0], [0], [1], [0, 0, 1, 1], [], []>} : vector<32x128xbf16>, vector<128x128xbf16>, vector<32x128xf32> -> vector<32x128xf32>
    %36 = arith.addf %30, %35 : vector<32x128xf32>
    %37 = vector.extract_strided_slice %3 {offsets = [0, 1, 0], sizes = [4, 8, 128], strides = [1, 1, 1]} : vector<4x9x256xbf16> to vector<4x8x128xbf16>
    %38 = vector.shape_cast %37 : vector<4x8x128xbf16> to vector<32x128xbf16>
    %c5 = arith.constant 5 : index
    %c0_27 = arith.constant 0 : index
    %c0_28 = arith.constant 0 : index
    %39 = vector.load %arg5[%c5, %c0_27, %c0_28] : memref<9x128x128xbf16, #tpu.memory_space<vmem>>, vector<1x128x128xbf16>
    %40 = vector.shape_cast %39 : vector<1x128x128xbf16> to vector<128x128xbf16>
    %cst_29 = arith.constant dense<0.000000e+00> : vector<32x128xf32>
    %41 = tpu.matmul %38, %40, %cst_29 {dimension_numbers = #tpu.dot_dimension_numbers<[1], [0], [0], [1], [0, 0, 1, 1], [], []>} : vector<32x128xbf16>, vector<128x128xbf16>, vector<32x128xf32> -> vector<32x128xf32>
    %42 = arith.addf %36, %41 : vector<32x128xf32>
    %43 = vector.extract_strided_slice %5 {offsets = [0, 0, 0], sizes = [4, 8, 128], strides = [1, 1, 1]} : vector<4x9x256xbf16> to vector<4x8x128xbf16>
    %44 = vector.shape_cast %43 : vector<4x8x128xbf16> to vector<32x128xbf16>
    %c6 = arith.constant 6 : index
    %c0_30 = arith.constant 0 : index
    %c0_31 = arith.constant 0 : index
    %45 = vector.load %arg5[%c6, %c0_30, %c0_31] : memref<9x128x128xbf16, #tpu.memory_space<vmem>>, vector<1x128x128xbf16>
    %46 = vector.shape_cast %45 : vector<1x128x128xbf16> to vector<128x128xbf16>
    %cst_32 = arith.constant dense<0.000000e+00> : vector<32x128xf32>
    %47 = tpu.matmul %44, %46, %cst_32 {dimension_numbers = #tpu.dot_dimension_numbers<[1], [0], [0], [1], [0, 0, 1, 1], [], []>} : vector<32x128xbf16>, vector<128x128xbf16>, vector<32x128xf32> -> vector<32x128xf32>
    %48 = arith.addf %42, %47 : vector<32x128xf32>
    %49 = vector.extract_strided_slice %5 {offsets = [0, 0, 128], sizes = [4, 8, 128], strides = [1, 1, 1]} : vector<4x9x256xbf16> to vector<4x8x128xbf16>
    %50 = vector.shape_cast %49 : vector<4x8x128xbf16> to vector<32x128xbf16>
    %c7 = arith.constant 7 : index
    %c0_33 = arith.constant 0 : index
    %c0_34 = arith.constant 0 : index
    %51 = vector.load %arg5[%c7, %c0_33, %c0_34] : memref<9x128x128xbf16, #tpu.memory_space<vmem>>, vector<1x128x128xbf16>
    %52 = vector.shape_cast %51 : vector<1x128x128xbf16> to vector<128x128xbf16>
    %cst_35 = arith.constant dense<0.000000e+00> : vector<32x128xf32>
    %53 = tpu.matmul %50, %52, %cst_35 {dimension_numbers = #tpu.dot_dimension_numbers<[1], [0], [0], [1], [0, 0, 1, 1], [], []>} : vector<32x128xbf16>, vector<128x128xbf16>, vector<32x128xf32> -> vector<32x128xf32>
    %54 = arith.addf %48, %53 : vector<32x128xf32>
    %55 = vector.extract_strided_slice %5 {offsets = [0, 1, 0], sizes = [4, 8, 128], strides = [1, 1, 1]} : vector<4x9x256xbf16> to vector<4x8x128xbf16>
    %56 = vector.shape_cast %55 : vector<4x8x128xbf16> to vector<32x128xbf16>
    %c8 = arith.constant 8 : index
    %c0_36 = arith.constant 0 : index
    %c0_37 = arith.constant 0 : index
    %57 = vector.load %arg5[%c8, %c0_36, %c0_37] : memref<9x128x128xbf16, #tpu.memory_space<vmem>>, vector<1x128x128xbf16>
    %58 = vector.shape_cast %57 : vector<1x128x128xbf16> to vector<128x128xbf16>
    %cst_38 = arith.constant dense<0.000000e+00> : vector<32x128xf32>
    %59 = tpu.matmul %56, %58, %cst_38 {dimension_numbers = #tpu.dot_dimension_numbers<[1], [0], [0], [1], [0, 0, 1, 1], [], []>} : vector<32x128xbf16>, vector<128x128xbf16>, vector<32x128xf32> -> vector<32x128xf32>
    %60 = arith.addf %54, %59 : vector<32x128xf32>
    %c0_39 = arith.constant 0 : index
    %c0_40 = arith.constant 0 : index
    %61 = vector.load %arg6[%c0_39, %c0_40] : memref<1x128xf32, #tpu.memory_space<vmem>>, vector<1x128xf32>
    %62 = vector.broadcast %61 : vector<1x128xf32> to vector<32x128xf32>
    %63 = arith.mulf %60, %62 : vector<32x128xf32>
    %c0_41 = arith.constant 0 : index
    %c0_42 = arith.constant 0 : index
    %64 = vector.load %arg7[%c0_41, %c0_42] : memref<1x128xf32, #tpu.memory_space<vmem>>, vector<1x128xf32>
    %65 = vector.broadcast %64 : vector<1x128xf32> to vector<32x128xf32>
    %66 = arith.addf %63, %65 : vector<32x128xf32>
    %cst_43 = arith.constant 0.000000e+00 : f32
    %67 = vector.broadcast %cst_43 : f32 to vector<32x128xf32>
    %68 = arith.maximumf %66, %67 : vector<32x128xf32>
    %69 = tpu.iota {dimensions = array<i32: 0>} : vector<32x128xi32>
    %c8_i32 = arith.constant 8 : i32
    %c0_i32 = arith.constant 0 : i32
    %70 = arith.cmpi eq, %c8_i32, %c0_i32 : i32
    %c1_i32 = arith.constant 1 : i32
    %71 = arith.select %70, %c1_i32, %c8_i32 : i32
    %72 = vector.broadcast %71 : i32 to vector<32x128xi32>
    %73 = arith.remsi %69, %72 : vector<32x128xi32>
    %c0_i32_44 = arith.constant 0 : i32
    %74 = vector.broadcast %c0_i32_44 : i32 to vector<32x128xi32>
    %75 = arith.cmpi ne, %73, %74 : vector<32x128xi32>
    %c0_i32_45 = arith.constant 0 : i32
    %76 = vector.broadcast %c0_i32_45 : i32 to vector<32x128xi32>
    %77 = arith.cmpi slt, %73, %76 : vector<32x128xi32>
    %c0_i32_46 = arith.constant 0 : i32
    %78 = arith.cmpi slt, %71, %c0_i32_46 : i32
    %79 = vector.broadcast %78 : i1 to vector<32x128xi1>
    %80 = vector.broadcast %79 : vector<32x128xi1> to vector<32x128xi1>
    %81 = arith.xori %77, %80 : vector<32x128xi1>
    %82 = arith.andi %81, %75 : vector<32x128xi1>
    %83 = vector.broadcast %71 : i32 to vector<32x128xi32>
    %84 = arith.addi %73, %83 : vector<32x128xi32>
    %85 = arith.select %82, %84, %73 : vector<32x128xi1>, vector<32x128xi32>
    %c4_i32 = arith.constant 4 : i32
    %86 = vector.broadcast %c4_i32 : i32 to vector<32x128xi32>
    %87 = arith.cmpi slt, %85, %86 : vector<32x128xi32>
    %cst_47 = arith.constant 0.000000e+00 : f32
    %88 = vector.broadcast %cst_47 : f32 to vector<32x128xf32>
    %89 = arith.select %87, %68, %88 : vector<32x128xi1>, vector<32x128xf32>
    %90 = vector.shape_cast %89 : vector<32x128xf32> to vector<4x8x128xf32>
    %91 = arith.truncf %90 : vector<4x8x128xf32> to vector<4x8x128xbf16>
    %c0_48 = arith.constant 0 : index
    %c0_49 = arith.constant 0 : index
    %c0_50 = arith.constant 0 : index
    %c0_51 = arith.constant 0 : index
    %92 = vector.load %arg8[%c0_48, %c0_49, %c0_50, %c0_51] : memref<1x4x8x128xbf16, #tpu.memory_space<vmem>>, vector<1x4x8x128xbf16>
    %93 = vector.shape_cast %92 : vector<1x4x8x128xbf16> to vector<4x8x128xbf16>
    %94 = vector.shape_cast %91 : vector<4x8x128xbf16> to vector<1x4x8x128xbf16>
    tpu.vector_store %arg8[%c0_48, %c0_49, %c0_50, %c0_51], %94 {strides = array<i32>} : memref<1x4x8x128xbf16, #tpu.memory_space<vmem>>, vector<1x4x8x128xbf16>,
    return
  }
  func.func @transform_0(%arg0: i32, %arg1: i32) -> (i32, i32, i32, i32) {
    %c0_i32 = arith.constant 0 : i32
    %c0_i32_0 = arith.constant 0 : i32
    %c0_i32_1 = arith.constant 0 : i32
    return %arg0, %arg1, %c0_i32, %c0_i32_0 : i32, i32, i32, i32
  }
  func.func @transform_1(%arg0: i32, %arg1: i32) -> (i32, i32, i32, i32) {
    %c0_i32 = arith.constant 0 : i32
    %c0_i32_0 = arith.constant 0 : i32
    %c0_i32_1 = arith.constant 0 : i32
    return %arg0, %arg1, %c0_i32, %c0_i32_0 : i32, i32, i32, i32
  }
  func.func @transform_2(%arg0: i32, %arg1: i32) -> (i32, i32, i32, i32) {
    %c0_i32 = arith.constant 0 : i32
    %c0_i32_0 = arith.constant 0 : i32
    %c0_i32_1 = arith.constant 0 : i32
    return %arg0, %arg1, %c0_i32, %c0_i32_0 : i32, i32, i32, i32
  }
  func.func @transform_3(%arg0: i32, %arg1: i32) -> (i32, i32, i32) {
    %c0_i32 = arith.constant 0 : i32
    %c0_i32_0 = arith.constant 0 : i32
    %c0_i32_1 = arith.constant 0 : i32
    %c0_i32_2 = arith.constant 0 : i32
    return %c0_i32, %c0_i32_0, %c0_i32_1 : i32, i32, i32
  }
  func.func @transform_4(%arg0: i32, %arg1: i32) -> (i32, i32) {
    %c0_i32 = arith.constant 0 : i32
    %c0_i32_0 = arith.constant 0 : i32
    %c0_i32_1 = arith.constant 0 : i32
    return %c0_i32, %c0_i32_0 : i32, i32
  }
  func.func @transform_5(%arg0: i32, %arg1: i32) -> (i32, i32) {
    %c0_i32 = arith.constant 0 : i32
    %c0_i32_0 = arith.constant 0 : i32
    %c0_i32_1 = arith.constant 0 : i32
    return %c0_i32, %c0_i32_0 : i32, i32
  }
  func.func @transform_6(%arg0: i32, %arg1: i32) -> (i32, i32, i32, i32) {
    %c0_i32 = arith.constant 0 : i32
    %c0_i32_0 = arith.constant 0 : i32
    %c0_i32_1 = arith.constant 0 : i32
    return %arg0, %arg1, %c0_i32, %c0_i32_0 : i32, i32, i32, i32
  }
}

module attributes {stable_mosaic.version = 11 : i64} {
  func.func @kernel(%arg0: i32, %arg1: i32, %arg2: memref<1x4x10x128xbf16, #tpu.memory_space<vmem>>, %arg3: memref<1x4x10x128xbf16, #tpu.memory_space<vmem>>, %arg4: memref<1x4x10x128xbf16, #tpu.memory_space<vmem>>, %arg5: memref<9x128x128xbf16, #tpu.memory_space<vmem>>, %arg6: memref<1x128xf32, #tpu.memory_space<vmem>>, %arg7: memref<1x128xf32, #tpu.memory_space<vmem>>, %arg8: memref<1x4x8x128xbf16, #tpu.memory_space<vmem>>) attributes {dimension_semantics = [#tpu.dimension_semantics<parallel>, #tpu.dimension_semantics<parallel>], iteration_bounds = array<i64: 2, 1>, scalar_prefetch = 0 : i64, scratch_operands = 0 : i64, tpu.core_type = #tpu.core_type<tc>, window_params = [{transform_indices = @transform_0, window_bounds = array<i64: 1, 4, 10, 128>}, {transform_indices = @transform_1, window_bounds = array<i64: 1, 4, 10, 128>}, {transform_indices = @transform_2, window_bounds = array<i64: 1, 4, 10, 128>}, {pipeline_mode = #tpu.pipeline_mode<synchronous>, transform_indices = @transform_3, window_bounds = array<i64: 9, 128, 128>}, {pipeline_mode = #tpu.pipeline_mode<synchronous>, transform_indices = @transform_4, window_bounds = array<i64: 1, 128>}, {pipeline_mode = #tpu.pipeline_mode<synchronous>, transform_indices = @transform_5, window_bounds = array<i64: 1, 128>}, {transform_indices = @transform_6, window_bounds = array<i64: 1, 4, 8, 128>}]} {
    %c0 = arith.constant 0 : index
    %c0_0 = arith.constant 0 : index
    %c0_1 = arith.constant 0 : index
    %c0_2 = arith.constant 0 : index
    %0 = vector.load %arg2[%c0, %c0_0, %c0_1, %c0_2] : memref<1x4x10x128xbf16, #tpu.memory_space<vmem>>, vector<1x4x10x128xbf16>
    %1 = vector.shape_cast %0 : vector<1x4x10x128xbf16> to vector<4x10x128xbf16>
    %c0_3 = arith.constant 0 : index
    %c0_4 = arith.constant 0 : index
    %c0_5 = arith.constant 0 : index
    %c0_6 = arith.constant 0 : index
    %2 = vector.load %arg3[%c0_3, %c0_4, %c0_5, %c0_6] : memref<1x4x10x128xbf16, #tpu.memory_space<vmem>>, vector<1x4x10x128xbf16>
    %3 = vector.shape_cast %2 : vector<1x4x10x128xbf16> to vector<4x10x128xbf16>
    %c0_7 = arith.constant 0 : index
    %c0_8 = arith.constant 0 : index
    %c0_9 = arith.constant 0 : index
    %c0_10 = arith.constant 0 : index
    %4 = vector.load %arg4[%c0_7, %c0_8, %c0_9, %c0_10] : memref<1x4x10x128xbf16, #tpu.memory_space<vmem>>, vector<1x4x10x128xbf16>
    %5 = vector.shape_cast %4 : vector<1x4x10x128xbf16> to vector<4x10x128xbf16>
    %cst = arith.constant 0.000000e+00 : f32
    %6 = vector.broadcast %cst : f32 to vector<32x128xf32>
    %7 = vector.extract_strided_slice %1 {offsets = [0, 0, 0], sizes = [4, 8, 128], strides = [1, 1, 1]} : vector<4x10x128xbf16> to vector<4x8x128xbf16>
    %8 = vector.shape_cast %7 : vector<4x8x128xbf16> to vector<32x128xbf16>
    %c0_11 = arith.constant 0 : index
    %c0_12 = arith.constant 0 : index
    %c0_13 = arith.constant 0 : index
    %9 = vector.load %arg5[%c0_11, %c0_12, %c0_13] : memref<9x128x128xbf16, #tpu.memory_space<vmem>>, vector<1x128x128xbf16>
    %10 = vector.shape_cast %9 : vector<1x128x128xbf16> to vector<128x128xbf16>
    %cst_14 = arith.constant dense<0.000000e+00> : vector<32x128xf32>
    %11 = tpu.matmul %8, %10, %cst_14 {dimension_numbers = #tpu.dot_dimension_numbers<[1], [0], [0], [1], [0, 0, 1, 1], [], []>} : vector<32x128xbf16>, vector<128x128xbf16>, vector<32x128xf32> -> vector<32x128xf32>
    %12 = arith.addf %6, %11 : vector<32x128xf32>
    %13 = vector.extract_strided_slice %1 {offsets = [0, 1, 0], sizes = [4, 8, 128], strides = [1, 1, 1]} : vector<4x10x128xbf16> to vector<4x8x128xbf16>
    %14 = vector.shape_cast %13 : vector<4x8x128xbf16> to vector<32x128xbf16>
    %c1 = arith.constant 1 : index
    %c0_15 = arith.constant 0 : index
    %c0_16 = arith.constant 0 : index
    %15 = vector.load %arg5[%c1, %c0_15, %c0_16] : memref<9x128x128xbf16, #tpu.memory_space<vmem>>, vector<1x128x128xbf16>
    %16 = vector.shape_cast %15 : vector<1x128x128xbf16> to vector<128x128xbf16>
    %cst_17 = arith.constant dense<0.000000e+00> : vector<32x128xf32>
    %17 = tpu.matmul %14, %16, %cst_17 {dimension_numbers = #tpu.dot_dimension_numbers<[1], [0], [0], [1], [0, 0, 1, 1], [], []>} : vector<32x128xbf16>, vector<128x128xbf16>, vector<32x128xf32> -> vector<32x128xf32>
    %18 = arith.addf %12, %17 : vector<32x128xf32>
    %19 = vector.extract_strided_slice %1 {offsets = [0, 2, 0], sizes = [4, 8, 128], strides = [1, 1, 1]} : vector<4x10x128xbf16> to vector<4x8x128xbf16>
    %20 = vector.shape_cast %19 : vector<4x8x128xbf16> to vector<32x128xbf16>
    %c2 = arith.constant 2 : index
    %c0_18 = arith.constant 0 : index
    %c0_19 = arith.constant 0 : index
    %21 = vector.load %arg5[%c2, %c0_18, %c0_19] : memref<9x128x128xbf16, #tpu.memory_space<vmem>>, vector<1x128x128xbf16>
    %22 = vector.shape_cast %21 : vector<1x128x128xbf16> to vector<128x128xbf16>
    %cst_20 = arith.constant dense<0.000000e+00> : vector<32x128xf32>
    %23 = tpu.matmul %20, %22, %cst_20 {dimension_numbers = #tpu.dot_dimension_numbers<[1], [0], [0], [1], [0, 0, 1, 1], [], []>} : vector<32x128xbf16>, vector<128x128xbf16>, vector<32x128xf32> -> vector<32x128xf32>
    %24 = arith.addf %18, %23 : vector<32x128xf32>
    %25 = vector.extract_strided_slice %3 {offsets = [0, 0, 0], sizes = [4, 8, 128], strides = [1, 1, 1]} : vector<4x10x128xbf16> to vector<4x8x128xbf16>
    %26 = vector.shape_cast %25 : vector<4x8x128xbf16> to vector<32x128xbf16>
    %c3 = arith.constant 3 : index
    %c0_21 = arith.constant 0 : index
    %c0_22 = arith.constant 0 : index
    %27 = vector.load %arg5[%c3, %c0_21, %c0_22] : memref<9x128x128xbf16, #tpu.memory_space<vmem>>, vector<1x128x128xbf16>
    %28 = vector.shape_cast %27 : vector<1x128x128xbf16> to vector<128x128xbf16>
    %cst_23 = arith.constant dense<0.000000e+00> : vector<32x128xf32>
    %29 = tpu.matmul %26, %28, %cst_23 {dimension_numbers = #tpu.dot_dimension_numbers<[1], [0], [0], [1], [0, 0, 1, 1], [], []>} : vector<32x128xbf16>, vector<128x128xbf16>, vector<32x128xf32> -> vector<32x128xf32>
    %30 = arith.addf %24, %29 : vector<32x128xf32>
    %31 = vector.extract_strided_slice %3 {offsets = [0, 1, 0], sizes = [4, 8, 128], strides = [1, 1, 1]} : vector<4x10x128xbf16> to vector<4x8x128xbf16>
    %32 = vector.shape_cast %31 : vector<4x8x128xbf16> to vector<32x128xbf16>
    %c4 = arith.constant 4 : index
    %c0_24 = arith.constant 0 : index
    %c0_25 = arith.constant 0 : index
    %33 = vector.load %arg5[%c4, %c0_24, %c0_25] : memref<9x128x128xbf16, #tpu.memory_space<vmem>>, vector<1x128x128xbf16>
    %34 = vector.shape_cast %33 : vector<1x128x128xbf16> to vector<128x128xbf16>
    %cst_26 = arith.constant dense<0.000000e+00> : vector<32x128xf32>
    %35 = tpu.matmul %32, %34, %cst_26 {dimension_numbers = #tpu.dot_dimension_numbers<[1], [0], [0], [1], [0, 0, 1, 1], [], []>} : vector<32x128xbf16>, vector<128x128xbf16>, vector<32x128xf32> -> vector<32x128xf32>
    %36 = arith.addf %30, %35 : vector<32x128xf32>
    %37 = vector.extract_strided_slice %3 {offsets = [0, 2, 0], sizes = [4, 8, 128], strides = [1, 1, 1]} : vector<4x10x128xbf16> to vector<4x8x128xbf16>
    %38 = vector.shape_cast %37 : vector<4x8x128xbf16> to vector<32x128xbf16>
    %c5 = arith.constant 5 : index
    %c0_27 = arith.constant 0 : index
    %c0_28 = arith.constant 0 : index
    %39 = vector.load %arg5[%c5, %c0_27, %c0_28] : memref<9x128x128xbf16, #tpu.memory_space<vmem>>, vector<1x128x128xbf16>
    %40 = vector.shape_cast %39 : vector<1x128x128xbf16> to vector<128x128xbf16>
    %cst_29 = arith.constant dense<0.000000e+00> : vector<32x128xf32>
    %41 = tpu.matmul %38, %40, %cst_29 {dimension_numbers = #tpu.dot_dimension_numbers<[1], [0], [0], [1], [0, 0, 1, 1], [], []>} : vector<32x128xbf16>, vector<128x128xbf16>, vector<32x128xf32> -> vector<32x128xf32>
    %42 = arith.addf %36, %41 : vector<32x128xf32>
    %43 = vector.extract_strided_slice %5 {offsets = [0, 0, 0], sizes = [4, 8, 128], strides = [1, 1, 1]} : vector<4x10x128xbf16> to vector<4x8x128xbf16>
    %44 = vector.shape_cast %43 : vector<4x8x128xbf16> to vector<32x128xbf16>
    %c6 = arith.constant 6 : index
    %c0_30 = arith.constant 0 : index
    %c0_31 = arith.constant 0 : index
    %45 = vector.load %arg5[%c6, %c0_30, %c0_31] : memref<9x128x128xbf16, #tpu.memory_space<vmem>>, vector<1x128x128xbf16>
    %46 = vector.shape_cast %45 : vector<1x128x128xbf16> to vector<128x128xbf16>
    %cst_32 = arith.constant dense<0.000000e+00> : vector<32x128xf32>
    %47 = tpu.matmul %44, %46, %cst_32 {dimension_numbers = #tpu.dot_dimension_numbers<[1], [0], [0], [1], [0, 0, 1, 1], [], []>} : vector<32x128xbf16>, vector<128x128xbf16>, vector<32x128xf32> -> vector<32x128xf32>
    %48 = arith.addf %42, %47 : vector<32x128xf32>
    %49 = vector.extract_strided_slice %5 {offsets = [0, 1, 0], sizes = [4, 8, 128], strides = [1, 1, 1]} : vector<4x10x128xbf16> to vector<4x8x128xbf16>
    %50 = vector.shape_cast %49 : vector<4x8x128xbf16> to vector<32x128xbf16>
    %c7 = arith.constant 7 : index
    %c0_33 = arith.constant 0 : index
    %c0_34 = arith.constant 0 : index
    %51 = vector.load %arg5[%c7, %c0_33, %c0_34] : memref<9x128x128xbf16, #tpu.memory_space<vmem>>, vector<1x128x128xbf16>
    %52 = vector.shape_cast %51 : vector<1x128x128xbf16> to vector<128x128xbf16>
    %cst_35 = arith.constant dense<0.000000e+00> : vector<32x128xf32>
    %53 = tpu.matmul %50, %52, %cst_35 {dimension_numbers = #tpu.dot_dimension_numbers<[1], [0], [0], [1], [0, 0, 1, 1], [], []>} : vector<32x128xbf16>, vector<128x128xbf16>, vector<32x128xf32> -> vector<32x128xf32>
    %54 = arith.addf %48, %53 : vector<32x128xf32>
    %55 = vector.extract_strided_slice %5 {offsets = [0, 2, 0], sizes = [4, 8, 128], strides = [1, 1, 1]} : vector<4x10x128xbf16> to vector<4x8x128xbf16>
    %56 = vector.shape_cast %55 : vector<4x8x128xbf16> to vector<32x128xbf16>
    %c8 = arith.constant 8 : index
    %c0_36 = arith.constant 0 : index
    %c0_37 = arith.constant 0 : index
    %57 = vector.load %arg5[%c8, %c0_36, %c0_37] : memref<9x128x128xbf16, #tpu.memory_space<vmem>>, vector<1x128x128xbf16>
    %58 = vector.shape_cast %57 : vector<1x128x128xbf16> to vector<128x128xbf16>
    %cst_38 = arith.constant dense<0.000000e+00> : vector<32x128xf32>
    %59 = tpu.matmul %56, %58, %cst_38 {dimension_numbers = #tpu.dot_dimension_numbers<[1], [0], [0], [1], [0, 0, 1, 1], [], []>} : vector<32x128xbf16>, vector<128x128xbf16>, vector<32x128xf32> -> vector<32x128xf32>
    %60 = arith.addf %54, %59 : vector<32x128xf32>
    %c0_39 = arith.constant 0 : index
    %c0_40 = arith.constant 0 : index
    %61 = vector.load %arg6[%c0_39, %c0_40] : memref<1x128xf32, #tpu.memory_space<vmem>>, vector<1x128xf32>
    %62 = vector.broadcast %61 : vector<1x128xf32> to vector<32x128xf32>
    %63 = arith.mulf %60, %62 : vector<32x128xf32>
    %c0_41 = arith.constant 0 : index
    %c0_42 = arith.constant 0 : index
    %64 = vector.load %arg7[%c0_41, %c0_42] : memref<1x128xf32, #tpu.memory_space<vmem>>, vector<1x128xf32>
    %65 = vector.broadcast %64 : vector<1x128xf32> to vector<32x128xf32>
    %66 = arith.addf %63, %65 : vector<32x128xf32>
    %cst_43 = arith.constant 0.000000e+00 : f32
    %67 = vector.broadcast %cst_43 : f32 to vector<32x128xf32>
    %68 = arith.maximumf %66, %67 : vector<32x128xf32>
    %69 = tpu.iota {dimensions = array<i32: 0>} : vector<32x128xi32>
    %c8_i32 = arith.constant 8 : i32
    %c0_i32 = arith.constant 0 : i32
    %70 = arith.cmpi eq, %c8_i32, %c0_i32 : i32
    %c1_i32 = arith.constant 1 : i32
    %71 = arith.select %70, %c1_i32, %c8_i32 : i32
    %72 = vector.broadcast %71 : i32 to vector<32x128xi32>
    %73 = arith.remsi %69, %72 : vector<32x128xi32>
    %c0_i32_44 = arith.constant 0 : i32
    %74 = vector.broadcast %c0_i32_44 : i32 to vector<32x128xi32>
    %75 = arith.cmpi ne, %73, %74 : vector<32x128xi32>
    %c0_i32_45 = arith.constant 0 : i32
    %76 = vector.broadcast %c0_i32_45 : i32 to vector<32x128xi32>
    %77 = arith.cmpi slt, %73, %76 : vector<32x128xi32>
    %c0_i32_46 = arith.constant 0 : i32
    %78 = arith.cmpi slt, %71, %c0_i32_46 : i32
    %79 = vector.broadcast %78 : i1 to vector<32x128xi1>
    %80 = vector.broadcast %79 : vector<32x128xi1> to vector<32x128xi1>
    %81 = arith.xori %77, %80 : vector<32x128xi1>
    %82 = arith.andi %81, %75 : vector<32x128xi1>
    %83 = vector.broadcast %71 : i32 to vector<32x128xi32>
    %84 = arith.addi %73, %83 : vector<32x128xi32>
    %85 = arith.select %82, %84, %73 : vector<32x128xi1>, vector<32x128xi32>
    %c4_i32 = arith.constant 4 : i32
    %86 = vector.broadcast %c4_i32 : i32 to vector<32x128xi32>
    %87 = arith.cmpi slt, %85, %86 : vector<32x128xi32>
    %cst_47 = arith.constant 0.000000e+00 : f32
    %88 = vector.broadcast %cst_47 : f32 to vector<32x128xf32>
    %89 = arith.select %87, %68, %88 : vector<32x128xi1>, vector<32x128xf32>
    %90 = vector.shape_cast %89 : vector<32x128xf32> to vector<4x8x128xf32>
    %91 = arith.truncf %90 : vector<4x8x128xf32> to vector<4x8x128xbf16>
    %c0_48 = arith.constant 0 : index
    %c0_49 = arith.constant 0 : index
    %c0_50 = arith.constant 0 : index
    %c0_51 = arith.constant 0 : index
    %92 = vector.load %arg8[%c0_48, %c0_49, %c0_50, %c0_51] : memref<1x4x8x128xbf16, #tpu.memory_space<vmem>>, vector<1x4x8x128xbf16>
    %93 = vector.shape_cast %92 : vector<1x4x8x128xbf16> to vector<4x8x128xbf16>
    %94 = vector.shape_cast %91 : vector<4x8x128xbf16> to vector<1x4x8x128xbf16>
    tpu.vector_store %arg8[%c0_48, %c0_49, %c0_50, %c0_51], %94 {strides = array<i32>} : memref<1x4x8x128xbf16, #tpu.memory_space<vmem>>, vector<1x4x8x128xbf16>,
    return
  }
  func.func @transform_0(%arg0: i32, %arg1: i32) -> (i32, i32, i32, i32) {
    %c0_i32 = arith.constant 0 : i32
    %c0_i32_0 = arith.constant 0 : i32
    %c0_i32_1 = arith.constant 0 : i32
    return %arg0, %arg1, %c0_i32, %c0_i32_0 : i32, i32, i32, i32
  }
  func.func @transform_1(%arg0: i32, %arg1: i32) -> (i32, i32, i32, i32) {
    %c0_i32 = arith.constant 0 : i32
    %c0_i32_0 = arith.constant 0 : i32
    %c0_i32_1 = arith.constant 0 : i32
    return %arg0, %arg1, %c0_i32, %c0_i32_0 : i32, i32, i32, i32
  }
  func.func @transform_2(%arg0: i32, %arg1: i32) -> (i32, i32, i32, i32) {
    %c0_i32 = arith.constant 0 : i32
    %c0_i32_0 = arith.constant 0 : i32
    %c0_i32_1 = arith.constant 0 : i32
    return %arg0, %arg1, %c0_i32, %c0_i32_0 : i32, i32, i32, i32
  }
  func.func @transform_3(%arg0: i32, %arg1: i32) -> (i32, i32, i32) {
    %c0_i32 = arith.constant 0 : i32
    %c0_i32_0 = arith.constant 0 : i32
    %c0_i32_1 = arith.constant 0 : i32
    %c0_i32_2 = arith.constant 0 : i32
    return %c0_i32, %c0_i32_0, %c0_i32_1 : i32, i32, i32
  }
  func.func @transform_4(%arg0: i32, %arg1: i32) -> (i32, i32) {
    %c0_i32 = arith.constant 0 : i32
    %c0_i32_0 = arith.constant 0 : i32
    %c0_i32_1 = arith.constant 0 : i32
    return %c0_i32, %c0_i32_0 : i32, i32
  }
  func.func @transform_5(%arg0: i32, %arg1: i32) -> (i32, i32) {
    %c0_i32 = arith.constant 0 : i32
    %c0_i32_0 = arith.constant 0 : i32
    %c0_i32_1 = arith.constant 0 : i32
    return %c0_i32, %c0_i32_0 : i32, i32
  }
  func.func @transform_6(%arg0: i32, %arg1: i32) -> (i32, i32, i32, i32) {
    %c0_i32 = arith.constant 0 : i32
    %c0_i32_0 = arith.constant 0 : i32
    %c0_i32_1 = arith.constant 0 : i32
    return %arg0, %arg1, %c0_i32, %c0_i32_0 : i32, i32, i32, i32
  }
}

module attributes {stable_mosaic.version = 11 : i64} {
  func.func @kernel(%arg0: i32, %arg1: i32, %arg2: memref<1x2x9x256xbf16, #tpu.memory_space<vmem>>, %arg3: memref<1x2x9x256xbf16, #tpu.memory_space<vmem>>, %arg4: memref<1x2x9x256xbf16, #tpu.memory_space<vmem>>, %arg5: memref<9x128x128xbf16, #tpu.memory_space<vmem>>, %arg6: memref<1x128xf32, #tpu.memory_space<vmem>>, %arg7: memref<1x128xf32, #tpu.memory_space<vmem>>, %arg8: memref<1x2x8x128xbf16, #tpu.memory_space<vmem>>) attributes {dimension_semantics = [#tpu.dimension_semantics<parallel>, #tpu.dimension_semantics<parallel>], iteration_bounds = array<i64: 2, 1>, scalar_prefetch = 0 : i64, scratch_operands = 0 : i64, tpu.core_type = #tpu.core_type<tc>, window_params = [{transform_indices = @transform_0, window_bounds = array<i64: 1, 2, 9, 256>}, {transform_indices = @transform_1, window_bounds = array<i64: 1, 2, 9, 256>}, {transform_indices = @transform_2, window_bounds = array<i64: 1, 2, 9, 256>}, {pipeline_mode = #tpu.pipeline_mode<synchronous>, transform_indices = @transform_3, window_bounds = array<i64: 9, 128, 128>}, {pipeline_mode = #tpu.pipeline_mode<synchronous>, transform_indices = @transform_4, window_bounds = array<i64: 1, 128>}, {pipeline_mode = #tpu.pipeline_mode<synchronous>, transform_indices = @transform_5, window_bounds = array<i64: 1, 128>}, {transform_indices = @transform_6, window_bounds = array<i64: 1, 2, 8, 128>}]} {
    %c0 = arith.constant 0 : index
    %c0_0 = arith.constant 0 : index
    %c0_1 = arith.constant 0 : index
    %c0_2 = arith.constant 0 : index
    %0 = vector.load %arg2[%c0, %c0_0, %c0_1, %c0_2] : memref<1x2x9x256xbf16, #tpu.memory_space<vmem>>, vector<1x2x9x256xbf16>
    %1 = vector.shape_cast %0 : vector<1x2x9x256xbf16> to vector<2x9x256xbf16>
    %c0_3 = arith.constant 0 : index
    %c0_4 = arith.constant 0 : index
    %c0_5 = arith.constant 0 : index
    %c0_6 = arith.constant 0 : index
    %2 = vector.load %arg3[%c0_3, %c0_4, %c0_5, %c0_6] : memref<1x2x9x256xbf16, #tpu.memory_space<vmem>>, vector<1x2x9x256xbf16>
    %3 = vector.shape_cast %2 : vector<1x2x9x256xbf16> to vector<2x9x256xbf16>
    %c0_7 = arith.constant 0 : index
    %c0_8 = arith.constant 0 : index
    %c0_9 = arith.constant 0 : index
    %c0_10 = arith.constant 0 : index
    %4 = vector.load %arg4[%c0_7, %c0_8, %c0_9, %c0_10] : memref<1x2x9x256xbf16, #tpu.memory_space<vmem>>, vector<1x2x9x256xbf16>
    %5 = vector.shape_cast %4 : vector<1x2x9x256xbf16> to vector<2x9x256xbf16>
    %cst = arith.constant 0.000000e+00 : f32
    %6 = vector.broadcast %cst : f32 to vector<16x128xf32>
    %7 = vector.extract_strided_slice %1 {offsets = [0, 0, 0], sizes = [2, 8, 128], strides = [1, 1, 1]} : vector<2x9x256xbf16> to vector<2x8x128xbf16>
    %8 = vector.shape_cast %7 : vector<2x8x128xbf16> to vector<16x128xbf16>
    %c0_11 = arith.constant 0 : index
    %c0_12 = arith.constant 0 : index
    %c0_13 = arith.constant 0 : index
    %9 = vector.load %arg5[%c0_11, %c0_12, %c0_13] : memref<9x128x128xbf16, #tpu.memory_space<vmem>>, vector<1x128x128xbf16>
    %10 = vector.shape_cast %9 : vector<1x128x128xbf16> to vector<128x128xbf16>
    %cst_14 = arith.constant dense<0.000000e+00> : vector<16x128xf32>
    %11 = tpu.matmul %8, %10, %cst_14 {dimension_numbers = #tpu.dot_dimension_numbers<[1], [0], [0], [1], [0, 0, 1, 1], [], []>} : vector<16x128xbf16>, vector<128x128xbf16>, vector<16x128xf32> -> vector<16x128xf32>
    %12 = arith.addf %6, %11 : vector<16x128xf32>
    %13 = vector.extract_strided_slice %1 {offsets = [0, 0, 128], sizes = [2, 8, 128], strides = [1, 1, 1]} : vector<2x9x256xbf16> to vector<2x8x128xbf16>
    %14 = vector.shape_cast %13 : vector<2x8x128xbf16> to vector<16x128xbf16>
    %c1 = arith.constant 1 : index
    %c0_15 = arith.constant 0 : index
    %c0_16 = arith.constant 0 : index
    %15 = vector.load %arg5[%c1, %c0_15, %c0_16] : memref<9x128x128xbf16, #tpu.memory_space<vmem>>, vector<1x128x128xbf16>
    %16 = vector.shape_cast %15 : vector<1x128x128xbf16> to vector<128x128xbf16>
    %cst_17 = arith.constant dense<0.000000e+00> : vector<16x128xf32>
    %17 = tpu.matmul %14, %16, %cst_17 {dimension_numbers = #tpu.dot_dimension_numbers<[1], [0], [0], [1], [0, 0, 1, 1], [], []>} : vector<16x128xbf16>, vector<128x128xbf16>, vector<16x128xf32> -> vector<16x128xf32>
    %18 = arith.addf %12, %17 : vector<16x128xf32>
    %19 = vector.extract_strided_slice %1 {offsets = [0, 1, 0], sizes = [2, 8, 128], strides = [1, 1, 1]} : vector<2x9x256xbf16> to vector<2x8x128xbf16>
    %20 = vector.shape_cast %19 : vector<2x8x128xbf16> to vector<16x128xbf16>
    %c2 = arith.constant 2 : index
    %c0_18 = arith.constant 0 : index
    %c0_19 = arith.constant 0 : index
    %21 = vector.load %arg5[%c2, %c0_18, %c0_19] : memref<9x128x128xbf16, #tpu.memory_space<vmem>>, vector<1x128x128xbf16>
    %22 = vector.shape_cast %21 : vector<1x128x128xbf16> to vector<128x128xbf16>
    %cst_20 = arith.constant dense<0.000000e+00> : vector<16x128xf32>
    %23 = tpu.matmul %20, %22, %cst_20 {dimension_numbers = #tpu.dot_dimension_numbers<[1], [0], [0], [1], [0, 0, 1, 1], [], []>} : vector<16x128xbf16>, vector<128x128xbf16>, vector<16x128xf32> -> vector<16x128xf32>
    %24 = arith.addf %18, %23 : vector<16x128xf32>
    %25 = vector.extract_strided_slice %3 {offsets = [0, 0, 0], sizes = [2, 8, 128], strides = [1, 1, 1]} : vector<2x9x256xbf16> to vector<2x8x128xbf16>
    %26 = vector.shape_cast %25 : vector<2x8x128xbf16> to vector<16x128xbf16>
    %c3 = arith.constant 3 : index
    %c0_21 = arith.constant 0 : index
    %c0_22 = arith.constant 0 : index
    %27 = vector.load %arg5[%c3, %c0_21, %c0_22] : memref<9x128x128xbf16, #tpu.memory_space<vmem>>, vector<1x128x128xbf16>
    %28 = vector.shape_cast %27 : vector<1x128x128xbf16> to vector<128x128xbf16>
    %cst_23 = arith.constant dense<0.000000e+00> : vector<16x128xf32>
    %29 = tpu.matmul %26, %28, %cst_23 {dimension_numbers = #tpu.dot_dimension_numbers<[1], [0], [0], [1], [0, 0, 1, 1], [], []>} : vector<16x128xbf16>, vector<128x128xbf16>, vector<16x128xf32> -> vector<16x128xf32>
    %30 = arith.addf %24, %29 : vector<16x128xf32>
    %31 = vector.extract_strided_slice %3 {offsets = [0, 0, 128], sizes = [2, 8, 128], strides = [1, 1, 1]} : vector<2x9x256xbf16> to vector<2x8x128xbf16>
    %32 = vector.shape_cast %31 : vector<2x8x128xbf16> to vector<16x128xbf16>
    %c4 = arith.constant 4 : index
    %c0_24 = arith.constant 0 : index
    %c0_25 = arith.constant 0 : index
    %33 = vector.load %arg5[%c4, %c0_24, %c0_25] : memref<9x128x128xbf16, #tpu.memory_space<vmem>>, vector<1x128x128xbf16>
    %34 = vector.shape_cast %33 : vector<1x128x128xbf16> to vector<128x128xbf16>
    %cst_26 = arith.constant dense<0.000000e+00> : vector<16x128xf32>
    %35 = tpu.matmul %32, %34, %cst_26 {dimension_numbers = #tpu.dot_dimension_numbers<[1], [0], [0], [1], [0, 0, 1, 1], [], []>} : vector<16x128xbf16>, vector<128x128xbf16>, vector<16x128xf32> -> vector<16x128xf32>
    %36 = arith.addf %30, %35 : vector<16x128xf32>
    %37 = vector.extract_strided_slice %3 {offsets = [0, 1, 0], sizes = [2, 8, 128], strides = [1, 1, 1]} : vector<2x9x256xbf16> to vector<2x8x128xbf16>
    %38 = vector.shape_cast %37 : vector<2x8x128xbf16> to vector<16x128xbf16>
    %c5 = arith.constant 5 : index
    %c0_27 = arith.constant 0 : index
    %c0_28 = arith.constant 0 : index
    %39 = vector.load %arg5[%c5, %c0_27, %c0_28] : memref<9x128x128xbf16, #tpu.memory_space<vmem>>, vector<1x128x128xbf16>
    %40 = vector.shape_cast %39 : vector<1x128x128xbf16> to vector<128x128xbf16>
    %cst_29 = arith.constant dense<0.000000e+00> : vector<16x128xf32>
    %41 = tpu.matmul %38, %40, %cst_29 {dimension_numbers = #tpu.dot_dimension_numbers<[1], [0], [0], [1], [0, 0, 1, 1], [], []>} : vector<16x128xbf16>, vector<128x128xbf16>, vector<16x128xf32> -> vector<16x128xf32>
    %42 = arith.addf %36, %41 : vector<16x128xf32>
    %43 = vector.extract_strided_slice %5 {offsets = [0, 0, 0], sizes = [2, 8, 128], strides = [1, 1, 1]} : vector<2x9x256xbf16> to vector<2x8x128xbf16>
    %44 = vector.shape_cast %43 : vector<2x8x128xbf16> to vector<16x128xbf16>
    %c6 = arith.constant 6 : index
    %c0_30 = arith.constant 0 : index
    %c0_31 = arith.constant 0 : index
    %45 = vector.load %arg5[%c6, %c0_30, %c0_31] : memref<9x128x128xbf16, #tpu.memory_space<vmem>>, vector<1x128x128xbf16>
    %46 = vector.shape_cast %45 : vector<1x128x128xbf16> to vector<128x128xbf16>
    %cst_32 = arith.constant dense<0.000000e+00> : vector<16x128xf32>
    %47 = tpu.matmul %44, %46, %cst_32 {dimension_numbers = #tpu.dot_dimension_numbers<[1], [0], [0], [1], [0, 0, 1, 1], [], []>} : vector<16x128xbf16>, vector<128x128xbf16>, vector<16x128xf32> -> vector<16x128xf32>
    %48 = arith.addf %42, %47 : vector<16x128xf32>
    %49 = vector.extract_strided_slice %5 {offsets = [0, 0, 128], sizes = [2, 8, 128], strides = [1, 1, 1]} : vector<2x9x256xbf16> to vector<2x8x128xbf16>
    %50 = vector.shape_cast %49 : vector<2x8x128xbf16> to vector<16x128xbf16>
    %c7 = arith.constant 7 : index
    %c0_33 = arith.constant 0 : index
    %c0_34 = arith.constant 0 : index
    %51 = vector.load %arg5[%c7, %c0_33, %c0_34] : memref<9x128x128xbf16, #tpu.memory_space<vmem>>, vector<1x128x128xbf16>
    %52 = vector.shape_cast %51 : vector<1x128x128xbf16> to vector<128x128xbf16>
    %cst_35 = arith.constant dense<0.000000e+00> : vector<16x128xf32>
    %53 = tpu.matmul %50, %52, %cst_35 {dimension_numbers = #tpu.dot_dimension_numbers<[1], [0], [0], [1], [0, 0, 1, 1], [], []>} : vector<16x128xbf16>, vector<128x128xbf16>, vector<16x128xf32> -> vector<16x128xf32>
    %54 = arith.addf %48, %53 : vector<16x128xf32>
    %55 = vector.extract_strided_slice %5 {offsets = [0, 1, 0], sizes = [2, 8, 128], strides = [1, 1, 1]} : vector<2x9x256xbf16> to vector<2x8x128xbf16>
    %56 = vector.shape_cast %55 : vector<2x8x128xbf16> to vector<16x128xbf16>
    %c8 = arith.constant 8 : index
    %c0_36 = arith.constant 0 : index
    %c0_37 = arith.constant 0 : index
    %57 = vector.load %arg5[%c8, %c0_36, %c0_37] : memref<9x128x128xbf16, #tpu.memory_space<vmem>>, vector<1x128x128xbf16>
    %58 = vector.shape_cast %57 : vector<1x128x128xbf16> to vector<128x128xbf16>
    %cst_38 = arith.constant dense<0.000000e+00> : vector<16x128xf32>
    %59 = tpu.matmul %56, %58, %cst_38 {dimension_numbers = #tpu.dot_dimension_numbers<[1], [0], [0], [1], [0, 0, 1, 1], [], []>} : vector<16x128xbf16>, vector<128x128xbf16>, vector<16x128xf32> -> vector<16x128xf32>
    %60 = arith.addf %54, %59 : vector<16x128xf32>
    %c0_39 = arith.constant 0 : index
    %c0_40 = arith.constant 0 : index
    %61 = vector.load %arg6[%c0_39, %c0_40] : memref<1x128xf32, #tpu.memory_space<vmem>>, vector<1x128xf32>
    %62 = vector.broadcast %61 : vector<1x128xf32> to vector<16x128xf32>
    %63 = arith.mulf %60, %62 : vector<16x128xf32>
    %c0_41 = arith.constant 0 : index
    %c0_42 = arith.constant 0 : index
    %64 = vector.load %arg7[%c0_41, %c0_42] : memref<1x128xf32, #tpu.memory_space<vmem>>, vector<1x128xf32>
    %65 = vector.broadcast %64 : vector<1x128xf32> to vector<16x128xf32>
    %66 = arith.addf %63, %65 : vector<16x128xf32>
    %cst_43 = arith.constant 0.000000e+00 : f32
    %67 = vector.broadcast %cst_43 : f32 to vector<16x128xf32>
    %68 = arith.maximumf %66, %67 : vector<16x128xf32>
    %69 = tpu.iota {dimensions = array<i32: 0>} : vector<16x128xi32>
    %c8_i32 = arith.constant 8 : i32
    %c0_i32 = arith.constant 0 : i32
    %70 = arith.cmpi eq, %c8_i32, %c0_i32 : i32
    %c1_i32 = arith.constant 1 : i32
    %71 = arith.select %70, %c1_i32, %c8_i32 : i32
    %72 = vector.broadcast %71 : i32 to vector<16x128xi32>
    %73 = arith.remsi %69, %72 : vector<16x128xi32>
    %c0_i32_44 = arith.constant 0 : i32
    %74 = vector.broadcast %c0_i32_44 : i32 to vector<16x128xi32>
    %75 = arith.cmpi ne, %73, %74 : vector<16x128xi32>
    %c0_i32_45 = arith.constant 0 : i32
    %76 = vector.broadcast %c0_i32_45 : i32 to vector<16x128xi32>
    %77 = arith.cmpi slt, %73, %76 : vector<16x128xi32>
    %c0_i32_46 = arith.constant 0 : i32
    %78 = arith.cmpi slt, %71, %c0_i32_46 : i32
    %79 = vector.broadcast %78 : i1 to vector<16x128xi1>
    %80 = vector.broadcast %79 : vector<16x128xi1> to vector<16x128xi1>
    %81 = arith.xori %77, %80 : vector<16x128xi1>
    %82 = arith.andi %81, %75 : vector<16x128xi1>
    %83 = vector.broadcast %71 : i32 to vector<16x128xi32>
    %84 = arith.addi %73, %83 : vector<16x128xi32>
    %85 = arith.select %82, %84, %73 : vector<16x128xi1>, vector<16x128xi32>
    %c2_i32 = arith.constant 2 : i32
    %86 = vector.broadcast %c2_i32 : i32 to vector<16x128xi32>
    %87 = arith.cmpi slt, %85, %86 : vector<16x128xi32>
    %cst_47 = arith.constant 0.000000e+00 : f32
    %88 = vector.broadcast %cst_47 : f32 to vector<16x128xf32>
    %89 = arith.select %87, %68, %88 : vector<16x128xi1>, vector<16x128xf32>
    %90 = vector.shape_cast %89 : vector<16x128xf32> to vector<2x8x128xf32>
    %91 = arith.truncf %90 : vector<2x8x128xf32> to vector<2x8x128xbf16>
    %c0_48 = arith.constant 0 : index
    %c0_49 = arith.constant 0 : index
    %c0_50 = arith.constant 0 : index
    %c0_51 = arith.constant 0 : index
    %92 = vector.load %arg8[%c0_48, %c0_49, %c0_50, %c0_51] : memref<1x2x8x128xbf16, #tpu.memory_space<vmem>>, vector<1x2x8x128xbf16>
    %93 = vector.shape_cast %92 : vector<1x2x8x128xbf16> to vector<2x8x128xbf16>
    %94 = vector.shape_cast %91 : vector<2x8x128xbf16> to vector<1x2x8x128xbf16>
    tpu.vector_store %arg8[%c0_48, %c0_49, %c0_50, %c0_51], %94 {strides = array<i32>} : memref<1x2x8x128xbf16, #tpu.memory_space<vmem>>, vector<1x2x8x128xbf16>,
    return
  }
  func.func @transform_0(%arg0: i32, %arg1: i32) -> (i32, i32, i32, i32) {
    %c0_i32 = arith.constant 0 : i32
    %c0_i32_0 = arith.constant 0 : i32
    %c0_i32_1 = arith.constant 0 : i32
    return %arg0, %arg1, %c0_i32, %c0_i32_0 : i32, i32, i32, i32
  }
  func.func @transform_1(%arg0: i32, %arg1: i32) -> (i32, i32, i32, i32) {
    %c0_i32 = arith.constant 0 : i32
    %c0_i32_0 = arith.constant 0 : i32
    %c0_i32_1 = arith.constant 0 : i32
    return %arg0, %arg1, %c0_i32, %c0_i32_0 : i32, i32, i32, i32
  }
  func.func @transform_2(%arg0: i32, %arg1: i32) -> (i32, i32, i32, i32) {
    %c0_i32 = arith.constant 0 : i32
    %c0_i32_0 = arith.constant 0 : i32
    %c0_i32_1 = arith.constant 0 : i32
    return %arg0, %arg1, %c0_i32, %c0_i32_0 : i32, i32, i32, i32
  }
  func.func @transform_3(%arg0: i32, %arg1: i32) -> (i32, i32, i32) {
    %c0_i32 = arith.constant 0 : i32
    %c0_i32_0 = arith.constant 0 : i32
    %c0_i32_1 = arith.constant 0 : i32
    %c0_i32_2 = arith.constant 0 : i32
    return %c0_i32, %c0_i32_0, %c0_i32_1 : i32, i32, i32
  }
  func.func @transform_4(%arg0: i32, %arg1: i32) -> (i32, i32) {
    %c0_i32 = arith.constant 0 : i32
    %c0_i32_0 = arith.constant 0 : i32
    %c0_i32_1 = arith.constant 0 : i32
    return %c0_i32, %c0_i32_0 : i32, i32
  }
  func.func @transform_5(%arg0: i32, %arg1: i32) -> (i32, i32) {
    %c0_i32 = arith.constant 0 : i32
    %c0_i32_0 = arith.constant 0 : i32
    %c0_i32_1 = arith.constant 0 : i32
    return %c0_i32, %c0_i32_0 : i32, i32
  }
  func.func @transform_6(%arg0: i32, %arg1: i32) -> (i32, i32, i32, i32) {
    %c0_i32 = arith.constant 0 : i32
    %c0_i32_0 = arith.constant 0 : i32
    %c0_i32_1 = arith.constant 0 : i32
    return %arg0, %arg1, %c0_i32, %c0_i32_0 : i32, i32, i32, i32
  }
}

module attributes {stable_mosaic.version = 11 : i64} {
  func.func @kernel(%arg0: i32, %arg1: i32, %arg2: memref<1x2x10x128xbf16, #tpu.memory_space<vmem>>, %arg3: memref<1x2x10x128xbf16, #tpu.memory_space<vmem>>, %arg4: memref<1x2x10x128xbf16, #tpu.memory_space<vmem>>, %arg5: memref<9x128x128xbf16, #tpu.memory_space<vmem>>, %arg6: memref<1x128xf32, #tpu.memory_space<vmem>>, %arg7: memref<1x128xf32, #tpu.memory_space<vmem>>, %arg8: memref<1x2x8x128xbf16, #tpu.memory_space<vmem>>) attributes {dimension_semantics = [#tpu.dimension_semantics<parallel>, #tpu.dimension_semantics<parallel>], iteration_bounds = array<i64: 2, 1>, scalar_prefetch = 0 : i64, scratch_operands = 0 : i64, tpu.core_type = #tpu.core_type<tc>, window_params = [{transform_indices = @transform_0, window_bounds = array<i64: 1, 2, 10, 128>}, {transform_indices = @transform_1, window_bounds = array<i64: 1, 2, 10, 128>}, {transform_indices = @transform_2, window_bounds = array<i64: 1, 2, 10, 128>}, {pipeline_mode = #tpu.pipeline_mode<synchronous>, transform_indices = @transform_3, window_bounds = array<i64: 9, 128, 128>}, {pipeline_mode = #tpu.pipeline_mode<synchronous>, transform_indices = @transform_4, window_bounds = array<i64: 1, 128>}, {pipeline_mode = #tpu.pipeline_mode<synchronous>, transform_indices = @transform_5, window_bounds = array<i64: 1, 128>}, {transform_indices = @transform_6, window_bounds = array<i64: 1, 2, 8, 128>}]} {
    %c0 = arith.constant 0 : index
    %c0_0 = arith.constant 0 : index
    %c0_1 = arith.constant 0 : index
    %c0_2 = arith.constant 0 : index
    %0 = vector.load %arg2[%c0, %c0_0, %c0_1, %c0_2] : memref<1x2x10x128xbf16, #tpu.memory_space<vmem>>, vector<1x2x10x128xbf16>
    %1 = vector.shape_cast %0 : vector<1x2x10x128xbf16> to vector<2x10x128xbf16>
    %c0_3 = arith.constant 0 : index
    %c0_4 = arith.constant 0 : index
    %c0_5 = arith.constant 0 : index
    %c0_6 = arith.constant 0 : index
    %2 = vector.load %arg3[%c0_3, %c0_4, %c0_5, %c0_6] : memref<1x2x10x128xbf16, #tpu.memory_space<vmem>>, vector<1x2x10x128xbf16>
    %3 = vector.shape_cast %2 : vector<1x2x10x128xbf16> to vector<2x10x128xbf16>
    %c0_7 = arith.constant 0 : index
    %c0_8 = arith.constant 0 : index
    %c0_9 = arith.constant 0 : index
    %c0_10 = arith.constant 0 : index
    %4 = vector.load %arg4[%c0_7, %c0_8, %c0_9, %c0_10] : memref<1x2x10x128xbf16, #tpu.memory_space<vmem>>, vector<1x2x10x128xbf16>
    %5 = vector.shape_cast %4 : vector<1x2x10x128xbf16> to vector<2x10x128xbf16>
    %cst = arith.constant 0.000000e+00 : f32
    %6 = vector.broadcast %cst : f32 to vector<16x128xf32>
    %7 = vector.extract_strided_slice %1 {offsets = [0, 0, 0], sizes = [2, 8, 128], strides = [1, 1, 1]} : vector<2x10x128xbf16> to vector<2x8x128xbf16>
    %8 = vector.shape_cast %7 : vector<2x8x128xbf16> to vector<16x128xbf16>
    %c0_11 = arith.constant 0 : index
    %c0_12 = arith.constant 0 : index
    %c0_13 = arith.constant 0 : index
    %9 = vector.load %arg5[%c0_11, %c0_12, %c0_13] : memref<9x128x128xbf16, #tpu.memory_space<vmem>>, vector<1x128x128xbf16>
    %10 = vector.shape_cast %9 : vector<1x128x128xbf16> to vector<128x128xbf16>
    %cst_14 = arith.constant dense<0.000000e+00> : vector<16x128xf32>
    %11 = tpu.matmul %8, %10, %cst_14 {dimension_numbers = #tpu.dot_dimension_numbers<[1], [0], [0], [1], [0, 0, 1, 1], [], []>} : vector<16x128xbf16>, vector<128x128xbf16>, vector<16x128xf32> -> vector<16x128xf32>
    %12 = arith.addf %6, %11 : vector<16x128xf32>
    %13 = vector.extract_strided_slice %1 {offsets = [0, 1, 0], sizes = [2, 8, 128], strides = [1, 1, 1]} : vector<2x10x128xbf16> to vector<2x8x128xbf16>
    %14 = vector.shape_cast %13 : vector<2x8x128xbf16> to vector<16x128xbf16>
    %c1 = arith.constant 1 : index
    %c0_15 = arith.constant 0 : index
    %c0_16 = arith.constant 0 : index
    %15 = vector.load %arg5[%c1, %c0_15, %c0_16] : memref<9x128x128xbf16, #tpu.memory_space<vmem>>, vector<1x128x128xbf16>
    %16 = vector.shape_cast %15 : vector<1x128x128xbf16> to vector<128x128xbf16>
    %cst_17 = arith.constant dense<0.000000e+00> : vector<16x128xf32>
    %17 = tpu.matmul %14, %16, %cst_17 {dimension_numbers = #tpu.dot_dimension_numbers<[1], [0], [0], [1], [0, 0, 1, 1], [], []>} : vector<16x128xbf16>, vector<128x128xbf16>, vector<16x128xf32> -> vector<16x128xf32>
    %18 = arith.addf %12, %17 : vector<16x128xf32>
    %19 = vector.extract_strided_slice %1 {offsets = [0, 2, 0], sizes = [2, 8, 128], strides = [1, 1, 1]} : vector<2x10x128xbf16> to vector<2x8x128xbf16>
    %20 = vector.shape_cast %19 : vector<2x8x128xbf16> to vector<16x128xbf16>
    %c2 = arith.constant 2 : index
    %c0_18 = arith.constant 0 : index
    %c0_19 = arith.constant 0 : index
    %21 = vector.load %arg5[%c2, %c0_18, %c0_19] : memref<9x128x128xbf16, #tpu.memory_space<vmem>>, vector<1x128x128xbf16>
    %22 = vector.shape_cast %21 : vector<1x128x128xbf16> to vector<128x128xbf16>
    %cst_20 = arith.constant dense<0.000000e+00> : vector<16x128xf32>
    %23 = tpu.matmul %20, %22, %cst_20 {dimension_numbers = #tpu.dot_dimension_numbers<[1], [0], [0], [1], [0, 0, 1, 1], [], []>} : vector<16x128xbf16>, vector<128x128xbf16>, vector<16x128xf32> -> vector<16x128xf32>
    %24 = arith.addf %18, %23 : vector<16x128xf32>
    %25 = vector.extract_strided_slice %3 {offsets = [0, 0, 0], sizes = [2, 8, 128], strides = [1, 1, 1]} : vector<2x10x128xbf16> to vector<2x8x128xbf16>
    %26 = vector.shape_cast %25 : vector<2x8x128xbf16> to vector<16x128xbf16>
    %c3 = arith.constant 3 : index
    %c0_21 = arith.constant 0 : index
    %c0_22 = arith.constant 0 : index
    %27 = vector.load %arg5[%c3, %c0_21, %c0_22] : memref<9x128x128xbf16, #tpu.memory_space<vmem>>, vector<1x128x128xbf16>
    %28 = vector.shape_cast %27 : vector<1x128x128xbf16> to vector<128x128xbf16>
    %cst_23 = arith.constant dense<0.000000e+00> : vector<16x128xf32>
    %29 = tpu.matmul %26, %28, %cst_23 {dimension_numbers = #tpu.dot_dimension_numbers<[1], [0], [0], [1], [0, 0, 1, 1], [], []>} : vector<16x128xbf16>, vector<128x128xbf16>, vector<16x128xf32> -> vector<16x128xf32>
    %30 = arith.addf %24, %29 : vector<16x128xf32>
    %31 = vector.extract_strided_slice %3 {offsets = [0, 1, 0], sizes = [2, 8, 128], strides = [1, 1, 1]} : vector<2x10x128xbf16> to vector<2x8x128xbf16>
    %32 = vector.shape_cast %31 : vector<2x8x128xbf16> to vector<16x128xbf16>
    %c4 = arith.constant 4 : index
    %c0_24 = arith.constant 0 : index
    %c0_25 = arith.constant 0 : index
    %33 = vector.load %arg5[%c4, %c0_24, %c0_25] : memref<9x128x128xbf16, #tpu.memory_space<vmem>>, vector<1x128x128xbf16>
    %34 = vector.shape_cast %33 : vector<1x128x128xbf16> to vector<128x128xbf16>
    %cst_26 = arith.constant dense<0.000000e+00> : vector<16x128xf32>
    %35 = tpu.matmul %32, %34, %cst_26 {dimension_numbers = #tpu.dot_dimension_numbers<[1], [0], [0], [1], [0, 0, 1, 1], [], []>} : vector<16x128xbf16>, vector<128x128xbf16>, vector<16x128xf32> -> vector<16x128xf32>
    %36 = arith.addf %30, %35 : vector<16x128xf32>
    %37 = vector.extract_strided_slice %3 {offsets = [0, 2, 0], sizes = [2, 8, 128], strides = [1, 1, 1]} : vector<2x10x128xbf16> to vector<2x8x128xbf16>
    %38 = vector.shape_cast %37 : vector<2x8x128xbf16> to vector<16x128xbf16>
    %c5 = arith.constant 5 : index
    %c0_27 = arith.constant 0 : index
    %c0_28 = arith.constant 0 : index
    %39 = vector.load %arg5[%c5, %c0_27, %c0_28] : memref<9x128x128xbf16, #tpu.memory_space<vmem>>, vector<1x128x128xbf16>
    %40 = vector.shape_cast %39 : vector<1x128x128xbf16> to vector<128x128xbf16>
    %cst_29 = arith.constant dense<0.000000e+00> : vector<16x128xf32>
    %41 = tpu.matmul %38, %40, %cst_29 {dimension_numbers = #tpu.dot_dimension_numbers<[1], [0], [0], [1], [0, 0, 1, 1], [], []>} : vector<16x128xbf16>, vector<128x128xbf16>, vector<16x128xf32> -> vector<16x128xf32>
    %42 = arith.addf %36, %41 : vector<16x128xf32>
    %43 = vector.extract_strided_slice %5 {offsets = [0, 0, 0], sizes = [2, 8, 128], strides = [1, 1, 1]} : vector<2x10x128xbf16> to vector<2x8x128xbf16>
    %44 = vector.shape_cast %43 : vector<2x8x128xbf16> to vector<16x128xbf16>
    %c6 = arith.constant 6 : index
    %c0_30 = arith.constant 0 : index
    %c0_31 = arith.constant 0 : index
    %45 = vector.load %arg5[%c6, %c0_30, %c0_31] : memref<9x128x128xbf16, #tpu.memory_space<vmem>>, vector<1x128x128xbf16>
    %46 = vector.shape_cast %45 : vector<1x128x128xbf16> to vector<128x128xbf16>
    %cst_32 = arith.constant dense<0.000000e+00> : vector<16x128xf32>
    %47 = tpu.matmul %44, %46, %cst_32 {dimension_numbers = #tpu.dot_dimension_numbers<[1], [0], [0], [1], [0, 0, 1, 1], [], []>} : vector<16x128xbf16>, vector<128x128xbf16>, vector<16x128xf32> -> vector<16x128xf32>
    %48 = arith.addf %42, %47 : vector<16x128xf32>
    %49 = vector.extract_strided_slice %5 {offsets = [0, 1, 0], sizes = [2, 8, 128], strides = [1, 1, 1]} : vector<2x10x128xbf16> to vector<2x8x128xbf16>
    %50 = vector.shape_cast %49 : vector<2x8x128xbf16> to vector<16x128xbf16>
    %c7 = arith.constant 7 : index
    %c0_33 = arith.constant 0 : index
    %c0_34 = arith.constant 0 : index
    %51 = vector.load %arg5[%c7, %c0_33, %c0_34] : memref<9x128x128xbf16, #tpu.memory_space<vmem>>, vector<1x128x128xbf16>
    %52 = vector.shape_cast %51 : vector<1x128x128xbf16> to vector<128x128xbf16>
    %cst_35 = arith.constant dense<0.000000e+00> : vector<16x128xf32>
    %53 = tpu.matmul %50, %52, %cst_35 {dimension_numbers = #tpu.dot_dimension_numbers<[1], [0], [0], [1], [0, 0, 1, 1], [], []>} : vector<16x128xbf16>, vector<128x128xbf16>, vector<16x128xf32> -> vector<16x128xf32>
    %54 = arith.addf %48, %53 : vector<16x128xf32>
    %55 = vector.extract_strided_slice %5 {offsets = [0, 2, 0], sizes = [2, 8, 128], strides = [1, 1, 1]} : vector<2x10x128xbf16> to vector<2x8x128xbf16>
    %56 = vector.shape_cast %55 : vector<2x8x128xbf16> to vector<16x128xbf16>
    %c8 = arith.constant 8 : index
    %c0_36 = arith.constant 0 : index
    %c0_37 = arith.constant 0 : index
    %57 = vector.load %arg5[%c8, %c0_36, %c0_37] : memref<9x128x128xbf16, #tpu.memory_space<vmem>>, vector<1x128x128xbf16>
    %58 = vector.shape_cast %57 : vector<1x128x128xbf16> to vector<128x128xbf16>
    %cst_38 = arith.constant dense<0.000000e+00> : vector<16x128xf32>
    %59 = tpu.matmul %56, %58, %cst_38 {dimension_numbers = #tpu.dot_dimension_numbers<[1], [0], [0], [1], [0, 0, 1, 1], [], []>} : vector<16x128xbf16>, vector<128x128xbf16>, vector<16x128xf32> -> vector<16x128xf32>
    %60 = arith.addf %54, %59 : vector<16x128xf32>
    %c0_39 = arith.constant 0 : index
    %c0_40 = arith.constant 0 : index
    %61 = vector.load %arg6[%c0_39, %c0_40] : memref<1x128xf32, #tpu.memory_space<vmem>>, vector<1x128xf32>
    %62 = vector.broadcast %61 : vector<1x128xf32> to vector<16x128xf32>
    %63 = arith.mulf %60, %62 : vector<16x128xf32>
    %c0_41 = arith.constant 0 : index
    %c0_42 = arith.constant 0 : index
    %64 = vector.load %arg7[%c0_41, %c0_42] : memref<1x128xf32, #tpu.memory_space<vmem>>, vector<1x128xf32>
    %65 = vector.broadcast %64 : vector<1x128xf32> to vector<16x128xf32>
    %66 = arith.addf %63, %65 : vector<16x128xf32>
    %cst_43 = arith.constant 0.000000e+00 : f32
    %67 = vector.broadcast %cst_43 : f32 to vector<16x128xf32>
    %68 = arith.maximumf %66, %67 : vector<16x128xf32>
    %69 = tpu.iota {dimensions = array<i32: 0>} : vector<16x128xi32>
    %c8_i32 = arith.constant 8 : i32
    %c0_i32 = arith.constant 0 : i32
    %70 = arith.cmpi eq, %c8_i32, %c0_i32 : i32
    %c1_i32 = arith.constant 1 : i32
    %71 = arith.select %70, %c1_i32, %c8_i32 : i32
    %72 = vector.broadcast %71 : i32 to vector<16x128xi32>
    %73 = arith.remsi %69, %72 : vector<16x128xi32>
    %c0_i32_44 = arith.constant 0 : i32
    %74 = vector.broadcast %c0_i32_44 : i32 to vector<16x128xi32>
    %75 = arith.cmpi ne, %73, %74 : vector<16x128xi32>
    %c0_i32_45 = arith.constant 0 : i32
    %76 = vector.broadcast %c0_i32_45 : i32 to vector<16x128xi32>
    %77 = arith.cmpi slt, %73, %76 : vector<16x128xi32>
    %c0_i32_46 = arith.constant 0 : i32
    %78 = arith.cmpi slt, %71, %c0_i32_46 : i32
    %79 = vector.broadcast %78 : i1 to vector<16x128xi1>
    %80 = vector.broadcast %79 : vector<16x128xi1> to vector<16x128xi1>
    %81 = arith.xori %77, %80 : vector<16x128xi1>
    %82 = arith.andi %81, %75 : vector<16x128xi1>
    %83 = vector.broadcast %71 : i32 to vector<16x128xi32>
    %84 = arith.addi %73, %83 : vector<16x128xi32>
    %85 = arith.select %82, %84, %73 : vector<16x128xi1>, vector<16x128xi32>
    %c2_i32 = arith.constant 2 : i32
    %86 = vector.broadcast %c2_i32 : i32 to vector<16x128xi32>
    %87 = arith.cmpi slt, %85, %86 : vector<16x128xi32>
    %cst_47 = arith.constant 0.000000e+00 : f32
    %88 = vector.broadcast %cst_47 : f32 to vector<16x128xf32>
    %89 = arith.select %87, %68, %88 : vector<16x128xi1>, vector<16x128xf32>
    %90 = vector.shape_cast %89 : vector<16x128xf32> to vector<2x8x128xf32>
    %91 = arith.truncf %90 : vector<2x8x128xf32> to vector<2x8x128xbf16>
    %c0_48 = arith.constant 0 : index
    %c0_49 = arith.constant 0 : index
    %c0_50 = arith.constant 0 : index
    %c0_51 = arith.constant 0 : index
    %92 = vector.load %arg8[%c0_48, %c0_49, %c0_50, %c0_51] : memref<1x2x8x128xbf16, #tpu.memory_space<vmem>>, vector<1x2x8x128xbf16>
    %93 = vector.shape_cast %92 : vector<1x2x8x128xbf16> to vector<2x8x128xbf16>
    %94 = vector.shape_cast %91 : vector<2x8x128xbf16> to vector<1x2x8x128xbf16>
    tpu.vector_store %arg8[%c0_48, %c0_49, %c0_50, %c0_51], %94 {strides = array<i32>} : memref<1x2x8x128xbf16, #tpu.memory_space<vmem>>, vector<1x2x8x128xbf16>,
    return
  }
  func.func @transform_0(%arg0: i32, %arg1: i32) -> (i32, i32, i32, i32) {
    %c0_i32 = arith.constant 0 : i32
    %c0_i32_0 = arith.constant 0 : i32
    %c0_i32_1 = arith.constant 0 : i32
    return %arg0, %arg1, %c0_i32, %c0_i32_0 : i32, i32, i32, i32
  }
  func.func @transform_1(%arg0: i32, %arg1: i32) -> (i32, i32, i32, i32) {
    %c0_i32 = arith.constant 0 : i32
    %c0_i32_0 = arith.constant 0 : i32
    %c0_i32_1 = arith.constant 0 : i32
    return %arg0, %arg1, %c0_i32, %c0_i32_0 : i32, i32, i32, i32
  }
  func.func @transform_2(%arg0: i32, %arg1: i32) -> (i32, i32, i32, i32) {
    %c0_i32 = arith.constant 0 : i32
    %c0_i32_0 = arith.constant 0 : i32
    %c0_i32_1 = arith.constant 0 : i32
    return %arg0, %arg1, %c0_i32, %c0_i32_0 : i32, i32, i32, i32
  }
  func.func @transform_3(%arg0: i32, %arg1: i32) -> (i32, i32, i32) {
    %c0_i32 = arith.constant 0 : i32
    %c0_i32_0 = arith.constant 0 : i32
    %c0_i32_1 = arith.constant 0 : i32
    %c0_i32_2 = arith.constant 0 : i32
    return %c0_i32, %c0_i32_0, %c0_i32_1 : i32, i32, i32
  }
  func.func @transform_4(%arg0: i32, %arg1: i32) -> (i32, i32) {
    %c0_i32 = arith.constant 0 : i32
    %c0_i32_0 = arith.constant 0 : i32
    %c0_i32_1 = arith.constant 0 : i32
    return %c0_i32, %c0_i32_0 : i32, i32
  }
  func.func @transform_5(%arg0: i32, %arg1: i32) -> (i32, i32) {
    %c0_i32 = arith.constant 0 : i32
    %c0_i32_0 = arith.constant 0 : i32
    %c0_i32_1 = arith.constant 0 : i32
    return %c0_i32, %c0_i32_0 : i32, i32
  }
  func.func @transform_6(%arg0: i32, %arg1: i32) -> (i32, i32, i32, i32) {
    %c0_i32 = arith.constant 0 : i32
    %c0_i32_0 = arith.constant 0 : i32
    %c0_i32_1 = arith.constant 0 : i32
    return %arg0, %arg1, %c0_i32, %c0_i32_0 : i32, i32, i32, i32
  }
}

</mosaic_0001>

<bundles_post_ra>
// kernel: _lambda_.16
= control target key start
LH: loop header
LB: loop body
LE: loop exit
PB: predicated region body
PF: predicated region fallthrough
CT: control target
= control target key end

     0   :  { %s3150_s21 = smov 0   ;;  %s3152_s22 = smov 0   ;;  %s3675_s0 = inlined_call_operand.vmem [shape: bf16[2,8,9,256], index: 0, kind: input, shape index: {}]   ;;  %s3676_s1 = inlined_call_operand.vmem [shape: bf16[2,8,9,256], index: 1, kind: input, shape index: {}]   ;;  %s3677_s2 = inlined_call_operand.vmem [shape: bf16[2,8,9,256], index: 2, kind: input, shape index: {}]   ;;  %s3678_s3 = inlined_call_operand.vmem [shape: bf16[9,128,128], index: 3, kind: input, shape index: {}]   ;;  %s3679_s4 = inlined_call_operand.vmem [shape: f32[1,128], index: 4, kind: input, shape index: {}]   ;;  %s3680_s5 = inlined_call_operand.vmem [shape: f32[1,128], index: 5, kind: input, shape index: {}]   ;;  %s3681_s6 = inlined_call_operand.vmem [shape: bf16[2,8,8,128], index: 6, kind: output, shape index: {}]  }
   0x1   :  { %s3154_s23 = smov 0  }
   0x2 LB: > { %s28_s24 = sadd.s32 1, %s3109_s22  ;;  %p2367_p0 = scmp.ge.s32.totalorder %s3113_s23, 1  ;;  %s3113_s23 = sphi %s3154_s23, %s16_s23   ;;  %s3109_s22 = sphi %s3152_s22, %s3693_s22   ;;  %s3105_s21 = sphi %s3150_s21, %s3692_s21  }
   0x3   : > { %p30_p1 = scmp.ge.s32.totalorder %s28_s24, 2  ;;  %p270_p2 = scmp.lt.s32.totalorder %s3113_s23, 3 }
   0x5   : > { %s3695_s24 = smov (%p30_p1, %s28_s24), 0  ;;  %p271_p3 = pnand %p2367_p0, %p270_p2 }
   0x7   : > { %274 = sbr.rel (%p271_p3) target bundleno = 384 (0x180), region = 44 }
   0xc   : > { %v3007_v0 = vld [vmem:[%s3678_s3 + $0x78] sm:$0xff]   ;;  %v3009_v2 = vld [vmem:[%s3678_s3 + $0x70] sm:$0xff]   ;;  %p330_p4 = scmp.lt.s32.totalorder %s3105_s21, 1  ;;  %v3011_v4 = vld [vmem:[%s3678_s3 + $0x68] sm:$0xff]   ;;  %vm728_vm0 = vsmask.f32 3328 }
   0xd   : > { %v3008_v1 = vld [vmem:[%s3678_s3 + $0x38] sm:$0xff]   ;;  %2751 = vmatprep.subr.bf16.mxu0 %v3007_v0  ;;  %v3010_v3 = vld [vmem:[%s3678_s3 + $0x30] sm:$0xff]   ;;  %v3012_v5 = vld [vmem:[%s3678_s3 + $0x28] sm:$0xff]   ;;  %vm729_vm1 = vsmask.f32 7440 }
   0xe   : > { %2775 = vmatprep.subr.bf16.mxu1 %v3008_v1  ;;  %2752 = vmatpush3.bf16.msra.mxu0 %v3007_v0  ;;  %s3697_s21 = smov (!%p330_p4, %s3105_s21), 1  ;;  %v3013_v6 = vld [vmem:[%s3678_s3 + $0x60] sm:$0xff]   ;;  %v3015_v8 = vld [vmem:[%s3678_s3 + $0x58] sm:$0xff]   ;;  %v3017_v10 = vld [vmem:[%s3678_s3 + $0x50] sm:$0xff]  }
   0xf   : > { %2776 = vmatpush3.bf16.msra.mxu1 %v3008_v1  ;;  %2753 = vmatprep.subr.bf16.mxu0 %v3009_v2  ;;  %v3014_v7 = vld [vmem:[%s3678_s3 + $0x20] sm:$0xff]   ;;  %s3195_s17 = sshll.u32 %s3697_s21, 7  ;;  %v3016_v9 = vld [vmem:[%s3678_s3 + $0x18] sm:$0xff]   ;;  %v3018_v13 = vld [vmem:[%s3678_s3 + $0x10] sm:$0xff]   ;;  %s2619_s8 = sshll.u32 %s3697_s21, 5 }
  0x10   : > { %2777 = vmatprep.subr.bf16.mxu1 %v3010_v3  ;;  %s3207_s28 = scalar_lea.vmem %s3675_s0, %s3195_s17  ;;  %v3019_v18 = vld [vmem:[%s3678_s3 + $0x48] sm:$0xff]   ;;  %v3021_v20 = vld [vmem:[%s3678_s3 + $0x40] sm:$0xff]   ;;  %v3025_v30 = vld [vmem:[%s3678_s3 + $0xb8] sm:$0xff]   ;;  %s3276_s11 = scalar_lea.vmem %s3676_s1, %s3195_s17 }
  0x11   : > { %v373_v11 = vld [vmem:[%s3207_s28] sm:$0xff]  ;;  %v375_v12 = vld [vmem:[%s3207_s28 + $0x10] sm:$0xff]  ;;  %v3020_v19 = vld [vmem:[%s3678_s3 + $0x8] sm:$0xff]   ;;  %s3493_s20 = scalar_lea.vmem %s3677_s2, %s3195_s17  ;;  %s370_s12 = scalar_lea.vmem %s3681_s6, %s2619_s8 }
  0x12   : > { %2754 = vmatpush3.bf16.msra.mxu0 %v3009_v2  ;;  %v445_v14 = vrot.slane %v373_v11, 4  ;;  %v446_v15 = vrot.slane %v375_v12, 4  ;;  %v2404_v16 = vcombine.low %v373_v11, %v375_v12  ;;  %v3022_v21 = vld [vmem:[%s3678_s3] sm:$0xff]   ;;  %v732_v22 = vshrl.u32 %v373_v11, 16  ;;  %v3231_v25 = vld [vmem:[%s3207_s28 + $0x30] sm:$0xff]  ;;  %v3026_v31 = vld [vmem:[%s3678_s3 + $0xf8] sm:$0xff]  }
  0x13   : > { %2778 = vmatpush3.bf16.msra.mxu1 %v3010_v3  ;;  %2755 = vmatprep.subr.bf16.mxu0 %v3011_v4  ;;  %v735_v23 = vshll.u32 %v373_v11, 16  ;;  %v377_v24 = vld [vmem:[%s3207_s28 + $0x20] sm:$0xff]  ;;  %v746_v26 = vshrl.u32 %v375_v12, 16  ;;  %v749_v27 = vshll.u32 %v375_v12, 16  ;;  %v448_v29 = vrot.slane %v3231_v25, 4  ;;  %v3027_v41 = vld [vmem:[%s3678_s3 + $0xb0] sm:$0xff]   ;;  %vm3287_vm2 = vmor %vm728_vm0, %vm729_vm1 }
  0x14   : > { %2779 = vmatprep.subr.bf16.mxu1 %v3012_v5  ;;  %v2392_v17 = vcombine.low %v445_v14, %v446_v15  ;;  %2791 = vmatprep.mubr.bf16.mxu1 %v2404_v16  ;;  %v447_v28 = vrot.slane %v377_v24, 4  ;;  %v734_v32 = vrot.slane %v732_v22, 4  ;;  %v760_v36 = vshrl.u32 %v377_v24, 16  ;;  %v3241_v37 = vld [vmem:[%s3207_s28 + $0x40] sm:$0xff]  ;;  %v3248_v42 = vld [vmem:[%s3207_s28 + $0x50] sm:$0xff]  ;;  %v3029_v58 = vld [vmem:[%s3678_s3 + $0xa8] sm:$0xff]  }
  0x15   : > { %v737_v33 = vrot.slane %v735_v23, 5  ;;  %v748_v34 = vrot.slane %v746_v26, 4  ;;  %v751_v35 = vrot.slane %v749_v27, 5  ;;  %v763_v39 = vshll.u32 %v377_v24, 16  ;;  %v3255_v47 = vld [vmem:[%s3207_s28 + $0x60] sm:$0xff]  ;;  %v3258_v48 = vld [vmem:[%s3207_s28 + $0x70] sm:$0xff] }
  0x16   : > { %2756 = vmatpush3.bf16.msra.mxu0 %v3011_v4  ;;  %2767 = vmatprep.mubr.bf16.mxu0 %v2392_v17  ;;  %v2393_v38 = vcombine.low %v447_v28, %v448_v29  ;;  %v774_v40 = vshrl.u32 %v3231_v25, 16  ;;  %v449_v43 = vrot.slane %v3241_v37, 4  ;;  %v777_v44 = vshll.u32 %v3231_v25, 16  ;;  %v3028_v50 = vld [vmem:[%s3678_s3 + $0xf0] sm:$0xff]   ;;  %v3030_v59 = vld [vmem:[%s3678_s3 + $0xe8] sm:$0xff]   ;;  %v3032_v12 = vld [vmem:[%s3678_s3 + $0xe0] sm:$0xff]  }
  0x17   : > { %2780 = vmatpush3.bf16.msra.mxu1 %v3012_v5  ;;  %2757 = vmatprep.subr.bf16.mxu0 %v3013_v6  ;;  %v2405_v45 = vcombine.low %v377_v24, %v3231_v25  ;;  %v450_v46 = vrot.slane %v3248_v42, 4  ;;  %v3260_v49 = vrot.slane %v760_v36, 4  ;;  %v738_v52 = vor.u32 %v737_v33, %v734_v32  ;;  %v374_v60 = vld [vmem:[%s3207_s28 + $0x8] sm:$0x11]  ;;  %v376_v61 = vld [vmem:[%s3207_s28 + $0x18] sm:$0x11] }
  0x18   : > { %2781 = vmatprep.subr.bf16.mxu1 %v3014_v7  ;;  %v2406_v53 = vcombine.low %v3241_v37, %v3248_v42  ;;  %v451_v54 = vrot.slane %v3255_v47, 4  ;;  %v452_v55 = vrot.slane %v3258_v48, 4  ;;  %v752_v56 = vor.u32 %v751_v35, %v748_v34  ;;  %v3033_v14 = vld [vmem:[%s3678_s3 + $0x98] sm:$0xff]   ;;  %v378_v25 = vld [vmem:[%s3207_s28 + $0x28] sm:$0x11]  ;;  %v3037_v29 = vld [vmem:[%s3678_s3 + $0x90] sm:$0xff]  }
  0x19   : > { %v2394_v51 = vcombine.low %v449_v43, %v450_v46  ;;  %v765_v57 = vrot.slane %v763_v39, 5  ;;  %v739_v62 = vrot.slane %v738_v52, 4  ;;  %v741_v0 = vshll.u32 %v374_v60, 16  ;;  %v380_v26 = vld [vmem:[%s3207_s28 + $0x38] sm:$0x11]  ;;  %v3039_v43 = vld [vmem:[%s3678_s3 + $0x88] sm:$0xff]  }
  0x1a   : > { %2758 = vmatpush3.bf16.msra.mxu0 %v3013_v6  ;;  %v2395_v63 = vcombine.low %v451_v54, %v452_v55  ;;  %v753_v1 = vrot.slane %v752_v56, 4  ;;  %v755_v2 = vshll.u32 %v376_v61, 16  ;;  %v776_v3 = vrot.slane %v774_v40, 4  ;;  %v388_v54 = vld [vmem:[%s3207_s28 + $0x78] sm:$0x11]  ;;  %v3041_v55 = vld [vmem:[%s3678_s3 + $0x80] sm:$0xff]  }
  0x1b   : > { %2782 = vmatpush3.bf16.msra.mxu1 %v3014_v7  ;;  %2759 = vmatprep.subr.bf16.mxu0 %v3015_v8  ;;  %v779_v4 = vrot.slane %v777_v44, 5  ;;  %v2407_v5 = vcombine.low %v3255_v47, %v3258_v48  ;;  %v3292_v7 = vld [vmem:[%s3276_s11] sm:$0xff]  ;;  %v791_v22 = vshll.u32 %v3241_v37, 16  ;;  %v802_v23 = vshrl.u32 %v3248_v42, 16  ;;  %v3040_v44 = vld [vmem:[%s3678_s3 + $0xc8] sm:$0xff]  }
  0x1c   : > { %2783 = vmatprep.subr.bf16.mxu1 %v3016_v9  ;;  %v757_v11 = vrot.slane %v755_v2, 5  ;;  %v805_v24 = vshll.u32 %v3248_v42, 16  ;;  %v769_v33 = vshll.u32 %v378_v25, 16  ;;  %v783_v34 = vshll.u32 %v380_v26, 16  ;;  %v3042_v60 = vld [vmem:[%s3678_s3 + $0xc0] sm:$0xff]  }
  0x1d   : > { %v793_v32 = vrot.slane %v791_v22, 5  ;;  %v804_v35 = vrot.slane %v802_v23, 4  ;;  %v816_v39 = vshrl.u32 %v3255_v47, 16  ;;  %v819_v40 = vshll.u32 %v3255_v47, 16  ;;  %v3375_v23 = vld [vmem:[%s3276_s11 + $0x40] sm:$0xff] }
  0x1e   : > { %2760 = vmatpush3.bf16.msra.mxu0 %v3015_v8  ;;  %v3295_v8 = vld [vmem:[%s3276_s11 + $0x10] sm:$0xff]  ;;  %v758_v16 = vsel %vm3287_vm2, %v753_v1, %v757_v11  ;;  %v807_v36 = vrot.slane %v805_v24, 5  ;;  %v833_v42 = vshll.u32 %v3258_v48, 16  ;;  %v1325_v46 = vshll.u32 %v3292_v7, 16 }
  0x1f   : > { %2784 = vmatpush3.bf16.msra.mxu1 %v3016_v9  ;;  %2761 = vmatprep.subr.bf16.mxu0 %v3017_v10  ;;  %v3031_v9 = vld [vmem:[%s3678_s3 + $0xa0] sm:$0xff]   ;;  %v2460_v17 = vcombine.low %v3292_v7, %v3295_v8  ;;  %v771_v47 = vrot.slane %v769_v33, 5  ;;  %v785_v52 = vrot.slane %v783_v34, 5  ;;  %v818_v56 = vrot.slane %v816_v39, 4  ;;  %v3366_v11 = vld [vmem:[%s3276_s11 + $0x30] sm:$0xff] }
  0x20   : > { %2785 = vmatprep.subr.bf16.mxu1 %v3018_v13  ;;  %v1336_v61 = vshrl.u32 %v3295_v8, 16  ;;  %v390_v33 = vld [vmem:[%s3276_s11 + $0x8] sm:$0x11]  ;;  %v392_v34 = vld [vmem:[%s3276_s11 + $0x18] sm:$0x11] }
  0x22   : > { %2762 = vmatpush3.bf16.msra.mxu0 %v3017_v10  ;;  %v743_v10 = vrot.slane %v741_v0, 5 }
  0x23   : > { %2786 = vmatpush3.bf16.msra.mxu1 %v3018_v13  ;;  %2763 = vmatprep.subr.bf16.mxu0 %v3019_v18  ;;  %v766_v13 = vor.u32 %v765_v57, %v3260_v49  ;;  %v821_v57 = vrot.slane %v819_v40, 5 }
  0x24   : > { %2787 = vmatprep.subr.bf16.mxu1 %v3020_v19  ;;  %v744_v15 = vsel %vm3287_vm2, %v739_v62, %v743_v10  ;;  %v1339_v62 = vshll.u32 %v3295_v8, 16  ;;  %v3363_v10 = vld [vmem:[%s3276_s11 + $0x20] sm:$0xff] }
  0x25   : > { %v3322_v27 = vrot.slane %v766_v13, 4  ;;  %v822_v13 = vor.u32 %v821_v57, %v818_v56  ;;  %v1353_v56 = vshll.u32 %v3363_v10, 16  ;;  %v3054_v57 = vld [vmem:[%s3678_s3 + $0x160] sm:$0xff]  }
  0x26   : > { %2764 = vmatpush3.bf16.msra.mxu0 %v3019_v18  ;;  %v780_v18 = vor.u32 %v779_v4, %v776_v3 }
  0x27   : > { %2788 = vmatpush3.bf16.msra.mxu1 %v3020_v19  ;;  %2765 = vmatprep.subr.bf16.mxu0 %v3021_v20  ;;  %v3034_v19 = vld [vmem:[%s3678_s3 + $0xd8] sm:$0xff]   ;;  %v772_v3 = vsel %vm3287_vm2, %v3322_v27, %v771_v47  ;;  %v823_v26 = vrot.slane %v822_v13, 4 }
  0x28   : > { %2789 = vmatprep.subr.bf16.mxu1 %v3022_v21  ;;  %v3324_v28 = vrot.slane %v780_v18, 4  ;;  %v1341_v18 = vrot.slane %v1339_v62, 5  ;;  %v396_v13 = vld [vmem:[%s3276_s11 + $0x38] sm:$0x11] }
  0x2a   : > { %2766 = vmatpush3.bf16.msra.mxu0 %v3021_v20  ;;  %v2432_v20 = vcombine.low %v744_v15, %v758_v16  ;;  %v786_v4 = vsel %vm3287_vm2, %v3324_v28, %v785_v52  ;;  %v1327_v16 = vrot.slane %v1325_v46, 5  ;;  %v2461_v28 = vcombine.low %v3363_v10, %v3366_v11 }
  0x2b   : > { %2790 = vmatpush3.bf16.msra.mxu1 %v3022_v21  ;;  %2799 = vmatprep.subr.bf16.mxu0 %v3025_v30  ;;  %v788_v21 = vshrl.u32 %v3241_v37, 16  ;;  %v382_v37 = vld [vmem:[%s3207_s28 + $0x48] sm:$0x11] }
  0x2c   : > { %2823 = vmatprep.subr.bf16.mxu1 %v3026_v31 }
  0x2d   : > { %2768 = vmatmul.mubr.bf16.vlgmr.msra.gmra.mxu0 %v2393_v38  ;;  %v384_v38 = vld [vmem:[%s3207_s28 + $0x58] sm:$0x11] }
  0x2e   : > { %2792 = vmatmul.mubr.bf16.vlgmr.msra.gmra.mxu1 %v2405_v45  ;;  %2800 = vmatpush3.bf16.msra.mxu0 %v3025_v30  ;;  %v3038_v30 = vld [vmem:[%s3678_s3 + $0xd0] sm:$0xff]   ;;  %v1322_v45 = vshrl.u32 %v3292_v7, 16 }
  0x2f   : > { %2824 = vmatpush3.bf16.msra.mxu1 %v3026_v31  ;;  %2801 = vmatprep.subr.bf16.mxu0 %v3027_v41  ;;  %v790_v31 = vrot.slane %v788_v21, 4  ;;  %v2433_v21 = vcombine.low %v772_v3, %v786_v4 }
  0x30   : > { %2825 = vmatprep.subr.bf16.mxu1 %v3028_v50  ;;  %2771 = vmatprep.mubr.bf16.mxu0 %v2394_v51  ;;  %v386_v51 = vld [vmem:[%s3207_s28 + $0x68] sm:$0x11]  ;;  %v1324_v15 = vrot.slane %v1322_v45, 4 }
  0x31   : > { %2795 = vmatprep.mubr.bf16.mxu1 %v2406_v53  ;;  %v794_v49 = vor.u32 %v793_v32, %v790_v31  ;;  %v811_v53 = vshll.u32 %v384_v38, 16  ;;  %v825_v0 = vshll.u32 %v386_v51, 16  ;;  %v3047_v32 = vld [vmem:[%s3678_s3 + $0x130] sm:$0xff]   ;;  %v1345_v38 = vshll.u32 %v392_v34, 16  ;;  %v400_v34 = vld [vmem:[%s3276_s11 + $0x58] sm:$0x11] }
  0x32   : > { %2802 = vmatpush3.bf16.msra.mxu0 %v3027_v41  ;;  %v830_v41 = vshrl.u32 %v3258_v48, 16  ;;  %v808_v48 = vor.u32 %v807_v36, %v804_v35  ;;  %v3048_v35 = vld [vmem:[%s3678_s3 + $0x170] sm:$0xff]   ;;  %v1160_v51 = vrot.slane %v3295_v8, 4  ;;  %v1350_v8 = vshrl.u32 %v3363_v10, 16 }
  0x33   : > { %2826 = vmatpush3.bf16.msra.mxu1 %v3028_v50  ;;  %2803 = vmatprep.subr.bf16.mxu0 %v3029_v58  ;;  %v797_v50 = vshll.u32 %v382_v37, 16  ;;  %v1331_v37 = vshll.u32 %v390_v33, 16  ;;  %v1347_v47 = vrot.slane %v1345_v38, 5 }
  0x34   : > { %2827 = vmatprep.subr.bf16.mxu1 %v3030_v59  ;;  %v809_v2 = vrot.slane %v808_v48, 4  ;;  %v1159_v48 = vrot.slane %v3292_v7, 4  ;;  %v3053_v7 = vld [vmem:[%s3678_s3 + $0x120] sm:$0xff]  }
  0x35   : > { %2772 = vmatmul.mubr.bf16.gmra.mxu0 %v2395_v63  ;;  %v795_v63 = vrot.slane %v794_v49, 4  ;;  %v799_v1 = vrot.slane %v797_v50, 5  ;;  %v1333_v46 = vrot.slane %v1331_v37, 5  ;;  %v3410_v50 = vld [vmem:[%s3276_s11 + $0x70] sm:$0xff] }
  0x36   : > { %2804 = vmatpush3.bf16.msra.mxu0 %v3029_v58  ;;  %2796 = vmatmul.mubr.bf16.gmra.mxu1 %v2407_v5  ;;  %v832_v58 = vrot.slane %v830_v41, 4  ;;  %v813_v5 = vrot.slane %v811_v53, 5  ;;  %v3049_v41 = vld [vmem:[%s3678_s3 + $0x128] sm:$0xff]   ;;  %v1420_v4 = vshrl.u32 %v3410_v50, 16 }
  0x37   : > { %2828 = vmatpush3.bf16.msra.mxu1 %v3030_v59  ;;  %2805 = vmatprep.subr.bf16.mxu0 %v3031_v9  ;;  %v835_v59 = vrot.slane %v833_v42, 5  ;;  %v800_v24 = vsel %vm3287_vm2, %v795_v63, %v799_v1  ;;  %v1381_v63 = vshll.u32 %v3375_v23, 16 }
  0x38   : > { %2829 = vmatprep.subr.bf16.mxu1 %v3032_v12  ;;  %2815 = vmatprep.mubr.bf16.mxu0 %v2432_v20  ;;  %v827_v20 = vrot.slane %v825_v0, 5  ;;  %v814_v25 = vsel %vm3287_vm2, %v809_v2, %v813_v5  ;;  %v3055_v5 = vld [vmem:[%s3678_s3 + $0x118] sm:$0xff]  }
  0x39   : > { %2839 = vmatprep.mubr.bf16.mxu1 %v2460_v17  ;;  %v1338_v17 = vrot.slane %v1336_v61, 4  ;;  %v2434_v36 = vcombine.low %v800_v24, %v814_v25  ;;  %v1378_v61 = vshrl.u32 %v3375_v23, 16  ;;  %v1383_v25 = vrot.slane %v1381_v63, 5 }
  0x3a   : > { %2806 = vmatpush3.bf16.msra.mxu0 %v3031_v9  ;;  %v839_v9 = vshll.u32 %v388_v54, 16  ;;  %v828_v39 = vsel %vm3287_vm2, %v823_v26, %v827_v20  ;;  %v3058_v20 = vld [vmem:[%s3678_s3 + $0x150] sm:$0xff]   ;;  %v3059_v26 = vld [vmem:[%s3678_s3 + $0x108] sm:$0xff]   ;;  %v1163_v63 = vrot.slane %v3375_v23, 4 }
  0x3b   : > { %2830 = vmatpush3.bf16.msra.mxu1 %v3032_v12  ;;  %2807 = vmatprep.subr.bf16.mxu0 %v3033_v14  ;;  %v3045_v12 = vld [vmem:[%s3678_s3 + $0x138] sm:$0xff]   ;;  %v1342_v31 = vor.u32 %v1341_v18, %v1338_v17  ;;  %v1380_v24 = vrot.slane %v1378_v61, 4 }
  0x3c   : > { %2831 = vmatprep.subr.bf16.mxu1 %v3034_v19  ;;  %v841_v22 = vrot.slane %v839_v9, 5  ;;  %v3056_v9 = vld [vmem:[%s3678_s3 + $0x158] sm:$0xff]  }
  0x3d   : > { %v1343_v49 = vrot.slane %v1342_v31, 4  ;;  %v3060_v31 = vld [vmem:[%s3678_s3 + $0x148] sm:$0xff]  }
  0x3e   : > { %2808 = vmatpush3.bf16.msra.mxu0 %v3033_v14  ;;  %v836_v14 = vor.u32 %v835_v59, %v832_v58  ;;  %v2488_v58 = vcombine.low %v1159_v48, %v1160_v51  ;;  %v1364_v59 = vshrl.u32 %v3366_v11, 16  ;;  %v402_v51 = vld [vmem:[%s3276_s11 + $0x68] sm:$0x11] }
  0x3f   : > { %2832 = vmatpush3.bf16.msra.mxu1 %v3034_v19  ;;  %2809 = vmatprep.subr.bf16.mxu0 %v3037_v29  ;;  %v3046_v19 = vld [vmem:[%s3678_s3 + $0x178] sm:$0xff]  }
  0x40   : > { %2833 = vmatprep.subr.bf16.mxu1 %v3038_v30  ;;  %v837_v27 = vrot.slane %v836_v14, 4  ;;  %v3057_v14 = vld [vmem:[%s3678_s3 + $0x110] sm:$0xff]   ;;  %v1366_v17 = vrot.slane %v1364_v59, 4 }
  0x42   : > { %2810 = vmatpush3.bf16.msra.mxu0 %v3037_v29  ;;  %v3384_v29 = vld [vmem:[%s3276_s11 + $0x50] sm:$0xff]  ;;  %v842_v40 = vsel %vm3287_vm2, %v837_v27, %v841_v22  ;;  %v1373_v22 = vshll.u32 %v396_v13, 16 }
  0x43   : > { %2834 = vmatpush3.bf16.msra.mxu1 %v3038_v30  ;;  %2811 = vmatprep.subr.bf16.mxu0 %v3039_v43  ;;  %v1328_v30 = vor.u32 %v1327_v16, %v1324_v15  ;;  %v2462_v42 = vcombine.low %v3375_v23, %v3384_v29  ;;  %v2435_v52 = vcombine.low %v828_v39, %v842_v40  ;;  %v1392_v0 = vshrl.u32 %v3384_v29, 16  ;;  %v3061_v39 = vld [vmem:[%s3678_s3 + $0x100] sm:$0xff]   ;;  %v3066_v13 = vld [vmem:[%s3678_s3 + $0x1f0] sm:$0xff]  }
  0x44   : > { %2835 = vmatprep.subr.bf16.mxu1 %v3040_v44  ;;  %v1395_v1 = vshll.u32 %v3384_v29, 16  ;;  %v1352_v15 = vrot.slane %v1350_v8, 4  ;;  %v1355_v16 = vrot.slane %v1353_v56, 5  ;;  %v3062_v40 = vld [vmem:[%s3678_s3 + $0x140] sm:$0xff]  }
  0x45   : > { %v1329_v45 = vrot.slane %v1328_v30, 4  ;;  %v398_v30 = vld [vmem:[%s3276_s11 + $0x48] sm:$0x11] }
  0x46   : > { %2812 = vmatpush3.bf16.msra.mxu0 %v3039_v43  ;;  %v3404_v43 = vld [vmem:[%s3276_s11 + $0x60] sm:$0xff]  ;;  %v1356_v27 = vor.u32 %v1355_v16, %v1352_v15  ;;  %v1397_v33 = vrot.slane %v1395_v1, 5  ;;  %v1166_v16 = vrot.slane %v3410_v50, 4 }
  0x47   : > { %2836 = vmatpush3.bf16.msra.mxu1 %v3040_v44  ;;  %2813 = vmatprep.subr.bf16.mxu0 %v3041_v55  ;;  %v3050_v44 = vld [vmem:[%s3678_s3 + $0x168] sm:$0xff]   ;;  %v2463_v53 = vcombine.low %v3404_v43, %v3410_v50  ;;  %v1334_v54 = vsel %vm3287_vm2, %v1329_v45, %v1333_v46  ;;  %v1406_v2 = vshrl.u32 %v3404_v43, 16  ;;  %v1409_v3 = vshll.u32 %v3404_v43, 16 }
  0x48   : > { %2837 = vmatprep.subr.bf16.mxu1 %v3042_v60  ;;  %v1357_v37 = vrot.slane %v1356_v27, 4  ;;  %v1401_v45 = vshll.u32 %v400_v34, 16  ;;  %v1165_v15 = vrot.slane %v3404_v43, 4  ;;  %v3069_v27 = vld [vmem:[%s3678_s3 + $0x1a0] sm:$0xff]   ;;  %v3073_v34 = vld [vmem:[%s3678_s3 + $0x190] sm:$0xff]  }
  0x49   : > { %v1408_v46 = vrot.slane %v1406_v2, 4 }
  0x4a   : > { %2814 = vmatpush3.bf16.msra.mxu0 %v3041_v55  ;;  %v1348_v55 = vsel %vm3287_vm2, %v1343_v49, %v1347_v47  ;;  %v1411_v49 = vrot.slane %v1409_v3, 5  ;;  %v1422_v47 = vrot.slane %v1420_v4, 4  ;;  %v3065_v3 = vld [vmem:[%s3678_s3 + $0x1b0] sm:$0xff]  }
  0x4b   : > { %2838 = vmatpush3.bf16.msra.mxu1 %v3042_v60  ;;  %2847 = vmatprep.subr.bf16.mxu0 %v3045_v12  ;;  %v1367_v60 = vshll.u32 %v3366_v11, 16  ;;  %v2516_v62 = vcombine.low %v1334_v54, %v1348_v55  ;;  %v1162_v54 = vrot.slane %v3366_v11, 4  ;;  %v3064_v11 = vld [vmem:[%s3678_s3 + $0x1f8] sm:$0xff]  }
  0x4c   : > { %2871 = vmatprep.subr.bf16.mxu1 %v3046_v19  ;;  %v1412_v59 = vor.u32 %v1411_v49, %v1408_v46  ;;  %v3558_v46 = vld [vmem:[%s3493_s20 + $0x50] sm:$0xff] }
  0x4d   : > { %2816 = vmatmul.mubr.bf16.vlgmr.msra.gmra.mxu0 %v2433_v21  ;;  %v1369_v18 = vrot.slane %v1367_v60, 5  ;;  %v1415_v60 = vshll.u32 %v402_v51, 16  ;;  %v1985_v51 = vshll.u32 %v3558_v46, 16 }
  0x4e   : > { %2840 = vmatmul.mubr.bf16.vlgmr.msra.gmra.mxu1 %v2461_v28  ;;  %2848 = vmatpush3.bf16.msra.mxu0 %v3045_v12  ;;  %v394_v12 = vld [vmem:[%s3276_s11 + $0x28] sm:$0x11]  ;;  %v1413_v23 = vrot.slane %v1412_v59, 4 }
  0x4f   : > { %2872 = vmatpush3.bf16.msra.mxu1 %v3046_v19  ;;  %2849 = vmatprep.subr.bf16.mxu0 %v3047_v32  ;;  %v1423_v19 = vshll.u32 %v3410_v50, 16  ;;  %v1359_v21 = vshll.u32 %v394_v12, 16  ;;  %v1370_v28 = vor.u32 %v1369_v18, %v1366_v17  ;;  %v3501_v18 = vld [vmem:[%s3493_s20] sm:$0xff]  ;;  %v3068_v50 = vld [vmem:[%s3678_s3 + $0x1e8] sm:$0xff]  }
  0x50   : > { %2873 = vmatprep.subr.bf16.mxu1 %v3048_v35  ;;  %2819 = vmatprep.mubr.bf16.mxu0 %v2434_v36  ;;  %v1375_v36 = vrot.slane %v1373_v22, 5  ;;  %v2491_v22 = vcombine.low %v1165_v15, %v1166_v16 }
  0x51   : > { %2843 = vmatprep.mubr.bf16.mxu1 %v2462_v42  ;;  %v1371_v38 = vrot.slane %v1370_v28, 4  ;;  %v1387_v42 = vshll.u32 %v398_v30, 16  ;;  %v1425_v48 = vrot.slane %v1423_v19, 5  ;;  %v3504_v19 = vld [vmem:[%s3493_s20 + $0x10] sm:$0xff]  ;;  %v3070_v28 = vld [vmem:[%s3678_s3 + $0x1e0] sm:$0xff]  }
  0x52   : > { %2850 = vmatpush3.bf16.msra.mxu0 %v3047_v32  ;;  %v1394_v32 = vrot.slane %v1392_v0, 4  ;;  %v1164_v0 = vrot.slane %v3384_v29, 4  ;;  %v1417_v29 = vrot.slane %v1415_v60, 5  ;;  %v2544_v30 = vcombine.low %v3501_v18, %v3504_v19 }
  0x53   : > { %2874 = vmatpush3.bf16.msra.mxu1 %v3048_v35  ;;  %2851 = vmatprep.subr.bf16.mxu0 %v3049_v41  ;;  %v1361_v35 = vrot.slane %v1359_v21, 5  ;;  %v1389_v56 = vrot.slane %v1387_v42, 5  ;;  %v1426_v61 = vor.u32 %v1425_v48, %v1422_v47  ;;  %v1929_v42 = vshll.u32 %v3504_v19, 16 }
  0x54   : > { %2875 = vmatprep.subr.bf16.mxu1 %v3050_v44  ;;  %v1418_v21 = vsel %vm3287_vm2, %v1413_v23, %v1417_v29  ;;  %v1982_v48 = vshrl.u32 %v3558_v46, 16  ;;  %v3587_v23 = vld [vmem:[%s3493_s20 + $0x70] sm:$0xff] }
  0x55   : > { %2820 = vmatmul.mubr.bf16.gmra.mxu0 %v2435_v52  ;;  %v404_v52 = vld [vmem:[%s3276_s11 + $0x78] sm:$0x11]  ;;  %v1362_v55 = vsel %vm3287_vm2, %v1357_v37, %v1361_v35  ;;  %v3074_v35 = vld [vmem:[%s3678_s3 + $0x1d0] sm:$0xff]   ;;  %v3076_v37 = vld [vmem:[%s3678_s3 + $0x1c8] sm:$0xff]  }
  0x56   : > { %2852 = vmatpush3.bf16.msra.mxu0 %v3049_v41  ;;  %2844 = vmatmul.mubr.bf16.gmra.mxu1 %v2463_v53  ;;  %v1384_v41 = vor.u32 %v1383_v25, %v1380_v24  ;;  %v1161_v53 = vrot.slane %v3363_v10, 4  ;;  %v3063_v10 = vld [vmem:[%s3678_s3 + $0x1b8] sm:$0xff]   ;;  %v1749_v24 = vrot.slane %v3501_v18, 4  ;;  %v1750_v25 = vrot.slane %v3504_v19, 4 }
  0x57   : > { %2876 = vmatpush3.bf16.msra.mxu1 %v3050_v44  ;;  %2853 = vmatprep.subr.bf16.mxu0 %v3053_v7  ;;  %v1398_v44 = vor.u32 %v1397_v33, %v1394_v32  ;;  %v3071_v32 = vld [vmem:[%s3678_s3 + $0x198] sm:$0xff]   ;;  %v1984_v60 = vrot.slane %v1982_v48, 4 }
  0x58   : > { %2877 = vmatprep.subr.bf16.mxu1 %v3054_v57  ;;  %2863 = vmatprep.mubr.bf16.mxu0 %v2488_v58  ;;  %v1385_v8 = vrot.slane %v1384_v41, 4  ;;  %v1403_v58 = vrot.slane %v1401_v45, 5  ;;  %v2489_v1 = vcombine.low %v1161_v53, %v1162_v54  ;;  %v3072_v33 = vld [vmem:[%s3678_s3 + $0x1d8] sm:$0xff]   ;;  %v1926_v41 = vshrl.u32 %v3504_v19, 16  ;;  %v3555_v45 = vld [vmem:[%s3493_s20 + $0x40] sm:$0xff] }
  0x59   : > { %2887 = vmatprep.mubr.bf16.mxu1 %v2516_v62  ;;  %v1429_v62 = vshll.u32 %v404_v52, 16  ;;  %v1968_v49 = vshrl.u32 %v3555_v45, 16  ;;  %v1971_v47 = vshll.u32 %v3555_v45, 16  ;;  %v3077_v52 = vld [vmem:[%s3678_s3 + $0x180] sm:$0xff]   ;;  %v2546_v19 = vcombine.low %v3555_v45, %v3558_v46 }
  0x5a   : > { %2854 = vmatpush3.bf16.msra.mxu0 %v3053_v7  ;;  %v1376_v7 = vsel %vm3287_vm2, %v1371_v38, %v1375_v36  ;;  %v1390_v4 = vsel %vm3287_vm2, %v1385_v8, %v1389_v56  ;;  %v3075_v36 = vld [vmem:[%s3678_s3 + $0x188] sm:$0xff]   ;;  %v1912_v38 = vshrl.u32 %v3501_v18, 16  ;;  %v3078_v53 = vld [vmem:[%s3678_s3 + $0x1c0] sm:$0xff]  }
  0x5b   : > { %2878 = vmatpush3.bf16.msra.mxu1 %v3054_v57  ;;  %2855 = vmatprep.subr.bf16.mxu0 %v3055_v5  ;;  %v1399_v57 = vrot.slane %v1398_v44, 4  ;;  %v2517_v2 = vcombine.low %v1362_v55, %v1376_v7  ;;  %v1431_v12 = vrot.slane %v1429_v62, 5  ;;  %v3552_v44 = vld [vmem:[%s3493_s20 + $0x30] sm:$0xff]  ;;  %v406_v7 = vld [vmem:[%s3493_s20 + $0x8] sm:$0x11]  ;;  %v1973_v59 = vrot.slane %v1971_v47, 5 }
  0x5c   : > { %2879 = vmatprep.subr.bf16.mxu1 %v3056_v9  ;;  %v1752_v55 = vrot.slane %v3552_v44, 4  ;;  %v1914_v8 = vrot.slane %v1912_v38, 4  ;;  %v3081_v62 = vld [vmem:[%s3678_s3 + $0x238] sm:$0xff]   ;;  %v3086_v38 = vld [vmem:[%s3678_s3 + $0x220] sm:$0xff]   ;;  %v1954_v48 = vshrl.u32 %v3552_v44, 16 }
  0x5e   : > { %2856 = vmatpush3.bf16.msra.mxu0 %v3055_v5  ;;  %v1404_v5 = vsel %vm3287_vm2, %v1399_v57, %v1403_v58  ;;  %v1928_v57 = vrot.slane %v1926_v41, 4  ;;  %v1931_v58 = vrot.slane %v1929_v42, 5 }
  0x5f   : > { %2880 = vmatpush3.bf16.msra.mxu1 %v3056_v9  ;;  %2857 = vmatprep.subr.bf16.mxu0 %v3057_v14  ;;  %v1427_v9 = vrot.slane %v1426_v61, 4  ;;  %v2518_v17 = vcombine.low %v1390_v4, %v1404_v5  ;;  %v1987_v61 = vrot.slane %v1985_v51, 5  ;;  %v1754_v4 = vrot.slane %v3558_v46, 4  ;;  %v3584_v5 = vld [vmem:[%s3493_s20 + $0x60] sm:$0xff] }
  0x60   : > { %2881 = vmatprep.subr.bf16.mxu1 %v3058_v20  ;;  %v1996_v41 = vshrl.u32 %v3584_v5, 16  ;;  %v1999_v42 = vshll.u32 %v3584_v5, 16  ;;  %v1957_v51 = vshll.u32 %v3552_v44, 16 }
  0x61   : > { %v1432_v43 = vsel %vm3287_vm2, %v1427_v9, %v1431_v12  ;;  %v1921_v9 = vshll.u32 %v406_v7, 16  ;;  %v1932_v12 = vor.u32 %v1931_v58, %v1928_v57  ;;  %v1988_v16 = vor.u32 %v1987_v61, %v1984_v60  ;;  %v3088_v58 = vld [vmem:[%s3678_s3 + $0x210] sm:$0xff]   ;;  %v420_v60 = vld [vmem:[%s3493_s20 + $0x78] sm:$0x11] }
  0x62   : > { %2858 = vmatpush3.bf16.msra.mxu0 %v3057_v14  ;;  %v2490_v14 = vcombine.low %v1163_v63, %v1164_v0  ;;  %v414_v63 = vld [vmem:[%s3493_s20 + $0x48] sm:$0x11]  ;;  %v416_v0 = vld [vmem:[%s3493_s20 + $0x58] sm:$0x11] }
  0x63   : > { %2882 = vmatpush3.bf16.msra.mxu1 %v3058_v20  ;;  %2859 = vmatprep.subr.bf16.mxu0 %v3059_v26  ;;  %v3067_v20 = vld [vmem:[%s3678_s3 + $0x1a8] sm:$0xff]   ;;  %v1977_v15 = vshll.u32 %v414_v63, 16 }
  0x64   : > { %2883 = vmatprep.subr.bf16.mxu1 %v3060_v31 }
  0x66   : > { %2860 = vmatpush3.bf16.msra.mxu0 %v3059_v26  ;;  %v2519_v26 = vcombine.low %v1418_v21, %v1432_v43  ;;  %v1755_v21 = vrot.slane %v3584_v5, 4  ;;  %v1756_v43 = vrot.slane %v3587_v23, 4 }
  0x67   : > { %2884 = vmatpush3.bf16.msra.mxu1 %v3060_v31  ;;  %2861 = vmatprep.subr.bf16.mxu0 %v3061_v39  ;;  %v2572_v31 = vcombine.low %v1749_v24, %v1750_v25  ;;  %v1933_v24 = vrot.slane %v1932_v12, 4 }
  0x68   : > { %2885 = vmatprep.subr.bf16.mxu1 %v3062_v40 }
  0x6a   : > { %2862 = vmatpush3.bf16.msra.mxu0 %v3061_v39  ;;  %v3546_v39 = vld [vmem:[%s3493_s20 + $0x20] sm:$0xff] }
  0x6b   : > { %2886 = vmatpush3.bf16.msra.mxu1 %v3062_v40  ;;  %2895 = vmatprep.subr.bf16.mxu0 %v3063_v10  ;;  %v1915_v40 = vshll.u32 %v3501_v18, 16  ;;  %v1751_v54 = vrot.slane %v3546_v39, 4  ;;  %v3082_v18 = vld [vmem:[%s3678_s3 + $0x230] sm:$0xff]   ;;  %v1943_v47 = vshll.u32 %v3546_v39, 16 }
  0x6c   : > { %2919 = vmatprep.subr.bf16.mxu1 %v3064_v11 }
  0x6d   : > { %2864 = vmatmul.mubr.bf16.vlgmr.msra.gmra.mxu0 %v2489_v1  ;;  %v1917_v56 = vrot.slane %v1915_v40, 5  ;;  %v2545_v1 = vcombine.low %v3546_v39, %v3552_v44  ;;  %v1945_v7 = vrot.slane %v1943_v47, 5 }
  0x6e   : > { %2888 = vmatmul.mubr.bf16.vlgmr.msra.gmra.mxu1 %v2517_v2  ;;  %2896 = vmatpush3.bf16.msra.mxu0 %v3063_v10  ;;  %v408_v10 = vld [vmem:[%s3493_s20 + $0x18] sm:$0x11]  ;;  %v2573_v2 = vcombine.low %v1751_v54, %v1752_v55  ;;  %v1998_v54 = vrot.slane %v1996_v41, 4 }
  0x6f   : > { %2920 = vmatpush3.bf16.msra.mxu1 %v3064_v11  ;;  %2897 = vmatprep.subr.bf16.mxu0 %v3065_v3  ;;  %v1970_v11 = vrot.slane %v1968_v49, 4  ;;  %v1918_v29 = vor.u32 %v1917_v56, %v1914_v8  ;;  %v1940_v49 = vshrl.u32 %v3546_v39, 16  ;;  %v2001_v39 = vrot.slane %v1999_v42, 5 }
  0x70   : > { %2921 = vmatprep.subr.bf16.mxu1 %v3066_v13  ;;  %2867 = vmatprep.mubr.bf16.mxu0 %v2490_v14  ;;  %v1956_v8 = vrot.slane %v1954_v48, 4  ;;  %v1959_v56 = vrot.slane %v1957_v51, 5 }
  0x71   : > { %2891 = vmatprep.mubr.bf16.mxu1 %v2518_v17  ;;  %v1974_v14 = vor.u32 %v1973_v59, %v1970_v11  ;;  %v1991_v17 = vshll.u32 %v416_v0, 16  ;;  %v1942_v44 = vrot.slane %v1940_v49, 4  ;;  %v412_v11 = vld [vmem:[%s3493_s20 + $0x38] sm:$0x11]  ;;  %v418_v59 = vld [vmem:[%s3493_s20 + $0x68] sm:$0x11] }
  0x72   : > { %2898 = vmatpush3.bf16.msra.mxu0 %v3065_v3  ;;  %v1753_v3 = vrot.slane %v3555_v45, 4  ;;  %v2010_v45 = vshrl.u32 %v3587_v23, 16  ;;  %v1960_v63 = vor.u32 %v1959_v56, %v1956_v8  ;;  %v1963_v0 = vshll.u32 %v412_v11, 16 }
  0x73   : > { %2922 = vmatpush3.bf16.msra.mxu1 %v3066_v13  ;;  %2899 = vmatprep.subr.bf16.mxu0 %v3067_v20  ;;  %v1935_v13 = vshll.u32 %v408_v10, 16  ;;  %v410_v10 = vld [vmem:[%s3493_s20 + $0x28] sm:$0x11]  ;;  %v1946_v61 = vor.u32 %v1945_v7, %v1942_v44 }
  0x74   : > { %2923 = vmatprep.subr.bf16.mxu1 %v3068_v50  ;;  %v2012_v55 = vrot.slane %v2010_v45, 4  ;;  %v1965_v12 = vrot.slane %v1963_v0, 5 }
  0x75   : > { %2868 = vmatmul.mubr.bf16.gmra.mxu0 %v2491_v22  ;;  %v1923_v22 = vrot.slane %v1921_v9, 5  ;;  %v1937_v25 = vrot.slane %v1935_v13, 5  ;;  %v1961_v9 = vrot.slane %v1960_v63, 4 }
  0x76   : > { %2900 = vmatpush3.bf16.msra.mxu0 %v3067_v20  ;;  %2892 = vmatmul.mubr.bf16.gmra.mxu1 %v2519_v26  ;;  %v2574_v20 = vcombine.low %v1753_v3, %v1754_v4  ;;  %v1975_v26 = vrot.slane %v1974_v14, 4  ;;  %v3089_v3 = vld [vmem:[%s3678_s3 + $0x208] sm:$0xff]   ;;  %v2005_v4 = vshll.u32 %v418_v59, 16 }
  0x77   : > { %2924 = vmatpush3.bf16.msra.mxu1 %v3068_v50  ;;  %2901 = vmatprep.subr.bf16.mxu0 %v3069_v27  ;;  %v1919_v50 = vrot.slane %v1918_v29, 4 }
  0x78   : > { %2925 = vmatprep.subr.bf16.mxu1 %v3070_v28  ;;  %2911 = vmatprep.mubr.bf16.mxu0 %v2544_v30  ;;  %v1993_v30 = vrot.slane %v1991_v17, 5 }
  0x79   : > { %2935 = vmatprep.mubr.bf16.mxu1 %v2572_v31  ;;  %v3085_v31 = vld [vmem:[%s3678_s3 + $0x228] sm:$0xff]  }
  0x7a   : > { %2902 = vmatpush3.bf16.msra.mxu0 %v3069_v27  ;;  %v1979_v27 = vrot.slane %v1977_v15, 5  ;;  %v3090_v15 = vld [vmem:[%s3678_s3 + $0x200] sm:$0xff]  }
  0x7b   : > { %2926 = vmatpush3.bf16.msra.mxu1 %v3070_v28  ;;  %2903 = vmatprep.subr.bf16.mxu0 %v3071_v32  ;;  %v1989_v28 = vrot.slane %v1988_v16, 4  ;;  %v2007_v16 = vrot.slane %v2005_v4, 5 }
  0x7c   : > { %2927 = vmatprep.subr.bf16.mxu1 %v3072_v33 }
  0x7e   : > { %2904 = vmatpush3.bf16.msra.mxu0 %v3071_v32  ;;  %v2547_v32 = vcombine.low %v3584_v5, %v3587_v23  ;;  %v2019_v5 = vshll.u32 %v420_v60, 16 }
  0x7f   : > { %2928 = vmatpush3.bf16.msra.mxu1 %v3072_v33  ;;  %2905 = vmatprep.subr.bf16.mxu0 %v3073_v34  ;;  %v1924_v33 = vsel %vm3287_vm2, %v1919_v50, %v1923_v22 }
  0x80   : > { %2929 = vmatprep.subr.bf16.mxu1 %v3074_v35  ;;  %v2021_v17 = vrot.slane %v2019_v5, 5 }
  0x82   : > { %2906 = vmatpush3.bf16.msra.mxu0 %v3073_v34  ;;  %v1938_v34 = vsel %vm3287_vm2, %v1933_v24, %v1937_v25 }
  0x83   : > { %2930 = vmatpush3.bf16.msra.mxu1 %v3074_v35  ;;  %2907 = vmatprep.subr.bf16.mxu0 %v3075_v36  ;;  %v2575_v35 = vcombine.low %v1755_v21, %v1756_v43  ;;  %v2600_v40 = vcombine.low %v1924_v33, %v1938_v34 }
  0x84   : > { %2931 = vmatprep.subr.bf16.mxu1 %v3076_v37 }
  0x86   : > { %2908 = vmatpush3.bf16.msra.mxu0 %v3075_v36  ;;  %v1980_v36 = vsel %vm3287_vm2, %v1975_v26, %v1979_v27 }
  0x87   : > { %2932 = vmatpush3.bf16.msra.mxu1 %v3076_v37  ;;  %2909 = vmatprep.subr.bf16.mxu0 %v3077_v52  ;;  %v1994_v37 = vsel %vm3287_vm2, %v1989_v28, %v1993_v30 }
  0x88   : > { %2933 = vmatprep.subr.bf16.mxu1 %v3078_v53  ;;  %v2602_v46 = vcombine.low %v1980_v36, %v1994_v37 }
  0x8a   : > { %2910 = vmatpush3.bf16.msra.mxu0 %v3077_v52  ;;  %v2013_v52 = vshll.u32 %v3587_v23, 16  ;;  %v1947_v23 = vrot.slane %v1946_v61, 4 }
  0x8b   : > { %2934 = vmatpush3.bf16.msra.mxu1 %v3078_v53  ;;  %2943 = vmatprep.subr.bf16.mxu0 %v3081_v62  ;;  %v3087_v53 = vld [vmem:[%s3678_s3 + $0x218] sm:$0xff]  }
  0x8c   : > { %2967 = vmatprep.subr.bf16.mxu1 %v3081_v62  ;;  %v2015_v57 = vrot.slane %v2013_v52, 5 }
  0x8d   : > { %2912 = vmatmul.mubr.bf16.vlgmr.msra.gmra.mxu0 %v2545_v1  ;;  %v2002_v1 = vor.u32 %v2001_v39, %v1998_v54 }
  0x8e   : > { %2936 = vmatmul.mubr.bf16.vlgmr.msra.gmra.mxu1 %v2573_v2  ;;  %2944 = vmatpush3.bf16.msra.mxu0 %v3081_v62  ;;  %v2016_v2 = vor.u32 %v2015_v57, %v2012_v55 }
  0x8f   : > { %2975 = vmatpush3.bf16.msra.mxu1 %v3081_v62  ;;  %2945 = vmatprep.subr.bf16.mxu0 %v3082_v18  ;;  %v1949_v62 = vshll.u32 %v410_v10, 16  ;;  %v2003_v13 = vrot.slane %v2002_v1, 4 }
  0x90   : > { %2968 = vmatprep.subr.bf16.mxu1 %v3082_v18  ;;  %2915 = vmatprep.mubr.bf16.mxu0 %v2546_v19  ;;  %v2017_v14 = vrot.slane %v2016_v2, 4  ;;  %v1966_v19 = vsel %vm3287_vm2, %v1961_v9, %v1965_v12 }
  0x91   : > { %2939 = vmatprep.mubr.bf16.mxu1 %v2574_v20  ;;  %v1951_v29 = vrot.slane %v1949_v62, 5  ;;  %v2008_v20 = vsel %vm3287_vm2, %v2003_v13, %v2007_v16 }
  0x92   : > { %2946 = vmatpush3.bf16.msra.mxu0 %v3082_v18  ;;  %v2022_v21 = vsel %vm3287_vm2, %v2017_v14, %v2021_v17 }
  0x93   : > { %2976 = vmatpush3.bf16.msra.mxu1 %v3082_v18  ;;  %2947 = vmatprep.subr.bf16.mxu0 %v3085_v31  ;;  %v1952_v18 = vsel %vm3287_vm2, %v1947_v23, %v1951_v29  ;;  %v2603_v50 = vcombine.low %v2008_v20, %v2022_v21 }
  0x94   : > { %2969 = vmatprep.subr.bf16.mxu1 %v3085_v31  ;;  %v2601_v43 = vcombine.low %v1952_v18, %v1966_v19 }
  0x95   : > { %2916 = vmatmul.mubr.bf16.gmra.mxu0 %v2547_v32 }
  0x96   : > { %2948 = vmatpush3.bf16.msra.mxu0 %v3085_v31  ;;  %2940 = vmatmul.mubr.bf16.gmra.mxu1 %v2575_v35 }
  0x97   : > { %2977 = vmatpush3.bf16.msra.mxu1 %v3085_v31  ;;  %2949 = vmatprep.subr.bf16.mxu0 %v3086_v38 }
  0x98   : > { %2970 = vmatprep.subr.bf16.mxu1 %v3086_v38  ;;  %2959 = vmatprep.mubr.bf16.mxu0 %v2600_v40 }
  0x99   : > { %2963 = vmatprep.mubr.bf16.mxu1 %v2602_v46 }
  0x9a   : > { %2950 = vmatpush3.bf16.msra.mxu0 %v3086_v38 }
  0x9b   : > { %2978 = vmatpush3.bf16.msra.mxu1 %v3086_v38  ;;  %2951 = vmatprep.subr.bf16.mxu0 %v3087_v53 }
  0x9c   : > { %2971 = vmatprep.subr.bf16.mxu1 %v3087_v53 }
  0x9e   : > { %2952 = vmatpush3.bf16.msra.mxu0 %v3087_v53 }
  0x9f   : > { %2979 = vmatpush3.bf16.msra.mxu1 %v3087_v53  ;;  %2953 = vmatprep.subr.bf16.mxu0 %v3088_v58 }
  0xa0   : > { %2972 = vmatprep.subr.bf16.mxu1 %v3088_v58 }
  0xa2   : > { %2954 = vmatpush3.bf16.msra.mxu0 %v3088_v58 }
  0xa3   : > { %2980 = vmatpush3.bf16.msra.mxu1 %v3088_v58  ;;  %2955 = vmatprep.subr.bf16.mxu0 %v3089_v3 }
  0xa4   : > { %2973 = vmatprep.subr.bf16.mxu1 %v3089_v3 }
  0xa6   : > { %2956 = vmatpush3.bf16.msra.mxu0 %v3089_v3 }
  0xa7   : > { %2981 = vmatpush3.bf16.msra.mxu1 %v3089_v3  ;;  %2957 = vmatprep.subr.bf16.mxu0 %v3090_v15 }
  0xa8   : > { %2974 = vmatprep.subr.bf16.mxu1 %v3090_v15 }
  0xaa   : > { %2958 = vmatpush3.bf16.msra.mxu0 %v3090_v15 }
  0xab   : > { %2982 = vmatpush3.bf16.msra.mxu1 %v3090_v15 }
  0xad   : > { %2960 = vmatmul.mubr.bf16.vlgmr.msra.gmra.mxu0 %v2601_v43 }
  0xae   : > { %2964 = vmatmul.mubr.bf16.vlgmr.msra.gmra.mxu1 %v2603_v50 }
  0xed   : > { %v2769_v22 = vpop.f32.mrf.mxu0 }
  0xee   : > { %v2793_v25 = vpop.f32.mrf.mxu1 }
  0xef   : > { %v568_v24 = vpop.f32.mrf.mxu0  ;;  %v706_v13 = vadd.f32 %v2793_v25, %v2769_v22 }
  0xf0   : > { %v697_v27 = vpop.f32.mrf.mxu1 }
  0xf1   : > { %v2770_v26 = vpop.f32.mrf.mxu0  ;;  %v698_v17 = vadd.f32 %v697_v27, %v568_v24 }
  0xf2   : > { %v2794_v31 = vpop.f32.mrf.mxu1 }
  0xf3   : > { %v571_v28 = vpop.f32.mrf.mxu0  ;;  %v709_v21 = vadd.f32 %v2794_v31, %v2770_v26 }
  0xf4   : > { %v700_v33 = vpop.f32.mrf.mxu1 }
  0xf5   : > { %v2773_v30 = vpop.f32.mrf.mxu0  ;;  %v701_v25 = vadd.f32 %v700_v33, %v571_v28 }
  0xf6   : > { %v2797_v34 = vpop.f32.mrf.mxu1 }
  0xf7   : > { %v584_v32 = vpop.f32.mrf.mxu0  ;;  %v722_v15 = vadd.f32 %v2797_v34, %v2773_v30 }
  0xf8   : > { %v713_v35 = vpop.f32.mrf.mxu1 }
  0xf9   : > { %v2774_v6 = vpop.f32.mrf.mxu0  ;;  %v714_v19 = vadd.f32 %v713_v35, %v584_v32 }
  0xfa   : > { %v2798_v38 = vpop.f32.mrf.mxu1 }
  0xfb   : > { %v587_v36 = vpop.f32.mrf.mxu0 }
  0xfc   : > { %v716_v41 = vpop.f32.mrf.mxu1 }
  0xfd   : > { %v717_v24 = vadd.f32 %v716_v41, %v587_v36 }
 0x10d   : > { %v2817_v37 = vpop.f32.mrf.mxu0 }
 0x10e   : > { %v2841_v42 = vpop.f32.mrf.mxu1  ;;  %v991_v18 = vadd.f32 %v2817_v37, %v706_v13 }
 0x10f   : > { %v958_v40 = vpop.f32.mrf.mxu0 }
 0x110   : > { %v1120_v46 = vpop.f32.mrf.mxu1  ;;  %v989_v43 = vadd.f32 %v958_v40, %v698_v17 }
 0x111   : > { %v2818_v45 = vpop.f32.mrf.mxu0 }
 0x112   : > { %v2842_v47 = vpop.f32.mrf.mxu1  ;;  %v992_v30 = vadd.f32 %v2818_v45, %v709_v21  ;;  %v1151_v37 = vadd.f32 %v1120_v46, %v989_v43 }
 0x113   : > { %v961_v49 = vpop.f32.mrf.mxu0 }
 0x114   : > { %v1123_v51 = vpop.f32.mrf.mxu1  ;;  %v990_v32 = vadd.f32 %v961_v49, %v701_v25  ;;  %v1154_v40 = vadd.f32 %v2842_v47, %v992_v30 }
 0x115   : > { %v2821_v48 = vpop.f32.mrf.mxu0 }
 0x116   : > { %v2845_v53 = vpop.f32.mrf.mxu1  ;;  %v995_v20 = vadd.f32 %v2821_v48, %v722_v15 }
 0x117   : > { %v974_v52 = vpop.f32.mrf.mxu0 }
 0x118   : > { %v1136_v39 = vpop.f32.mrf.mxu1  ;;  %v1157_v27 = vadd.f32 %v2845_v53, %v995_v20 }
 0x119   : > { %v2822_v54 = vpop.f32.mrf.mxu0 }
 0x11a   : > { %v2846_v44 = vpop.f32.mrf.mxu1 }
 0x11b   : > { %v977_v55 = vpop.f32.mrf.mxu0 }
 0x11c   : > { %v1139_v8 = vpop.f32.mrf.mxu1  ;;  %v994_v48 = vadd.f32 %v977_v55, %v717_v24 }
 0x12d   : > { %v2865_v7 = vpop.f32.mrf.mxu0 }
 0x12e   : > { %v2889_v57 = vpop.f32.mrf.mxu1 }
 0x12f   : > { %v1282_v56 = vpop.f32.mrf.mxu0 }
 0x130   : > { %v1548_v10 = vpop.f32.mrf.mxu1  ;;  %v1313_v17 = vadd.f32 %v1282_v56, %v1151_v37 }
 0x131   : > { %v2866_v58 = vpop.f32.mrf.mxu0 }
 0x132   : > { %v2890_v59 = vpop.f32.mrf.mxu1  ;;  %v1316_v33 = vadd.f32 %v2866_v58, %v1154_v40  ;;  %v1579_v53 = vadd.f32 %v1548_v10, %v1313_v17 }
 0x133   : > { %v1285_v11 = vpop.f32.mrf.mxu0 }
 0x134   : > { %v3644_v61 = vpop.f32.mrf.mxu1 }
 0x135   : > { %v2869_v60 = vpop.f32.mrf.mxu0  ;;  %3684 = vst [vmem:[#allocation2_spill] sm:$0xff] %v3644_v61  ;;  %v725_v61 = vadd.f32 %v2798_v38, %v2774_v6 }
 0x136   : > { %v2893_v62 = vpop.f32.mrf.mxu1  ;;  %v1319_v26 = vadd.f32 %v2869_v60, %v1157_v27  ;;  %v1582_v60 = vadd.f32 %v2890_v59, %v1316_v33 }
 0x137   : > { %v1298_v63 = vpop.f32.mrf.mxu0  ;;  %v996_v13 = vadd.f32 %v2822_v54, %v725_v61 }
 0x138   : > { %v1564_v0 = vpop.f32.mrf.mxu1  ;;  %v1585_v45 = vadd.f32 %v2893_v62, %v1319_v26 }
 0x139   : > { %v2870_v1 = vpop.f32.mrf.mxu0  ;;  %v1158_v6 = vadd.f32 %v2846_v44, %v996_v13 }
 0x13a   : > { %v2894_v2 = vpop.f32.mrf.mxu1 }
 0x13b   : > { %v1301_v3 = vpop.f32.mrf.mxu0  ;;  %v1320_v36 = vadd.f32 %v2870_v1, %v1158_v6 }
 0x13c   : > { %v1567_v5 = vpop.f32.mrf.mxu1 }
 0x13d   : > { %v1586_v56 = vadd.f32 %v2894_v2, %v1320_v36 }
 0x14d   : > { %v2913_v4 = vpop.f32.mrf.mxu0 }
 0x14e   : > { %v2937_v23 = vpop.f32.mrf.mxu1 }
 0x14f   : > { %v1710_v29 = vpop.f32.mrf.mxu0 }
 0x150   : > { %v3646_v9 = vpop.f32.mrf.mxu1  ;;  %v1741_v47 = vadd.f32 %v1710_v29, %v1579_v53 }
 0x151   : > { %3685 = vst [vmem:[#allocation3_spill] sm:$0xff] %v3646_v9  ;;  %v2914_v12 = vpop.f32.mrf.mxu0  ;;  %v993_v9 = vadd.f32 %v974_v52, %v714_v19  ;;  %v1152_v52 = vadd.f32 %v1123_v51, %v990_v32 }
 0x152   : > { %v3648_v14 = vpop.f32.mrf.mxu1  ;;  %v1744_v58 = vadd.f32 %v2914_v12, %v1582_v60 }
 0x153   : > { %3686 = vst [vmem:[#allocation4_spill] sm:$0xff] %v3648_v14  ;;  %v1713_v16 = vpop.f32.mrf.mxu0  ;;  %v1153_v14 = vadd.f32 %v2841_v42, %v991_v18  ;;  %v1155_v15 = vadd.f32 %v1136_v39, %v993_v9  ;;  %v1156_v42 = vadd.f32 %v1139_v8, %v994_v48  ;;  %v1314_v46 = vadd.f32 %v1285_v11, %v1152_v52  ;;  %v2612_v11 = vld [vmem:[%s3679_s4] ss:$0 sm:$0xff] }
 0x154   : > { %v3650_v50 = vpop.f32.mrf.mxu1 }
 0x155   : > { %3687 = vst [vmem:[#allocation5_spill] sm:$0xff] %v3650_v50  ;;  %v2917_v22 = vpop.f32.mrf.mxu0  ;;  %v1315_v35 = vadd.f32 %v2865_v7, %v1153_v14  ;;  %v1317_v38 = vadd.f32 %v1298_v63, %v1155_v15  ;;  %v1318_v55 = vadd.f32 %v1301_v3, %v1156_v42  ;;  %v3688_v63 = vld [vmem:[#allocation2_spill] sm:$0xff] }
 0x156   : > { %v2941_v34 = vpop.f32.mrf.mxu1  ;;  %v1747_v7 = vadd.f32 %v2917_v22, %v1585_v45  ;;  %v1580_v51 = vadd.f32 %v3688_v63, %v1314_v46  ;;  %v2613_v22 = vld [vmem:[%s3680_s5] ss:$0 sm:$0xff] }
 0x157   : > { %v1726_v31 = vpop.f32.mrf.mxu0  ;;  %v1581_v28 = vadd.f32 %v2889_v57, %v1315_v35  ;;  %v1583_v39 = vadd.f32 %v1564_v0, %v1317_v38  ;;  %v1584_v62 = vadd.f32 %v1567_v5, %v1318_v55 }
 0x158   : > { %v1888_v50 = vpop.f32.mrf.mxu1  ;;  %v1909_v1 = vadd.f32 %v2941_v34, %v1747_v7  ;;  %v3689_v0 = vld [vmem:[#allocation3_spill] sm:$0xff]  ;;  %v1742_v59 = vadd.f32 %v1713_v16, %v1580_v51 }
 0x159   : > { %v2918_v41 = vpop.f32.mrf.mxu0  ;;  %v1743_v49 = vadd.f32 %v2913_v4, %v1581_v28  ;;  %v1745_v61 = vadd.f32 %v1726_v31, %v1583_v39  ;;  %v1903_v3 = vadd.f32 %v3689_v0, %v1741_v47 }
 0x15a   : > { %v2942_v54 = vpop.f32.mrf.mxu1  ;;  %v1748_v9 = vadd.f32 %v2918_v41, %v1586_v56 }
 0x15b   : > { %v1729_v44 = vpop.f32.mrf.mxu0  ;;  %v1905_v57 = vadd.f32 %v2937_v23, %v1743_v49  ;;  %v1907_v29 = vadd.f32 %v1888_v50, %v1745_v61  ;;  %v3690_v23 = vld [vmem:[#allocation4_spill] sm:$0xff] }
 0x15c   : > { %v1891_v8 = vpop.f32.mrf.mxu1  ;;  %v1746_v14 = vadd.f32 %v1729_v44, %v1584_v62  ;;  %v1906_v12 = vadd.f32 %v3690_v23, %v1744_v58  ;;  %v1910_v43 = vadd.f32 %v2942_v54, %v1748_v9  ;;  %v3691_v16 = vld [vmem:[#allocation5_spill] sm:$0xff] }
 0x15d   : > { %v1904_v24 = vadd.f32 %v3691_v16, %v1742_v59 }
 0x15e   : > { %v1908_v37 = vadd.f32 %v1891_v8, %v1746_v14 }
 0x16d   : > { %v2961_v10 = vpop.f32.mrf.mxu0 }
 0x16e   : > { %v2171_v4 = vadd.f32 %v2961_v10, %v1905_v57  ;;  %v2965_v2 = vpop.f32.mrf.mxu1 }
 0x16f   : > { %v2175_v18 = vadd.f32 %v2965_v2, %v1909_v1  ;;  %v2138_v19 = vpop.f32.mrf.mxu0 }
 0x170   : > { %v2186_v20 = vmul.f32 %v2612_v11, %v2171_v4  ;;  %v2169_v5 = vadd.f32 %v2138_v19, %v1903_v3  ;;  %v2154_v21 = vpop.f32.mrf.mxu1 }
 0x171   : > { %v2190_v25 = vmul.f32 %v2612_v11, %v2175_v18  ;;  %v2173_v30 = vadd.f32 %v2154_v21, %v1907_v29  ;;  %v2962_v34 = vpop.f32.mrf.mxu0 }
 0x172   : > { %v2184_v50 = vmul.f32 %v2612_v11, %v2169_v5  ;;  %v2172_v27 = vadd.f32 %v2962_v34, %v1906_v12  ;;  %v2966_v13 = vpop.f32.mrf.mxu1  ;;  %v2201_v48 = vadd.f32 %v2613_v22, %v2186_v20 }
 0x173   : > { %v2188_v32 = vmul.f32 %v2612_v11, %v2173_v30  ;;  %v2176_v35 = vadd.f32 %v2966_v13, %v1910_v43  ;;  %v2141_v15 = vpop.f32.mrf.mxu0  ;;  %v2205_v17 = vadd.f32 %v2613_v22, %v2190_v25 }
 0x174   : > { %v2187_v26 = vmul.f32 %v2612_v11, %v2172_v27  ;;  %v2170_v31 = vadd.f32 %v2141_v15, %v1904_v24  ;;  %v2157_v40 = vpop.f32.mrf.mxu1  ;;  %v2199_v52 = vadd.f32 %v2613_v22, %v2184_v50  ;;  %v2209_v41 = vmax.f32 %v2201_v48, 0.0 }
 0x175   : > { %v2191_v6 = vmul.f32 %v2612_v11, %v2176_v35  ;;  %v2174_v38 = vadd.f32 %v2157_v40, %v1908_v37  ;;  %v2203_v42 = vadd.f32 %v2613_v22, %v2188_v32  ;;  %v2213_v49 = vmax.f32 %v2205_v17, 0.0 }
 0x176   : > { %v2202_v28 = vadd.f32 %v2613_v22, %v2187_v26  ;;  %v2185_v33 = vmul.f32 %v2612_v11, %v2170_v31  ;;  %v2207_v55 = vmax.f32 %v2199_v52, 0.0 }
 0x177   : > { %v2206_v45 = vadd.f32 %v2613_v22, %v2191_v6  ;;  %v2189_v36 = vmul.f32 %v2612_v11, %v2174_v38  ;;  %v2211_v47 = vmax.f32 %v2203_v42, 0.0 }
 0x178   : > { %v2210_v53 = vmax.f32 %v2202_v28, 0.0  ;;  %v2200_v46 = vadd.f32 %v2613_v22, %v2185_v33 }
 0x179   : > { %v2214_v54 = vmax.f32 %v2206_v45, 0.0  ;;  %v2204_v39 = vadd.f32 %v2613_v22, %v2189_v36 }
 0x17a   : > { %v2628_v7 = vpack.c.bf16 %v2210_v53, %v2209_v41  ;;  %v2208_v60 = vmax.f32 %v2200_v46, 0.0 }
 0x17b   : > { %v2638_v56 = vpack.c.bf16 %v2214_v54, %v2213_v49  ;;  %v2212_v61 = vmax.f32 %v2204_v39, 0.0 }
 0x17c   : > { %2640 = vst [vmem:[%s370_s12 + $0x8] sm:$0xff] %v2628_v7   ;;  %v2623_v44 = vpack.c.bf16 %v2208_v60, %v2207_v55 }
 0x17d   : > { %2642 = vst [vmem:[%s370_s12 + $0x18] sm:$0xff] %v2638_v56   ;;  %v2633_v63 = vpack.c.bf16 %v2212_v61, %v2211_v47 }
 0x17e   : > { %2624 = vst [vmem:[%s370_s12] sm:$0xff] %v2623_v44  }
 0x17f   : > { %2641 = vst [vmem:[%s370_s12 + $0x10] sm:$0xff] %v2633_v63  }
 0x180 PF: > { %s16_s23 = sadd.s32 1, %s3113_s23   ;;  %s3692_s21 = smov %s3109_s22 }
 0x181   : > { %p13_p5 = scmp.ge.s32.totalorder %s16_s23, 4   ;;  %s3693_s22 = smov %s3695_s24 }
 0x183   :  { %15 = sbr.rel (!%p13_p5) target bundleno = 2 (0x2), region = 88 }

// kernel: _lambda_.17
= control target key start
LH: loop header
LB: loop body
LE: loop exit
PB: predicated region body
PF: predicated region fallthrough
CT: control target
= control target key end

     0   :  { %s3273_s21 = smov 0   ;;  %s3275_s22 = smov 0   ;;  %s3963_s0 = inlined_call_operand.vmem [shape: bf16[2,8,10,128], index: 0, kind: input, shape index: {}]   ;;  %s3964_s1 = inlined_call_operand.vmem [shape: bf16[2,8,10,128], index: 1, kind: input, shape index: {}]   ;;  %s3965_s2 = inlined_call_operand.vmem [shape: bf16[2,8,10,128], index: 2, kind: input, shape index: {}]   ;;  %s3966_s3 = inlined_call_operand.vmem [shape: bf16[9,128,128], index: 3, kind: input, shape index: {}]   ;;  %s3967_s4 = inlined_call_operand.vmem [shape: f32[1,128], index: 4, kind: input, shape index: {}]   ;;  %s3968_s5 = inlined_call_operand.vmem [shape: f32[1,128], index: 5, kind: input, shape index: {}]   ;;  %s3969_s6 = inlined_call_operand.vmem [shape: bf16[2,8,8,128], index: 6, kind: output, shape index: {}]  }
   0x1   :  { %s3277_s23 = smov 0  }
   0x2 LB: > { %s28_s24 = sadd.s32 1, %s3232_s22  ;;  %p2466_p0 = scmp.ge.s32.totalorder %s3236_s23, 1  ;;  %s3236_s23 = sphi %s3277_s23, %s16_s23   ;;  %s3232_s22 = sphi %s3275_s22, %s3983_s22   ;;  %s3228_s21 = sphi %s3273_s21, %s3982_s21  }
   0x3   : > { %p30_p1 = scmp.ge.s32.totalorder %s28_s24, 2  ;;  %p270_p2 = scmp.lt.s32.totalorder %s3236_s23, 3 }
   0x5   : > { %s3985_s24 = smov (%p30_p1, %s28_s24), 0  ;;  %p271_p3 = pnand %p2466_p0, %p270_p2 }
   0x7   : > { %274 = sbr.rel (%p271_p3) target bundleno = 384 (0x180), region = 44 }
   0xc   : > { %v3130_v0 = vld [vmem:[%s3966_s3 + $0x78] sm:$0xff]   ;;  %v3132_v2 = vld [vmem:[%s3966_s3 + $0x70] sm:$0xff]   ;;  %p330_p4 = scmp.lt.s32.totalorder %s3228_s21, 1  ;;  %v3134_v4 = vld [vmem:[%s3966_s3 + $0x68] sm:$0xff]   ;;  %vm437_vm0 = vsmask.f32 3328 }
   0xd   : > { %v3131_v1 = vld [vmem:[%s3966_s3 + $0x38] sm:$0xff]   ;;  %2874 = vmatprep.subr.bf16.mxu0 %v3130_v0  ;;  %v3133_v3 = vld [vmem:[%s3966_s3 + $0x30] sm:$0xff]   ;;  %v3135_v5 = vld [vmem:[%s3966_s3 + $0x28] sm:$0xff]   ;;  %vm438_vm1 = vsmask.f32 7440  ;;  %vm843_vm3 = vcmask 1042432  }
   0xe   : > { %2898 = vmatprep.subr.bf16.mxu1 %v3131_v1  ;;  %2875 = vmatpush3.bf16.msra.mxu0 %v3130_v0  ;;  %s3987_s21 = smov (!%p330_p4, %s3228_s21), 1  ;;  %v3136_v6 = vld [vmem:[%s3966_s3 + $0x60] sm:$0xff]   ;;  %v3138_v8 = vld [vmem:[%s3966_s3 + $0x58] sm:$0xff]   ;;  %v3140_v10 = vld [vmem:[%s3966_s3 + $0x50] sm:$0xff]   ;;  %vm844_vm4 = vcmask 1046532  }
   0xf   : > { %2899 = vmatpush3.bf16.msra.mxu1 %v3131_v1  ;;  %2876 = vmatprep.subr.bf16.mxu0 %v3132_v2  ;;  %v3137_v7 = vld [vmem:[%s3966_s3 + $0x20] sm:$0xff]   ;;  %s3318_s17 = sshll.u32 %s3987_s21, 6  ;;  %v3139_v9 = vld [vmem:[%s3966_s3 + $0x18] sm:$0xff]   ;;  %v3141_v14 = vld [vmem:[%s3966_s3 + $0x10] sm:$0xff]   ;;  %s2742_s7 = sshll.u32 %s3987_s21, 5 }
  0x10   : > { %2900 = vmatprep.subr.bf16.mxu1 %v3133_v3  ;;  %s3330_s28 = scalar_lea.vmem %s3963_s0, %s3318_s17  ;;  %v3142_v17 = vld [vmem:[%s3966_s3 + $0x48] sm:$0xff]   ;;  %vm3383_vm2 = vmor %vm437_vm0, %vm438_vm1  ;;  %v3144_v46 = vld [vmem:[%s3966_s3 + $0x40] sm:$0xff]   ;;  %s3484_s16 = scalar_lea.vmem %s3964_s1, %s3318_s17 }
  0x11   : > { %v3336_v11 = vld [vmem:[%s3330_s28] sm:$0xf]  ;;  %v3339_v12 = vld [vmem:[%s3330_s28 + $0x4] sm:$0x1]  ;;  %v3342_v13 = vld [vmem:[%s3330_s28 + $0x8] sm:$0xf] }
  0x12   : > { %2877 = vmatpush3.bf16.msra.mxu0 %v3132_v2  ;;  %v3348_v15 = vld [vmem:[%s3330_s28 + $0xc] sm:$0x1]  ;;  %v2503_v16 = vcombine.low %v3336_v11, %v3342_v13  ;;  %v441_v18 = vshrl.u32 %v3336_v11, 16  ;;  %v444_v19 = vshll.u32 %v3336_v11, 16  ;;  %v450_v20 = vshll.u32 %v3339_v12, 16  ;;  %v3145_v50 = vld [vmem:[%s3966_s3] sm:$0xff]   ;;  %vm3472_vm5 = vmor %vm843_vm3, %vm844_vm4 }
  0x13   : > { %2901 = vmatpush3.bf16.msra.mxu1 %v3133_v3  ;;  %2878 = vmatprep.subr.bf16.mxu0 %v3134_v4  ;;  %v455_v21 = vshrl.u32 %v3342_v13, 16  ;;  %v3360_v22 = vld [vmem:[%s3330_s28 + $0x10] sm:$0xf]  ;;  %v3143_v23 = vld [vmem:[%s3966_s3 + $0x8] sm:$0xff]   ;;  %v458_v24 = vshll.u32 %v3342_v13, 16  ;;  %v464_v25 = vshll.u32 %v3348_v15, 16 }
  0x14   : > { %2902 = vmatprep.subr.bf16.mxu1 %v3135_v5  ;;  %2914 = vmatprep.mubr.bf16.mxu1 %v2503_v16  ;;  %v3368_v26 = vld [vmem:[%s3330_s28 + $0x14] sm:$0x1]  ;;  %v443_v27 = vrot.slane %v441_v18, 4  ;;  %v446_v28 = vrot.slane %v444_v19, 5  ;;  %v452_v29 = vrot.slane %v450_v20, 5  ;;  %v469_v35 = vshrl.u32 %v3360_v22, 16 }
  0x15   : > { %v457_v30 = vrot.slane %v455_v21, 4  ;;  %v3371_v31 = vld [vmem:[%s3330_s28 + $0x18] sm:$0xf]  ;;  %v460_v32 = vrot.slane %v458_v24, 5  ;;  %v466_v33 = vrot.slane %v464_v25, 5  ;;  %v472_v36 = vshll.u32 %v3360_v22, 16 }
  0x16   : > { %2879 = vmatpush3.bf16.msra.mxu0 %v3134_v4  ;;  %v3374_v34 = vld [vmem:[%s3330_s28 + $0x1c] sm:$0x1]  ;;  %v447_v37 = vor.u32 %v446_v28, %v443_v27  ;;  %v478_v38 = vshll.u32 %v3368_v26, 16  ;;  %v483_v39 = vshrl.u32 %v3371_v31, 16  ;;  %v486_v40 = vshll.u32 %v3371_v31, 16  ;;  %v3150_v4 = vld [vmem:[%s3966_s3 + $0xb0] sm:$0xff]  }
  0x17   : > { %2903 = vmatpush3.bf16.msra.mxu1 %v3135_v5  ;;  %2880 = vmatprep.subr.bf16.mxu0 %v3136_v6  ;;  %v461_v42 = vor.u32 %v460_v32, %v457_v30  ;;  %v471_v43 = vrot.slane %v469_v35, 4  ;;  %v474_v44 = vrot.slane %v472_v36, 5  ;;  %v492_v45 = vshll.u32 %v3374_v34, 16  ;;  %v3148_v59 = vld [vmem:[%s3966_s3 + $0xb8] sm:$0xff]   ;;  %v3430_v16 = vld [vmem:[%s3330_s28 + $0x28] sm:$0xf] }
  0x18   : > { %2904 = vmatprep.subr.bf16.mxu1 %v3137_v7  ;;  %v448_v47 = vrot.slane %v447_v37, 4  ;;  %v485_v48 = vrot.slane %v483_v39, 4  ;;  %v488_v49 = vrot.slane %v486_v40, 5  ;;  %v480_v53 = vrot.slane %v478_v38, 5  ;;  %v3149_v62 = vld [vmem:[%s3966_s3 + $0xf8] sm:$0xff]   ;;  %v3153_v18 = vld [vmem:[%s3966_s3 + $0xe8] sm:$0xff]  }
  0x19   : > { %v462_v51 = vrot.slane %v461_v42, 4  ;;  %v475_v52 = vor.u32 %v474_v44, %v471_v43  ;;  %v494_v56 = vrot.slane %v492_v45, 5  ;;  %v848_v1 = vrot.slane %v3339_v12, 5  ;;  %v3443_v24 = vld [vmem:[%s3330_s28 + $0x30] sm:$0xf] }
  0x1a   : > { %2881 = vmatpush3.bf16.msra.mxu0 %v3136_v6  ;;  %v453_v54 = vsel %vm3383_vm2, %v448_v47, %v452_v29  ;;  %v489_v55 = vor.u32 %v488_v49, %v485_v48  ;;  %v2504_v3 = vcombine.low %v3360_v22, %v3371_v31  ;;  %v852_v5 = vrot.slane %v3348_v15, 5  ;;  %v3151_v6 = vld [vmem:[%s3966_s3 + $0xf0] sm:$0xff]   ;;  %v3453_v30 = vld [vmem:[%s3330_s28 + $0x38] sm:$0xf]  ;;  %v3456_v37 = vld [vmem:[%s3330_s28 + $0x3c] sm:$0x1] }
  0x1b   : > { %2905 = vmatpush3.bf16.msra.mxu1 %v3137_v7  ;;  %2882 = vmatprep.subr.bf16.mxu0 %v3138_v8  ;;  %v467_v57 = vsel %vm3383_vm2, %v462_v51, %v466_v33  ;;  %v476_v58 = vrot.slane %v475_v52, 4  ;;  %v3419_v7 = vld [vmem:[%s3330_s28 + $0x20] sm:$0xf]  ;;  %v514_v25 = vshll.u32 %v3430_v16, 16  ;;  %v3450_v29 = vld [vmem:[%s3330_s28 + $0x34] sm:$0x1] }
  0x1c   : > { %2906 = vmatprep.subr.bf16.mxu1 %v3139_v9  ;;  %v2491_v60 = vcombine.low %v453_v54, %v467_v57  ;;  %v490_v61 = vrot.slane %v489_v55, 4  ;;  %v497_v19 = vshrl.u32 %v3419_v7, 16  ;;  %v500_v20 = vshll.u32 %v3419_v7, 16  ;;  %v3154_v47 = vld [vmem:[%s3966_s3 + $0xa0] sm:$0xff]  }
  0x1d   : > { %v481_v63 = vsel %vm3383_vm2, %v476_v58, %v480_v53  ;;  %v2505_v28 = vcombine.low %v3419_v7, %v3430_v16  ;;  %v516_v38 = vrot.slane %v514_v25, 5  ;;  %v525_v40 = vshrl.u32 %v3443_v24, 16  ;;  %v3155_v52 = vld [vmem:[%s3966_s3 + $0xe0] sm:$0xff]  }
  0x1e   : > { %2883 = vmatpush3.bf16.msra.mxu0 %v3138_v8  ;;  %2890 = vmatprep.mubr.bf16.mxu0 %v2491_v60  ;;  %v495_v0 = vsel %vm3383_vm2, %v490_v61, %v494_v56  ;;  %v2515_v8 = vrot.slane %v3336_v11, 9  ;;  %v499_v32 = vrot.slane %v497_v19, 4  ;;  %v502_v33 = vrot.slane %v500_v20, 5  ;;  %v3509_v12 = vld [vmem:[%s3484_s16] sm:$0xf]  ;;  %v3161_v20 = vld [vmem:[%s3966_s3 + $0xd0] sm:$0xff]  }
  0x1f   : > { %2907 = vmatpush3.bf16.msra.mxu1 %v3139_v9  ;;  %2884 = vmatprep.subr.bf16.mxu0 %v3140_v10  ;;  %v2492_v2 = vcombine.low %v481_v63, %v495_v0  ;;  %v2516_v9 = vrot.slane %v3342_v13, 9  ;;  %v528_v42 = vshll.u32 %v3443_v24, 16  ;;  %v534_v44 = vshll.u32 %v3450_v29, 16  ;;  %v3156_v0 = vld [vmem:[%s3966_s3 + $0x98] sm:$0xff]  }
  0x20   : > { %2908 = vmatprep.subr.bf16.mxu1 %v3141_v14  ;;  %v503_v43 = vor.u32 %v502_v33, %v499_v32  ;;  %v539_v45 = vshrl.u32 %v3453_v30, 16  ;;  %v527_v49 = vrot.slane %v525_v40, 4  ;;  %v548_v51 = vshll.u32 %v3456_v37, 16 }
  0x21   : > { %v2506_v60 = vcombine.low %v3443_v24, %v3453_v30  ;;  %v860_v25 = vrot.slane %v3374_v34, 5  ;;  %v2519_v32 = vrot.slane %v3419_v7, 9  ;;  %v1195_v33 = vshrl.u32 %v3509_v12, 16 }
  0x22   : > { %2885 = vmatpush3.bf16.msra.mxu0 %v3140_v10  ;;  %v3152_v10 = vld [vmem:[%s3966_s3 + $0xa8] sm:$0xff]   ;;  %v504_v53 = vrot.slane %v503_v43, 4  ;;  %v541_v54 = vrot.slane %v539_v45, 4  ;;  %v550_v63 = vrot.slane %v548_v51, 5  ;;  %v3168_v45 = vld [vmem:[%s3966_s3 + $0x138] sm:$0xff]  }
  0x23   : > { %2909 = vmatpush3.bf16.msra.mxu1 %v3141_v14  ;;  %2886 = vmatprep.subr.bf16.mxu0 %v3142_v17  ;;  %v3427_v14 = vld [vmem:[%s3330_s28 + $0x24] sm:$0x1] }
  0x24   : > { %2910 = vmatprep.subr.bf16.mxu1 %v3143_v23  ;;  %v506_v21 = vshll.u32 %v3427_v14, 16 }
  0x26   : > { %2887 = vmatpush3.bf16.msra.mxu0 %v3142_v17  ;;  %v3433_v17 = vld [vmem:[%s3330_s28 + $0x2c] sm:$0x1]  ;;  %v508_v35 = vrot.slane %v506_v21, 5  ;;  %v856_v21 = vrot.slane %v3368_v26, 5  ;;  %s3707_s28 = scalar_lea.vmem %s3965_s2, %s3318_s17 }
  0x27   : > { %2911 = vmatpush3.bf16.msra.mxu1 %v3143_v23  ;;  %2888 = vmatprep.subr.bf16.mxu0 %v3144_v46  ;;  %v511_v23 = vshrl.u32 %v3430_v16, 16  ;;  %v520_v27 = vshll.u32 %v3433_v17, 16  ;;  %v3163_v26 = vld [vmem:[%s3966_s3 + $0xc8] sm:$0xff]  }
  0x28   : > { %2912 = vmatprep.subr.bf16.mxu1 %v3145_v50  ;;  %v509_v61 = vsel %vm3383_vm2, %v504_v53, %v508_v35  ;;  %v1198_v35 = vshll.u32 %v3509_v12, 16  ;;  %v3570_v53 = vld [vmem:[%s3484_s16 + $0x20] sm:$0xf] }
  0x29   : > { %v513_v36 = vrot.slane %v511_v23, 4  ;;  %v522_v39 = vrot.slane %v520_v27, 5  ;;  %v2517_v23 = vrot.slane %v3360_v22, 9  ;;  %v3162_v27 = vld [vmem:[%s3966_s3 + $0x88] sm:$0xff]   ;;  %v3164_v22 = vld [vmem:[%s3966_s3 + $0x80] sm:$0xff]  }
  0x2a   : > { %2889 = vmatpush3.bf16.msra.mxu0 %v3144_v46  ;;  %v542_v46 = vshll.u32 %v3453_v30, 16  ;;  %v1200_v51 = vrot.slane %v1198_v35, 5 }
  0x2b   : > { %2913 = vmatpush3.bf16.msra.mxu1 %v3145_v50  ;;  %2922 = vmatprep.subr.bf16.mxu0 %v3148_v59  ;;  %v517_v48 = vor.u32 %v516_v38, %v513_v36  ;;  %v530_v50 = vrot.slane %v528_v42, 5  ;;  %v857_v34 = vsel %vm3472_vm5, %v2517_v23, %v856_v21  ;;  %v3548_v38 = vld [vmem:[%s3484_s16 + $0x10] sm:$0xf] }
  0x2c   : > { %2946 = vmatprep.subr.bf16.mxu1 %v3149_v62  ;;  %v544_v55 = vrot.slane %v542_v46, 5  ;;  %v1223_v42 = vshrl.u32 %v3548_v38, 16  ;;  %v1226_v43 = vshll.u32 %v3548_v38, 16  ;;  %v2520_v46 = vrot.slane %v3430_v16, 9 }
  0x2d   : > { %2891 = vmatmul.mubr.bf16.vlgmr.msra.gmra.mxu0 %v2492_v2  ;;  %v518_v57 = vrot.slane %v517_v48, 4  ;;  %v531_v58 = vor.u32 %v530_v50, %v527_v49  ;;  %v872_v48 = vrot.slane %v3450_v29, 5  ;;  %v3169_v49 = vld [vmem:[%s3966_s3 + $0x178] sm:$0xff]   ;;  %v1197_v50 = vrot.slane %v1195_v33, 4 }
  0x2e   : > { %2915 = vmatmul.mubr.bf16.vlgmr.msra.gmra.mxu1 %v2504_v3  ;;  %2923 = vmatpush3.bf16.msra.mxu0 %v3148_v59  ;;  %v536_v59 = vrot.slane %v534_v44, 5  ;;  %v3556_v44 = vld [vmem:[%s3484_s16 + $0x18] sm:$0xf]  ;;  %v2522_v16 = vrot.slane %v3453_v30, 9 }
  0x2f   : > { %2947 = vmatpush3.bf16.msra.mxu1 %v3149_v62  ;;  %2924 = vmatprep.subr.bf16.mxu0 %v3150_v4  ;;  %v545_v62 = vor.u32 %v544_v55, %v541_v54  ;;  %v523_v2 = vsel %vm3383_vm2, %v518_v57, %v522_v39  ;;  %v532_v3 = vrot.slane %v531_v58, 4  ;;  %v864_v39 = vrot.slane %v3427_v14, 5  ;;  %v3583_v58 = vld [vmem:[%s3484_s16 + $0x28] sm:$0xf] }
  0x30   : > { %2948 = vmatprep.subr.bf16.mxu1 %v3151_v6  ;;  %2918 = vmatprep.mubr.bf16.mxu1 %v2505_v28  ;;  %v2518_v28 = vrot.slane %v3371_v31, 9  ;;  %v3165_v31 = vld [vmem:[%s3966_s3 + $0xc0] sm:$0xff]   ;;  %v868_v14 = vrot.slane %v3433_v17, 5  ;;  %v876_v55 = vrot.slane %v3456_v37, 5  ;;  %v2568_v30 = vcombine.low %v3548_v38, %v3556_v44  ;;  %v3590_v37 = vld [vmem:[%s3484_s16 + $0x30] sm:$0xf] }
  0x31   : > { %v546_v19 = vrot.slane %v545_v62, 4  ;;  %v537_v11 = vsel %vm3383_vm2, %v532_v3, %v536_v59  ;;  %v865_v29 = vsel %vm3472_vm5, %v2519_v32, %v864_v39  ;;  %v1237_v59 = vshrl.u32 %v3556_v44, 16  ;;  %v3627_v39 = vld [vmem:[%s3484_s16 + $0x1c] sm:$0x1] }
  0x32   : > { %2925 = vmatpush3.bf16.msra.mxu0 %v3150_v4  ;;  %v849_v4 = vsel %vm3472_vm5, %v2515_v8, %v848_v1  ;;  %v3512_v1 = vld [vmem:[%s3484_s16 + $0x8] sm:$0xf]  ;;  %v861_v36 = vsel %vm3472_vm5, %v2518_v28, %v860_v25  ;;  %v869_v54 = vsel %vm3472_vm5, %v2520_v46, %v868_v14  ;;  %v2569_v3 = vcombine.low %v3570_v53, %v3583_v58 }
  0x33   : > { %2949 = vmatpush3.bf16.msra.mxu1 %v3151_v6  ;;  %2926 = vmatprep.subr.bf16.mxu0 %v3152_v10  ;;  %v853_v6 = vsel %vm3472_vm5, %v2516_v9, %v852_v5  ;;  %v551_v13 = vsel %vm3383_vm2, %v546_v19, %v550_v63  ;;  %v2567_v5 = vcombine.low %v3509_v12, %v3512_v1  ;;  %v3160_v9 = vld [vmem:[%s3966_s3 + $0x90] sm:$0xff]   ;;  %v1209_v7 = vshrl.u32 %v3512_v1, 16  ;;  %v3593_v63 = vld [vmem:[%s3484_s16 + $0x38] sm:$0xf]  ;;  %v390_v19 = vld [vmem:[%s3484_s16 + $0x4] sm:$0x1] }
  0x34   : > { %2950 = vmatprep.subr.bf16.mxu1 %v3153_v18  ;;  %v2539_v15 = vcombine.low %v849_v4, %v853_v6  ;;  %v2494_v8 = vcombine.low %v537_v11, %v551_v13  ;;  %v1212_v40 = vshll.u32 %v3512_v1, 16  ;;  %v2541_v62 = vcombine.low %v865_v29, %v869_v54  ;;  %v392_v13 = vld [vmem:[%s3484_s16 + $0xc] sm:$0x1]  ;;  %v3179_v54 = vld [vmem:[%s3966_s3 + $0x158] sm:$0xff]  }
  0x35   : > { %v1211_v17 = vrot.slane %v1209_v7, 4  ;;  %v2607_v4 = vrot.slane %v3509_v12, 9  ;;  %v2608_v11 = vrot.slane %v3512_v1, 9  ;;  %v1204_v12 = vshll.u32 %v390_v19, 16  ;;  %v3177_v7 = vld [vmem:[%s3966_s3 + $0x160] sm:$0xff]  }
  0x36   : > { %2927 = vmatpush3.bf16.msra.mxu0 %v3152_v10  ;;  %v3157_v10 = vld [vmem:[%s3966_s3 + $0xd8] sm:$0xff]   ;;  %2919 = vmatmul.mubr.bf16.gmra.mxu1 %v2506_v60  ;;  %v1214_v57 = vrot.slane %v1212_v40, 5  ;;  %v3171_v60 = vld [vmem:[%s3966_s3 + $0x170] sm:$0xff]   ;;  %v1218_v21 = vshll.u32 %v392_v13, 16  ;;  %v1474_v23 = vrot.slane %v392_v13, 5  ;;  %v1228_v25 = vrot.slane %v1226_v43, 5 }
  0x37   : > { %2951 = vmatpush3.bf16.msra.mxu1 %v3153_v18  ;;  %2928 = vmatprep.subr.bf16.mxu0 %v3154_v47  ;;  %v2493_v18 = vcombine.low %v509_v61, %v523_v2  ;;  %v1201_v61 = vor.u32 %v1200_v51, %v1197_v50  ;;  %v1240_v2 = vshll.u32 %v3556_v44, 16  ;;  %v1206_v28 = vrot.slane %v1204_v12, 5  ;;  %v3674_v12 = vld [vmem:[%s3484_s16 + $0x34] sm:$0x1] }
  0x38   : > { %2952 = vmatprep.subr.bf16.mxu1 %v3155_v52  ;;  %2962 = vmatprep.mubr.bf16.mxu1 %v2567_v5  ;;  %v1470_v5 = vrot.slane %v390_v19, 5  ;;  %v1220_v32 = vrot.slane %v1218_v21, 5  ;;  %v1239_v33 = vrot.slane %v1237_v59, 4  ;;  %v1246_v50 = vshll.u32 %v3627_v39, 16  ;;  %v3180_v59 = vld [vmem:[%s3966_s3 + $0x110] sm:$0xff]  }
  0x39   : > { %2894 = vmatprep.mubr.bf16.mxu0 %v2493_v18  ;;  %v3172_v18 = vld [vmem:[%s3966_s3 + $0x128] sm:$0xff]   ;;  %v1242_v35 = vrot.slane %v1240_v2, 5  ;;  %v1268_v51 = vshll.u32 %v3583_v58, 16  ;;  %v1296_v29 = vshll.u32 %v3593_v63, 16  ;;  %v2609_v2 = vrot.slane %v3548_v38, 9 }
  0x3a   : > { %2929 = vmatpush3.bf16.msra.mxu0 %v3154_v47  ;;  %v2521_v47 = vrot.slane %v3443_v24, 9  ;;  %v3170_v24 = vld [vmem:[%s3966_s3 + $0x130] sm:$0xff]   ;;  %v2610_v19 = vrot.slane %v3556_v44, 9  ;;  %v3182_v38 = vld [vmem:[%s3966_s3 + $0x108] sm:$0xff]  }
  0x3b   : > { %2953 = vmatpush3.bf16.msra.mxu1 %v3155_v52  ;;  %2930 = vmatprep.subr.bf16.mxu0 %v3156_v0  ;;  %v2540_v52 = vcombine.low %v857_v34, %v861_v36  ;;  %v3176_v34 = vld [vmem:[%s3966_s3 + $0x120] sm:$0xff]  }
  0x3c   : > { %2954 = vmatprep.subr.bf16.mxu1 %v3157_v10  ;;  %2895 = vmatmul.mubr.bf16.gmra.mxu0 %v2494_v8  ;;  %v873_v6 = vsel %vm3472_vm5, %v2521_v47, %v872_v48  ;;  %v1225_v8 = vrot.slane %v1223_v42, 4  ;;  %v1254_v47 = vshll.u32 %v3570_v53, 16  ;;  %v1265_v48 = vshrl.u32 %v3583_v58, 16 }
  0x3d   : > { %2938 = vmatprep.mubr.bf16.mxu0 %v2539_v15  ;;  %v1202_v15 = vrot.slane %v1201_v61, 4  ;;  %v3181_v61 = vld [vmem:[%s3966_s3 + $0x150] sm:$0xff]  }
  0x3e   : > { %2931 = vmatpush3.bf16.msra.mxu0 %v3156_v0  ;;  %v1215_v0 = vor.u32 %v1214_v57, %v1211_v17  ;;  %v1229_v42 = vor.u32 %v1228_v25, %v1225_v8  ;;  %v1293_v17 = vshrl.u32 %v3593_v63, 16  ;;  %v3183_v25 = vld [vmem:[%s3966_s3 + $0x148] sm:$0xff]  }
  0x3f   : > { %2955 = vmatpush3.bf16.msra.mxu1 %v3157_v10  ;;  %2932 = vmatprep.subr.bf16.mxu0 %v3160_v9  ;;  %v877_v10 = vsel %vm3472_vm5, %v2522_v16, %v876_v55  ;;  %v1207_v36 = vsel %vm3383_vm2, %v1202_v15, %v1206_v28  ;;  %v1282_v16 = vshll.u32 %v3590_v37, 16 }
  0x40   : > { %2956 = vmatprep.subr.bf16.mxu1 %v3161_v20  ;;  %v2542_v1 = vcombine.low %v873_v6, %v877_v10  ;;  %v3650_v55 = vrot.slane %v1229_v42, 4  ;;  %v1256_v6 = vrot.slane %v1254_v47, 5  ;;  %v1267_v10 = vrot.slane %v1265_v48, 4 }
  0x41   : > { %v1295_v21 = vrot.slane %v1293_v17, 4  ;;  %v2611_v42 = vrot.slane %v3570_v53, 9  ;;  %v3723_v17 = vld [vmem:[%s3707_s28 + $0x8] sm:$0xf] }
  0x42   : > { %2933 = vmatpush3.bf16.msra.mxu0 %v3160_v9  ;;  %v3173_v9 = vld [vmem:[%s3966_s3 + $0x168] sm:$0xff]  }
  0x43   : > { %2957 = vmatpush3.bf16.msra.mxu1 %v3161_v20  ;;  %2934 = vmatprep.subr.bf16.mxu0 %v3162_v27  ;;  %v1216_v20 = vrot.slane %v1215_v0, 4  ;;  %v1248_v0 = vrot.slane %v1246_v50, 5 }
  0x44   : > { %2958 = vmatprep.subr.bf16.mxu1 %v3163_v26 }
  0x45   : > { %v1221_v40 = vsel %vm3383_vm2, %v1216_v20, %v1220_v32 }
  0x46   : > { %2935 = vmatpush3.bf16.msra.mxu0 %v3162_v27  ;;  %v2570_v27 = vcombine.low %v3590_v37, %v3593_v63  ;;  %v2595_v46 = vcombine.low %v1207_v36, %v1221_v40 }
  0x47   : > { %2959 = vmatpush3.bf16.msra.mxu1 %v3163_v26  ;;  %2936 = vmatprep.subr.bf16.mxu0 %v3164_v22  ;;  %v1471_v26 = vsel %vm3472_vm5, %v2607_v4, %v1470_v5  ;;  %v3677_v5 = vld [vmem:[%s3484_s16 + $0x3c] sm:$0x1] }
  0x48   : > { %2960 = vmatprep.subr.bf16.mxu1 %v3165_v31 }
  0x4a   : > { %2937 = vmatpush3.bf16.msra.mxu0 %v3164_v22  ;;  %v3617_v22 = vld [vmem:[%s3484_s16 + $0x14] sm:$0x1] }
  0x4b   : > { %2961 = vmatpush3.bf16.msra.mxu1 %v3165_v31  ;;  %2970 = vmatprep.subr.bf16.mxu0 %v3168_v45  ;;  %v1475_v31 = vsel %vm3472_vm5, %v2608_v11, %v1474_v23  ;;  %v1232_v43 = vshll.u32 %v3617_v22, 16  ;;  %v1482_v11 = vrot.slane %v3627_v39, 5  ;;  %v1298_v23 = vrot.slane %v1296_v29, 5 }
  0x4c   : > { %2994 = vmatprep.subr.bf16.mxu1 %v3169_v49  ;;  %v2631_v14 = vcombine.low %v1471_v26, %v1475_v31 }
  0x4d   : > { %2939 = vmatmul.mubr.bf16.vlgmr.msra.gmra.mxu0 %v2540_v52  ;;  %v1279_v52 = vshrl.u32 %v3590_v37, 16  ;;  %v1234_v57 = vrot.slane %v1232_v43, 5  ;;  %v1483_v31 = vsel %vm3472_vm5, %v2610_v19, %v1482_v11  ;;  %v1299_v40 = vor.u32 %v1298_v23, %v1295_v21  ;;  %v3190_v21 = vld [vmem:[%s3966_s3 + $0x1a8] sm:$0xff]  }
  0x4e   : > { %2963 = vmatmul.mubr.bf16.vlgmr.msra.gmra.mxu1 %v2568_v30  ;;  %2971 = vmatpush3.bf16.msra.mxu0 %v3168_v45  ;;  %v1251_v45 = vshrl.u32 %v3570_v53, 16  ;;  %v3653_v30 = vld [vmem:[%s3484_s16 + $0x24] sm:$0x1]  ;;  %v1498_v19 = vrot.slane %v3677_v5, 5 }
  0x4f   : > { %2995 = vmatpush3.bf16.msra.mxu1 %v3169_v49  ;;  %2972 = vmatprep.subr.bf16.mxu0 %v3170_v24  ;;  %v1243_v49 = vor.u32 %v1242_v35, %v1239_v33  ;;  %v1260_v13 = vshll.u32 %v3653_v30, 16  ;;  %v1281_v8 = vrot.slane %v1279_v52, 4  ;;  %v1288_v33 = vshll.u32 %v3674_v12, 16 }
  0x50   : > { %2996 = vmatprep.subr.bf16.mxu1 %v3171_v60  ;;  %2942 = vmatprep.mubr.bf16.mxu0 %v2541_v62  ;;  %v1253_v4 = vrot.slane %v1251_v45, 4  ;;  %v1302_v35 = vshll.u32 %v3677_v5, 16  ;;  %v1486_v43 = vrot.slane %v3653_v30, 5  ;;  %v3186_v45 = vld [vmem:[%s3966_s3 + $0x1b8] sm:$0xff]   ;;  %v3734_v30 = vld [vmem:[%s3707_s28 + $0x4] sm:$0x1] }
  0x51   : > { %2966 = vmatprep.mubr.bf16.mxu1 %v2569_v3  ;;  %v1244_v62 = vrot.slane %v1243_v49, 4  ;;  %v1478_v3 = vrot.slane %v3617_v22, 5  ;;  %v1262_v26 = vrot.slane %v1260_v13, 5  ;;  %v1290_v48 = vrot.slane %v1288_v33, 5  ;;  %v3189_v13 = vld [vmem:[%s3966_s3 + $0x1f0] sm:$0xff]   ;;  %v3192_v33 = vld [vmem:[%s3966_s3 + $0x1a0] sm:$0xff]  }
  0x52   : > { %2973 = vmatpush3.bf16.msra.mxu0 %v3170_v24  ;;  %v3178_v24 = vld [vmem:[%s3966_s3 + $0x118] sm:$0xff]   ;;  %v1257_v44 = vor.u32 %v1256_v6, %v1253_v4  ;;  %v1304_v49 = vrot.slane %v1302_v35, 5  ;;  %v1487_v29 = vsel %vm3472_vm5, %v2611_v42, %v1486_v43 }
  0x53   : > { %2997 = vmatpush3.bf16.msra.mxu1 %v3171_v60  ;;  %2974 = vmatprep.subr.bf16.mxu0 %v3172_v18  ;;  %v3659_v60 = vld [vmem:[%s3484_s16 + $0x2c] sm:$0x1]  ;;  %v3690_v28 = vsel %vm3472_vm5, %v2609_v2, %v1478_v3  ;;  %v1249_v32 = vsel %vm3383_vm2, %v1244_v62, %v1248_v0  ;;  %v1826_v0 = vshll.u32 %v3734_v30, 16  ;;  %s370_s16 = scalar_lea.vmem %s3969_s6, %s2742_s7 }
  0x54   : > { %2998 = vmatprep.subr.bf16.mxu1 %v3173_v9  ;;  %v1274_v15 = vshll.u32 %v3659_v60, 16  ;;  %v1258_v36 = vrot.slane %v1257_v44, 4  ;;  %v2632_v53 = vcombine.low %v3690_v28, %v1483_v31  ;;  %v3741_v62 = vld [vmem:[%s3707_s28 + $0xc] sm:$0x1] }
  0x55   : > { %2943 = vmatmul.mubr.bf16.gmra.mxu0 %v2542_v1  ;;  %v3184_v1 = vld [vmem:[%s3966_s3 + $0x100] sm:$0xff]   ;;  %v1840_v6 = vshll.u32 %v3741_v62, 16  ;;  %v1828_v5 = vrot.slane %v1826_v0, 5  ;;  %v3824_v0 = vld [vmem:[%s3707_s28 + $0x38] sm:$0xf] }
  0x56   : > { %2975 = vmatpush3.bf16.msra.mxu0 %v3172_v18  ;;  %2967 = vmatmul.mubr.bf16.gmra.mxu1 %v2570_v27  ;;  %v1270_v18 = vrot.slane %v1268_v51, 5  ;;  %v1235_v27 = vsel %vm3383_vm2, %v3650_v55, %v1234_v57  ;;  %v1276_v22 = vrot.slane %v1274_v15, 5  ;;  %v1263_v50 = vsel %vm3383_vm2, %v1258_v36, %v1262_v26  ;;  %v3769_v26 = vld [vmem:[%s3707_s28 + $0x10] sm:$0xf]  ;;  %v3193_v36 = vld [vmem:[%s3966_s3 + $0x1e0] sm:$0xff]  }
  0x57   : > { %2999 = vmatpush3.bf16.msra.mxu1 %v3173_v9  ;;  %2976 = vmatprep.subr.bf16.mxu0 %v3176_v34  ;;  %v1284_v9 = vrot.slane %v1282_v16, 5  ;;  %v2596_v47 = vcombine.low %v1235_v27, %v1249_v32  ;;  %v3720_v16 = vld [vmem:[%s3707_s28] sm:$0xf]  ;;  %v1831_v57 = vshrl.u32 %v3723_v17, 16  ;;  %v3191_v27 = vld [vmem:[%s3966_s3 + $0x1e8] sm:$0xff]  }
  0x58   : > { %3000 = vmatprep.subr.bf16.mxu1 %v3177_v7  ;;  %2986 = vmatprep.mubr.bf16.mxu0 %v2595_v46  ;;  %v1271_v20 = vor.u32 %v1270_v18, %v1267_v10  ;;  %v2612_v46 = vrot.slane %v3583_v58, 9  ;;  %v1300_v58 = vrot.slane %v1299_v40, 4  ;;  %v1820_v55 = vshll.u32 %v3720_v16, 16  ;;  %v3188_v10 = vld [vmem:[%s3966_s3 + $0x1b0] sm:$0xff]  }
  0x59   : > { %3010 = vmatprep.mubr.bf16.mxu1 %v2631_v14  ;;  %v1490_v14 = vrot.slane %v3659_v60, 5  ;;  %v2613_v60 = vrot.slane %v3590_v37, 9  ;;  %v1833_v4 = vrot.slane %v1831_v57, 4  ;;  %v1494_v37 = vrot.slane %v3674_v12, 5  ;;  %v3196_v57 = vld [vmem:[%s3966_s3 + $0x190] sm:$0xff]  }
  0x5a   : > { %2977 = vmatpush3.bf16.msra.mxu0 %v3176_v34  ;;  %v3185_v34 = vld [vmem:[%s3966_s3 + $0x140] sm:$0xff]   ;;  %v1272_v39 = vrot.slane %v1271_v20, 4  ;;  %v1822_v3 = vrot.slane %v1820_v55, 5  ;;  %v2614_v18 = vrot.slane %v3593_v63, 9  ;;  %v1305_v63 = vsel %vm3383_vm2, %v1300_v58, %v1304_v49  ;;  %v3813_v55 = vld [vmem:[%s3707_s28 + $0x30] sm:$0xf] }
  0x5b   : > { %3001 = vmatpush3.bf16.msra.mxu1 %v3177_v7  ;;  %2978 = vmatprep.subr.bf16.mxu0 %v3178_v24  ;;  %v1285_v7 = vor.u32 %v1284_v9, %v1281_v8  ;;  %v1842_v20 = vrot.slane %v1840_v6, 5  ;;  %v1495_v23 = vsel %vm3472_vm5, %v2613_v60, %v1494_v37  ;;  %v2659_v35 = vcombine.low %v3720_v16, %v3723_v17 }
  0x5c   : > { %3002 = vmatprep.subr.bf16.mxu1 %v3179_v54  ;;  %v1277_v51 = vsel %vm3383_vm2, %v1272_v39, %v1276_v22  ;;  %v3772_v22 = vld [vmem:[%s3707_s28 + $0x18] sm:$0xf]  ;;  %v1845_v39 = vshrl.u32 %v3769_v26, 16  ;;  %v1901_v6 = vshrl.u32 %v3813_v55, 16 }
  0x5d   : > { %v1286_v52 = vrot.slane %v1285_v7, 4  ;;  %v2597_v15 = vcombine.low %v1263_v50, %v1277_v51  ;;  %v1848_v7 = vshll.u32 %v3769_v26, 16  ;;  %v1859_v40 = vshrl.u32 %v3772_v22, 16 }
  0x5e   : > { %2979 = vmatpush3.bf16.msra.mxu0 %v3178_v24  ;;  %v3187_v24 = vld [vmem:[%s3966_s3 + $0x1f8] sm:$0xff]   ;;  %v1862_v42 = vshll.u32 %v3772_v22, 16  ;;  %v1847_v49 = vrot.slane %v1845_v39, 4 }
  0x5f   : > { %3003 = vmatpush3.bf16.msra.mxu1 %v3179_v54  ;;  %2980 = vmatprep.subr.bf16.mxu0 %v3180_v59  ;;  %v1817_v54 = vshrl.u32 %v3720_v16, 16  ;;  %v1291_v8 = vsel %vm3383_vm2, %v1286_v52, %v1290_v48  ;;  %v3806_v48 = vld [vmem:[%s3707_s28 + $0x28] sm:$0xf]  ;;  %v1850_v50 = vrot.slane %v1848_v7, 5  ;;  %v1861_v51 = vrot.slane %v1859_v40, 4 }
  0x60   : > { %3004 = vmatprep.subr.bf16.mxu1 %v3181_v61  ;;  %v2598_v28 = vcombine.low %v1291_v8, %v1305_v63  ;;  %v1864_v52 = vrot.slane %v1862_v42, 5  ;;  %v3837_v8 = vld [vmem:[%s3707_s28 + $0x2c] sm:$0x1] }
  0x61   : > { %v1819_v2 = vrot.slane %v1817_v54, 4  ;;  %v1890_v54 = vshll.u32 %v3806_v48, 16 }
  0x62   : > { %2981 = vmatpush3.bf16.msra.mxu0 %v3180_v59  ;;  %v1491_v59 = vsel %vm3472_vm5, %v2612_v46, %v1490_v14  ;;  %v3195_v46 = vld [vmem:[%s3966_s3 + $0x1d8] sm:$0xff]   ;;  %v3797_v14 = vld [vmem:[%s3707_s28 + $0x20] sm:$0xf] }
  0x63   : > { %3005 = vmatpush3.bf16.msra.mxu1 %v3181_v61  ;;  %2982 = vmatprep.subr.bf16.mxu0 %v3182_v38  ;;  %v1834_v61 = vshll.u32 %v3723_v17, 16  ;;  %v2633_v9 = vcombine.low %v1487_v29, %v1491_v59  ;;  %v1873_v58 = vshrl.u32 %v3797_v14, 16  ;;  %v1887_v29 = vshrl.u32 %v3806_v48, 16  ;;  %v3197_v59 = vld [vmem:[%s3966_s3 + $0x1d0] sm:$0xff]  }
  0x64   : > { %3006 = vmatprep.subr.bf16.mxu1 %v3183_v25 }
  0x65   : > { %v1836_v11 = vrot.slane %v1834_v61, 5  ;;  %v1875_v37 = vrot.slane %v1873_v58, 4 }
  0x66   : > { %2983 = vmatpush3.bf16.msra.mxu0 %v3182_v38  ;;  %v1823_v38 = vor.u32 %v1822_v3, %v1819_v2  ;;  %v3198_v2 = vld [vmem:[%s3966_s3 + $0x188] sm:$0xff]   ;;  %v1851_v3 = vor.u32 %v1850_v50, %v1847_v49 }
  0x67   : > { %3007 = vmatpush3.bf16.msra.mxu1 %v3183_v25  ;;  %2984 = vmatprep.subr.bf16.mxu0 %v3184_v1  ;;  %v1837_v44 = vor.u32 %v1836_v11, %v1833_v4  ;;  %v1499_v25 = vsel %vm3472_vm5, %v2614_v18, %v1498_v19  ;;  %v1865_v4 = vor.u32 %v1864_v52, %v1861_v51  ;;  %v1889_v19 = vrot.slane %v1887_v29, 4 }
  0x68   : > { %3008 = vmatprep.subr.bf16.mxu1 %v3185_v34  ;;  %v1824_v12 = vrot.slane %v1823_v38, 4  ;;  %v1892_v11 = vrot.slane %v1890_v54, 5  ;;  %v3834_v38 = vld [vmem:[%s3707_s28 + $0x24] sm:$0x1]  ;;  %v2660_v52 = vcombine.low %v3769_v26, %v3772_v22  ;;  %v3205_v54 = vld [vmem:[%s3966_s3 + $0x230] sm:$0xff]  }
  0x6a   : > { %2985 = vmatpush3.bf16.msra.mxu0 %v3184_v1  ;;  %v1838_v1 = vrot.slane %v1837_v44, 4  ;;  %v1829_v32 = vsel %vm3383_vm2, %v1824_v12, %v1828_v5  ;;  %v1852_v44 = vrot.slane %v1851_v3, 4  ;;  %v1866_v12 = vrot.slane %v1865_v4, 4 }
  0x6b   : > { %3009 = vmatpush3.bf16.msra.mxu1 %v3185_v34  ;;  %3018 = vmatprep.subr.bf16.mxu0 %v3186_v45  ;;  %v2634_v34 = vcombine.low %v1495_v23, %v1499_v25  ;;  %v1893_v23 = vor.u32 %v1892_v11, %v1889_v19  ;;  %v1896_v25 = vshll.u32 %v3837_v8, 16  ;;  %v2699_v3 = vrot.slane %v3720_v16, 9  ;;  %v3208_v16 = vld [vmem:[%s3966_s3 + $0x228] sm:$0xff]  }
  0x6c   : > { %3042 = vmatprep.subr.bf16.mxu1 %v3187_v24  ;;  %v1843_v31 = vsel %vm3383_vm2, %v1838_v1, %v1842_v20  ;;  %v3200_v1 = vld [vmem:[%s3966_s3 + $0x180] sm:$0xff]   ;;  %v2108_v19 = vrot.slane %v3834_v38, 5  ;;  %v2704_v11 = vrot.slane %v3806_v48, 9 }
  0x6d   : > { %2987 = vmatmul.mubr.bf16.vlgmr.msra.gmra.mxu0 %v2596_v47  ;;  %v2687_v43 = vcombine.low %v1829_v32, %v1843_v31  ;;  %v3800_v47 = vld [vmem:[%s3707_s28 + $0x14] sm:$0x1]  ;;  %v3201_v31 = vld [vmem:[%s3966_s3 + $0x1c0] sm:$0xff]   ;;  %v1894_v42 = vrot.slane %v1893_v23, 4  ;;  %v2702_v23 = vrot.slane %v3772_v22, 9 }
  0x6e   : > { %3011 = vmatmul.mubr.bf16.vlgmr.msra.gmra.mxu1 %v2632_v53  ;;  %3019 = vmatpush3.bf16.msra.mxu0 %v3186_v45  ;;  %v3194_v45 = vld [vmem:[%s3966_s3 + $0x198] sm:$0xff]   ;;  %v1854_v60 = vshll.u32 %v3800_v47, 16 }
  0x6f   : > { %3043 = vmatpush3.bf16.msra.mxu1 %v3187_v24  ;;  %3020 = vmatprep.subr.bf16.mxu0 %v3188_v10  ;;  %v3803_v53 = vld [vmem:[%s3707_s28 + $0x1c] sm:$0x1]  ;;  %v1876_v24 = vshll.u32 %v3797_v14, 16 }
  0x70   : > { %3044 = vmatprep.subr.bf16.mxu1 %v3189_v13  ;;  %2990 = vmatprep.mubr.bf16.mxu0 %v2597_v15  ;;  %v1868_v61 = vshll.u32 %v3803_v53, 16  ;;  %v1918_v15 = vshll.u32 %v3824_v0, 16  ;;  %v1856_v63 = vrot.slane %v1854_v60, 5 }
  0x71   : > { %3014 = vmatprep.mubr.bf16.mxu1 %v2633_v9  ;;  %v1878_v18 = vrot.slane %v1876_v24, 5  ;;  %v3199_v9 = vld [vmem:[%s3966_s3 + $0x1c8] sm:$0xff]  }
  0x72   : > { %3021 = vmatpush3.bf16.msra.mxu0 %v3188_v10  ;;  %v1904_v10 = vshll.u32 %v3813_v55, 16  ;;  %v1870_v5 = vrot.slane %v1868_v61, 5  ;;  %v1920_v32 = vrot.slane %v1918_v15, 5 }
  0x73   : > { %3045 = vmatpush3.bf16.msra.mxu1 %v3189_v13  ;;  %3022 = vmatprep.subr.bf16.mxu0 %v3190_v21  ;;  %v1915_v13 = vshrl.u32 %v3824_v0, 16  ;;  %v1879_v20 = vor.u32 %v1878_v18, %v1875_v37  ;;  %v2096_v37 = vrot.slane %v3741_v62, 5  ;;  %v2703_v18 = vrot.slane %v3797_v14, 9 }
  0x74   : > { %3046 = vmatprep.subr.bf16.mxu1 %v3191_v27  ;;  %v1871_v39 = vsel %vm3383_vm2, %v1866_v12, %v1870_v5  ;;  %v2662_v62 = vcombine.low %v3813_v55, %v3824_v0  ;;  %v3211_v12 = vld [vmem:[%s3966_s3 + $0x210] sm:$0xff]   ;;  %v3212_v5 = vld [vmem:[%s3966_s3 + $0x208] sm:$0xff]  }
  0x75   : > { %2991 = vmatmul.mubr.bf16.gmra.mxu0 %v2598_v28  ;;  %v1906_v28 = vrot.slane %v1904_v10, 5  ;;  %v1880_v7 = vrot.slane %v1879_v20, 4  ;;  %v2700_v10 = vrot.slane %v3723_v17, 9  ;;  %v2701_v20 = vrot.slane %v3769_v26, 9  ;;  %v3213_v26 = vld [vmem:[%s3966_s3 + $0x200] sm:$0xff]  }
  0x76   : > { %3023 = vmatpush3.bf16.msra.mxu0 %v3190_v21  ;;  %3015 = vmatmul.mubr.bf16.gmra.mxu1 %v2634_v34  ;;  %v1882_v21 = vshll.u32 %v3834_v38, 16  ;;  %v1917_v34 = vrot.slane %v1915_v13, 4  ;;  %v2112_v13 = vrot.slane %v3837_v8, 5  ;;  %v2109_v38 = vsel %vm3472_vm5, %v2703_v18, %v2108_v19  ;;  %v3209_v8 = vld [vmem:[%s3966_s3 + $0x220] sm:$0xff]  }
  0x77   : > { %3047 = vmatpush3.bf16.msra.mxu1 %v3191_v27  ;;  %3024 = vmatprep.subr.bf16.mxu0 %v3192_v33  ;;  %v1903_v27 = vrot.slane %v1901_v6, 4  ;;  %v2092_v6 = vrot.slane %v3734_v30, 5 }
  0x78   : > { %3048 = vmatprep.subr.bf16.mxu1 %v3193_v36  ;;  %3034 = vmatprep.mubr.bf16.mxu0 %v2659_v35  ;;  %v3854_v35 = vld [vmem:[%s3707_s28 + $0x3c] sm:$0x1]  ;;  %v1884_v40 = vrot.slane %v1882_v21, 5  ;;  %v1921_v50 = vor.u32 %v1920_v32, %v1917_v34  ;;  %v2113_v41 = vsel %vm3472_vm5, %v2704_v11, %v2112_v13  ;;  %v2100_v21 = vrot.slane %v3800_v47, 5 }
  0x79   : > { %3058 = vmatprep.mubr.bf16.mxu1 %v2687_v43  ;;  %v1898_v43 = vrot.slane %v1896_v25, 5  ;;  %v1924_v51 = vshll.u32 %v3854_v35, 16  ;;  %v2104_v25 = vrot.slane %v3803_v53, 5  ;;  %v2120_v34 = vrot.slane %v3854_v35, 5 }
  0x7a   : > { %3025 = vmatpush3.bf16.msra.mxu0 %v3192_v33  ;;  %v3851_v33 = vld [vmem:[%s3707_s28 + $0x34] sm:$0x1]  ;;  %v1885_v24 = vsel %vm3383_vm2, %v1880_v7, %v1884_v40  ;;  %v1922_v60 = vrot.slane %v1921_v50, 4  ;;  %v2101_v22 = vsel %vm3472_vm5, %v2701_v20, %v2100_v21 }
  0x7b   : > { %3049 = vmatpush3.bf16.msra.mxu1 %v3193_v36  ;;  %3026 = vmatprep.subr.bf16.mxu0 %v3194_v45  ;;  %v1857_v36 = vsel %vm3383_vm2, %v1852_v44, %v1856_v63  ;;  %v1910_v49 = vshll.u32 %v3851_v33, 16  ;;  %v1899_v29 = vsel %vm3383_vm2, %v1894_v42, %v1898_v43  ;;  %v1926_v61 = vrot.slane %v1924_v51, 5  ;;  %v3210_v63 = vld [vmem:[%s3966_s3 + $0x218] sm:$0xff]  }
  0x7c   : > { %3050 = vmatprep.subr.bf16.mxu1 %v3195_v46  ;;  %v2688_v58 = vcombine.low %v1857_v36, %v1871_v39  ;;  %v2689_v4 = vcombine.low %v1885_v24, %v1899_v29  ;;  %v2725_v44 = vcombine.low %v2109_v38, %v2113_v41  ;;  %v2105_v47 = vsel %vm3472_vm5, %v2702_v23, %v2104_v25 }
  0x7d   : > { %v1927_v30 = vsel %vm3383_vm2, %v1922_v60, %v1926_v61 }
  0x7e   : > { %3027 = vmatpush3.bf16.msra.mxu0 %v3194_v45  ;;  %v3204_v45 = vld [vmem:[%s3966_s3 + $0x238] sm:$0xff]  }
  0x7f   : > { %3051 = vmatpush3.bf16.msra.mxu1 %v3195_v46  ;;  %3028 = vmatprep.subr.bf16.mxu0 %v3196_v57  ;;  %v1907_v46 = vor.u32 %v1906_v28, %v1903_v27  ;;  %v2706_v27 = vrot.slane %v3824_v0, 9  ;;  %v2116_v28 = vrot.slane %v3851_v33, 5  ;;  %v2724_v0 = vcombine.low %v2101_v22, %v2105_v47 }
  0x80   : > { %3052 = vmatprep.subr.bf16.mxu1 %v3197_v59 }
  0x82   : > { %3029 = vmatpush3.bf16.msra.mxu0 %v3196_v57  ;;  %v1908_v57 = vrot.slane %v1907_v46, 4 }
  0x83   : > { %3053 = vmatpush3.bf16.msra.mxu1 %v3197_v59  ;;  %3030 = vmatprep.subr.bf16.mxu0 %v3198_v2  ;;  %v1912_v59 = vrot.slane %v1910_v49, 5 }
  0x84   : > { %3054 = vmatprep.subr.bf16.mxu1 %v3199_v9 }
  0x85   : > { %v1913_v17 = vsel %vm3383_vm2, %v1908_v57, %v1912_v59 }
  0x86   : > { %3031 = vmatpush3.bf16.msra.mxu0 %v3198_v2  ;;  %v2661_v2 = vcombine.low %v3797_v14, %v3806_v48  ;;  %v2093_v14 = vsel %vm3472_vm5, %v2699_v3, %v2092_v6  ;;  %v2097_v48 = vsel %vm3472_vm5, %v2700_v10, %v2096_v37  ;;  %v2690_v15 = vcombine.low %v1913_v17, %v1927_v30 }
  0x87   : > { %3055 = vmatpush3.bf16.msra.mxu1 %v3199_v9  ;;  %3032 = vmatprep.subr.bf16.mxu0 %v3200_v1  ;;  %v2723_v9 = vcombine.low %v2093_v14, %v2097_v48 }
  0x88   : > { %3056 = vmatprep.subr.bf16.mxu1 %v3201_v31 }
  0x8a   : > { %3033 = vmatpush3.bf16.msra.mxu0 %v3200_v1  ;;  %v2705_v1 = vrot.slane %v3813_v55, 9  ;;  %v2121_v55 = vsel %vm3472_vm5, %v2706_v27, %v2120_v34 }
  0x8b   : > { %3057 = vmatpush3.bf16.msra.mxu1 %v3201_v31  ;;  %3066 = vmatprep.subr.bf16.mxu0 %v3204_v45 }
  0x8c   : > { %3090 = vmatprep.subr.bf16.mxu1 %v3204_v45  ;;  %v2117_v53 = vsel %vm3472_vm5, %v2705_v1, %v2116_v28 }
  0x8d   : > { %3035 = vmatmul.mubr.bf16.vlgmr.msra.gmra.mxu0 %v2660_v52  ;;  %v2726_v32 = vcombine.low %v2117_v53, %v2121_v55 }
  0x8e   : > { %3059 = vmatmul.mubr.bf16.vlgmr.msra.gmra.mxu1 %v2688_v58  ;;  %3067 = vmatpush3.bf16.msra.mxu0 %v3204_v45 }
  0x8f   : > { %3098 = vmatpush3.bf16.msra.mxu1 %v3204_v45  ;;  %3068 = vmatprep.subr.bf16.mxu0 %v3205_v54 }
  0x90   : > { %3091 = vmatprep.subr.bf16.mxu1 %v3205_v54  ;;  %3038 = vmatprep.mubr.bf16.mxu0 %v2661_v2 }
  0x91   : > { %3062 = vmatprep.mubr.bf16.mxu1 %v2689_v4 }
  0x92   : > { %3069 = vmatpush3.bf16.msra.mxu0 %v3205_v54 }
  0x93   : > { %3099 = vmatpush3.bf16.msra.mxu1 %v3205_v54  ;;  %3070 = vmatprep.subr.bf16.mxu0 %v3208_v16 }
  0x94   : > { %3092 = vmatprep.subr.bf16.mxu1 %v3208_v16 }
  0x95   : > { %3039 = vmatmul.mubr.bf16.gmra.mxu0 %v2662_v62 }
  0x96   : > { %3071 = vmatpush3.bf16.msra.mxu0 %v3208_v16  ;;  %3063 = vmatmul.mubr.bf16.gmra.mxu1 %v2690_v15 }
  0x97   : > { %3100 = vmatpush3.bf16.msra.mxu1 %v3208_v16  ;;  %3072 = vmatprep.subr.bf16.mxu0 %v3209_v8 }
  0x98   : > { %3093 = vmatprep.subr.bf16.mxu1 %v3209_v8  ;;  %3082 = vmatprep.mubr.bf16.mxu0 %v2723_v9 }
  0x99   : > { %3086 = vmatprep.mubr.bf16.mxu1 %v2725_v44 }
  0x9a   : > { %3073 = vmatpush3.bf16.msra.mxu0 %v3209_v8 }
  0x9b   : > { %3101 = vmatpush3.bf16.msra.mxu1 %v3209_v8  ;;  %3074 = vmatprep.subr.bf16.mxu0 %v3210_v63 }
  0x9c   : > { %3094 = vmatprep.subr.bf16.mxu1 %v3210_v63 }
  0x9e   : > { %3075 = vmatpush3.bf16.msra.mxu0 %v3210_v63 }
  0x9f   : > { %3102 = vmatpush3.bf16.msra.mxu1 %v3210_v63  ;;  %3076 = vmatprep.subr.bf16.mxu0 %v3211_v12 }
  0xa0   : > { %3095 = vmatprep.subr.bf16.mxu1 %v3211_v12 }
  0xa2   : > { %3077 = vmatpush3.bf16.msra.mxu0 %v3211_v12 }
  0xa3   : > { %3103 = vmatpush3.bf16.msra.mxu1 %v3211_v12  ;;  %3078 = vmatprep.subr.bf16.mxu0 %v3212_v5 }
  0xa4   : > { %3096 = vmatprep.subr.bf16.mxu1 %v3212_v5 }
  0xa6   : > { %3079 = vmatpush3.bf16.msra.mxu0 %v3212_v5 }
  0xa7   : > { %3104 = vmatpush3.bf16.msra.mxu1 %v3212_v5  ;;  %3080 = vmatprep.subr.bf16.mxu0 %v3213_v26 }
  0xa8   : > { %3097 = vmatprep.subr.bf16.mxu1 %v3213_v26 }
  0xaa   : > { %3081 = vmatpush3.bf16.msra.mxu0 %v3213_v26 }
  0xab   : > { %3105 = vmatpush3.bf16.msra.mxu1 %v3213_v26 }
  0xad   : > { %3083 = vmatmul.mubr.bf16.vlgmr.msra.gmra.mxu0 %v2724_v0 }
  0xae   : > { %3087 = vmatmul.mubr.bf16.vlgmr.msra.gmra.mxu1 %v2726_v32 }
  0xed   : > { %v2892_v31 = vpop.f32.mrf.mxu0 }
  0xee   : > { %v2916_v35 = vpop.f32.mrf.mxu1 }
  0xef   : > { %v667_v33 = vpop.f32.mrf.mxu0  ;;  %v813_v1 = vadd.f32 %v2916_v35, %v2892_v31 }
  0xf0   : > { %v804_v39 = vpop.f32.mrf.mxu1 }
  0xf1   : > { %v2893_v36 = vpop.f32.mrf.mxu0  ;;  %v805_v26 = vadd.f32 %v804_v39, %v667_v33 }
  0xf2   : > { %v2917_v42 = vpop.f32.mrf.mxu1 }
  0xf3   : > { %v670_v7 = vpop.f32.mrf.mxu0  ;;  %v816_v55 = vadd.f32 %v2917_v42, %v2893_v36 }
  0xf4   : > { %v807_v45 = vpop.f32.mrf.mxu1 }
  0xf5   : > { %v808_v35 = vadd.f32 %v807_v45, %v670_v7 }
  0xf6   : > { %v2920_v46 = vpop.f32.mrf.mxu1 }
  0xf8   : > { %v820_v49 = vpop.f32.mrf.mxu1 }
  0xfa   : > { %v2921_v52 = vpop.f32.mrf.mxu1 }
  0xfc   : > { %v2896_v40 = vpop.f32.mrf.mxu0  ;;  %v823_v24 = vpop.f32.mrf.mxu1 }
  0xfd   : > { %v829_v28 = vadd.f32 %v2920_v46, %v2896_v40 }
  0xfe   : > { %v683_v43 = vpop.f32.mrf.mxu0 }
  0xff   : > { %v821_v47 = vadd.f32 %v820_v49, %v683_v43 }
 0x100   : > { %v2897_v56 = vpop.f32.mrf.mxu0 }
 0x102   : > { %v686_v50 = vpop.f32.mrf.mxu0 }
 0x103   : > { %v824_v33 = vadd.f32 %v823_v24, %v686_v50 }
 0x10d   : > { %v2940_v51 = vpop.f32.mrf.mxu0 }
 0x10e   : > { %v2964_v29 = vpop.f32.mrf.mxu1  ;;  %v1026_v22 = vadd.f32 %v2940_v51, %v813_v1 }
 0x10f   : > { %v993_v58 = vpop.f32.mrf.mxu0 }
 0x110   : > { %v1155_v57 = vpop.f32.mrf.mxu1  ;;  %v1024_v0 = vadd.f32 %v993_v58, %v805_v26 }
 0x111   : > { %v2941_v54 = vpop.f32.mrf.mxu0 }
 0x112   : > { %v2965_v60 = vpop.f32.mrf.mxu1  ;;  %v1027_v40 = vadd.f32 %v2941_v54, %v816_v55  ;;  %v1186_v51 = vadd.f32 %v1155_v57, %v1024_v0 }
 0x113   : > { %v996_v59 = vpop.f32.mrf.mxu0 }
 0x114   : > { %v1158_v2 = vpop.f32.mrf.mxu1  ;;  %v1025_v43 = vadd.f32 %v996_v59, %v808_v35  ;;  %v1189_v58 = vadd.f32 %v2965_v60, %v1027_v40 }
 0x115   : > { %v2944_v61 = vpop.f32.mrf.mxu0 }
 0x116   : > { %v2968_v4 = vpop.f32.mrf.mxu1  ;;  %v1030_v53 = vadd.f32 %v2944_v61, %v829_v28 }
 0x117   : > { %v1009_v3 = vpop.f32.mrf.mxu0 }
 0x118   : > { %v1171_v10 = vpop.f32.mrf.mxu1  ;;  %v1192_v39 = vadd.f32 %v2968_v4, %v1030_v53 }
 0x119   : > { %v2945_v6 = vpop.f32.mrf.mxu0 }
 0x11a   : > { %v2969_v18 = vpop.f32.mrf.mxu1 }
 0x11b   : > { %v1012_v37 = vpop.f32.mrf.mxu0 }
 0x11c   : > { %v1174_v11 = vpop.f32.mrf.mxu1  ;;  %v1029_v61 = vadd.f32 %v1012_v37, %v824_v33 }
 0x12d   : > { %v2988_v19 = vpop.f32.mrf.mxu0 }
 0x12e   : > { %v3012_v16 = vpop.f32.mrf.mxu1 }
 0x12f   : > { %v1421_v13 = vpop.f32.mrf.mxu0 }
 0x130   : > { %v1615_v30 = vpop.f32.mrf.mxu1  ;;  %v1452_v26 = vadd.f32 %v1421_v13, %v1186_v51 }
 0x131   : > { %v2989_v17 = vpop.f32.mrf.mxu0 }
 0x132   : > { %v3013_v14 = vpop.f32.mrf.mxu1  ;;  %v1455_v45 = vadd.f32 %v2989_v17, %v1189_v58  ;;  %v1646_v4 = vadd.f32 %v1615_v30, %v1452_v26 }
 0x133   : > { %v1424_v62 = vpop.f32.mrf.mxu0 }
 0x134   : > { %v3932_v15 = vpop.f32.mrf.mxu1 }
 0x135   : > { %v2992_v48 = vpop.f32.mrf.mxu0  ;;  %3974 = vst [vmem:[#allocation2_spill] sm:$0xff] %v3932_v15  ;;  %v832_v15 = vadd.f32 %v2921_v52, %v2897_v56 }
 0x136   : > { %v3016_v38 = vpop.f32.mrf.mxu1  ;;  %v1458_v36 = vadd.f32 %v2992_v48, %v1192_v39  ;;  %v1649_v48 = vadd.f32 %v3013_v14, %v1455_v45 }
 0x137   : > { %v1437_v41 = vpop.f32.mrf.mxu0  ;;  %v1031_v1 = vadd.f32 %v2945_v6, %v832_v15 }
 0x138   : > { %v1631_v8 = vpop.f32.mrf.mxu1  ;;  %v1652_v54 = vadd.f32 %v3016_v38, %v1458_v36 }
 0x139   : > { %v2993_v9 = vpop.f32.mrf.mxu0  ;;  %v1193_v56 = vadd.f32 %v2969_v18, %v1031_v1 }
 0x13a   : > { %v3017_v44 = vpop.f32.mrf.mxu1 }
 0x13b   : > { %v1440_v63 = vpop.f32.mrf.mxu0  ;;  %v1459_v50 = vadd.f32 %v2993_v9, %v1193_v56 }
 0x13c   : > { %v1634_v5 = vpop.f32.mrf.mxu1 }
 0x13d   : > { %v1653_v13 = vadd.f32 %v3017_v44, %v1459_v50 }
 0x14d   : > { %v3036_v12 = vpop.f32.mrf.mxu0 }
 0x14e   : > { %v3060_v20 = vpop.f32.mrf.mxu1 }
 0x14f   : > { %v1777_v21 = vpop.f32.mrf.mxu0 }
 0x150   : > { %v3934_v23 = vpop.f32.mrf.mxu1  ;;  %v1808_v60 = vadd.f32 %v1777_v21, %v1646_v4 }
 0x151   : > { %3975 = vst [vmem:[#allocation3_spill] sm:$0xff] %v3934_v23  ;;  %v3037_v25 = vpop.f32.mrf.mxu0  ;;  %v1028_v23 = vadd.f32 %v1009_v3, %v821_v47  ;;  %v1187_v3 = vadd.f32 %v1158_v2, %v1025_v43 }
 0x152   : > { %v3936_v27 = vpop.f32.mrf.mxu1  ;;  %v1811_v17 = vadd.f32 %v3037_v25, %v1649_v48 }
 0x153   : > { %3976 = vst [vmem:[#allocation4_spill] sm:$0xff] %v3936_v27  ;;  %v1780_v34 = vpop.f32.mrf.mxu0  ;;  %v1188_v27 = vadd.f32 %v2964_v29, %v1026_v22  ;;  %v1190_v28 = vadd.f32 %v1171_v10, %v1028_v23  ;;  %v1191_v29 = vadd.f32 %v1174_v11, %v1029_v61  ;;  %v1453_v57 = vadd.f32 %v1424_v62, %v1187_v3  ;;  %v2735_v62 = vld [vmem:[%s3967_s4] ss:$0 sm:$0xff] }
 0x154   : > { %v3938_v32 = vpop.f32.mrf.mxu1 }
 0x155   : > { %3977 = vst [vmem:[#allocation5_spill] sm:$0xff] %v3938_v32  ;;  %v3040_v31 = vpop.f32.mrf.mxu0  ;;  %v1454_v49 = vadd.f32 %v2988_v19, %v1188_v27  ;;  %v1456_v52 = vadd.f32 %v1437_v41, %v1190_v28  ;;  %v1457_v37 = vadd.f32 %v1440_v63, %v1191_v29  ;;  %v3978_v41 = vld [vmem:[#allocation2_spill] sm:$0xff] }
 0x156   : > { %v3064_v46 = vpop.f32.mrf.mxu1  ;;  %v1814_v19 = vadd.f32 %v3040_v31, %v1652_v54  ;;  %v1647_v2 = vadd.f32 %v3978_v41, %v1453_v57  ;;  %v2736_v31 = vld [vmem:[%s3968_s5] ss:$0 sm:$0xff] }
 0x157   : > { %v1793_v42 = vpop.f32.mrf.mxu0  ;;  %v1648_v7 = vadd.f32 %v3012_v16, %v1454_v49  ;;  %v1650_v10 = vadd.f32 %v1631_v8, %v1456_v52  ;;  %v1651_v38 = vadd.f32 %v1634_v5, %v1457_v37 }
 0x158   : > { %v2059_v32 = vpop.f32.mrf.mxu1  ;;  %v2080_v9 = vadd.f32 %v3064_v46, %v1814_v19  ;;  %v3979_v8 = vld [vmem:[#allocation3_spill] sm:$0xff]  ;;  %v1809_v14 = vadd.f32 %v1780_v34, %v1647_v2 }
 0x159   : > { %v3041_v24 = vpop.f32.mrf.mxu0  ;;  %v1810_v59 = vadd.f32 %v3036_v12, %v1648_v7  ;;  %v1812_v15 = vadd.f32 %v1793_v42, %v1650_v10  ;;  %v2074_v63 = vadd.f32 %v3979_v8, %v1808_v60 }
 0x15a   : > { %v3065_v6 = vpop.f32.mrf.mxu1  ;;  %v1815_v23 = vadd.f32 %v3041_v24, %v1653_v13 }
 0x15b   : > { %v1796_v18 = vpop.f32.mrf.mxu0  ;;  %v2076_v16 = vadd.f32 %v3060_v20, %v1810_v59  ;;  %v2078_v21 = vadd.f32 %v2059_v32, %v1812_v15  ;;  %v3980_v20 = vld [vmem:[#allocation4_spill] sm:$0xff] }
 0x15c   : > { %v2062_v11 = vpop.f32.mrf.mxu1  ;;  %v1813_v27 = vadd.f32 %v1796_v18, %v1651_v38  ;;  %v2077_v25 = vadd.f32 %v3980_v20, %v1811_v17  ;;  %v2081_v0 = vadd.f32 %v3065_v6, %v1815_v23  ;;  %v3981_v34 = vld [vmem:[#allocation5_spill] sm:$0xff] }
 0x15d   : > { %v2075_v33 = vadd.f32 %v3981_v34, %v1809_v14 }
 0x15e   : > { %v2079_v51 = vadd.f32 %v2062_v11, %v1813_v27 }
 0x16d   : > { %v3084_v30 = vpop.f32.mrf.mxu0 }
 0x16e   : > { %v2270_v12 = vadd.f32 %v3084_v30, %v2076_v16  ;;  %v3088_v44 = vpop.f32.mrf.mxu1 }
 0x16f   : > { %v2274_v22 = vadd.f32 %v3088_v44, %v2080_v9  ;;  %v2237_v47 = vpop.f32.mrf.mxu0 }
 0x170   : > { %v2285_v53 = vmul.f32 %v2735_v62, %v2270_v12  ;;  %v2268_v5 = vadd.f32 %v2237_v47, %v2074_v63  ;;  %v2253_v55 = vpop.f32.mrf.mxu1 }
 0x171   : > { %v2289_v35 = vmul.f32 %v2735_v62, %v2274_v22  ;;  %v2272_v40 = vadd.f32 %v2253_v55, %v2078_v21  ;;  %v3085_v46 = vpop.f32.mrf.mxu0 }
 0x172   : > { %v2283_v32 = vmul.f32 %v2735_v62, %v2268_v5  ;;  %v2271_v39 = vadd.f32 %v3085_v46, %v2077_v25  ;;  %v3089_v1 = vpop.f32.mrf.mxu1  ;;  %v2300_v61 = vadd.f32 %v2736_v31, %v2285_v53 }
 0x173   : > { %v2287_v43 = vmul.f32 %v2735_v62, %v2272_v40  ;;  %v2275_v49 = vadd.f32 %v3089_v1, %v2081_v0  ;;  %v2240_v28 = vpop.f32.mrf.mxu0  ;;  %v2304_v26 = vadd.f32 %v2736_v31, %v2289_v35 }
 0x174   : > { %v2286_v36 = vmul.f32 %v2735_v62, %v2271_v39  ;;  %v2269_v42 = vadd.f32 %v2240_v28, %v2075_v33  ;;  %v2256_v58 = vpop.f32.mrf.mxu1  ;;  %v2298_v3 = vadd.f32 %v2736_v31, %v2283_v32  ;;  %v2308_v24 = vmax.f32 %v2300_v61, 0.0 }
 0x175   : > { %v2290_v56 = vmul.f32 %v2735_v62, %v2275_v49  ;;  %v2273_v52 = vadd.f32 %v2256_v58, %v2079_v51  ;;  %v2302_v29 = vadd.f32 %v2736_v31, %v2287_v43  ;;  %v2312_v59 = vmax.f32 %v2304_v26, 0.0 }
 0x176   : > { %v2301_v7 = vadd.f32 %v2736_v31, %v2286_v36  ;;  %v2284_v45 = vmul.f32 %v2735_v62, %v2269_v42  ;;  %v2306_v37 = vmax.f32 %v2298_v3, 0.0 }
 0x177   : > { %v2305_v54 = vadd.f32 %v2736_v31, %v2290_v56  ;;  %v2288_v50 = vmul.f32 %v2735_v62, %v2273_v52  ;;  %v2310_v60 = vmax.f32 %v2302_v29, 0.0 }
 0x178   : > { %v2309_v4 = vmax.f32 %v2301_v7, 0.0  ;;  %v2299_v57 = vadd.f32 %v2736_v31, %v2284_v45 }
 0x179   : > { %v2313_v6 = vmax.f32 %v2305_v54, 0.0  ;;  %v2303_v10 = vadd.f32 %v2736_v31, %v2288_v50 }
 0x17a   : > { %v2751_v19 = vpack.c.bf16 %v2309_v4, %v2308_v24  ;;  %v2307_v48 = vmax.f32 %v2299_v57, 0.0 }
 0x17b   : > { %v2761_v13 = vpack.c.bf16 %v2313_v6, %v2312_v59  ;;  %v2311_v15 = vmax.f32 %v2303_v10, 0.0 }
 0x17c   : > { %2763 = vst [vmem:[%s370_s16 + $0x8] sm:$0xff] %v2751_v19   ;;  %v2746_v18 = vpack.c.bf16 %v2307_v48, %v2306_v37 }
 0x17d   : > { %2765 = vst [vmem:[%s370_s16 + $0x18] sm:$0xff] %v2761_v13   ;;  %v2756_v41 = vpack.c.bf16 %v2311_v15, %v2310_v60 }
 0x17e   : > { %2747 = vst [vmem:[%s370_s16] sm:$0xff] %v2746_v18  }
 0x17f   : > { %2764 = vst [vmem:[%s370_s16 + $0x10] sm:$0xff] %v2756_v41  }
 0x180 PF: > { %s16_s23 = sadd.s32 1, %s3236_s23   ;;  %s3982_s21 = smov %s3232_s22 }
 0x181   : > { %p13_p5 = scmp.ge.s32.totalorder %s16_s23, 4   ;;  %s3983_s22 = smov %s3985_s24 }
 0x183   :  { %15 = sbr.rel (!%p13_p5) target bundleno = 2 (0x2), region = 88 }

// kernel: _lambda_.20
= control target key start
LH: loop header
LB: loop body
LE: loop exit
PB: predicated region body
PF: predicated region fallthrough
CT: control target
= control target key end

     0   :  { %s2625_s21 = smov 0   ;;  %s2627_s22 = smov 0   ;;  %s3031_s0 = inlined_call_operand.vmem [shape: bf16[2,4,9,256], index: 0, kind: input, shape index: {}]   ;;  %s3032_s1 = inlined_call_operand.vmem [shape: bf16[2,4,9,256], index: 1, kind: input, shape index: {}]   ;;  %s3033_s2 = inlined_call_operand.vmem [shape: bf16[2,4,9,256], index: 2, kind: input, shape index: {}]   ;;  %s3034_s3 = inlined_call_operand.vmem [shape: bf16[9,128,128], index: 3, kind: input, shape index: {}]   ;;  %s3035_s4 = inlined_call_operand.vmem [shape: f32[1,128], index: 4, kind: input, shape index: {}]   ;;  %s3036_s5 = inlined_call_operand.vmem [shape: f32[1,128], index: 5, kind: input, shape index: {}]   ;;  %s3037_s6 = inlined_call_operand.vmem [shape: bf16[2,4,8,128], index: 6, kind: output, shape index: {}]  }
   0x1   :  { %s2629_s23 = smov 0  }
   0x2 LB: > { %s28_s24 = sadd.s32 1, %s2584_s22  ;;  %p1948_p0 = scmp.ge.s32.totalorder %s2588_s23, 1  ;;  %s2588_s23 = sphi %s2629_s23, %s16_s23   ;;  %s2584_s22 = sphi %s2627_s22, %s3041_s22   ;;  %s2580_s21 = sphi %s2625_s21, %s3040_s21  }
   0x3   : > { %p30_p1 = scmp.ge.s32.totalorder %s28_s24, 2  ;;  %p270_p2 = scmp.lt.s32.totalorder %s2588_s23, 3 }
   0x5   : > { %s3043_s24 = smov (%p30_p1, %s28_s24), 0  ;;  %p271_p3 = pnand %p1948_p0, %p270_p2 }
   0x6   : > { %p330_p4 = scmp.lt.s32.totalorder (!%p271_p3), %s2580_s21, 1 }
   0x7   : > { %274 = sbr.rel (%p271_p3) target bundleno = 384 (0x180), region = 44 }
   0xc   : > { %v2488_v0 = vld [vmem:[%s3034_s3 + $0x78] sm:$0xff]   ;;  %v2490_v2 = vld [vmem:[%s3034_s3 + $0x70] sm:$0xff]   ;;  %v2492_v4 = vld [vmem:[%s3034_s3 + $0x68] sm:$0xff]   ;;  %s3045_s21 = smov (!%p330_p4, %s2580_s21), 1  ;;  %vm648_vm0 = vsmask.f32 3328 }
   0xd   : > { %v2489_v1 = vld [vmem:[%s3034_s3 + $0x38] sm:$0xff]   ;;  %2284 = vmatprep.subr.bf16.mxu0 %v2488_v0  ;;  %v2491_v3 = vld [vmem:[%s3034_s3 + $0x30] sm:$0xff]   ;;  %v2493_v5 = vld [vmem:[%s3034_s3 + $0x28] sm:$0xff]   ;;  %s2670_s17 = sshll.u32 %s3045_s21, 6  ;;  %vm649_vm1 = vsmask.f32 7440 }
   0xe   : > { %2304 = vmatprep.subr.bf16.mxu1 %v2489_v1  ;;  %2285 = vmatpush3.bf16.msra.mxu0 %v2488_v0  ;;  %v2494_v6 = vld [vmem:[%s3034_s3 + $0x60] sm:$0xff]   ;;  %v2496_v8 = vld [vmem:[%s3034_s3 + $0x58] sm:$0xff]   ;;  %s2682_s28 = scalar_lea.vmem %s3031_s0, %s2670_s17  ;;  %v2498_v10 = vld [vmem:[%s3034_s3 + $0x50] sm:$0xff]   ;;  %s2734_s11 = scalar_lea.vmem %s3032_s1, %s2670_s17 }
   0xf   : > { %2305 = vmatpush3.bf16.msra.mxu1 %v2489_v1  ;;  %2286 = vmatprep.subr.bf16.mxu0 %v2490_v2  ;;  %v2495_v7 = vld [vmem:[%s3034_s3 + $0x20] sm:$0xff]   ;;  %v2497_v9 = vld [vmem:[%s3034_s3 + $0x18] sm:$0xff]   ;;  %v375_v12 = vld [vmem:[%s2682_s28 + $0x10] sm:$0xff]  ;;  %s2850_s16 = scalar_lea.vmem %s3033_s2, %s2670_s17  ;;  %s2182_s29 = sshll.u32 %s3045_s21, 4 }
  0x10   : > { %2306 = vmatprep.subr.bf16.mxu1 %v2491_v3  ;;  %v373_v11 = vld [vmem:[%s2682_s28] sm:$0xff]  ;;  %v2499_v13 = vld [vmem:[%s3034_s3 + $0x10] sm:$0xff]   ;;  %v418_v15 = vrot.slane %v375_v12, 4  ;;  %v2500_v18 = vld [vmem:[%s3034_s3 + $0x48] sm:$0xff]   ;;  %v666_v26 = vshrl.u32 %v375_v12, 16  ;;  %v669_v27 = vshll.u32 %v375_v12, 16 }
  0x11   : > { %v417_v14 = vrot.slane %v373_v11, 4  ;;  %v1983_v16 = vcombine.low %v373_v11, %v375_v12  ;;  %v2501_v19 = vld [vmem:[%s3034_s3 + $0x8] sm:$0xff]   ;;  %v2502_v20 = vld [vmem:[%s3034_s3 + $0x40] sm:$0xff]   ;;  %v652_v22 = vshrl.u32 %v373_v11, 16  ;;  %v655_v23 = vshll.u32 %v373_v11, 16  ;;  %v2708_v25 = vld [vmem:[%s2682_s28 + $0x30] sm:$0xff] }
  0x12   : > { %2287 = vmatpush3.bf16.msra.mxu0 %v2490_v2  ;;  %v2503_v21 = vld [vmem:[%s3034_s3] sm:$0xff]   ;;  %v420_v29 = vrot.slane %v2708_v25, 4  ;;  %v2506_v30 = vld [vmem:[%s3034_s3 + $0xb8] sm:$0xff]   ;;  %v668_v34 = vrot.slane %v666_v26, 4  ;;  %v671_v35 = vrot.slane %v669_v27, 5  ;;  %v2508_v38 = vld [vmem:[%s3034_s3 + $0xb0] sm:$0xff]  }
  0x13   : > { %2307 = vmatpush3.bf16.msra.mxu1 %v2491_v3  ;;  %2288 = vmatprep.subr.bf16.mxu0 %v2492_v4  ;;  %v1973_v17 = vcombine.low %v417_v14, %v418_v15  ;;  %v2705_v24 = vld [vmem:[%s2682_s28 + $0x20] sm:$0xff]  ;;  %v2507_v31 = vld [vmem:[%s3034_s3 + $0xf8] sm:$0xff]   ;;  %v654_v32 = vrot.slane %v652_v22, 4  ;;  %v657_v33 = vrot.slane %v655_v23, 5  ;;  %v2509_v40 = vld [vmem:[%s3034_s3 + $0xf0] sm:$0xff]   ;;  %v694_v55 = vshrl.u32 %v2708_v25, 16 }
  0x14   : > { %2308 = vmatprep.subr.bf16.mxu1 %v2493_v5  ;;  %2320 = vmatprep.mubr.bf16.mxu1 %v1983_v16  ;;  %v419_v28 = vrot.slane %v2705_v24, 4  ;;  %v1984_v37 = vcombine.low %v2705_v24, %v2708_v25  ;;  %v672_v41 = vor.u32 %v671_v35, %v668_v34  ;;  %v2510_v42 = vld [vmem:[%s3034_s3 + $0xa8] sm:$0xff]   ;;  %v376_v44 = vld [vmem:[%s2682_s28 + $0x18] sm:$0x11]  ;;  %vm2740_vm2 = vmor %vm648_vm0, %vm649_vm1  ;;  %v680_v51 = vshrl.u32 %v2705_v24, 16 }
  0x15   : > { %2300 = vmatprep.mubr.bf16.mxu0 %v1973_v17  ;;  %v658_v39 = vor.u32 %v657_v33, %v654_v32  ;;  %v374_v43 = vld [vmem:[%s2682_s28 + $0x8] sm:$0x11]  ;;  %v675_v50 = vshll.u32 %v376_v44, 16  ;;  %v2746_v53 = vld [vmem:[%s2734_s11] sm:$0xff]  ;;  %v683_v54 = vshll.u32 %v2705_v24, 16  ;;  %v2751_v57 = vld [vmem:[%s2734_s11 + $0x10] sm:$0xff] }
  0x16   : > { %2289 = vmatpush3.bf16.msra.mxu0 %v2492_v4  ;;  %v1974_v36 = vcombine.low %v419_v28, %v420_v29  ;;  %v661_v46 = vshll.u32 %v374_v43, 16  ;;  %v2511_v47 = vld [vmem:[%s3034_s3 + $0xe8] sm:$0xff]   ;;  %v673_v49 = vrot.slane %v672_v41, 4  ;;  %v2512_v58 = vld [vmem:[%s3034_s3 + $0xa0] sm:$0xff]   ;;  %v2035_v60 = vcombine.low %v2746_v53, %v2751_v57  ;;  %v2514_v4 = vld [vmem:[%s3034_s3 + $0x98] sm:$0xff]  }
  0x17   : > { %2309 = vmatpush3.bf16.msra.mxu1 %v2493_v5  ;;  %2290 = vmatprep.subr.bf16.mxu0 %v2494_v6  ;;  %v659_v45 = vrot.slane %v658_v39, 4  ;;  %v677_v56 = vrot.slane %v675_v50, 5  ;;  %v2513_v61 = vld [vmem:[%s3034_s3 + $0xe0] sm:$0xff]   ;;  %v682_v63 = vrot.slane %v680_v51, 4  ;;  %v697_v0 = vshll.u32 %v2708_v25, 16  ;;  %v2515_v5 = vld [vmem:[%s3034_s3 + $0xd8] sm:$0xff]  }
  0x18   : > { %2310 = vmatprep.subr.bf16.mxu1 %v2495_v7  ;;  %v663_v52 = vrot.slane %v661_v46, 5  ;;  %v685_v2 = vrot.slane %v683_v54, 5  ;;  %v696_v3 = vrot.slane %v694_v55, 4  ;;  %v1108_v11 = vshrl.u32 %v2751_v57, 16  ;;  %v2516_v12 = vld [vmem:[%s3034_s3 + $0x90] sm:$0xff]   ;;  %v2518_v22 = vld [vmem:[%s3034_s3 + $0x88] sm:$0xff]  }
  0x19   : > { %v678_v62 = vsel %vm2740_vm2, %v673_v49, %v677_v56  ;;  %v2517_v14 = vld [vmem:[%s3034_s3 + $0xd0] sm:$0xff]   ;;  %v2519_v24 = vld [vmem:[%s3034_s3 + $0xc8] sm:$0xff]   ;;  %v2521_v32 = vld [vmem:[%s3034_s3 + $0xc0] sm:$0xff]   ;;  %v964_v49 = vrot.slane %v2751_v57, 4 }
  0x1a   : > { %2291 = vmatpush3.bf16.msra.mxu0 %v2494_v6  ;;  %v664_v59 = vsel %vm2740_vm2, %v659_v45, %v663_v52  ;;  %v378_v6 = vld [vmem:[%s2682_s28 + $0x28] sm:$0x11]  ;;  %v686_v16 = vor.u32 %v685_v2, %v682_v63  ;;  %v384_v34 = vld [vmem:[%s2734_s11 + $0x18] sm:$0x11]  ;;  %v2803_v39 = vld [vmem:[%s2734_s11 + $0x20] sm:$0xff] }
  0x1b   : > { %2311 = vmatpush3.bf16.msra.mxu1 %v2495_v7  ;;  %2292 = vmatprep.subr.bf16.mxu0 %v2496_v8  ;;  %v2009_v1 = vcombine.low %v664_v59, %v678_v62  ;;  %v380_v7 = vld [vmem:[%s2682_s28 + $0x38] sm:$0x11]  ;;  %v689_v15 = vshll.u32 %v378_v6, 16  ;;  %v382_v33 = vld [vmem:[%s2734_s11 + $0x8] sm:$0x11]  ;;  %v1122_v52 = vshrl.u32 %v2803_v39, 16  ;;  %s370_s28 = scalar_lea.vmem %s3037_s6, %s2182_s29 }
  0x1c   : > { %2312 = vmatprep.subr.bf16.mxu1 %v2497_v9  ;;  %v687_v25 = vrot.slane %v686_v16, 4  ;;  %v1103_v35 = vshll.u32 %v382_v33, 16  ;;  %v2522_v43 = vld [vmem:[%s3034_s3 + $0x138] sm:$0xff]   ;;  %v1125_v54 = vshll.u32 %v2803_v39, 16  ;;  %v2529_v63 = vld [vmem:[%s3034_s3 + $0x168] sm:$0xff]   ;;  %v2530_v6 = vld [vmem:[%s3034_s3 + $0x120] sm:$0xff]  }
  0x1d   : > { %v691_v27 = vrot.slane %v689_v15, 5  ;;  %v2525_v44 = vld [vmem:[%s3034_s3 + $0x178] sm:$0xff]   ;;  %v386_v2 = vld [vmem:[%s2734_s11 + $0x28] sm:$0x11] }
  0x1e   : > { %2293 = vmatpush3.bf16.msra.mxu0 %v2496_v8  ;;  %v699_v8 = vrot.slane %v697_v0, 5  ;;  %v1105_v45 = vrot.slane %v1103_v35, 5  ;;  %v1124_v0 = vrot.slane %v1122_v52, 4  ;;  %v2533_v15 = vld [vmem:[%s3034_s3 + $0x158] sm:$0xff]  }
  0x1f   : > { %2313 = vmatpush3.bf16.msra.mxu1 %v2497_v9  ;;  %2294 = vmatprep.subr.bf16.mxu0 %v2498_v10  ;;  %v1094_v9 = vshrl.u32 %v2746_v53, 16 }
  0x20   : > { %2314 = vmatprep.subr.bf16.mxu1 %v2499_v13  ;;  %v700_v17 = vor.u32 %v699_v8, %v696_v3  ;;  %v388_v3 = vld [vmem:[%s2734_s11 + $0x38] sm:$0x11] }
  0x22   : > { %2295 = vmatpush3.bf16.msra.mxu0 %v2498_v10  ;;  %v1097_v10 = vshll.u32 %v2746_v53, 16  ;;  %v701_v26 = vrot.slane %v700_v17, 4 }
  0x23   : > { %2315 = vmatpush3.bf16.msra.mxu1 %v2499_v13  ;;  %2296 = vmatprep.subr.bf16.mxu0 %v2500_v18  ;;  %v1111_v13 = vshll.u32 %v2751_v57, 16 }
  0x24   : > { %2316 = vmatprep.subr.bf16.mxu1 %v2501_v19 }
  0x25   : > { %v1113_v23 = vrot.slane %v1111_v13, 5  ;;  %v2532_v13 = vld [vmem:[%s3034_s3 + $0x118] sm:$0xff]  }
  0x26   : > { %2297 = vmatpush3.bf16.msra.mxu0 %v2500_v18  ;;  %v703_v18 = vshll.u32 %v380_v7, 16  ;;  %v2531_v7 = vld [vmem:[%s3034_s3 + $0x160] sm:$0xff]  }
  0x27   : > { %2317 = vmatpush3.bf16.msra.mxu1 %v2501_v19  ;;  %2298 = vmatprep.subr.bf16.mxu0 %v2502_v20  ;;  %v1096_v19 = vrot.slane %v1094_v9, 4  ;;  %v1131_v9 = vshll.u32 %v386_v2, 16 }
  0x28   : > { %2318 = vmatprep.subr.bf16.mxu1 %v2503_v21  ;;  %v705_v28 = vrot.slane %v703_v18, 5 }
  0x29   : > { %v2864_v17 = vrot.slane %v1131_v9, 5 }
  0x2a   : > { %2299 = vmatpush3.bf16.msra.mxu0 %v2502_v20  ;;  %v1099_v20 = vrot.slane %v1097_v10, 5  ;;  %v1145_v10 = vshll.u32 %v388_v3, 16 }
  0x2b   : > { %2319 = vmatpush3.bf16.msra.mxu1 %v2503_v21  ;;  %2324 = vmatprep.subr.bf16.mxu0 %v2506_v30  ;;  %v1110_v21 = vrot.slane %v1108_v11, 4 }
  0x2c   : > { %2344 = vmatprep.subr.bf16.mxu1 %v2507_v31  ;;  %v1100_v29 = vor.u32 %v1099_v20, %v1096_v19  ;;  %v2866_v18 = vrot.slane %v1145_v10, 5  ;;  %v2869_v19 = vld [vmem:[%s2850_s16 + $0x10] sm:$0xff]  ;;  %v2541_v10 = vld [vmem:[%s3034_s3 + $0x1f8] sm:$0xff]  }
  0x2d   : > { %2301 = vmatmul.mubr.bf16.vlgmr.msra.gmra.mxu0 %v1974_v36  ;;  %v1117_v36 = vshll.u32 %v384_v34, 16  ;;  %v2537_v34 = vld [vmem:[%s3034_s3 + $0x148] sm:$0xff]  }
  0x2e   : > { %2321 = vmatmul.mubr.bf16.vlgmr.msra.gmra.mxu1 %v1984_v37  ;;  %2325 = vmatpush3.bf16.msra.mxu0 %v2506_v30  ;;  %v1114_v30 = vor.u32 %v1113_v23, %v1110_v21  ;;  %v692_v37 = vsel %vm2740_vm2, %v687_v25, %v691_v27  ;;  %v1101_v41 = vrot.slane %v1100_v29, 4  ;;  %v2534_v21 = vld [vmem:[%s3034_s3 + $0x110] sm:$0xff]   ;;  %v1550_v23 = vshrl.u32 %v2869_v19, 16  ;;  %v2880_v25 = vld [vmem:[%s2850_s16 + $0x20] sm:$0xff] }
  0x2f   : > { %2345 = vmatpush3.bf16.msra.mxu1 %v2507_v31  ;;  %2326 = vmatprep.subr.bf16.mxu0 %v2508_v38  ;;  %v2520_v31 = vld [vmem:[%s3034_s3 + $0x80] sm:$0xff]   ;;  %v1119_v46 = vrot.slane %v1117_v36, 5  ;;  %v1564_v27 = vshrl.u32 %v2880_v25, 16  ;;  %v1567_v29 = vshll.u32 %v2880_v25, 16 }
  0x30   : > { %2346 = vmatprep.subr.bf16.mxu1 %v2509_v40  ;;  %2360 = vmatprep.mubr.bf16.mxu1 %v2035_v60  ;;  %v1106_v55 = vsel %vm2740_vm2, %v1101_v41, %v1105_v45  ;;  %v1552_v33 = vrot.slane %v1550_v23, 4  ;;  %v2545_v23 = vld [vmem:[%s3034_s3 + $0x1e8] sm:$0xff]  }
  0x31   : > { %2340 = vmatprep.mubr.bf16.mxu0 %v2009_v1  ;;  %v1127_v1 = vrot.slane %v1125_v54, 5  ;;  %v1566_v41 = vrot.slane %v1564_v27, 4  ;;  %v2550_v27 = vld [vmem:[%s3034_s3 + $0x190] sm:$0xff]  }
  0x32   : > { %2327 = vmatpush3.bf16.msra.mxu0 %v2508_v38  ;;  %v706_v38 = vsel %vm2740_vm2, %v701_v26, %v705_v28  ;;  %v2535_v26 = vld [vmem:[%s3034_s3 + $0x150] sm:$0xff]  }
  0x33   : > { %2347 = vmatpush3.bf16.msra.mxu1 %v2509_v40  ;;  %2328 = vmatprep.subr.bf16.mxu0 %v2510_v42  ;;  %v2806_v40 = vld [vmem:[%s2734_s11 + $0x30] sm:$0xff]  ;;  %v2010_v50 = vcombine.low %v692_v37, %v706_v38  ;;  %v1128_v8 = vor.u32 %v1127_v1, %v1124_v0 }
  0x34   : > { %2348 = vmatprep.subr.bf16.mxu1 %v2511_v47  ;;  %v2036_v51 = vcombine.low %v2803_v39, %v2806_v40  ;;  %v1136_v57 = vshrl.u32 %v2806_v40, 16  ;;  %v1139_v60 = vshll.u32 %v2806_v40, 16 }
  0x35   : > { %v2862_v16 = vrot.slane %v1128_v8, 4 }
  0x36   : > { %2329 = vmatpush3.bf16.msra.mxu0 %v2510_v42  ;;  %v1115_v42 = vrot.slane %v1114_v30, 4 }
  0x37   : > { %2349 = vmatpush3.bf16.msra.mxu1 %v2511_v47  ;;  %2330 = vmatprep.subr.bf16.mxu0 %v2512_v58  ;;  %v963_v47 = vrot.slane %v2746_v53, 4  ;;  %v2526_v53 = vld [vmem:[%s3034_s3 + $0x130] sm:$0xff]  }
  0x38   : > { %2350 = vmatprep.subr.bf16.mxu1 %v2513_v61  ;;  %v1120_v56 = vsel %vm2740_vm2, %v1115_v42, %v1119_v46  ;;  %v390_v42 = vld [vmem:[%s2850_s16 + $0x8] sm:$0x11]  ;;  %v1569_v46 = vrot.slane %v1567_v29, 5 }
  0x39   : > { %v2061_v59 = vcombine.low %v963_v47, %v964_v49  ;;  %v2087_v62 = vcombine.low %v1106_v55, %v1120_v56  ;;  %v1545_v47 = vshll.u32 %v390_v42, 16  ;;  %v2552_v29 = vld [vmem:[%s3034_s3 + $0x188] sm:$0xff]  }
  0x3a   : > { %2331 = vmatpush3.bf16.msra.mxu0 %v2512_v58  ;;  %v2527_v58 = vld [vmem:[%s3034_s3 + $0x170] sm:$0xff]   ;;  %v1570_v54 = vor.u32 %v1569_v46, %v1566_v41  ;;  %v2560_v42 = vld [vmem:[%s3034_s3 + $0x228] sm:$0xff]  }
  0x3b   : > { %2351 = vmatpush3.bf16.msra.mxu1 %v2513_v61  ;;  %2332 = vmatprep.subr.bf16.mxu0 %v2514_v4  ;;  %v2528_v61 = vld [vmem:[%s3034_s3 + $0x128] sm:$0xff]   ;;  %v2559_v41 = vld [vmem:[%s3034_s3 + $0x230] sm:$0xff]  }
  0x3c   : > { %2352 = vmatprep.subr.bf16.mxu1 %v2515_v5  ;;  %v1571_v0 = vrot.slane %v1570_v54, 4 }
  0x3e   : > { %2333 = vmatpush3.bf16.msra.mxu0 %v2514_v4  ;;  %v1138_v4 = vrot.slane %v1136_v57, 4  ;;  %v1547_v57 = vrot.slane %v1545_v47, 5 }
  0x3f   : > { %2353 = vmatpush3.bf16.msra.mxu1 %v2515_v5  ;;  %2334 = vmatprep.subr.bf16.mxu0 %v2516_v12  ;;  %v1141_v5 = vrot.slane %v1139_v60, 5 }
  0x40   : > { %2354 = vmatprep.subr.bf16.mxu1 %v2517_v14 }
  0x41   : > { %v1142_v11 = vor.u32 %v1141_v5, %v1138_v4 }
  0x42   : > { %2335 = vmatpush3.bf16.msra.mxu0 %v2516_v12  ;;  %v2853_v12 = vld [vmem:[%s2850_s16] sm:$0xff] }
  0x43   : > { %2355 = vmatpush3.bf16.msra.mxu1 %v2517_v14  ;;  %2336 = vmatprep.subr.bf16.mxu0 %v2518_v22  ;;  %v1536_v14 = vshrl.u32 %v2853_v12, 16  ;;  %v1539_v20 = vshll.u32 %v2853_v12, 16 }
  0x44   : > { %2356 = vmatprep.subr.bf16.mxu1 %v2519_v24 }
  0x45   : > { %v1538_v28 = vrot.slane %v1536_v14, 4  ;;  %v1541_v30 = vrot.slane %v1539_v20, 5  ;;  %v1406_v14 = vrot.slane %v2869_v19, 4  ;;  %v2543_v20 = vld [vmem:[%s3034_s3 + $0x1f0] sm:$0xff]  }
  0x46   : > { %2337 = vmatpush3.bf16.msra.mxu0 %v2518_v22  ;;  %v2875_v22 = vrot.slane %v1142_v11, 4 }
  0x47   : > { %2357 = vmatpush3.bf16.msra.mxu1 %v2519_v24  ;;  %2338 = vmatprep.subr.bf16.mxu0 %v2520_v31  ;;  %v1553_v24 = vshll.u32 %v2869_v19, 16  ;;  %v1542_v36 = vor.u32 %v1541_v30, %v1538_v28  ;;  %v2551_v28 = vld [vmem:[%s3034_s3 + $0x1d0] sm:$0xff]   ;;  %v2553_v30 = vld [vmem:[%s3034_s3 + $0x1c8] sm:$0xff]  }
  0x48   : > { %2358 = vmatprep.subr.bf16.mxu1 %v2521_v32  ;;  %v1148_v8 = vsel %vm2740_vm2, %v2875_v22, %v2866_v18  ;;  %v2542_v18 = vld [vmem:[%s3034_s3 + $0x1b0] sm:$0xff]   ;;  %v2544_v22 = vld [vmem:[%s3034_s3 + $0x1a8] sm:$0xff]  }
  0x49   : > { %v1555_v37 = vrot.slane %v1553_v24, 5  ;;  %v2548_v24 = vld [vmem:[%s3034_s3 + $0x198] sm:$0xff]  }
  0x4a   : > { %2339 = vmatpush3.bf16.msra.mxu0 %v2520_v31  ;;  %v2536_v31 = vld [vmem:[%s3034_s3 + $0x108] sm:$0xff]  }
  0x4b   : > { %2359 = vmatpush3.bf16.msra.mxu1 %v2521_v32  ;;  %2364 = vmatprep.subr.bf16.mxu0 %v2522_v43  ;;  %v2891_v32 = vld [vmem:[%s2850_s16 + $0x30] sm:$0xff]  ;;  %v1556_v45 = vor.u32 %v1555_v37, %v1552_v33  ;;  %v2555_v33 = vld [vmem:[%s3034_s3 + $0x1c0] sm:$0xff]  }
  0x4c   : > { %2384 = vmatprep.subr.bf16.mxu1 %v2525_v44  ;;  %v1578_v35 = vshrl.u32 %v2891_v32, 16  ;;  %v1581_v38 = vshll.u32 %v2891_v32, 16  ;;  %v2114_v37 = vcombine.low %v2880_v25, %v2891_v32 }
  0x4d   : > { %2341 = vmatmul.mubr.bf16.vlgmr.msra.gmra.mxu0 %v2010_v50  ;;  %v394_v50 = vld [vmem:[%s2850_s16 + $0x28] sm:$0x11]  ;;  %v1557_v52 = vrot.slane %v1556_v45, 4  ;;  %v2565_v45 = vld [vmem:[%s3034_s3 + $0x200] sm:$0xff]  }
  0x4e   : > { %2365 = vmatpush3.bf16.msra.mxu0 %v2522_v43  ;;  %2361 = vmatmul.mubr.bf16.vlgmr.msra.gmra.mxu1 %v2036_v51  ;;  %v392_v43 = vld [vmem:[%s2850_s16 + $0x18] sm:$0x11]  ;;  %v1573_v55 = vshll.u32 %v394_v50, 16  ;;  %v1580_v56 = vrot.slane %v1578_v35, 4  ;;  %v1408_v35 = vrot.slane %v2891_v32, 4 }
  0x4f   : > { %2385 = vmatpush3.bf16.msra.mxu1 %v2525_v44  ;;  %2366 = vmatprep.subr.bf16.mxu0 %v2526_v53  ;;  %v1543_v44 = vrot.slane %v1542_v36, 4  ;;  %v1559_v49 = vshll.u32 %v392_v43, 16  ;;  %v396_v51 = vld [vmem:[%s2850_s16 + $0x38] sm:$0x11]  ;;  %v2563_v43 = vld [vmem:[%s3034_s3 + $0x210] sm:$0xff]  }
  0x50   : > { %2386 = vmatprep.subr.bf16.mxu1 %v2527_v58  ;;  %2380 = vmatprep.mubr.bf16.mxu0 %v2061_v59  ;;  %v1583_v59 = vrot.slane %v1581_v38, 5  ;;  %v1587_v60 = vshll.u32 %v396_v51, 16  ;;  %v1575_v1 = vrot.slane %v1573_v55, 5  ;;  %v2558_v36 = vld [vmem:[%s3034_s3 + $0x238] sm:$0xff]  }
  0x51   : > { %2400 = vmatprep.mubr.bf16.mxu1 %v2087_v62  ;;  %v965_v62 = vrot.slane %v2803_v39, 4  ;;  %v1548_v2 = vsel %vm2740_vm2, %v1543_v44, %v1547_v57  ;;  %v2540_v39 = vld [vmem:[%s3034_s3 + $0x1b8] sm:$0xff]   ;;  %v2564_v44 = vld [vmem:[%s3034_s3 + $0x208] sm:$0xff]  }
  0x52   : > { %2367 = vmatpush3.bf16.msra.mxu0 %v2526_v53  ;;  %v2538_v53 = vld [vmem:[%s3034_s3 + $0x100] sm:$0xff]   ;;  %v1584_v4 = vor.u32 %v1583_v59, %v1580_v56  ;;  %v1589_v5 = vrot.slane %v1587_v60, 5  ;;  %v2562_v32 = vld [vmem:[%s3034_s3 + $0x218] sm:$0xff]  }
  0x53   : > { %2387 = vmatpush3.bf16.msra.mxu1 %v2527_v58  ;;  %2368 = vmatprep.subr.bf16.mxu0 %v2528_v61  ;;  %v1561_v58 = vrot.slane %v1559_v49, 5 }
  0x54   : > { %2388 = vmatprep.subr.bf16.mxu1 %v2529_v63  ;;  %v1585_v9 = vrot.slane %v1584_v4, 4 }
  0x55   : > { %v1562_v3 = vsel %vm2740_vm2, %v1557_v52, %v1561_v58 }
  0x56   : > { %2369 = vmatpush3.bf16.msra.mxu0 %v2528_v61  ;;  %v2539_v61 = vld [vmem:[%s3034_s3 + $0x140] sm:$0xff]  }
  0x57   : > { %2389 = vmatpush3.bf16.msra.mxu1 %v2529_v63  ;;  %2370 = vmatprep.subr.bf16.mxu0 %v2530_v6  ;;  %v966_v63 = vrot.slane %v2806_v40, 4  ;;  %v1134_v40 = vsel %vm2740_vm2, %v2862_v16, %v2864_v17 }
  0x58   : > { %2390 = vmatprep.subr.bf16.mxu1 %v2531_v7  ;;  %v2088_v16 = vcombine.low %v1134_v40, %v1148_v8 }
  0x59   : > { %v2062_v11 = vcombine.low %v965_v62, %v966_v63 }
  0x5a   : > { %2371 = vmatpush3.bf16.msra.mxu0 %v2530_v6  ;;  %v2914_v6 = vcombine.low %v1548_v2, %v1562_v3 }
  0x5b   : > { %2391 = vmatpush3.bf16.msra.mxu1 %v2531_v7  ;;  %2372 = vmatprep.subr.bf16.mxu0 %v2532_v13  ;;  %v1576_v7 = vsel %vm2740_vm2, %v1571_v0, %v1575_v1 }
  0x5c   : > { %2392 = vmatprep.subr.bf16.mxu1 %v2533_v15 }
  0x5e   : > { %2373 = vmatpush3.bf16.msra.mxu0 %v2532_v13  ;;  %v1405_v13 = vrot.slane %v2853_v12, 4 }
  0x5f   : > { %2393 = vmatpush3.bf16.msra.mxu1 %v2533_v15  ;;  %2374 = vmatprep.subr.bf16.mxu0 %v2534_v21  ;;  %v1590_v15 = vsel %vm2740_vm2, %v1585_v9, %v1589_v5 }
  0x60   : > { %2394 = vmatprep.subr.bf16.mxu1 %v2535_v26  ;;  %v2936_v17 = vcombine.low %v1576_v7, %v1590_v15  ;;  %v2139_v48 = vcombine.low %v1405_v13, %v1406_v14 }
  0x62   : > { %2375 = vmatpush3.bf16.msra.mxu0 %v2534_v21  ;;  %v2113_v21 = vcombine.low %v2853_v12, %v2869_v19  ;;  %v2546_v12 = vld [vmem:[%s3034_s3 + $0x1a0] sm:$0xff]  }
  0x63   : > { %2395 = vmatpush3.bf16.msra.mxu1 %v2535_v26  ;;  %2376 = vmatprep.subr.bf16.mxu0 %v2536_v31  ;;  %v2547_v19 = vld [vmem:[%s3034_s3 + $0x1e0] sm:$0xff]   ;;  %v2549_v26 = vld [vmem:[%s3034_s3 + $0x1d8] sm:$0xff]  }
  0x64   : > { %2396 = vmatprep.subr.bf16.mxu1 %v2537_v34 }
  0x66   : > { %2377 = vmatpush3.bf16.msra.mxu0 %v2536_v31  ;;  %v2554_v31 = vld [vmem:[%s3034_s3 + $0x180] sm:$0xff]  }
  0x67   : > { %2397 = vmatpush3.bf16.msra.mxu1 %v2537_v34  ;;  %2378 = vmatprep.subr.bf16.mxu0 %v2538_v53  ;;  %v1407_v34 = vrot.slane %v2880_v25, 4  ;;  %v2561_v25 = vld [vmem:[%s3034_s3 + $0x220] sm:$0xff]  }
  0x68   : > { %2398 = vmatprep.subr.bf16.mxu1 %v2539_v61 }
  0x69   : > { %v2140_v38 = vcombine.low %v1407_v34, %v1408_v35 }
  0x6a   : > { %2379 = vmatpush3.bf16.msra.mxu0 %v2538_v53 }
  0x6b   : > { %2399 = vmatpush3.bf16.msra.mxu1 %v2539_v61  ;;  %2404 = vmatprep.subr.bf16.mxu0 %v2540_v39 }
  0x6c   : > { %2424 = vmatprep.subr.bf16.mxu1 %v2541_v10 }
  0x6d   : > { %2381 = vmatmul.mubr.bf16.vlgmr.msra.gmra.mxu0 %v2062_v11 }
  0x6e   : > { %2405 = vmatpush3.bf16.msra.mxu0 %v2540_v39  ;;  %2401 = vmatmul.mubr.bf16.vlgmr.msra.gmra.mxu1 %v2088_v16 }
  0x6f   : > { %2425 = vmatpush3.bf16.msra.mxu1 %v2541_v10  ;;  %2406 = vmatprep.subr.bf16.mxu0 %v2542_v18 }
  0x70   : > { %2426 = vmatprep.subr.bf16.mxu1 %v2543_v20  ;;  %2420 = vmatprep.mubr.bf16.mxu0 %v2113_v21 }
  0x71   : > { %2440 = vmatprep.mubr.bf16.mxu1 %v2139_v48 }
  0x72   : > { %2407 = vmatpush3.bf16.msra.mxu0 %v2542_v18 }
  0x73   : > { %2427 = vmatpush3.bf16.msra.mxu1 %v2543_v20  ;;  %2408 = vmatprep.subr.bf16.mxu0 %v2544_v22 }
  0x74   : > { %2428 = vmatprep.subr.bf16.mxu1 %v2545_v23 }
  0x76   : > { %2409 = vmatpush3.bf16.msra.mxu0 %v2544_v22 }
  0x77   : > { %2429 = vmatpush3.bf16.msra.mxu1 %v2545_v23  ;;  %2410 = vmatprep.subr.bf16.mxu0 %v2546_v12 }
  0x78   : > { %2430 = vmatprep.subr.bf16.mxu1 %v2547_v19 }
  0x7a   : > { %2411 = vmatpush3.bf16.msra.mxu0 %v2546_v12 }
  0x7b   : > { %2431 = vmatpush3.bf16.msra.mxu1 %v2547_v19  ;;  %2412 = vmatprep.subr.bf16.mxu0 %v2548_v24 }
  0x7c   : > { %2432 = vmatprep.subr.bf16.mxu1 %v2549_v26 }
  0x7e   : > { %2413 = vmatpush3.bf16.msra.mxu0 %v2548_v24 }
  0x7f   : > { %2433 = vmatpush3.bf16.msra.mxu1 %v2549_v26  ;;  %2414 = vmatprep.subr.bf16.mxu0 %v2550_v27  ;;  %v1743_v26 = vlaneseq }
  0x80   : > { %2434 = vmatprep.subr.bf16.mxu1 %v2551_v28 }
  0x81   : > { %v1744_v35 = vshrl.u32 %v1743_v26, 7 }
  0x82   : > { %2415 = vmatpush3.bf16.msra.mxu0 %v2550_v27 }
  0x83   : > { %2435 = vmatpush3.bf16.msra.mxu1 %v2551_v28  ;;  %2416 = vmatprep.subr.bf16.mxu0 %v2552_v29 }
  0x84   : > { %2436 = vmatprep.subr.bf16.mxu1 %v2553_v30 }
  0x86   : > { %2417 = vmatpush3.bf16.msra.mxu0 %v2552_v29 }
  0x87   : > { %2437 = vmatpush3.bf16.msra.mxu1 %v2553_v30  ;;  %2418 = vmatprep.subr.bf16.mxu0 %v2554_v31 }
  0x88   : > { %2438 = vmatprep.subr.bf16.mxu1 %v2555_v33 }
  0x8a   : > { %2419 = vmatpush3.bf16.msra.mxu0 %v2554_v31 }
  0x8b   : > { %2439 = vmatpush3.bf16.msra.mxu1 %v2555_v33  ;;  %2444 = vmatprep.subr.bf16.mxu0 %v2558_v36 }
  0x8d   : > { %2421 = vmatmul.mubr.bf16.vlgmr.msra.gmra.mxu0 %v2114_v37 }
  0x8e   : > { %2445 = vmatpush3.bf16.msra.mxu0 %v2558_v36  ;;  %2441 = vmatmul.mubr.bf16.vlgmr.msra.gmra.mxu1 %v2140_v38 }
  0x8f   : > { %2446 = vmatprep.subr.bf16.mxu0 %v2559_v41  ;;  %2460 = vmatprep.mubr.bf16.mxu0 %v2914_v6 }
  0x92   : > { %2447 = vmatpush3.bf16.msra.mxu0 %v2559_v41 }
  0x93   : > { %2448 = vmatprep.subr.bf16.mxu0 %v2560_v42 }
  0x96   : > { %2449 = vmatpush3.bf16.msra.mxu0 %v2560_v42  ;;  %v2175_v42 = vld [vmem:[%s3035_s4] ss:$0 sm:$0xff] }
  0x97   : > { %2450 = vmatprep.subr.bf16.mxu0 %v2561_v25 }
  0x9a   : > { %2451 = vmatpush3.bf16.msra.mxu0 %v2561_v25 }
  0x9b   : > { %2452 = vmatprep.subr.bf16.mxu0 %v2562_v32 }
  0x9e   : > { %2453 = vmatpush3.bf16.msra.mxu0 %v2562_v32 }
  0x9f   : > { %2454 = vmatprep.subr.bf16.mxu0 %v2563_v43 }
  0xa2   : > { %2455 = vmatpush3.bf16.msra.mxu0 %v2563_v43 }
  0xa3   : > { %2456 = vmatprep.subr.bf16.mxu0 %v2564_v44 }
  0xa6   : > { %2457 = vmatpush3.bf16.msra.mxu0 %v2564_v44 }
  0xa7   : > { %2458 = vmatprep.subr.bf16.mxu0 %v2565_v45 }
  0xaa   : > { %2459 = vmatpush3.bf16.msra.mxu0 %v2565_v45  ;;  %v2176_v45 = vld [vmem:[%s3036_s5] ss:$0 sm:$0xff] }
  0xad   : > { %2461 = vmatmul.mubr.bf16.vlgmr.msra.gmra.mxu0 %v2936_v17 }
  0xed   : > { %v2302_v46 = vpop.f32.mrf.mxu0 }
  0xee   : > { %v2322_v47 = vpop.f32.mrf.mxu1 }
  0xef   : > { %v528_v49 = vpop.f32.mrf.mxu0  ;;  %v642_v4 = vadd.f32 %v2322_v47, %v2302_v46  ;;  %v1746_v46 = vadd.s32 16, %v1744_v35 }
  0xf0   : > { %v633_v50 = vpop.f32.mrf.mxu1 }
  0xf1   : > { %v2303_v51 = vpop.f32.mrf.mxu0  ;;  %v634_v5 = vadd.f32 %v633_v50, %v528_v49  ;;  %v1747_v49 = vadd.s32 24, %v1744_v35 }
  0xf2   : > { %v2323_v52 = vpop.f32.mrf.mxu1 }
  0xf3   : > { %v531_v54 = vpop.f32.mrf.mxu0  ;;  %v645_v40 = vadd.f32 %v2323_v52, %v2303_v51 }
  0xf4   : > { %v636_v56 = vpop.f32.mrf.mxu1 }
  0xf5   : > { %v637_v10 = vadd.f32 %v636_v56, %v531_v54 }
 0x10d   : > { %v2342_v55 = vpop.f32.mrf.mxu0 }
 0x10e   : > { %v2362_v57 = vpop.f32.mrf.mxu1  ;;  %v831_v6 = vadd.f32 %v2342_v55, %v642_v4  ;;  %v1745_v55 = vadd.s32 8, %v1744_v35 }
 0x10f   : > { %v814_v53 = vpop.f32.mrf.mxu0 }
 0x110   : > { %v944_v59 = vpop.f32.mrf.mxu1  ;;  %v829_v8 = vadd.f32 %v814_v53, %v634_v5  ;;  %v961_v11 = vadd.f32 %v2362_v57, %v831_v6 }
 0x111   : > { %v2343_v58 = vpop.f32.mrf.mxu0 }
 0x112   : > { %v2363_v61 = vpop.f32.mrf.mxu1  ;;  %v832_v13 = vadd.f32 %v2343_v58, %v645_v40  ;;  %v959_v15 = vadd.f32 %v944_v59, %v829_v8  ;;  %v1766_v59 = vand.u32 7, %v1746_v46 }
 0x113   : > { %v817_v60 = vpop.f32.mrf.mxu0 }
 0x114   : > { %v947_v63 = vpop.f32.mrf.mxu1  ;;  %v830_v16 = vadd.f32 %v817_v60, %v637_v10  ;;  %v962_v21 = vadd.f32 %v2363_v61, %v832_v13  ;;  %v1773_v60 = vand.u32 7, %v1747_v49  ;;  %vm1798_vm3 = vcmp.lt.s32.totalorder %v1766_v59, 4 }
 0x116   : > { %v960_v22 = vadd.f32 %v947_v63, %v830_v16  ;;  %vm1799_vm4 = vcmp.lt.s32.totalorder %v1773_v60, 4 }
 0x12d   : > { %v2382_v62 = vpop.f32.mrf.mxu0 }
 0x12e   : > { %v2402_v1 = vpop.f32.mrf.mxu1  ;;  %v1091_v17 = vadd.f32 %v2382_v62, %v961_v11 }
 0x12f   : > { %v1074_v0 = vpop.f32.mrf.mxu0 }
 0x130   : > { %v1256_v3 = vpop.f32.mrf.mxu1  ;;  %v1089_v48 = vadd.f32 %v1074_v0, %v959_v15  ;;  %v1273_v23 = vadd.f32 %v2402_v1, %v1091_v17  ;;  %v1752_v1 = vand.u32 7, %v1744_v35 }
 0x131   : > { %v2383_v2 = vpop.f32.mrf.mxu0 }
 0x132   : > { %v2403_v39 = vpop.f32.mrf.mxu1  ;;  %v1092_v12 = vadd.f32 %v2383_v2, %v962_v21  ;;  %v1271_v27 = vadd.f32 %v1256_v3, %v1089_v48  ;;  %v1759_v2 = vand.u32 7, %v1745_v55  ;;  %vm1796_vm5 = vcmp.lt.s32.totalorder %v1752_v1, 4 }
 0x133   : > { %v1077_v7 = vpop.f32.mrf.mxu0 }
 0x134   : > { %v1259_v14 = vpop.f32.mrf.mxu1  ;;  %v1090_v28 = vadd.f32 %v1077_v7, %v960_v22  ;;  %v1274_v30 = vadd.f32 %v2403_v39, %v1092_v12  ;;  %vm1797_vm6 = vcmp.lt.s32.totalorder %v1759_v2, 4 }
 0x136   : > { %v1272_v36 = vadd.f32 %v1259_v14, %v1090_v28 }
 0x14d   : > { %v2422_v9 = vpop.f32.mrf.mxu0 }
 0x14e   : > { %v2442_v20 = vpop.f32.mrf.mxu1  ;;  %v1403_v29 = vadd.f32 %v2422_v9, %v1273_v23 }
 0x14f   : > { %v1386_v18 = vpop.f32.mrf.mxu0 }
 0x150   : > { %v1516_v24 = vpop.f32.mrf.mxu1  ;;  %v1401_v31 = vadd.f32 %v1386_v18, %v1271_v27  ;;  %v1533_v37 = vadd.f32 %v2442_v20, %v1403_v29 }
 0x151   : > { %v2423_v19 = vpop.f32.mrf.mxu0 }
 0x152   : > { %v2443_v34 = vpop.f32.mrf.mxu1  ;;  %v1404_v38 = vadd.f32 %v2423_v19, %v1274_v30  ;;  %v1531_v25 = vadd.f32 %v1516_v24, %v1401_v31 }
 0x153   : > { %v1389_v33 = vpop.f32.mrf.mxu0 }
 0x154   : > { %v1402_v32 = vadd.f32 %v1389_v33, %v1272_v36  ;;  %v1519_v44 = vpop.f32.mrf.mxu1  ;;  %v1534_v50 = vadd.f32 %v2443_v34, %v1404_v38 }
 0x156   : > { %v1532_v56 = vadd.f32 %v1519_v44, %v1402_v32 }
 0x16d   : > { %v2462_v41 = vpop.f32.mrf.mxu0 }
 0x16e   : > { %v1715_v43 = vadd.f32 %v2462_v41, %v1533_v37 }
 0x16f   : > { %v1698_v47 = vpop.f32.mrf.mxu0 }
 0x170   : > { %v1726_v51 = vmul.f32 %v2175_v42, %v1715_v43  ;;  %v1713_v52 = vadd.f32 %v1698_v47, %v1531_v25 }
 0x171   : > { %v2463_v54 = vpop.f32.mrf.mxu0 }
 0x172   : > { %v1737_v53 = vadd.f32 %v2176_v45, %v1726_v51  ;;  %v1724_v57 = vmul.f32 %v2175_v42, %v1713_v52  ;;  %v1716_v58 = vadd.f32 %v2463_v54, %v1534_v50 }
 0x173   : > { %v1701_v61 = vpop.f32.mrf.mxu0 }
 0x174   : > { %v1735_v62 = vadd.f32 %v2176_v45, %v1724_v57  ;;  %v1727_v63 = vmul.f32 %v2175_v42, %v1716_v58  ;;  %v1714_v0 = vadd.f32 %v1701_v61, %v1532_v56  ;;  %v1741_v3 = vmax.f32 %v1737_v53, 0.0 }
 0x176   : > { %v1738_v4 = vadd.f32 %v2176_v45, %v1727_v63  ;;  %v1725_v5 = vmul.f32 %v2175_v42, %v1714_v0  ;;  %v1739_v6 = vmax.f32 %v1735_v62, 0.0  ;;  %v1802_v40 = vsel %vm1798_vm3, %v1741_v3, 0.0 }
 0x178   : > { %v1742_v7 = vmax.f32 %v1738_v4, 0.0  ;;  %v1736_v39 = vadd.f32 %v2176_v45, %v1725_v5  ;;  %v1800_v11 = vsel %vm1796_vm5, %v1739_v6, 0.0 }
 0x17a   : > { %v1803_v8 = vsel %vm1799_vm4, %v1742_v7, 0.0  ;;  %v1740_v9 = vmax.f32 %v1736_v39, 0.0 }
 0x17b   : > { %v2191_v10 = vpack.c.bf16 %v1803_v8, %v1802_v40 }
 0x17c   : > { %v1801_v13 = vsel %vm1797_vm6, %v1740_v9, 0.0 }
 0x17d   : > { %2193 = vst [vmem:[%s370_s28 + $0x8] sm:$0xff] %v2191_v10   ;;  %v2186_v14 = vpack.c.bf16 %v1801_v13, %v1800_v11 }
 0x17f   : > { %2187 = vst [vmem:[%s370_s28] sm:$0xff] %v2186_v14  }
 0x180 PF: > { %s16_s23 = sadd.s32 1, %s2588_s23   ;;  %s3040_s21 = smov %s2584_s22 }
 0x181   : > { %p13_p5 = scmp.ge.s32.totalorder %s16_s23, 4   ;;  %s3041_s22 = smov %s3043_s24 }
 0x183   :  { %15 = sbr.rel (!%p13_p5) target bundleno = 2 (0x2), region = 88 }

// kernel: _lambda_.21
= control target key start
LH: loop header
LB: loop body
LE: loop exit
PB: predicated region body
PF: predicated region fallthrough
CT: control target
= control target key end

     0   :  { %s2688_s21 = smov 0   ;;  %s2690_s22 = smov 0   ;;  %s3162_s0 = inlined_call_operand.vmem [shape: bf16[2,4,10,128], index: 0, kind: input, shape index: {}]   ;;  %s3163_s1 = inlined_call_operand.vmem [shape: bf16[2,4,10,128], index: 1, kind: input, shape index: {}]   ;;  %s3164_s2 = inlined_call_operand.vmem [shape: bf16[2,4,10,128], index: 2, kind: input, shape index: {}]   ;;  %s3165_s3 = inlined_call_operand.vmem [shape: bf16[9,128,128], index: 3, kind: input, shape index: {}]   ;;  %s3166_s4 = inlined_call_operand.vmem [shape: f32[1,128], index: 4, kind: input, shape index: {}]   ;;  %s3167_s5 = inlined_call_operand.vmem [shape: f32[1,128], index: 5, kind: input, shape index: {}]   ;;  %s3168_s6 = inlined_call_operand.vmem [shape: bf16[2,4,8,128], index: 6, kind: output, shape index: {}]  }
   0x1   :  { %s2692_s23 = smov 0  }
   0x2 LB: > { %s28_s24 = sadd.s32 1, %s2647_s22  ;;  %p1999_p0 = scmp.ge.s32.totalorder %s2651_s23, 1  ;;  %s2651_s23 = sphi %s2692_s23, %s16_s23   ;;  %s2647_s22 = sphi %s2690_s22, %s3174_s22   ;;  %s2643_s21 = sphi %s2688_s21, %s3173_s21  }
   0x3   : > { %p30_p1 = scmp.ge.s32.totalorder %s28_s24, 2  ;;  %p270_p2 = scmp.lt.s32.totalorder %s2651_s23, 3 }
   0x5   : > { %s3176_s24 = smov (%p30_p1, %s28_s24), 0  ;;  %p271_p3 = pnand %p1999_p0, %p270_p2 }
   0x6   : > { %p330_p4 = scmp.lt.s32.totalorder (!%p271_p3), %s2643_s21, 1 }
   0x7   : > { %274 = sbr.rel (%p271_p3) target bundleno = 384 (0x180), region = 44 }
   0xc   : > { %v2551_v0 = vld [vmem:[%s3165_s3 + $0x78] sm:$0xff]   ;;  %v2553_v2 = vld [vmem:[%s3165_s3 + $0x70] sm:$0xff]   ;;  %v2555_v4 = vld [vmem:[%s3165_s3 + $0x68] sm:$0xff]   ;;  %s3178_s21 = smov (!%p330_p4, %s2643_s21), 1  ;;  %vm707_vm0 = vcmask 1042432   ;;  %vm708_vm2 = vcmask 1046532  }
   0xd   : > { %v2552_v1 = vld [vmem:[%s3165_s3 + $0x38] sm:$0xff]   ;;  %2347 = vmatprep.subr.bf16.mxu0 %v2551_v0  ;;  %v2554_v3 = vld [vmem:[%s3165_s3 + $0x30] sm:$0xff]   ;;  %v2556_v5 = vld [vmem:[%s3165_s3 + $0x28] sm:$0xff]   ;;  %s2733_s17 = sshll.u32 %s3178_s21, 5  ;;  %vm413_vm1 = vsmask.f32 3328 }
   0xe   : > { %2367 = vmatprep.subr.bf16.mxu1 %v2552_v1  ;;  %2348 = vmatpush3.bf16.msra.mxu0 %v2551_v0  ;;  %v2557_v6 = vld [vmem:[%s3165_s3 + $0x60] sm:$0xff]   ;;  %v2559_v8 = vld [vmem:[%s3165_s3 + $0x58] sm:$0xff]   ;;  %s2745_s28 = scalar_lea.vmem %s3162_s0, %s2733_s17  ;;  %v2561_v10 = vld [vmem:[%s3165_s3 + $0x50] sm:$0xff]   ;;  %vm414_vm3 = vsmask.f32 7440  ;;  %s2855_s12 = scalar_lea.vmem %s3163_s1, %s2733_s17 }
   0xf   : > { %2368 = vmatpush3.bf16.msra.mxu1 %v2552_v1  ;;  %2349 = vmatprep.subr.bf16.mxu0 %v2553_v2  ;;  %v2558_v7 = vld [vmem:[%s3165_s3 + $0x20] sm:$0xff]   ;;  %v2560_v9 = vld [vmem:[%s3165_s3 + $0x18] sm:$0xff]   ;;  %v2757_v13 = vld [vmem:[%s2745_s28 + $0x8] sm:$0xf]  ;;  %s2962_s18 = scalar_lea.vmem %s3164_s2, %s2733_s17  ;;  %s2245_s27 = sshll.u32 %s3178_s21, 4 }
  0x10   : > { %2369 = vmatprep.subr.bf16.mxu1 %v2554_v3  ;;  %v2751_v11 = vld [vmem:[%s2745_s28] sm:$0xf]  ;;  %v2754_v12 = vld [vmem:[%s2745_s28 + $0x4] sm:$0x1]  ;;  %v2562_v14 = vld [vmem:[%s3165_s3 + $0x10] sm:$0xff]   ;;  %v431_v21 = vshrl.u32 %v2757_v13, 16  ;;  %s370_s30 = scalar_lea.vmem %s3168_s6, %s2245_s27 }
  0x11   : > { %v2763_v15 = vld [vmem:[%s2745_s28 + $0xc] sm:$0x1]  ;;  %v2034_v16 = vcombine.low %v2751_v11, %v2757_v13  ;;  %v417_v18 = vshrl.u32 %v2751_v11, 16  ;;  %v420_v19 = vshll.u32 %v2751_v11, 16  ;;  %v426_v20 = vshll.u32 %v2754_v12, 16  ;;  %vm2798_vm4 = vmor %vm413_vm1, %vm414_vm3  ;;  %v2565_v46 = vld [vmem:[%s3165_s3 + $0x40] sm:$0xff]  }
  0x12   : > { %2350 = vmatpush3.bf16.msra.mxu0 %v2553_v2  ;;  %v2563_v17 = vld [vmem:[%s3165_s3 + $0x48] sm:$0xff]   ;;  %v2775_v22 = vld [vmem:[%s2745_s28 + $0x10] sm:$0xf]  ;;  %v434_v24 = vshll.u32 %v2757_v13, 16  ;;  %v440_v25 = vshll.u32 %v2763_v15, 16  ;;  %v433_v30 = vrot.slane %v431_v21, 4  ;;  %vm2815_vm5 = vmor %vm707_vm0, %vm708_vm2 }
  0x13   : > { %2370 = vmatpush3.bf16.msra.mxu1 %v2554_v3  ;;  %2351 = vmatprep.subr.bf16.mxu0 %v2555_v4  ;;  %v2564_v23 = vld [vmem:[%s3165_s3 + $0x8] sm:$0xff]   ;;  %v2783_v26 = vld [vmem:[%s2745_s28 + $0x14] sm:$0x1]  ;;  %v419_v27 = vrot.slane %v417_v18, 4  ;;  %v422_v28 = vrot.slane %v420_v19, 5  ;;  %v428_v29 = vrot.slane %v426_v20, 5 }
  0x14   : > { %2371 = vmatprep.subr.bf16.mxu1 %v2556_v5  ;;  %2383 = vmatprep.mubr.bf16.mxu1 %v2034_v16  ;;  %v2786_v31 = vld [vmem:[%s2745_s28 + $0x18] sm:$0xf]  ;;  %v436_v32 = vrot.slane %v434_v24, 5  ;;  %v442_v33 = vrot.slane %v440_v25, 5  ;;  %v2789_v34 = vld [vmem:[%s2745_s28 + $0x1c] sm:$0x1] }
  0x15   : > { %v445_v35 = vshrl.u32 %v2775_v22, 16  ;;  %v448_v36 = vshll.u32 %v2775_v22, 16  ;;  %v423_v37 = vor.u32 %v422_v28, %v419_v27  ;;  %v454_v38 = vshll.u32 %v2783_v26, 16  ;;  %v2566_v50 = vld [vmem:[%s3165_s3] sm:$0xff]   ;;  %v2569_v62 = vld [vmem:[%s3165_s3 + $0xb8] sm:$0xff]   ;;  %v2579_v28 = vld [vmem:[%s3165_s3 + $0x90] sm:$0xff]  }
  0x16   : > { %2352 = vmatpush3.bf16.msra.mxu0 %v2555_v4  ;;  %v459_v39 = vshrl.u32 %v2786_v31, 16  ;;  %v462_v40 = vshll.u32 %v2786_v31, 16  ;;  %v437_v42 = vor.u32 %v436_v32, %v433_v30  ;;  %v468_v45 = vshll.u32 %v2789_v34, 16  ;;  %v2570_v1 = vld [vmem:[%s3165_s3 + $0xf8] sm:$0xff]   ;;  %v2861_v16 = vld [vmem:[%s2855_s12] sm:$0xf] }
  0x17   : > { %2372 = vmatpush3.bf16.msra.mxu1 %v2556_v5  ;;  %2353 = vmatprep.subr.bf16.mxu0 %v2557_v6  ;;  %v447_v43 = vrot.slane %v445_v35, 4  ;;  %v450_v44 = vrot.slane %v448_v36, 5  ;;  %v424_v47 = vrot.slane %v423_v37, 4  ;;  %v712_v52 = vrot.slane %v2754_v12, 5  ;;  %v2867_v18 = vld [vmem:[%s2855_s12 + $0x8] sm:$0xf] }
  0x18   : > { %2373 = vmatprep.subr.bf16.mxu1 %v2558_v7  ;;  %v461_v48 = vrot.slane %v459_v39, 4  ;;  %v464_v49 = vrot.slane %v462_v40, 5  ;;  %v438_v51 = vrot.slane %v437_v42, 4  ;;  %v456_v54 = vrot.slane %v454_v38, 5  ;;  %v2577_v20 = vld [vmem:[%s3165_s3 + $0x98] sm:$0xff]   ;;  %v2581_v37 = vld [vmem:[%s3165_s3 + $0x88] sm:$0xff]  }
  0x19   : > { %v451_v53 = vor.u32 %v450_v44, %v447_v43  ;;  %v429_v55 = vsel %vm2798_vm4, %v424_v47, %v428_v29  ;;  %v716_v56 = vrot.slane %v2763_v15, 5  ;;  %v470_v58 = vrot.slane %v468_v45, 5  ;;  %v2575_v15 = vld [vmem:[%s3165_s3 + $0xa0] sm:$0xff]   ;;  %v2578_v21 = vld [vmem:[%s3165_s3 + $0xd8] sm:$0xff]   ;;  %v2580_v29 = vld [vmem:[%s3165_s3 + $0xd0] sm:$0xff]  }
  0x1a   : > { %2354 = vmatpush3.bf16.msra.mxu0 %v2557_v6  ;;  %v465_v57 = vor.u32 %v464_v49, %v461_v48  ;;  %v443_v60 = vsel %vm2798_vm4, %v438_v51, %v442_v33  ;;  %v2044_v4 = vrot.slane %v2751_v11, 9  ;;  %v2035_v6 = vcombine.low %v2775_v22, %v2786_v31  ;;  %v2582_v39 = vld [vmem:[%s3165_s3 + $0xc8] sm:$0xff]   ;;  %v2584_v44 = vld [vmem:[%s3165_s3 + $0xc0] sm:$0xff]   ;;  %v2908_v45 = vld [vmem:[%s2855_s12 + $0x10] sm:$0xf] }
  0x1b   : > { %2374 = vmatpush3.bf16.msra.mxu1 %v2558_v7  ;;  %2355 = vmatprep.subr.bf16.mxu0 %v2559_v8  ;;  %v452_v61 = vrot.slane %v451_v53, 4  ;;  %v2024_v63 = vcombine.low %v429_v55, %v443_v60  ;;  %v2045_v7 = vrot.slane %v2757_v13, 9  ;;  %v2573_v13 = vld [vmem:[%s3165_s3 + $0xa8] sm:$0xff]   ;;  %v2090_v19 = vcombine.low %v2861_v16, %v2867_v18  ;;  %v2913_v49 = vld [vmem:[%s2855_s12 + $0x18] sm:$0xf] }
  0x1c   : > { %2375 = vmatprep.subr.bf16.mxu1 %v2560_v9  ;;  %v466_v0 = vrot.slane %v465_v57, 4  ;;  %v986_v24 = vshll.u32 %v2861_v16, 16  ;;  %v997_v25 = vshrl.u32 %v2867_v18, 16  ;;  %v1000_v27 = vshll.u32 %v2867_v18, 16  ;;  %v384_v47 = vld [vmem:[%s2855_s12 + $0xc] sm:$0x1] }
  0x1d   : > { %v457_v2 = vsel %vm2798_vm4, %v452_v61, %v456_v54  ;;  %2363 = vmatprep.mubr.bf16.mxu0 %v2024_v63  ;;  %v717_v11 = vsel %vm2815_vm5, %v2045_v7, %v716_v56  ;;  %v720_v36 = vrot.slane %v2783_v26, 5  ;;  %v724_v38 = vrot.slane %v2789_v34, 5  ;;  %v2583_v34 = vld [vmem:[%s3165_s3 + $0x80] sm:$0xff]   ;;  %v2585_v54 = vld [vmem:[%s3165_s3 + $0x138] sm:$0xff]   ;;  %v2623_v41 = vld [vmem:[%s3165_s3 + $0x228] sm:$0xff]  }
  0x1e   : > { %2356 = vmatpush3.bf16.msra.mxu0 %v2559_v8  ;;  %v471_v3 = vsel %vm2798_vm4, %v466_v0, %v470_v58  ;;  %v2571_v8 = vld [vmem:[%s3165_s3 + $0xb0] sm:$0xff]   ;;  %v988_v32 = vrot.slane %v986_v24, 5  ;;  %v999_v33 = vrot.slane %v997_v25, 4  ;;  %v1002_v35 = vrot.slane %v1000_v27, 5  ;;  %v2588_v56 = vld [vmem:[%s3165_s3 + $0x178] sm:$0xff]  }
  0x1f   : > { %2376 = vmatpush3.bf16.msra.mxu1 %v2560_v9  ;;  %2357 = vmatprep.subr.bf16.mxu0 %v2561_v10  ;;  %v2025_v5 = vcombine.low %v457_v2, %v471_v3  ;;  %v713_v9 = vsel %vm2815_vm5, %v2044_v4, %v712_v52  ;;  %v2046_v40 = vrot.slane %v2775_v22, 9  ;;  %v2047_v26 = vrot.slane %v2786_v31, 9  ;;  %v2589_v3 = vld [vmem:[%s3165_s3 + $0x130] sm:$0xff]   ;;  %v388_v24 = vld [vmem:[%s2855_s12 + $0x1c] sm:$0x1] }
  0x20   : > { %2377 = vmatprep.subr.bf16.mxu1 %v2562_v14  ;;  %v2064_v12 = vcombine.low %v713_v9, %v717_v11  ;;  %v1003_v43 = vor.u32 %v1002_v35, %v999_v33  ;;  %v1006_v52 = vshll.u32 %v384_v47, 16  ;;  %v2126_v53 = vrot.slane %v2861_v16, 9  ;;  %v2970_v25 = vld [vmem:[%s2962_s18] sm:$0xf]  ;;  %v2973_v27 = vld [vmem:[%s2962_s18 + $0x8] sm:$0xf] }
  0x21   : > { %v721_v22 = vsel %vm2815_vm5, %v2046_v40, %v720_v36  ;;  %v725_v31 = vsel %vm2815_vm5, %v2047_v26, %v724_v38  ;;  %v2127_v55 = vrot.slane %v2867_v18, 9  ;;  %v2091_v63 = vcombine.low %v2908_v45, %v2913_v49  ;;  %v390_v40 = vld [vmem:[%s2962_s18 + $0x4] sm:$0x1] }
  0x22   : > { %2358 = vmatpush3.bf16.msra.mxu0 %v2561_v10  ;;  %v2572_v10 = vld [vmem:[%s3165_s3 + $0xf0] sm:$0xff]   ;;  %v1004_v51 = vrot.slane %v1003_v43, 4  ;;  %v1008_v58 = vrot.slane %v1006_v52, 5  ;;  %v2065_v61 = vcombine.low %v721_v22, %v725_v31  ;;  %v1011_v9 = vshrl.u32 %v2908_v45, 16  ;;  %v392_v43 = vld [vmem:[%s2962_s18 + $0xc] sm:$0x1] }
  0x23   : > { %2378 = vmatpush3.bf16.msra.mxu1 %v2562_v14  ;;  %2359 = vmatprep.subr.bf16.mxu0 %v2563_v17  ;;  %v2574_v14 = vld [vmem:[%s3165_s3 + $0xe8] sm:$0xff]   ;;  %v1014_v11 = vshll.u32 %v2908_v45, 16  ;;  %v1455_v33 = vshrl.u32 %v2973_v27, 16  ;;  %v1458_v35 = vshll.u32 %v2973_v27, 16  ;;  %v1034_v38 = vshll.u32 %v388_v24, 16 }
  0x24   : > { %2379 = vmatprep.subr.bf16.mxu1 %v2564_v23  ;;  %v2128_v52 = vrot.slane %v2908_v45, 9  ;;  %v2602_v45 = vld [vmem:[%s3165_s3 + $0x140] sm:$0xff]  }
  0x25   : > { %v1016_v18 = vrot.slane %v1014_v11, 5  ;;  %v1457_v22 = vrot.slane %v1455_v33, 4  ;;  %v1460_v31 = vrot.slane %v1458_v35, 5  ;;  %v3024_v11 = vld [vmem:[%s2962_s18 + $0x1c] sm:$0x1]  ;;  %v2606_v35 = vld [vmem:[%s3165_s3 + $0x1f0] sm:$0xff]  }
  0x26   : > { %2360 = vmatpush3.bf16.msra.mxu0 %v2563_v17  ;;  %v2576_v17 = vld [vmem:[%s3165_s3 + $0xe0] sm:$0xff]  }
  0x27   : > { %2380 = vmatpush3.bf16.msra.mxu1 %v2564_v23  ;;  %2361 = vmatprep.subr.bf16.mxu0 %v2565_v46  ;;  %v983_v23 = vshrl.u32 %v2861_v16, 16  ;;  %v1013_v16 = vrot.slane %v1011_v9, 4  ;;  %v2209_v9 = vrot.slane %v2973_v27, 9 }
  0x28   : > { %2381 = vmatprep.subr.bf16.mxu1 %v2566_v50 }
  0x29   : > { %v985_v30 = vrot.slane %v983_v23, 4  ;;  %v386_v23 = vld [vmem:[%s2855_s12 + $0x14] sm:$0x1] }
  0x2a   : > { %2362 = vmatpush3.bf16.msra.mxu0 %v2565_v46  ;;  %v382_v46 = vld [vmem:[%s2855_s12 + $0x4] sm:$0x1]  ;;  %v1020_v36 = vshll.u32 %v386_v23, 16 }
  0x2b   : > { %2382 = vmatpush3.bf16.msra.mxu1 %v2566_v50  ;;  %2387 = vmatprep.subr.bf16.mxu0 %v2569_v62  ;;  %v989_v42 = vor.u32 %v988_v32, %v985_v30  ;;  %v992_v50 = vshll.u32 %v382_v46, 16  ;;  %v1170_v60 = vrot.slane %v382_v46, 5  ;;  %v2597_v30 = vld [vmem:[%s3165_s3 + $0x110] sm:$0xff]   ;;  %v1017_v32 = vor.u32 %v1016_v18, %v1013_v16 }
  0x2c   : > { %2407 = vmatprep.subr.bf16.mxu1 %v2570_v1  ;;  %v1022_v46 = vrot.slane %v1020_v36, 5  ;;  %v1640_v18 = vrot.slane %v3024_v11, 5  ;;  %v2172_v36 = vcombine.low %v2970_v25, %v2973_v27  ;;  %v2610_v27 = vld [vmem:[%s3165_s3 + $0x1e0] sm:$0xff]  }
  0x2d   : > { %2364 = vmatmul.mubr.bf16.vlgmr.msra.gmra.mxu0 %v2025_v5  ;;  %v990_v48 = vrot.slane %v989_v42, 4  ;;  %v994_v57 = vrot.slane %v992_v50, 5  ;;  %v1171_v2 = vsel %vm2815_vm5, %v2126_v53, %v1170_v60  ;;  %v2590_v5 = vld [vmem:[%s3165_s3 + $0x170] sm:$0xff]   ;;  %v1450_v50 = vshll.u32 %v390_v40, 16 }
  0x2e   : > { %2384 = vmatmul.mubr.bf16.vlgmr.msra.gmra.mxu1 %v2035_v6  ;;  %2388 = vmatpush3.bf16.msra.mxu0 %v2569_v62  ;;  %v1174_v62 = vrot.slane %v384_v47, 5  ;;  %v1178_v53 = vrot.slane %v386_v23, 5  ;;  %v1461_v60 = vor.u32 %v1460_v31, %v1457_v22 }
  0x2f   : > { %2408 = vmatpush3.bf16.msra.mxu1 %v2570_v1  ;;  %2389 = vmatprep.subr.bf16.mxu0 %v2571_v8  ;;  %v995_v0 = vsel %vm2798_vm4, %v990_v48, %v994_v57  ;;  %v1009_v1 = vsel %vm2798_vm4, %v1004_v51, %v1008_v58  ;;  %v1036_v48 = vrot.slane %v1034_v38, 5  ;;  %v2600_v51 = vld [vmem:[%s3165_s3 + $0x148] sm:$0xff]   ;;  %v1182_v57 = vrot.slane %v388_v24, 5  ;;  %v2601_v58 = vld [vmem:[%s3165_s3 + $0x100] sm:$0xff]  }
  0x30   : > { %2409 = vmatprep.subr.bf16.mxu1 %v2572_v10  ;;  %2403 = vmatprep.mubr.bf16.mxu0 %v2064_v12  ;;  %v1175_v4 = vsel %vm2815_vm5, %v2127_v55, %v1174_v62  ;;  %v2116_v6 = vcombine.low %v995_v0, %v1009_v1  ;;  %v1025_v12 = vshrl.u32 %v2913_v49, 16  ;;  %v1464_v55 = vshll.u32 %v392_v43, 16  ;;  %v3002_v62 = vld [vmem:[%s2962_s18 + $0x10] sm:$0xf]  ;;  %v3005_v0 = vld [vmem:[%s2962_s18 + $0x14] sm:$0x1] }
  0x31   : > { %2423 = vmatprep.mubr.bf16.mxu1 %v2090_v19  ;;  %v2146_v7 = vcombine.low %v1171_v2, %v1175_v4  ;;  %v2596_v19 = vld [vmem:[%s3165_s3 + $0x158] sm:$0xff]   ;;  %v2608_v38 = vld [vmem:[%s3165_s3 + $0x1e8] sm:$0xff]  }
  0x32   : > { %2390 = vmatpush3.bf16.msra.mxu0 %v2571_v8  ;;  %v2591_v8 = vld [vmem:[%s3165_s3 + $0x128] sm:$0xff]  }
  0x33   : > { %2410 = vmatpush3.bf16.msra.mxu1 %v2572_v10  ;;  %2391 = vmatprep.subr.bf16.mxu0 %v2573_v13  ;;  %v2592_v10 = vld [vmem:[%s3165_s3 + $0x168] sm:$0xff]  }
  0x34   : > { %2411 = vmatprep.subr.bf16.mxu1 %v2574_v14 }
  0x36   : > { %2392 = vmatpush3.bf16.msra.mxu0 %v2573_v13  ;;  %v1028_v13 = vshll.u32 %v2913_v49, 16 }
  0x37   : > { %2412 = vmatpush3.bf16.msra.mxu1 %v2574_v14  ;;  %2393 = vmatprep.subr.bf16.mxu0 %v2575_v15  ;;  %v2593_v14 = vld [vmem:[%s3165_s3 + $0x120] sm:$0xff]  }
  0x38   : > { %2413 = vmatprep.subr.bf16.mxu1 %v2576_v17 }
  0x3a   : > { %2394 = vmatpush3.bf16.msra.mxu0 %v2575_v15  ;;  %v2594_v15 = vld [vmem:[%s3165_s3 + $0x160] sm:$0xff]  }
  0x3b   : > { %2414 = vmatpush3.bf16.msra.mxu1 %v2576_v17  ;;  %2395 = vmatprep.subr.bf16.mxu0 %v2577_v20  ;;  %v2595_v17 = vld [vmem:[%s3165_s3 + $0x118] sm:$0xff]  }
  0x3c   : > { %2415 = vmatprep.subr.bf16.mxu1 %v2578_v21 }
  0x3e   : > { %2396 = vmatpush3.bf16.msra.mxu0 %v2577_v20  ;;  %v1027_v20 = vrot.slane %v1025_v12, 4  ;;  %v1632_v12 = vrot.slane %v392_v43, 5 }
  0x3f   : > { %2416 = vmatpush3.bf16.msra.mxu1 %v2578_v21  ;;  %2397 = vmatprep.subr.bf16.mxu0 %v2579_v28  ;;  %v1030_v21 = vrot.slane %v1028_v13, 5  ;;  %v2210_v13 = vrot.slane %v3002_v62, 9 }
  0x40   : > { %2417 = vmatprep.subr.bf16.mxu1 %v2580_v29 }
  0x42   : > { %2398 = vmatpush3.bf16.msra.mxu0 %v2579_v28  ;;  %v1441_v28 = vshrl.u32 %v2970_v25, 16 }
  0x43   : > { %2418 = vmatpush3.bf16.msra.mxu1 %v2580_v29  ;;  %2399 = vmatprep.subr.bf16.mxu0 %v2581_v37  ;;  %v1444_v29 = vshll.u32 %v2970_v25, 16 }
  0x44   : > { %2419 = vmatprep.subr.bf16.mxu1 %v2582_v39  ;;  %v1443_v26 = vrot.slane %v1441_v28, 4 }
  0x45   : > { %v1446_v42 = vrot.slane %v1444_v29, 5 }
  0x46   : > { %2400 = vmatpush3.bf16.msra.mxu0 %v2581_v37  ;;  %v1031_v37 = vor.u32 %v1030_v21, %v1027_v20  ;;  %v3039_v21 = vsel %vm2815_vm5, %v2209_v9, %v1632_v12 }
  0x47   : > { %2420 = vmatpush3.bf16.msra.mxu1 %v2582_v39  ;;  %2401 = vmatprep.subr.bf16.mxu0 %v2583_v34  ;;  %v2598_v39 = vld [vmem:[%s3165_s3 + $0x150] sm:$0xff]  }
  0x48   : > { %2421 = vmatprep.subr.bf16.mxu1 %v2584_v44  ;;  %v1032_v47 = vrot.slane %v1031_v37, 4  ;;  %v2607_v37 = vld [vmem:[%s3165_s3 + $0x1a8] sm:$0xff]  }
  0x4a   : > { %2402 = vmatpush3.bf16.msra.mxu0 %v2583_v34  ;;  %v2599_v34 = vld [vmem:[%s3165_s3 + $0x108] sm:$0xff]   ;;  %v1037_v2 = vsel %vm2798_vm4, %v1032_v47, %v1036_v48  ;;  %v2614_v48 = vld [vmem:[%s3165_s3 + $0x1d0] sm:$0xff]  }
  0x4b   : > { %2422 = vmatpush3.bf16.msra.mxu1 %v2584_v44  ;;  %2427 = vmatprep.subr.bf16.mxu0 %v2585_v54  ;;  %v1018_v44 = vrot.slane %v1017_v32, 4  ;;  %v2605_v32 = vld [vmem:[%s3165_s3 + $0x1b0] sm:$0xff]  }
  0x4c   : > { %2447 = vmatprep.subr.bf16.mxu1 %v2588_v56 }
  0x4d   : > { %2404 = vmatmul.mubr.bf16.vlgmr.msra.gmra.mxu0 %v2065_v61  ;;  %v1452_v61 = vrot.slane %v1450_v50, 5  ;;  %v1023_v1 = vsel %vm2798_vm4, %v1018_v44, %v1022_v46  ;;  %v2613_v44 = vld [vmem:[%s3165_s3 + $0x190] sm:$0xff]   ;;  %v2615_v50 = vld [vmem:[%s3165_s3 + $0x188] sm:$0xff]  }
  0x4e   : > { %2428 = vmatpush3.bf16.msra.mxu0 %v2585_v54  ;;  %2424 = vmatmul.mubr.bf16.vlgmr.msra.gmra.mxu1 %v2091_v63  ;;  %v1447_v54 = vor.u32 %v1446_v42, %v1443_v26  ;;  %v1472_v26 = vshll.u32 %v3002_v62, 16 }
  0x4f   : > { %2448 = vmatpush3.bf16.msra.mxu1 %v2588_v56  ;;  %2429 = vmatprep.subr.bf16.mxu0 %v2589_v3  ;;  %v2129_v56 = vrot.slane %v2913_v49, 9  ;;  %v1466_v49 = vrot.slane %v1464_v55, 5  ;;  %v2616_v55 = vld [vmem:[%s3165_s3 + $0x1c8] sm:$0xff]  }
  0x50   : > { %2449 = vmatprep.subr.bf16.mxu1 %v2590_v5  ;;  %2443 = vmatprep.mubr.bf16.mxu0 %v2116_v6  ;;  %v1448_v63 = vrot.slane %v1447_v54, 4  ;;  %v1462_v6 = vrot.slane %v1461_v60, 4  ;;  %v1474_v31 = vrot.slane %v1472_v26, 5  ;;  %v1492_v54 = vshll.u32 %v3024_v11, 16 }
  0x51   : > { %2463 = vmatprep.mubr.bf16.mxu1 %v2146_v7  ;;  %v1183_v4 = vsel %vm2815_vm5, %v2129_v56, %v1182_v57  ;;  %v2208_v7 = vrot.slane %v2970_v25, 9  ;;  %v2609_v25 = vld [vmem:[%s3165_s3 + $0x1a0] sm:$0xff]  }
  0x52   : > { %2430 = vmatpush3.bf16.msra.mxu0 %v2589_v3  ;;  %v1179_v3 = vsel %vm2815_vm5, %v2128_v52, %v1178_v53  ;;  %v1453_v24 = vsel %vm2798_vm4, %v1448_v63, %v1452_v61  ;;  %v1467_v28 = vsel %vm2798_vm4, %v1462_v6, %v1466_v49  ;;  %v1478_v52 = vshll.u32 %v3005_v0, 16  ;;  %v2617_v56 = vld [vmem:[%s3165_s3 + $0x180] sm:$0xff]   ;;  %v2621_v63 = vld [vmem:[%s3165_s3 + $0x238] sm:$0xff]   ;;  %v2627_v6 = vld [vmem:[%s3165_s3 + $0x208] sm:$0xff]  }
  0x53   : > { %2450 = vmatpush3.bf16.msra.mxu1 %v2590_v5  ;;  %2431 = vmatprep.subr.bf16.mxu0 %v2591_v8  ;;  %v3016_v5 = vld [vmem:[%s2962_s18 + $0x18] sm:$0xf]  ;;  %v2147_v20 = vcombine.low %v1179_v3, %v1183_v4  ;;  %v2198_v59 = vcombine.low %v1453_v24, %v1467_v28  ;;  %v2618_v61 = vld [vmem:[%s3165_s3 + $0x1c0] sm:$0xff]   ;;  %v2622_v3 = vld [vmem:[%s3165_s3 + $0x230] sm:$0xff]  }
  0x54   : > { %2451 = vmatprep.subr.bf16.mxu1 %v2592_v10  ;;  %v1483_v42 = vshrl.u32 %v3016_v5, 16  ;;  %v1486_v43 = vshll.u32 %v3016_v5, 16  ;;  %v2625_v4 = vld [vmem:[%s3165_s3 + $0x218] sm:$0xff]  }
  0x56   : > { %2432 = vmatpush3.bf16.msra.mxu0 %v2591_v8  ;;  %v1628_v8 = vrot.slane %v390_v40, 5  ;;  %v1469_v40 = vshrl.u32 %v3002_v62, 16  ;;  %v1485_v46 = vrot.slane %v1483_v42, 4  ;;  %v1488_v47 = vrot.slane %v1486_v43, 5 }
  0x57   : > { %2452 = vmatpush3.bf16.msra.mxu1 %v2592_v10  ;;  %2433 = vmatprep.subr.bf16.mxu0 %v2593_v14  ;;  %v2603_v10 = vld [vmem:[%s3165_s3 + $0x1b8] sm:$0xff]  }
  0x58   : > { %2453 = vmatprep.subr.bf16.mxu1 %v2594_v15  ;;  %v3033_v16 = vsel %vm2815_vm5, %v2208_v7, %v1628_v8  ;;  %v1471_v22 = vrot.slane %v1469_v40, 4  ;;  %v1489_v53 = vor.u32 %v1488_v47, %v1485_v46  ;;  %v2628_v7 = vld [vmem:[%s3165_s3 + $0x200] sm:$0xff]  }
  0x59   : > { %v2228_v29 = vcombine.low %v3033_v16, %v3039_v21 }
  0x5a   : > { %2434 = vmatpush3.bf16.msra.mxu0 %v2593_v14  ;;  %v1636_v14 = vrot.slane %v3005_v0, 5  ;;  %v1490_v60 = vrot.slane %v1489_v53, 4 }
  0x5b   : > { %2454 = vmatpush3.bf16.msra.mxu1 %v2594_v15  ;;  %2435 = vmatprep.subr.bf16.mxu0 %v2595_v17  ;;  %v2604_v15 = vld [vmem:[%s3165_s3 + $0x1f8] sm:$0xff]  }
  0x5c   : > { %2455 = vmatprep.subr.bf16.mxu1 %v2596_v19  ;;  %v3043_v23 = vsel %vm2815_vm5, %v2210_v13, %v1636_v14 }
  0x5e   : > { %2436 = vmatpush3.bf16.msra.mxu0 %v2595_v17  ;;  %v2211_v17 = vrot.slane %v3016_v5, 9 }
  0x5f   : > { %2456 = vmatpush3.bf16.msra.mxu1 %v2596_v19  ;;  %2437 = vmatprep.subr.bf16.mxu0 %v2597_v30  ;;  %v2117_v19 = vcombine.low %v1023_v1, %v1037_v2  ;;  %v2173_v1 = vcombine.low %v3002_v62, %v3016_v5  ;;  %v2624_v62 = vld [vmem:[%s3165_s3 + $0x220] sm:$0xff]   ;;  %v2626_v5 = vld [vmem:[%s3165_s3 + $0x210] sm:$0xff]  }
  0x60   : > { %2457 = vmatprep.subr.bf16.mxu1 %v2598_v39 }
  0x62   : > { %2438 = vmatpush3.bf16.msra.mxu0 %v2597_v30  ;;  %v3053_v30 = vsel %vm2815_vm5, %v2211_v17, %v1640_v18 }
  0x63   : > { %2458 = vmatpush3.bf16.msra.mxu1 %v2598_v39  ;;  %2439 = vmatprep.subr.bf16.mxu0 %v2599_v34  ;;  %v2229_v33 = vcombine.low %v3043_v23, %v3053_v30  ;;  %v2611_v39 = vld [vmem:[%s3165_s3 + $0x198] sm:$0xff]  }
  0x64   : > { %2459 = vmatprep.subr.bf16.mxu1 %v2600_v51 }
  0x66   : > { %2440 = vmatpush3.bf16.msra.mxu0 %v2599_v34  ;;  %v2612_v34 = vld [vmem:[%s3165_s3 + $0x1d8] sm:$0xff]  }
  0x67   : > { %2460 = vmatpush3.bf16.msra.mxu1 %v2600_v51  ;;  %2441 = vmatprep.subr.bf16.mxu0 %v2601_v58  ;;  %v1475_v51 = vor.u32 %v1474_v31, %v1471_v22 }
  0x68   : > { %2461 = vmatprep.subr.bf16.mxu1 %v2602_v45 }
  0x69   : > { %v1476_v57 = vrot.slane %v1475_v51, 4 }
  0x6a   : > { %2442 = vmatpush3.bf16.msra.mxu0 %v2601_v58  ;;  %v1480_v58 = vrot.slane %v1478_v52, 5 }
  0x6b   : > { %2462 = vmatpush3.bf16.msra.mxu1 %v2602_v45  ;;  %2467 = vmatprep.subr.bf16.mxu0 %v2603_v10  ;;  %v1494_v45 = vrot.slane %v1492_v54, 5 }
  0x6c   : > { %2487 = vmatprep.subr.bf16.mxu1 %v2604_v15  ;;  %v1481_v49 = vsel %vm2798_vm4, %v1476_v57, %v1480_v58 }
  0x6d   : > { %2444 = vmatmul.mubr.bf16.vlgmr.msra.gmra.mxu0 %v2117_v19  ;;  %v1495_v0 = vsel %vm2798_vm4, %v1490_v60, %v1494_v45 }
  0x6e   : > { %2468 = vmatpush3.bf16.msra.mxu0 %v2603_v10  ;;  %2464 = vmatmul.mubr.bf16.vlgmr.msra.gmra.mxu1 %v2147_v20  ;;  %v2199_v2 = vcombine.low %v1481_v49, %v1495_v0 }
  0x6f   : > { %2488 = vmatpush3.bf16.msra.mxu1 %v2604_v15  ;;  %2469 = vmatprep.subr.bf16.mxu0 %v2605_v32 }
  0x70   : > { %2489 = vmatprep.subr.bf16.mxu1 %v2606_v35  ;;  %2483 = vmatprep.mubr.bf16.mxu0 %v2172_v36 }
  0x71   : > { %2503 = vmatprep.mubr.bf16.mxu1 %v2198_v59 }
  0x72   : > { %2470 = vmatpush3.bf16.msra.mxu0 %v2605_v32 }
  0x73   : > { %2490 = vmatpush3.bf16.msra.mxu1 %v2606_v35  ;;  %2471 = vmatprep.subr.bf16.mxu0 %v2607_v37 }
  0x74   : > { %2491 = vmatprep.subr.bf16.mxu1 %v2608_v38 }
  0x76   : > { %2472 = vmatpush3.bf16.msra.mxu0 %v2607_v37 }
  0x77   : > { %2492 = vmatpush3.bf16.msra.mxu1 %v2608_v38  ;;  %2473 = vmatprep.subr.bf16.mxu0 %v2609_v25 }
  0x78   : > { %2493 = vmatprep.subr.bf16.mxu1 %v2610_v27 }
  0x7a   : > { %2474 = vmatpush3.bf16.msra.mxu0 %v2609_v25 }
  0x7b   : > { %2494 = vmatpush3.bf16.msra.mxu1 %v2610_v27  ;;  %2475 = vmatprep.subr.bf16.mxu0 %v2611_v39 }
  0x7c   : > { %2495 = vmatprep.subr.bf16.mxu1 %v2612_v34 }
  0x7e   : > { %2476 = vmatpush3.bf16.msra.mxu0 %v2611_v39 }
  0x7f   : > { %2496 = vmatpush3.bf16.msra.mxu1 %v2612_v34  ;;  %2477 = vmatprep.subr.bf16.mxu0 %v2613_v44 }
  0x80   : > { %2497 = vmatprep.subr.bf16.mxu1 %v2614_v48 }
  0x82   : > { %2478 = vmatpush3.bf16.msra.mxu0 %v2613_v44 }
  0x83   : > { %2498 = vmatpush3.bf16.msra.mxu1 %v2614_v48  ;;  %2479 = vmatprep.subr.bf16.mxu0 %v2615_v50 }
  0x84   : > { %2499 = vmatprep.subr.bf16.mxu1 %v2616_v55 }
  0x86   : > { %2480 = vmatpush3.bf16.msra.mxu0 %v2615_v50 }
  0x87   : > { %2500 = vmatpush3.bf16.msra.mxu1 %v2616_v55  ;;  %2481 = vmatprep.subr.bf16.mxu0 %v2617_v56  ;;  %v1794_v55 = vlaneseq }
  0x88   : > { %2501 = vmatprep.subr.bf16.mxu1 %v2618_v61 }
  0x89   : > { %v1795_v49 = vshrl.u32 %v1794_v55, 7 }
  0x8a   : > { %2482 = vmatpush3.bf16.msra.mxu0 %v2617_v56 }
  0x8b   : > { %2502 = vmatpush3.bf16.msra.mxu1 %v2618_v61  ;;  %2507 = vmatprep.subr.bf16.mxu0 %v2621_v63 }
  0x8d   : > { %2484 = vmatmul.mubr.bf16.vlgmr.msra.gmra.mxu0 %v2173_v1 }
  0x8e   : > { %2508 = vmatpush3.bf16.msra.mxu0 %v2621_v63  ;;  %2504 = vmatmul.mubr.bf16.vlgmr.msra.gmra.mxu1 %v2199_v2 }
  0x8f   : > { %2509 = vmatprep.subr.bf16.mxu0 %v2622_v3  ;;  %2523 = vmatprep.mubr.bf16.mxu0 %v2228_v29 }
  0x92   : > { %2510 = vmatpush3.bf16.msra.mxu0 %v2622_v3 }
  0x93   : > { %2511 = vmatprep.subr.bf16.mxu0 %v2623_v41 }
  0x96   : > { %2512 = vmatpush3.bf16.msra.mxu0 %v2623_v41  ;;  %v2238_v41 = vld [vmem:[%s3166_s4] ss:$0 sm:$0xff] }
  0x97   : > { %2513 = vmatprep.subr.bf16.mxu0 %v2624_v62 }
  0x9a   : > { %2514 = vmatpush3.bf16.msra.mxu0 %v2624_v62 }
  0x9b   : > { %2515 = vmatprep.subr.bf16.mxu0 %v2625_v4 }
  0x9e   : > { %2516 = vmatpush3.bf16.msra.mxu0 %v2625_v4 }
  0x9f   : > { %2517 = vmatprep.subr.bf16.mxu0 %v2626_v5 }
  0xa2   : > { %2518 = vmatpush3.bf16.msra.mxu0 %v2626_v5 }
  0xa3   : > { %2519 = vmatprep.subr.bf16.mxu0 %v2627_v6 }
  0xa6   : > { %2520 = vmatpush3.bf16.msra.mxu0 %v2627_v6 }
  0xa7   : > { %2521 = vmatprep.subr.bf16.mxu0 %v2628_v7 }
  0xaa   : > { %2522 = vmatpush3.bf16.msra.mxu0 %v2628_v7  ;;  %v2239_v7 = vld [vmem:[%s3167_s5] ss:$0 sm:$0xff] }
  0xad   : > { %2524 = vmatmul.mubr.bf16.vlgmr.msra.gmra.mxu0 %v2229_v33 }
  0xed   : > { %v2365_v8 = vpop.f32.mrf.mxu0 }
  0xee   : > { %v2385_v9 = vpop.f32.mrf.mxu1 }
  0xef   : > { %v579_v10 = vpop.f32.mrf.mxu0  ;;  %v697_v35 = vadd.f32 %v2385_v9, %v2365_v8  ;;  %v1797_v8 = vadd.s32 16, %v1795_v49 }
  0xf0   : > { %v688_v11 = vpop.f32.mrf.mxu1 }
  0xf1   : > { %v2366_v12 = vpop.f32.mrf.mxu0  ;;  %v689_v36 = vadd.f32 %v688_v11, %v579_v10  ;;  %v1798_v10 = vadd.s32 24, %v1795_v49 }
  0xf2   : > { %v2386_v13 = vpop.f32.mrf.mxu1 }
  0xf3   : > { %v582_v14 = vpop.f32.mrf.mxu0  ;;  %v700_v25 = vadd.f32 %v2386_v13, %v2366_v12 }
  0xf4   : > { %v691_v16 = vpop.f32.mrf.mxu1 }
  0xf5   : > { %v692_v40 = vadd.f32 %v691_v16, %v582_v14 }
 0x10d   : > { %v2405_v15 = vpop.f32.mrf.mxu0 }
 0x10e   : > { %v2425_v18 = vpop.f32.mrf.mxu1  ;;  %v850_v59 = vadd.f32 %v2405_v15, %v697_v35  ;;  %v1796_v15 = vadd.s32 8, %v1795_v49 }
 0x10f   : > { %v833_v17 = vpop.f32.mrf.mxu0 }
 0x110   : > { %v963_v20 = vpop.f32.mrf.mxu1  ;;  %v848_v27 = vadd.f32 %v833_v17, %v689_v36  ;;  %v980_v26 = vadd.f32 %v2425_v18, %v850_v59 }
 0x111   : > { %v2406_v19 = vpop.f32.mrf.mxu0 }
 0x112   : > { %v2426_v24 = vpop.f32.mrf.mxu1  ;;  %v851_v42 = vadd.f32 %v2406_v19, %v700_v25  ;;  %v978_v34 = vadd.f32 %v963_v20, %v848_v27  ;;  %v1817_v20 = vand.u32 7, %v1797_v8 }
 0x113   : > { %v836_v21 = vpop.f32.mrf.mxu0 }
 0x114   : > { %v966_v29 = vpop.f32.mrf.mxu1  ;;  %v849_v44 = vadd.f32 %v836_v21, %v692_v40  ;;  %v981_v47 = vadd.f32 %v2426_v24, %v851_v42  ;;  %v1824_v21 = vand.u32 7, %v1798_v10  ;;  %vm1849_vm6 = vcmp.lt.s32.totalorder %v1817_v20, 4 }
 0x116   : > { %v979_v50 = vadd.f32 %v966_v29, %v849_v44  ;;  %vm1850_vm7 = vcmp.lt.s32.totalorder %v1824_v21, 4 }
 0x12d   : > { %v2445_v28 = vpop.f32.mrf.mxu0 }
 0x12e   : > { %v2465_v23 = vpop.f32.mrf.mxu1  ;;  %v1162_v22 = vadd.f32 %v2445_v28, %v980_v26 }
 0x12f   : > { %v1145_v32 = vpop.f32.mrf.mxu0 }
 0x130   : > { %v1291_v33 = vpop.f32.mrf.mxu1  ;;  %v1160_v48 = vadd.f32 %v1145_v32, %v978_v34  ;;  %v1308_v51 = vadd.f32 %v2465_v23, %v1162_v22  ;;  %v1803_v23 = vand.u32 7, %v1795_v49 }
 0x131   : > { %v2446_v30 = vpop.f32.mrf.mxu0 }
 0x132   : > { %v2466_v38 = vpop.f32.mrf.mxu1  ;;  %v1163_v52 = vadd.f32 %v2446_v30, %v981_v47  ;;  %v1306_v56 = vadd.f32 %v1291_v33, %v1160_v48  ;;  %v1810_v30 = vand.u32 7, %v1796_v15  ;;  %vm1847_vm8 = vcmp.lt.s32.totalorder %v1803_v23, 4 }
 0x133   : > { %v1148_v37 = vpop.f32.mrf.mxu0 }
 0x134   : > { %v1294_v43 = vpop.f32.mrf.mxu1  ;;  %v1161_v57 = vadd.f32 %v1148_v37, %v979_v50  ;;  %v1309_v60 = vadd.f32 %v2466_v38, %v1163_v52  ;;  %vm1848_vm9 = vcmp.lt.s32.totalorder %v1810_v30, 4 }
 0x136   : > { %v1307_v0 = vadd.f32 %v1294_v43, %v1161_v57 }
 0x14d   : > { %v2485_v39 = vpop.f32.mrf.mxu0 }
 0x14e   : > { %v2505_v46 = vpop.f32.mrf.mxu1  ;;  %v1438_v58 = vadd.f32 %v2485_v39, %v1308_v51 }
 0x14f   : > { %v1421_v31 = vpop.f32.mrf.mxu0 }
 0x150   : > { %v1603_v54 = vpop.f32.mrf.mxu1  ;;  %v1436_v45 = vadd.f32 %v1421_v31, %v1306_v56  ;;  %v1620_v1 = vadd.f32 %v2505_v46, %v1438_v58 }
 0x151   : > { %v2486_v53 = vpop.f32.mrf.mxu0 }
 0x152   : > { %v2506_v63 = vpop.f32.mrf.mxu1  ;;  %v1439_v2 = vadd.f32 %v2486_v53, %v1309_v60  ;;  %v1618_v62 = vadd.f32 %v1603_v54, %v1436_v45 }
 0x153   : > { %v1424_v61 = vpop.f32.mrf.mxu0 }
 0x154   : > { %v1437_v4 = vadd.f32 %v1424_v61, %v1307_v0  ;;  %v1606_v6 = vpop.f32.mrf.mxu1  ;;  %v1621_v11 = vadd.f32 %v2506_v63, %v1439_v2 }
 0x156   : > { %v1619_v16 = vadd.f32 %v1606_v6, %v1437_v4 }
 0x16d   : > { %v2525_v3 = vpop.f32.mrf.mxu0 }
 0x16e   : > { %v1766_v5 = vadd.f32 %v2525_v3, %v1620_v1 }
 0x16f   : > { %v1749_v9 = vpop.f32.mrf.mxu0 }
 0x170   : > { %v1777_v12 = vmul.f32 %v2238_v41, %v1766_v5  ;;  %v1764_v13 = vadd.f32 %v1749_v9, %v1618_v62 }
 0x171   : > { %v2526_v14 = vpop.f32.mrf.mxu0 }
 0x172   : > { %v1788_v17 = vadd.f32 %v2239_v7, %v1777_v12  ;;  %v1775_v18 = vmul.f32 %v2238_v41, %v1764_v13  ;;  %v1767_v19 = vadd.f32 %v2526_v14, %v1621_v11 }
 0x173   : > { %v1752_v24 = vpop.f32.mrf.mxu0 }
 0x174   : > { %v1786_v28 = vadd.f32 %v2239_v7, %v1775_v18  ;;  %v1778_v29 = vmul.f32 %v2238_v41, %v1767_v19  ;;  %v1765_v32 = vadd.f32 %v1752_v24, %v1619_v16  ;;  %v1792_v33 = vmax.f32 %v1788_v17, 0.0 }
 0x176   : > { %v1789_v35 = vadd.f32 %v2239_v7, %v1778_v29  ;;  %v1776_v36 = vmul.f32 %v2238_v41, %v1765_v32  ;;  %v1790_v59 = vmax.f32 %v1786_v28, 0.0  ;;  %v1853_v25 = vsel %vm1849_vm6, %v1792_v33, 0.0 }
 0x178   : > { %v1793_v37 = vmax.f32 %v1789_v35, 0.0  ;;  %v1787_v38 = vadd.f32 %v2239_v7, %v1776_v36  ;;  %v1851_v26 = vsel %vm1847_vm8, %v1790_v59, 0.0 }
 0x17a   : > { %v1854_v27 = vsel %vm1850_vm7, %v1793_v37, 0.0  ;;  %v1791_v39 = vmax.f32 %v1787_v38, 0.0 }
 0x17b   : > { %v2254_v40 = vpack.c.bf16 %v1854_v27, %v1853_v25 }
 0x17c   : > { %v1852_v42 = vsel %vm1848_vm9, %v1791_v39, 0.0 }
 0x17d   : > { %2256 = vst [vmem:[%s370_s30 + $0x8] sm:$0xff] %v2254_v40   ;;  %v2249_v43 = vpack.c.bf16 %v1852_v42, %v1851_v26 }
 0x17f   : > { %2250 = vst [vmem:[%s370_s30] sm:$0xff] %v2249_v43  }
 0x180 PF: > { %s16_s23 = sadd.s32 1, %s2651_s23   ;;  %s3173_s21 = smov %s2647_s22 }
 0x181   : > { %p13_p5 = scmp.ge.s32.totalorder %s16_s23, 4   ;;  %s3174_s22 = smov %s3176_s24 }
 0x183   :  { %15 = sbr.rel (!%p13_p5) target bundleno = 2 (0x2), region = 88 }

// kernel: _lambda_.26
= control target key start
LH: loop header
LB: loop body
LE: loop exit
PB: predicated region body
PF: predicated region fallthrough
CT: control target
= control target key end

     0   :  { %s2332_s21 = smov 0   ;;  %s2334_s22 = smov 0   ;;  %s2758_s0 = inlined_call_operand.vmem [shape: bf16[2,2,9,256], index: 0, kind: input, shape index: {}]   ;;  %s2759_s1 = inlined_call_operand.vmem [shape: bf16[2,2,9,256], index: 1, kind: input, shape index: {}]   ;;  %s2760_s2 = inlined_call_operand.vmem [shape: bf16[2,2,9,256], index: 2, kind: input, shape index: {}]   ;;  %s2761_s3 = inlined_call_operand.vmem [shape: bf16[9,128,128], index: 3, kind: input, shape index: {}]   ;;  %s2762_s4 = inlined_call_operand.vmem [shape: f32[1,128], index: 4, kind: input, shape index: {}]   ;;  %s2763_s5 = inlined_call_operand.vmem [shape: f32[1,128], index: 5, kind: input, shape index: {}]   ;;  %s2764_s6 = inlined_call_operand.vmem [shape: bf16[2,2,8,128], index: 6, kind: output, shape index: {}]  }
   0x1   :  { %s2336_s23 = smov 0  }
   0x2 LB: > { %s28_s24 = sadd.s32 1, %s2289_s22  ;;  %p1678_p0 = scmp.ge.s32.totalorder %s2293_s23, 1  ;;  %s2293_s23 = sphi %s2336_s23, %s16_s23   ;;  %s2289_s22 = sphi %s2334_s22, %s2768_s22   ;;  %s2285_s21 = sphi %s2332_s21, %s2767_s21  }
   0x3   : > { %p30_p1 = scmp.ge.s32.totalorder %s28_s24, 2  ;;  %p270_p2 = scmp.lt.s32.totalorder %s2293_s23, 3 }
   0x5   : > { %s2770_s24 = smov (%p30_p1, %s28_s24), 0  ;;  %p271_p3 = pnand %p1678_p0, %p270_p2 }
   0x6   : > { %p330_p4 = scmp.lt.s32.totalorder (!%p271_p3), %s2285_s21, 1 }
   0x7   : > { %274 = sbr.rel (%p271_p3) target bundleno = 382 (0x17e), region = 44 }
   0xc   : > { %v2196_v0 = vld [vmem:[%s2761_s3 + $0x78] sm:$0xff]   ;;  %v2295_v1 = vmov 0.0   ;;  %v2198_v3 = vld [vmem:[%s2761_s3 + $0x70] sm:$0xff]   ;;  %vm2296_vm0 = vmmov 0   ;;  %v2200_v5 = vld [vmem:[%s2761_s3 + $0x68] sm:$0xff]   ;;  %s2772_s21 = smov (!%p330_p4, %s2285_s21), 1 }
   0xd   : > { %1990 = vmatprep.subr.bf16.mxu0 %v2295_v1  ;;  %2010 = vmatprep.subr.bf16.mxu1 %v2295_v1  ;;  %v2197_v2 = vld [vmem:[%s2761_s3 + $0x38] sm:$0xff]   ;;  %v2199_v4 = vld [vmem:[%s2761_s3 + $0x30] sm:$0xff]   ;;  %v2201_v6 = vld [vmem:[%s2761_s3 + $0x28] sm:$0xff]   ;;  %s2396_s19 = sshll.u32 %s2772_s21, 5  ;;  %vm608_vm1 = vsmask.f32 3328 }
   0xe   : > { %1991 = vmatpush3.bf16.msra.mxu0 %v2196_v0  ;;  %2006 = vmatprep.mubr.msk.bf16.mxu0 %vm2296_vm0, %v2295_v1  ;;  %v2202_v7 = vld [vmem:[%s2761_s3 + $0x60] sm:$0xff]   ;;  %v2204_v9 = vld [vmem:[%s2761_s3 + $0x58] sm:$0xff]   ;;  %s2407_s28 = scalar_lea.vmem %s2758_s0, %s2396_s19  ;;  %v2206_v11 = vld [vmem:[%s2761_s3 + $0x50] sm:$0xff]   ;;  %vm609_vm2 = vsmask.f32 7440  ;;  %s2505_s10 = scalar_lea.vmem %s2759_s1, %s2396_s19 }
   0xf   : > { %2011 = vmatpush3.bf16.msra.mxu1 %v2197_v2  ;;  %1992 = vmatprep.subr.bf16.mxu0 %v2295_v1  ;;  %v2203_v8 = vld [vmem:[%s2761_s3 + $0x20] sm:$0xff]   ;;  %v2205_v10 = vld [vmem:[%s2761_s3 + $0x18] sm:$0xff]   ;;  %v2207_v12 = vld [vmem:[%s2761_s3 + $0x10] sm:$0xff]  }
  0x10   : > { %2012 = vmatprep.subr.bf16.mxu1 %v2295_v1  ;;  %2026 = vmatprep.mubr.msk.bf16.mxu1 %vm2296_vm0, %v2295_v1  ;;  %v2208_v13 = vld [vmem:[%s2761_s3 + $0x48] sm:$0xff]   ;;  %v373_v14 = vld [vmem:[%s2407_s28] sm:$0xff]  ;;  %v375_v15 = vld [vmem:[%s2407_s28 + $0x10] sm:$0xff] }
  0x11   : > { %v2209_v16 = vld [vmem:[%s2761_s3 + $0x8] sm:$0xff]   ;;  %v403_v17 = vrot.slane %v373_v14, 4  ;;  %v404_v18 = vrot.slane %v375_v15, 4  ;;  %v2210_v19 = vld [vmem:[%s2761_s3 + $0x40] sm:$0xff]   ;;  %v1712_v22 = vcombine.low %v373_v14, %v375_v15  ;;  %v2213_v23 = vld [vmem:[%s2761_s3 + $0xb8] sm:$0xff]   ;;  %v612_v27 = vshrl.u32 %v373_v14, 16 }
  0x12   : > { %1993 = vmatpush3.bf16.msra.mxu0 %v2198_v3  ;;  %v2211_v20 = vld [vmem:[%s2761_s3] sm:$0xff]   ;;  %v2214_v24 = vld [vmem:[%s2761_s3 + $0xf8] sm:$0xff]   ;;  %v2215_v25 = vld [vmem:[%s2761_s3 + $0xb0] sm:$0xff]   ;;  %v615_v29 = vshll.u32 %v373_v14, 16  ;;  %v626_v31 = vshrl.u32 %v375_v15, 16  ;;  %v629_v32 = vshll.u32 %v375_v15, 16 }
  0x13   : > { %2013 = vmatpush3.bf16.msra.mxu1 %v2199_v4  ;;  %1994 = vmatprep.subr.bf16.mxu0 %v2295_v1  ;;  %v1703_v21 = vcombine.low %v403_v17, %v404_v18  ;;  %v2216_v26 = vld [vmem:[%s2761_s3 + $0xf0] sm:$0xff]   ;;  %v2217_v28 = vld [vmem:[%s2761_s3 + $0xa8] sm:$0xff]   ;;  %v614_v33 = vrot.slane %v612_v27, 4  ;;  %v2219_v34 = vld [vmem:[%s2761_s3 + $0xa0] sm:$0xff]  }
  0x14   : > { %2014 = vmatprep.subr.bf16.mxu1 %v2295_v1  ;;  %v2218_v30 = vld [vmem:[%s2761_s3 + $0xe8] sm:$0xff]   ;;  %v617_v35 = vrot.slane %v615_v29, 5  ;;  %v2220_v36 = vld [vmem:[%s2761_s3 + $0xe0] sm:$0xff]   ;;  %v628_v37 = vrot.slane %v626_v31, 4  ;;  %v2221_v38 = vld [vmem:[%s2761_s3 + $0x98] sm:$0xff]   ;;  %v631_v39 = vrot.slane %v629_v32, 5 }
  0x15   : > { %v2222_v40 = vld [vmem:[%s2761_s3 + $0xd8] sm:$0xff]   ;;  %v374_v41 = vld [vmem:[%s2407_s28 + $0x8] sm:$0x11]  ;;  %v2223_v43 = vld [vmem:[%s2761_s3 + $0x90] sm:$0xff]  }
  0x16   : > { %1995 = vmatpush3.bf16.msra.mxu0 %v2200_v5  ;;  %v376_v42 = vld [vmem:[%s2407_s28 + $0x18] sm:$0x11]  ;;  %v618_v44 = vor.u32 %v617_v35, %v614_v33  ;;  %v632_v45 = vor.u32 %v631_v39, %v628_v37  ;;  %v621_v46 = vshll.u32 %v374_v41, 16  ;;  %v2224_v48 = vld [vmem:[%s2761_s3 + $0xd0] sm:$0xff]   ;;  %v2225_v49 = vld [vmem:[%s2761_s3 + $0x88] sm:$0xff]   ;;  %s2543_s28 = scalar_lea.vmem %s2760_s2, %s2396_s19 }
  0x17   : > { %2015 = vmatpush3.bf16.msra.mxu1 %v2201_v6  ;;  %1996 = vmatprep.subr.bf16.mxu0 %v2295_v1  ;;  %v635_v47 = vshll.u32 %v376_v42, 16  ;;  %v2226_v50 = vld [vmem:[%s2761_s3 + $0xc8] sm:$0xff]   ;;  %vm2497_vm3 = vmor %vm608_vm1, %vm609_vm2  ;;  %v2227_v56 = vld [vmem:[%s2761_s3 + $0x80] sm:$0xff]  }
  0x18   : > { %2016 = vmatprep.subr.bf16.mxu1 %v2295_v1  ;;  %v619_v51 = vrot.slane %v618_v44, 4  ;;  %v633_v52 = vrot.slane %v632_v45, 4  ;;  %v623_v53 = vrot.slane %v621_v46, 5  ;;  %v2228_v57 = vld [vmem:[%s2761_s3 + $0xc0] sm:$0xff]   ;;  %v2523_v61 = vld [vmem:[%s2505_s10 + $0x10] sm:$0xff]  ;;  %v2229_v63 = vld [vmem:[%s2761_s3 + $0x138] sm:$0xff]  }
  0x19   : > { %v637_v54 = vrot.slane %v635_v47, 5  ;;  %v2519_v60 = vld [vmem:[%s2505_s10] sm:$0xff]  ;;  %v2231_v2 = vld [vmem:[%s2761_s3 + $0x178] sm:$0xff]   ;;  %v2232_v3 = vld [vmem:[%s2761_s3 + $0x130] sm:$0xff]  }
  0x1a   : > { %1997 = vmatpush3.bf16.msra.mxu0 %v2202_v7  ;;  %v624_v58 = vsel %vm2497_vm3, %v619_v51, %v623_v53  ;;  %v1762_v0 = vcombine.low %v2519_v60, %v2523_v61  ;;  %v2233_v4 = vld [vmem:[%s2761_s3 + $0x170] sm:$0xff]   ;;  %v980_v5 = vshrl.u32 %v2519_v60, 16  ;;  %v983_v6 = vshll.u32 %v2519_v60, 16  ;;  %v2557_v7 = vld [vmem:[%s2543_s28] sm:$0xff]  ;;  %v384_v32 = vld [vmem:[%s2543_s28 + $0x18] sm:$0x11] }
  0x1b   : > { %2017 = vmatpush3.bf16.msra.mxu1 %v2203_v8  ;;  %1998 = vmatprep.subr.bf16.mxu0 %v2295_v1  ;;  %v638_v59 = vsel %vm2497_vm3, %v633_v52, %v637_v54  ;;  %v2234_v8 = vld [vmem:[%s2761_s3 + $0x128] sm:$0xff]   ;;  %v2236_v18 = vld [vmem:[%s2761_s3 + $0x120] sm:$0xff]   ;;  %v2248_v55 = vld [vmem:[%s2761_s3 + $0x1b0] sm:$0xff]  }
  0x1c   : > { %2018 = vmatprep.subr.bf16.mxu1 %v2295_v1  ;;  %v1737_v62 = vcombine.low %v624_v58, %v638_v59  ;;  %v378_v35 = vld [vmem:[%s2505_s10 + $0x8] sm:$0x11]  ;;  %v866_v58 = vrot.slane %v2523_v61, 4  ;;  %v2244_v59 = vld [vmem:[%s2761_s3 + $0x100] sm:$0xff]  }
  0x1d   : > { %v989_v44 = vshll.u32 %v378_v35, 16  ;;  %v2243_v51 = vld [vmem:[%s2761_s3 + $0x148] sm:$0xff]  }
  0x1e   : > { %1999 = vmatpush3.bf16.msra.mxu0 %v2204_v9  ;;  %v2563_v9 = vld [vmem:[%s2543_s28 + $0x10] sm:$0xff] }
  0x1f   : > { %2019 = vmatpush3.bf16.msra.mxu1 %v2205_v10  ;;  %2000 = vmatprep.subr.bf16.mxu0 %v2295_v1  ;;  %v1348_v10 = vshrl.u32 %v2557_v7, 16  ;;  %v1362_v14 = vshrl.u32 %v2563_v9, 16  ;;  %v1365_v15 = vshll.u32 %v2563_v9, 16  ;;  %v991_v53 = vrot.slane %v989_v44, 5 }
  0x20   : > { %2020 = vmatprep.subr.bf16.mxu1 %v2295_v1 }
  0x21   : > { %v1350_v17 = vrot.slane %v1348_v10, 4  ;;  %v2253_v10 = vld [vmem:[%s2761_s3 + $0x1e0] sm:$0xff]  }
  0x22   : > { %2001 = vmatpush3.bf16.msra.mxu0 %v2206_v11  ;;  %v1351_v11 = vshll.u32 %v2557_v7, 16 }
  0x23   : > { %2021 = vmatpush3.bf16.msra.mxu1 %v2207_v12  ;;  %2002 = vmatprep.subr.bf16.mxu0 %v2295_v1  ;;  %v994_v12 = vshrl.u32 %v2523_v61, 16 }
  0x24   : > { %2022 = vmatprep.subr.bf16.mxu1 %v2295_v1 }
  0x25   : > { %v996_v27 = vrot.slane %v994_v12, 4  ;;  %v2255_v12 = vld [vmem:[%s2761_s3 + $0x1d8] sm:$0xff]  }
  0x26   : > { %2003 = vmatpush3.bf16.msra.mxu0 %v2208_v13  ;;  %v2235_v13 = vld [vmem:[%s2761_s3 + $0x168] sm:$0xff]  }
  0x27   : > { %2023 = vmatpush3.bf16.msra.mxu1 %v2209_v16  ;;  %2004 = vmatprep.subr.bf16.mxu0 %v2295_v1  ;;  %v997_v16 = vshll.u32 %v2523_v61, 16 }
  0x28   : > { %2024 = vmatprep.subr.bf16.mxu1 %v2295_v1 }
  0x29   : > { %v999_v31 = vrot.slane %v997_v16, 5  ;;  %v2259_v16 = vld [vmem:[%s2761_s3 + $0x1c8] sm:$0xff]  }
  0x2a   : > { %2005 = vmatpush3.bf16.msra.mxu0 %v2210_v19  ;;  %v1353_v19 = vrot.slane %v1351_v11, 5  ;;  %v2254_v11 = vld [vmem:[%s2761_s3 + $0x198] sm:$0xff]  }
  0x2b   : > { %2025 = vmatpush3.bf16.msra.mxu1 %v2211_v20  ;;  %2030 = vmatprep.subr.bf16.mxu0 %v2295_v1  ;;  %v2237_v20 = vld [vmem:[%s2761_s3 + $0x160] sm:$0xff]   ;;  %v1000_v45 = vor.u32 %v999_v31, %v996_v27  ;;  %v2269_v27 = vld [vmem:[%s2761_s3 + $0x208] sm:$0xff]  }
  0x2c   : > { %2050 = vmatprep.subr.bf16.mxu1 %v2295_v1 }
  0x2d   : > { %2007 = vmatmul.mubr.bf16.vlgmr.msra.gmra.mxu0 %v1703_v21  ;;  %v1364_v21 = vrot.slane %v1362_v14, 4  ;;  %v1001_v54 = vrot.slane %v1000_v45, 4  ;;  %v2257_v14 = vld [vmem:[%s2761_s3 + $0x1d0] sm:$0xff]  }
  0x2e   : > { %2027 = vmatmul.mubr.bf16.vlgmr.msra.gmra.mxu1 %v1712_v22  ;;  %2031 = vmatpush3.bf16.msra.mxu0 %v2213_v23  ;;  %v1354_v22 = vor.u32 %v1353_v19, %v1350_v17  ;;  %v1367_v23 = vrot.slane %v1365_v15, 5  ;;  %v2258_v15 = vld [vmem:[%s2761_s3 + $0x188] sm:$0xff]   ;;  %v2260_v17 = vld [vmem:[%s2761_s3 + $0x180] sm:$0xff]   ;;  %v1234_v19 = vrot.slane %v2563_v9, 4 }
  0x2f   : > { %2051 = vmatpush3.bf16.msra.mxu1 %v2214_v24  ;;  %2032 = vmatprep.subr.bf16.mxu0 %v2295_v1  ;;  %v982_v24 = vrot.slane %v980_v5, 4  ;;  %v2250_v5 = vld [vmem:[%s2761_s3 + $0x1a8] sm:$0xff]  }
  0x30   : > { %2052 = vmatprep.subr.bf16.mxu1 %v2295_v1  ;;  %2046 = vmatprep.mubr.msk.bf16.mxu0 %vm2296_vm0, %v2295_v1  ;;  %v1368_v29 = vor.u32 %v1367_v23, %v1364_v21  ;;  %v1355_v33 = vrot.slane %v1354_v22, 4  ;;  %v1837_v21 = vcombine.low %v2557_v7, %v2563_v9  ;;  %v2263_v22 = vld [vmem:[%s2761_s3 + $0x238] sm:$0xff]   ;;  %v2266_v9 = vld [vmem:[%s2761_s3 + $0x220] sm:$0xff]  }
  0x31   : > { %2066 = vmatprep.mubr.msk.bf16.mxu1 %vm2296_vm0, %v2295_v1 }
  0x32   : > { %2033 = vmatpush3.bf16.msra.mxu0 %v2215_v25  ;;  %v985_v25 = vrot.slane %v983_v6, 5  ;;  %v1369_v37 = vrot.slane %v1368_v29, 4  ;;  %v2251_v6 = vld [vmem:[%s2761_s3 + $0x1e8] sm:$0xff]  }
  0x33   : > { %2053 = vmatpush3.bf16.msra.mxu1 %v2216_v26  ;;  %2034 = vmatprep.subr.bf16.mxu0 %v2295_v1  ;;  %v2238_v26 = vld [vmem:[%s2761_s3 + $0x118] sm:$0xff]  }
  0x34   : > { %2054 = vmatprep.subr.bf16.mxu1 %v2295_v1  ;;  %v986_v41 = vor.u32 %v985_v25, %v982_v24  ;;  %v2264_v24 = vld [vmem:[%s2761_s3 + $0x230] sm:$0xff]   ;;  %v2267_v25 = vld [vmem:[%s2761_s3 + $0x218] sm:$0xff]  }
  0x36   : > { %2035 = vmatpush3.bf16.msra.mxu0 %v2217_v28  ;;  %v382_v28 = vld [vmem:[%s2543_s28 + $0x8] sm:$0x11]  ;;  %v987_v52 = vrot.slane %v986_v41, 4 }
  0x37   : > { %2055 = vmatpush3.bf16.msra.mxu1 %v2218_v30  ;;  %2036 = vmatprep.subr.bf16.mxu0 %v2295_v1  ;;  %v2239_v30 = vld [vmem:[%s2761_s3 + $0x158] sm:$0xff]  }
  0x38   : > { %2056 = vmatprep.subr.bf16.mxu1 %v2295_v1 }
  0x3a   : > { %2037 = vmatpush3.bf16.msra.mxu0 %v2219_v34  ;;  %v1357_v34 = vshll.u32 %v382_v28, 16  ;;  %v2270_v28 = vld [vmem:[%s2761_s3 + $0x200] sm:$0xff]  }
  0x3b   : > { %2057 = vmatpush3.bf16.msra.mxu1 %v2220_v36  ;;  %2038 = vmatprep.subr.bf16.mxu0 %v2295_v1  ;;  %v380_v36 = vld [vmem:[%s2505_s10 + $0x18] sm:$0x11]  ;;  %s1903_s10 = sshll.u32 %s2772_s21, 3 }
  0x3c   : > { %2058 = vmatprep.subr.bf16.mxu1 %v2295_v1  ;;  %v1359_v39 = vrot.slane %v1357_v34, 5  ;;  %v1003_v46 = vshll.u32 %v380_v36, 16  ;;  %s370_s30 = scalar_lea.vmem %s2764_s6, %s1903_s10 }
  0x3e   : > { %2039 = vmatpush3.bf16.msra.mxu0 %v2221_v38  ;;  %v1371_v38 = vshll.u32 %v384_v32, 16  ;;  %v1360_v47 = vsel %vm2497_vm3, %v1355_v33, %v1359_v39 }
  0x3f   : > { %2059 = vmatpush3.bf16.msra.mxu1 %v2222_v40  ;;  %2040 = vmatprep.subr.bf16.mxu0 %v2295_v1  ;;  %v2240_v40 = vld [vmem:[%s2761_s3 + $0x110] sm:$0xff]  }
  0x40   : > { %2060 = vmatprep.subr.bf16.mxu1 %v2295_v1  ;;  %v1373_v42 = vrot.slane %v1371_v38, 5 }
  0x42   : > { %2041 = vmatpush3.bf16.msra.mxu0 %v2223_v43  ;;  %v2241_v43 = vld [vmem:[%s2761_s3 + $0x150] sm:$0xff]  }
  0x43   : > { %2061 = vmatpush3.bf16.msra.mxu1 %v2224_v48  ;;  %2042 = vmatprep.subr.bf16.mxu0 %v2295_v1  ;;  %v1374_v48 = vsel %vm2497_vm3, %v1369_v37, %v1373_v42 }
  0x44   : > { %2062 = vmatprep.subr.bf16.mxu1 %v2295_v1 }
  0x46   : > { %2043 = vmatpush3.bf16.msra.mxu0 %v2225_v49  ;;  %v2608_v49 = vcombine.low %v1360_v47, %v1374_v48 }
  0x47   : > { %2063 = vmatpush3.bf16.msra.mxu1 %v2226_v50  ;;  %2044 = vmatprep.subr.bf16.mxu0 %v2295_v1  ;;  %v2242_v50 = vld [vmem:[%s2761_s3 + $0x108] sm:$0xff]  }
  0x48   : > { %2064 = vmatprep.subr.bf16.mxu1 %v2295_v1 }
  0x4a   : > { %2045 = vmatpush3.bf16.msra.mxu0 %v2227_v56  ;;  %v1005_v56 = vrot.slane %v1003_v46, 5 }
  0x4b   : > { %2065 = vmatpush3.bf16.msra.mxu1 %v2228_v57  ;;  %2070 = vmatprep.subr.bf16.mxu0 %v2295_v1  ;;  %v865_v57 = vrot.slane %v2519_v60, 4 }
  0x4c   : > { %2090 = vmatprep.subr.bf16.mxu1 %v2295_v1  ;;  %v1006_v60 = vsel %vm2497_vm3, %v1001_v54, %v1005_v56 }
  0x4d   : > { %2047 = vmatmul.mubr.bf16.vlgmr.msra.gmra.mxu0 %v1737_v62  ;;  %v2245_v62 = vld [vmem:[%s2761_s3 + $0x140] sm:$0xff]   ;;  %v1787_v61 = vcombine.low %v865_v57, %v866_v58 }
  0x4e   : > { %2071 = vmatpush3.bf16.msra.mxu0 %v2229_v63  ;;  %2067 = vmatmul.mubr.bf16.vlgmr.msra.gmra.mxu1 %v1762_v0  ;;  %v992_v63 = vsel %vm2497_vm3, %v987_v52, %v991_v53  ;;  %v2246_v0 = vld [vmem:[%s2761_s3 + $0x1b8] sm:$0xff]  }
  0x4f   : > { %2091 = vmatpush3.bf16.msra.mxu1 %v2231_v2  ;;  %2072 = vmatprep.subr.bf16.mxu0 %v2295_v1  ;;  %v1812_v2 = vcombine.low %v992_v63, %v1006_v60 }
  0x50   : > { %2092 = vmatprep.subr.bf16.mxu1 %v2295_v1  ;;  %2086 = vmatprep.mubr.msk.bf16.mxu0 %vm2296_vm0, %v2295_v1 }
  0x51   : > { %2106 = vmatprep.mubr.msk.bf16.mxu1 %vm2296_vm0, %v2295_v1 }
  0x52   : > { %2073 = vmatpush3.bf16.msra.mxu0 %v2232_v3  ;;  %v2247_v3 = vld [vmem:[%s2761_s3 + $0x1f8] sm:$0xff]  }
  0x53   : > { %2093 = vmatpush3.bf16.msra.mxu1 %v2233_v4  ;;  %2074 = vmatprep.subr.bf16.mxu0 %v2295_v1  ;;  %v2249_v4 = vld [vmem:[%s2761_s3 + $0x1f0] sm:$0xff]  }
  0x54   : > { %2094 = vmatprep.subr.bf16.mxu1 %v2295_v1 }
  0x56   : > { %2075 = vmatpush3.bf16.msra.mxu0 %v2234_v8  ;;  %v2252_v8 = vld [vmem:[%s2761_s3 + $0x1a0] sm:$0xff]  }
  0x57   : > { %2095 = vmatpush3.bf16.msra.mxu1 %v2235_v13  ;;  %2076 = vmatprep.subr.bf16.mxu0 %v2295_v1  ;;  %v2256_v13 = vld [vmem:[%s2761_s3 + $0x190] sm:$0xff]  }
  0x58   : > { %2096 = vmatprep.subr.bf16.mxu1 %v2295_v1 }
  0x5a   : > { %2077 = vmatpush3.bf16.msra.mxu0 %v2236_v18  ;;  %v1233_v18 = vrot.slane %v2557_v7, 4  ;;  %v2265_v7 = vld [vmem:[%s2761_s3 + $0x228] sm:$0xff]  }
  0x5b   : > { %2097 = vmatpush3.bf16.msra.mxu1 %v2237_v20  ;;  %2078 = vmatprep.subr.bf16.mxu0 %v2295_v1  ;;  %v2261_v20 = vld [vmem:[%s2761_s3 + $0x1c0] sm:$0xff]  }
  0x5c   : > { %2098 = vmatprep.subr.bf16.mxu1 %v2295_v1  ;;  %v1862_v23 = vcombine.low %v1233_v18, %v1234_v19 }
  0x5e   : > { %2079 = vmatpush3.bf16.msra.mxu0 %v2238_v26  ;;  %v2268_v26 = vld [vmem:[%s2761_s3 + $0x210] sm:$0xff]  }
  0x5f   : > { %2099 = vmatpush3.bf16.msra.mxu1 %v2239_v30  ;;  %2080 = vmatprep.subr.bf16.mxu0 %v2295_v1 }
  0x60   : > { %2100 = vmatprep.subr.bf16.mxu1 %v2295_v1 }
  0x62   : > { %2081 = vmatpush3.bf16.msra.mxu0 %v2240_v40 }
  0x63   : > { %2101 = vmatpush3.bf16.msra.mxu1 %v2241_v43  ;;  %2082 = vmatprep.subr.bf16.mxu0 %v2295_v1 }
  0x64   : > { %2102 = vmatprep.subr.bf16.mxu1 %v2295_v1 }
  0x66   : > { %2083 = vmatpush3.bf16.msra.mxu0 %v2242_v50 }
  0x67   : > { %2103 = vmatpush3.bf16.msra.mxu1 %v2243_v51  ;;  %2084 = vmatprep.subr.bf16.mxu0 %v2295_v1 }
  0x68   : > { %2104 = vmatprep.subr.bf16.mxu1 %v2295_v1 }
  0x6a   : > { %2085 = vmatpush3.bf16.msra.mxu0 %v2244_v59 }
  0x6b   : > { %2105 = vmatpush3.bf16.msra.mxu1 %v2245_v62  ;;  %2110 = vmatprep.subr.bf16.mxu0 %v2295_v1 }
  0x6c   : > { %2130 = vmatprep.subr.bf16.mxu1 %v2295_v1 }
  0x6d   : > { %2087 = vmatmul.mubr.bf16.vlgmr.msra.gmra.mxu0 %v1787_v61 }
  0x6e   : > { %2111 = vmatpush3.bf16.msra.mxu0 %v2246_v0  ;;  %2107 = vmatmul.mubr.bf16.vlgmr.msra.gmra.mxu1 %v1812_v2 }
  0x6f   : > { %2131 = vmatpush3.bf16.msra.mxu1 %v2247_v3  ;;  %2112 = vmatprep.subr.bf16.mxu0 %v2295_v1 }
  0x70   : > { %2132 = vmatprep.subr.bf16.mxu1 %v2295_v1  ;;  %2126 = vmatprep.mubr.msk.bf16.mxu0 %vm2296_vm0, %v2295_v1 }
  0x71   : > { %2146 = vmatprep.mubr.msk.bf16.mxu1 %vm2296_vm0, %v2295_v1 }
  0x72   : > { %2113 = vmatpush3.bf16.msra.mxu0 %v2248_v55 }
  0x73   : > { %2133 = vmatpush3.bf16.msra.mxu1 %v2249_v4  ;;  %2114 = vmatprep.subr.bf16.mxu0 %v2295_v1 }
  0x74   : > { %2134 = vmatprep.subr.bf16.mxu1 %v2295_v1 }
  0x76   : > { %2115 = vmatpush3.bf16.msra.mxu0 %v2250_v5 }
  0x77   : > { %2135 = vmatpush3.bf16.msra.mxu1 %v2251_v6  ;;  %2116 = vmatprep.subr.bf16.mxu0 %v2295_v1 }
  0x78   : > { %2136 = vmatprep.subr.bf16.mxu1 %v2295_v1 }
  0x7a   : > { %2117 = vmatpush3.bf16.msra.mxu0 %v2252_v8  ;;  %v1507_v8 = vlaneseq }
  0x7b   : > { %2137 = vmatpush3.bf16.msra.mxu1 %v2253_v10  ;;  %2118 = vmatprep.subr.bf16.mxu0 %v2295_v1 }
  0x7c   : > { %2138 = vmatprep.subr.bf16.mxu1 %v2295_v1 }
  0x7e   : > { %2119 = vmatpush3.bf16.msra.mxu0 %v2254_v11 }
  0x7f   : > { %2139 = vmatpush3.bf16.msra.mxu1 %v2255_v12  ;;  %2120 = vmatprep.subr.bf16.mxu0 %v2295_v1 }
  0x80   : > { %2140 = vmatprep.subr.bf16.mxu1 %v2295_v1 }
  0x82   : > { %2121 = vmatpush3.bf16.msra.mxu0 %v2256_v13 }
  0x83   : > { %2141 = vmatpush3.bf16.msra.mxu1 %v2257_v14  ;;  %2122 = vmatprep.subr.bf16.mxu0 %v2295_v1  ;;  %v1896_v14 = vld [vmem:[%s2762_s4] ss:$0 sm:$0xff] }
  0x84   : > { %2142 = vmatprep.subr.bf16.mxu1 %v2295_v1 }
  0x86   : > { %2123 = vmatpush3.bf16.msra.mxu0 %v2258_v15  ;;  %v1508_v15 = vshrl.u32 %v1507_v8, 7 }
  0x87   : > { %2143 = vmatpush3.bf16.msra.mxu1 %v2259_v16  ;;  %2124 = vmatprep.subr.bf16.mxu0 %v2295_v1 }
  0x88   : > { %2144 = vmatprep.subr.bf16.mxu1 %v2295_v1  ;;  %v1509_v19 = vadd.s32 8, %v1508_v15 }
  0x8a   : > { %2125 = vmatpush3.bf16.msra.mxu0 %v2260_v17  ;;  %v1897_v17 = vld [vmem:[%s2763_s5] ss:$0 sm:$0xff] }
  0x8b   : > { %2145 = vmatpush3.bf16.msra.mxu1 %v2261_v20  ;;  %2150 = vmatprep.subr.bf16.mxu0 %v2295_v1 }
  0x8d   : > { %2127 = vmatmul.mubr.bf16.vlgmr.msra.gmra.mxu0 %v1837_v21 }
  0x8e   : > { %2151 = vmatpush3.bf16.msra.mxu0 %v2263_v22  ;;  %2147 = vmatmul.mubr.bf16.vlgmr.msra.gmra.mxu1 %v1862_v23 }
  0x8f   : > { %2152 = vmatprep.subr.bf16.mxu0 %v2295_v1  ;;  %2166 = vmatprep.mubr.msk.bf16.mxu0 %vm2296_vm0, %v2295_v1 }
  0x92   : > { %2153 = vmatpush3.bf16.msra.mxu0 %v2264_v24 }
  0x93   : > { %2154 = vmatprep.subr.bf16.mxu0 %v2295_v1 }
  0x96   : > { %2155 = vmatpush3.bf16.msra.mxu0 %v2265_v7  ;;  %v1514_v7 = vand.u32 7, %v1508_v15 }
  0x97   : > { %2156 = vmatprep.subr.bf16.mxu0 %v2295_v1 }
  0x98   : > { %vm1534_vm4 = vcmp.lt.s32.totalorder %v1514_v7, 2 }
  0x9a   : > { %2157 = vmatpush3.bf16.msra.mxu0 %v2266_v9  ;;  %v1521_v9 = vand.u32 7, %v1509_v19 }
  0x9b   : > { %2158 = vmatprep.subr.bf16.mxu0 %v2295_v1 }
  0x9c   : > { %vm1535_vm5 = vcmp.lt.s32.totalorder %v1521_v9, 2 }
  0x9e   : > { %2159 = vmatpush3.bf16.msra.mxu0 %v2267_v25 }
  0x9f   : > { %2160 = vmatprep.subr.bf16.mxu0 %v2295_v1 }
  0xa2   : > { %2161 = vmatpush3.bf16.msra.mxu0 %v2268_v26 }
  0xa3   : > { %2162 = vmatprep.subr.bf16.mxu0 %v2295_v1 }
  0xa6   : > { %2163 = vmatpush3.bf16.msra.mxu0 %v2269_v27 }
  0xa7   : > { %2164 = vmatprep.subr.bf16.mxu0 %v2295_v1 }
  0xaa   : > { %2165 = vmatpush3.bf16.msra.mxu0 %v2270_v28 }
  0xad   : > { %2167 = vmatmul.mubr.bf16.vlgmr.msra.gmra.mxu0 %v2608_v49 }
  0xed   : > { %v508_v29 = vpop.f32.mrf.mxu0 }
  0xee   : > { %v601_v30 = vpop.f32.mrf.mxu1 }
  0xef   : > { %v602_v31 = vadd.f32 %v601_v30, %v508_v29  ;;  %v2008_v32 = vpop.f32.mrf.mxu0 }
  0xf0   : > { %v2028_v33 = vpop.f32.mrf.mxu1 }
  0xf1   : > { %v511_v34 = vpop.f32.mrf.mxu0 }
  0xf2   : > { %v604_v35 = vpop.f32.mrf.mxu1 }
  0xf3   : > { %v605_v36 = vadd.f32 %v604_v35, %v511_v34  ;;  %v2009_v37 = vpop.f32.mrf.mxu0 }
  0xf4   : > { %v2029_v38 = vpop.f32.mrf.mxu1 }
 0x10d   : > { %v742_v39 = vpop.f32.mrf.mxu0 }
 0x10e   : > { %v749_v40 = vadd.f32 %v742_v39, %v602_v31  ;;  %v856_v41 = vpop.f32.mrf.mxu1 }
 0x10f   : > { %v2048_v42 = vpop.f32.mrf.mxu0 }
 0x110   : > { %v863_v43 = vadd.f32 %v856_v41, %v749_v40  ;;  %v2068_v44 = vpop.f32.mrf.mxu1 }
 0x111   : > { %v745_v1 = vpop.f32.mrf.mxu0 }
 0x112   : > { %v750_v45 = vadd.f32 %v745_v1, %v605_v36  ;;  %v859_v46 = vpop.f32.mrf.mxu1 }
 0x113   : > { %v2049_v47 = vpop.f32.mrf.mxu0 }
 0x114   : > { %v864_v48 = vadd.f32 %v859_v46, %v750_v45  ;;  %v2069_v49 = vpop.f32.mrf.mxu1 }
 0x12d   : > { %v970_v50 = vpop.f32.mrf.mxu0 }
 0x12e   : > { %v1110_v51 = vpop.f32.mrf.mxu1  ;;  %v977_v55 = vadd.f32 %v970_v50, %v863_v43 }
 0x12f   : > { %v2088_v52 = vpop.f32.mrf.mxu0 }
 0x130   : > { %v2108_v53 = vpop.f32.mrf.mxu1  ;;  %v1117_v4 = vadd.f32 %v1110_v51, %v977_v55 }
 0x131   : > { %v973_v54 = vpop.f32.mrf.mxu0 }
 0x132   : > { %v1113_v56 = vpop.f32.mrf.mxu1  ;;  %v978_v5 = vadd.f32 %v973_v54, %v864_v48 }
 0x133   : > { %v2089_v57 = vpop.f32.mrf.mxu0 }
 0x134   : > { %v2109_v58 = vpop.f32.mrf.mxu1  ;;  %v1118_v10 = vadd.f32 %v1113_v56, %v978_v5 }
 0x14d   : > { %v1224_v59 = vpop.f32.mrf.mxu0 }
 0x14e   : > { %v1338_v62 = vpop.f32.mrf.mxu1  ;;  %v1231_v6 = vadd.f32 %v1224_v59, %v1117_v4 }
 0x14f   : > { %v2128_v63 = vpop.f32.mrf.mxu0 }
 0x150   : > { %v2148_v60 = vpop.f32.mrf.mxu1  ;;  %v1345_v11 = vadd.f32 %v1338_v62, %v1231_v6 }
 0x151   : > { %v1227_v61 = vpop.f32.mrf.mxu0 }
 0x152   : > { %v1341_v0 = vpop.f32.mrf.mxu1  ;;  %v1232_v12 = vadd.f32 %v1227_v61, %v1118_v10 }
 0x153   : > { %v2129_v2 = vpop.f32.mrf.mxu0 }
 0x154   : > { %v2149_v3 = vpop.f32.mrf.mxu1  ;;  %v1346_v20 = vadd.f32 %v1341_v0, %v1232_v12 }
 0x16d   : > { %v1478_v13 = vpop.f32.mrf.mxu0 }
 0x16e   : > { %v1485_v16 = vadd.f32 %v1478_v13, %v1345_v11 }
 0x16f   : > { %v2168_v18 = vpop.f32.mrf.mxu0 }
 0x170   : > { %v1494_v21 = vmul.f32 %v1896_v14, %v1485_v16 }
 0x171   : > { %v1481_v22 = vpop.f32.mrf.mxu0 }
 0x172   : > { %v1503_v23 = vadd.f32 %v1897_v17, %v1494_v21  ;;  %v1486_v24 = vadd.f32 %v1481_v22, %v1346_v20 }
 0x173   : > { %v2169_v25 = vpop.f32.mrf.mxu0 }
 0x174   : > { %v1495_v26 = vmul.f32 %v1896_v14, %v1486_v24  ;;  %v1505_v27 = vmax.f32 %v1503_v23, 0.0 }
 0x176   : > { %v1504_v28 = vadd.f32 %v1897_v17, %v1495_v26  ;;  %v1536_v30 = vsel %vm1534_vm4, %v1505_v27, 0.0 }
 0x178   : > { %v1506_v29 = vmax.f32 %v1504_v28, 0.0 }
 0x17a   : > { %v1537_v31 = vsel %vm1535_vm5, %v1506_v29, 0.0 }
 0x17b   : > { %v1907_v32 = vpack.c.bf16 %v1537_v31, %v1536_v30 }
 0x17d   : > { %1908 = vst [vmem:[%s370_s30] sm:$0xff] %v1907_v32  }
 0x17e PF: > { %s16_s23 = sadd.s32 1, %s2293_s23   ;;  %s2767_s21 = smov %s2289_s22 }
 0x17f   : > { %p13_p5 = scmp.ge.s32.totalorder %s16_s23, 4   ;;  %s2768_s22 = smov %s2770_s24 }
 0x181   :  { %15 = sbr.rel (!%p13_p5) target bundleno = 2 (0x2), region = 88 }

// kernel: _lambda_.27
= control target key start
LH: loop header
LB: loop body
LE: loop exit
PB: predicated region body
PF: predicated region fallthrough
CT: control target
= control target key end

     0   :  { %s2365_s21 = smov 0   ;;  %s2367_s22 = smov 0   ;;  %s2826_s0 = inlined_call_operand.vmem [shape: bf16[2,2,10,128], index: 0, kind: input, shape index: {}]   ;;  %s2827_s1 = inlined_call_operand.vmem [shape: bf16[2,2,10,128], index: 1, kind: input, shape index: {}]   ;;  %s2828_s2 = inlined_call_operand.vmem [shape: bf16[2,2,10,128], index: 2, kind: input, shape index: {}]   ;;  %s2829_s3 = inlined_call_operand.vmem [shape: bf16[9,128,128], index: 3, kind: input, shape index: {}]   ;;  %s2830_s4 = inlined_call_operand.vmem [shape: f32[1,128], index: 4, kind: input, shape index: {}]   ;;  %s2831_s5 = inlined_call_operand.vmem [shape: f32[1,128], index: 5, kind: input, shape index: {}]   ;;  %s2832_s6 = inlined_call_operand.vmem [shape: bf16[2,2,8,128], index: 6, kind: output, shape index: {}]  }
   0x1   :  { %s2369_s23 = smov 0  }
   0x2 LB: > { %s28_s24 = sadd.s32 1, %s2322_s22  ;;  %p1705_p0 = scmp.ge.s32.totalorder %s2326_s23, 1  ;;  %s2326_s23 = sphi %s2369_s23, %s16_s23   ;;  %s2322_s22 = sphi %s2367_s22, %s2838_s22   ;;  %s2318_s21 = sphi %s2365_s21, %s2837_s21  }
   0x3   : > { %p30_p1 = scmp.ge.s32.totalorder %s28_s24, 2  ;;  %p270_p2 = scmp.lt.s32.totalorder %s2326_s23, 3 }
   0x5   : > { %s2840_s24 = smov (%p30_p1, %s28_s24), 0  ;;  %p271_p3 = pnand %p1705_p0, %p270_p2 }
   0x6   : > { %p330_p4 = scmp.lt.s32.totalorder (!%p271_p3), %s2318_s21, 1 }
   0x7   : > { %274 = sbr.rel (%p271_p3) target bundleno = 382 (0x17e), region = 44 }
   0xc   : > { %v2229_v0 = vld [vmem:[%s2829_s3 + $0x78] sm:$0xff]   ;;  %v2328_v1 = vmov 0.0   ;;  %v2231_v3 = vld [vmem:[%s2829_s3 + $0x70] sm:$0xff]   ;;  %vm2329_vm0 = vmmov 0   ;;  %v2233_v5 = vld [vmem:[%s2829_s3 + $0x68] sm:$0xff]   ;;  %s2842_s21 = smov (!%p330_p4, %s2318_s21), 1 }
   0xd   : > { %2023 = vmatprep.subr.bf16.mxu0 %v2328_v1  ;;  %2043 = vmatprep.subr.bf16.mxu1 %v2328_v1  ;;  %v2230_v2 = vld [vmem:[%s2829_s3 + $0x38] sm:$0xff]   ;;  %v2232_v4 = vld [vmem:[%s2829_s3 + $0x30] sm:$0xff]   ;;  %v2234_v6 = vld [vmem:[%s2829_s3 + $0x28] sm:$0xff]   ;;  %s2417_s15 = sshll.u32 %s2842_s21, 4  ;;  %vm401_vm1 = vsmask.f32 3328 }
   0xe   : > { %2024 = vmatpush3.bf16.msra.mxu0 %v2229_v0  ;;  %2039 = vmatprep.mubr.msk.bf16.mxu0 %vm2329_vm0, %v2328_v1  ;;  %v2235_v7 = vld [vmem:[%s2829_s3 + $0x60] sm:$0xff]   ;;  %s338_s20 = scalar_lea.vmem %s2826_s0, %s2417_s15  ;;  %v2237_v9 = vld [vmem:[%s2829_s3 + $0x58] sm:$0xff]   ;;  %v2239_v14 = vld [vmem:[%s2829_s3 + $0x50] sm:$0xff]   ;;  %vm402_vm2 = vsmask.f32 7440  ;;  %vm639_vm4 = vcmask 1042432   ;;  %s2556_s9 = scalar_lea.vmem %s2827_s1, %s2417_s15 }
   0xf   : > { %2044 = vmatpush3.bf16.msra.mxu1 %v2230_v2  ;;  %2025 = vmatprep.subr.bf16.mxu0 %v2328_v1  ;;  %v2236_v8 = vld [vmem:[%s2829_s3 + $0x20] sm:$0xff]   ;;  %v2238_v10 = vld [vmem:[%s2829_s3 + $0x18] sm:$0xff]   ;;  %v2440_v13 = vld [vmem:[%s338_s20 + $0x8] sm:$0xf]  ;;  %vm640_vm5 = vcmask 1046532   ;;  %s360_s29 = scalar_lea.vmem %s2828_s2, %s2417_s15  ;;  %s1936_s26 = sshll.u32 %s2842_s21, 3 }
  0x10   : > { %2045 = vmatprep.subr.bf16.mxu1 %v2328_v1  ;;  %2059 = vmatprep.mubr.msk.bf16.mxu1 %vm2329_vm0, %v2328_v1  ;;  %v2436_v11 = vld [vmem:[%s338_s20] sm:$0xf]  ;;  %v2438_v12 = vld [vmem:[%s338_s20 + $0x4] sm:$0x1]  ;;  %v2240_v15 = vld [vmem:[%s2829_s3 + $0x10] sm:$0xff]   ;;  %v419_v20 = vshrl.u32 %v2440_v13, 16 }
  0x11   : > { %v2448_v16 = vld [vmem:[%s338_s20 + $0xc] sm:$0x1]  ;;  %v405_v17 = vshrl.u32 %v2436_v11, 16  ;;  %v408_v18 = vshll.u32 %v2436_v11, 16  ;;  %v414_v19 = vshll.u32 %v2438_v12, 16  ;;  %v422_v21 = vshll.u32 %v2440_v13, 16  ;;  %vm2466_vm3 = vmor %vm401_vm1, %vm402_vm2 }
  0x12   : > { %2026 = vmatpush3.bf16.msra.mxu0 %v2231_v3  ;;  %v428_v22 = vshll.u32 %v2448_v16, 16  ;;  %v421_v25 = vrot.slane %v419_v20, 4  ;;  %v2241_v26 = vld [vmem:[%s2829_s3 + $0x48] sm:$0xff]   ;;  %v2243_v36 = vld [vmem:[%s2829_s3 + $0x40] sm:$0xff]   ;;  %v1739_v41 = vcombine.low %v2436_v11, %v2440_v13  ;;  %v2246_v42 = vld [vmem:[%s2829_s3 + $0xb8] sm:$0xff]   ;;  %v644_v54 = vrot.slane %v2438_v12, 5 }
  0x13   : > { %2046 = vmatpush3.bf16.msra.mxu1 %v2232_v4  ;;  %2027 = vmatprep.subr.bf16.mxu0 %v2328_v1  ;;  %v407_v23 = vrot.slane %v405_v17, 4  ;;  %v410_v24 = vrot.slane %v408_v18, 5  ;;  %v424_v27 = vrot.slane %v422_v21, 5  ;;  %v2242_v28 = vld [vmem:[%s2829_s3 + $0x8] sm:$0xff]   ;;  %v416_v30 = vrot.slane %v414_v19, 5  ;;  %v2244_v38 = vld [vmem:[%s2829_s3] sm:$0xff]   ;;  %vm2542_vm6 = vmor %vm639_vm4, %vm640_vm5 }
  0x14   : > { %2047 = vmatprep.subr.bf16.mxu1 %v2328_v1  ;;  %v430_v33 = vrot.slane %v428_v22, 5  ;;  %v2247_v43 = vld [vmem:[%s2829_s3 + $0xf8] sm:$0xff]   ;;  %v2248_v44 = vld [vmem:[%s2829_s3 + $0xb0] sm:$0xff]   ;;  %v2250_v46 = vld [vmem:[%s2829_s3 + $0xa8] sm:$0xff]   ;;  %v648_v55 = vrot.slane %v2448_v16, 5  ;;  %v1748_v58 = vrot.slane %v2436_v11, 9 }
  0x15   : > { %v411_v29 = vor.u32 %v410_v24, %v407_v23  ;;  %v425_v32 = vor.u32 %v424_v27, %v421_v25  ;;  %v2249_v45 = vld [vmem:[%s2829_s3 + $0xf0] sm:$0xff]   ;;  %v2251_v47 = vld [vmem:[%s2829_s3 + $0xe8] sm:$0xff]   ;;  %v2252_v48 = vld [vmem:[%s2829_s3 + $0xa0] sm:$0xff]   ;;  %v1749_v59 = vrot.slane %v2440_v13, 9 }
  0x16   : > { %2028 = vmatpush3.bf16.msra.mxu0 %v2233_v5  ;;  %v2253_v49 = vld [vmem:[%s2829_s3 + $0xe0] sm:$0xff]   ;;  %v2254_v50 = vld [vmem:[%s2829_s3 + $0x98] sm:$0xff]   ;;  %v2256_v52 = vld [vmem:[%s2829_s3 + $0x90] sm:$0xff]   ;;  %v645_v63 = vsel %vm2542_vm6, %v1748_v58, %v644_v54 }
  0x17   : > { %2048 = vmatpush3.bf16.msra.mxu1 %v2234_v6  ;;  %2029 = vmatprep.subr.bf16.mxu0 %v2328_v1  ;;  %v412_v34 = vrot.slane %v411_v29, 4  ;;  %v426_v35 = vrot.slane %v425_v32, 4  ;;  %v2255_v51 = vld [vmem:[%s2829_s3 + $0xd8] sm:$0xff]   ;;  %v2257_v53 = vld [vmem:[%s2829_s3 + $0xd0] sm:$0xff]   ;;  %v2258_v56 = vld [vmem:[%s2829_s3 + $0x88] sm:$0xff]   ;;  %v649_v0 = vsel %vm2542_vm6, %v1749_v59, %v648_v55 }
  0x18   : > { %2049 = vmatprep.subr.bf16.mxu1 %v2328_v1  ;;  %v2259_v60 = vld [vmem:[%s2829_s3 + $0xc8] sm:$0xff]   ;;  %v2260_v61 = vld [vmem:[%s2829_s3 + $0x80] sm:$0xff]   ;;  %v1766_v4 = vcombine.low %v645_v63, %v649_v0  ;;  %v2262_v5 = vld [vmem:[%s2829_s3 + $0x138] sm:$0xff]  }
  0x19   : > { %v417_v37 = vsel %vm2466_vm3, %v412_v34, %v416_v30  ;;  %v431_v39 = vsel %vm2466_vm3, %v426_v35, %v430_v33  ;;  %v2261_v62 = vld [vmem:[%s2829_s3 + $0xc0] sm:$0xff]   ;;  %v2574_v3 = vld [vmem:[%s2556_s9 + $0x8] sm:$0xf]  ;;  %v2266_v11 = vld [vmem:[%s2829_s3 + $0x170] sm:$0xff]  }
  0x1a   : > { %2030 = vmatpush3.bf16.msra.mxu0 %v2235_v7  ;;  %v1730_v40 = vcombine.low %v417_v37, %v431_v39  ;;  %v2570_v2 = vld [vmem:[%s2556_s9] sm:$0xf]  ;;  %v2264_v7 = vld [vmem:[%s2829_s3 + $0x178] sm:$0xff]   ;;  %v891_v12 = vshrl.u32 %v2574_v3, 16  ;;  %v894_v13 = vshll.u32 %v2574_v3, 16  ;;  %v2268_v19 = vld [vmem:[%s2829_s3 + $0x168] sm:$0xff]  }
  0x1b   : > { %2050 = vmatpush3.bf16.msra.mxu1 %v2236_v8  ;;  %2031 = vmatprep.subr.bf16.mxu0 %v2328_v1  ;;  %v1791_v6 = vcombine.low %v2570_v2, %v2574_v3  ;;  %v877_v8 = vshrl.u32 %v2570_v2, 16  ;;  %v2614_v17 = vld [vmem:[%s360_s29] sm:$0xf]  ;;  %v2616_v18 = vld [vmem:[%s360_s29 + $0x8] sm:$0xf]  ;;  %v2273_v55 = vld [vmem:[%s2829_s3 + $0x110] sm:$0xff]  }
  0x1c   : > { %2051 = vmatprep.subr.bf16.mxu1 %v2328_v1  ;;  %v1253_v20 = vshrl.u32 %v2614_v17, 16  ;;  %v1256_v21 = vshll.u32 %v2614_v17, 16  ;;  %v1267_v22 = vshrl.u32 %v2616_v18, 16  ;;  %v2269_v23 = vld [vmem:[%s2829_s3 + $0x120] sm:$0xff]   ;;  %v1270_v24 = vshll.u32 %v2616_v18, 16  ;;  %v2275_v0 = vld [vmem:[%s2829_s3 + $0x108] sm:$0xff]  }
  0x1d   : > { %v382_v25 = vld [vmem:[%s360_s29 + $0x4] sm:$0x1]  ;;  %v893_v37 = vrot.slane %v891_v12, 4  ;;  %v2279_v31 = vld [vmem:[%s2829_s3 + $0x1b8] sm:$0xff]   ;;  %v2281_v57 = vld [vmem:[%s2829_s3 + $0x1b0] sm:$0xff]  }
  0x1e   : > { %2032 = vmatpush3.bf16.msra.mxu0 %v2237_v9  ;;  %v880_v9 = vshll.u32 %v2570_v2, 16  ;;  %v1255_v27 = vrot.slane %v1253_v20, 4  ;;  %v1262_v29 = vshll.u32 %v382_v25, 16  ;;  %v1269_v30 = vrot.slane %v1267_v22, 4  ;;  %v2270_v34 = vld [vmem:[%s2829_s3 + $0x160] sm:$0xff]   ;;  %v2282_v22 = vld [vmem:[%s2829_s3 + $0x1f0] sm:$0xff]  }
  0x1f   : > { %2052 = vmatpush3.bf16.msra.mxu1 %v2238_v10  ;;  %2033 = vmatprep.subr.bf16.mxu0 %v2328_v1  ;;  %v2265_v10 = vld [vmem:[%s2829_s3 + $0x130] sm:$0xff]   ;;  %v1272_v32 = vrot.slane %v1270_v24, 5  ;;  %v2284_v24 = vld [vmem:[%s2829_s3 + $0x1e8] sm:$0xff]  }
  0x20   : > { %2053 = vmatprep.subr.bf16.mxu1 %v2328_v1  ;;  %v2612_v16 = vrot.slane %v880_v9, 5  ;;  %v1825_v9 = vrot.slane %v2570_v2, 9  ;;  %v2278_v2 = vld [vmem:[%s2829_s3 + $0x140] sm:$0xff]  }
  0x22   : > { %2034 = vmatpush3.bf16.msra.mxu0 %v2239_v14  ;;  %v2605_v14 = vrot.slane %v877_v8, 4  ;;  %v2276_v8 = vld [vmem:[%s2829_s3 + $0x148] sm:$0xff]  }
  0x23   : > { %2054 = vmatpush3.bf16.msra.mxu1 %v2240_v15  ;;  %2035 = vmatprep.subr.bf16.mxu0 %v2328_v1  ;;  %v2267_v15 = vld [vmem:[%s2829_s3 + $0x128] sm:$0xff]  }
  0x24   : > { %2055 = vmatprep.subr.bf16.mxu1 %v2328_v1 }
  0x26   : > { %2036 = vmatpush3.bf16.msra.mxu0 %v2241_v26  ;;  %v384_v26 = vld [vmem:[%s360_s29 + $0xc] sm:$0x1]  ;;  %s370_s29 = scalar_lea.vmem %s2832_s6, %s1936_s26 }
  0x27   : > { %2056 = vmatpush3.bf16.msra.mxu1 %v2242_v28  ;;  %2037 = vmatprep.subr.bf16.mxu0 %v2328_v1  ;;  %v1258_v28 = vrot.slane %v1256_v21, 5  ;;  %v1276_v33 = vshll.u32 %v384_v26, 16  ;;  %v1400_v54 = vrot.slane %v384_v26, 5  ;;  %v2280_v21 = vld [vmem:[%s2829_s3 + $0x1f8] sm:$0xff]   ;;  %v2286_v26 = vld [vmem:[%s2829_s3 + $0x1e0] sm:$0xff]  }
  0x28   : > { %2057 = vmatprep.subr.bf16.mxu1 %v2328_v1 }
  0x29   : > { %v1259_v35 = vor.u32 %v1258_v28, %v1255_v27  ;;  %v1278_v39 = vrot.slane %v1276_v33, 5  ;;  %v2287_v27 = vld [vmem:[%s2829_s3 + $0x198] sm:$0xff]   ;;  %v2292_v33 = vld [vmem:[%s2829_s3 + $0x1c8] sm:$0xff]  }
  0x2a   : > { %2038 = vmatpush3.bf16.msra.mxu0 %v2243_v36  ;;  %v1264_v36 = vrot.slane %v1262_v29, 5  ;;  %v2288_v28 = vld [vmem:[%s2829_s3 + $0x1d8] sm:$0xff]   ;;  %v2289_v29 = vld [vmem:[%s2829_s3 + $0x190] sm:$0xff]  }
  0x2b   : > { %2058 = vmatpush3.bf16.msra.mxu1 %v2244_v38  ;;  %2063 = vmatprep.subr.bf16.mxu0 %v2328_v1  ;;  %v1273_v38 = vor.u32 %v1272_v32, %v1269_v30  ;;  %v2290_v30 = vld [vmem:[%s2829_s3 + $0x1d0] sm:$0xff]   ;;  %v2291_v32 = vld [vmem:[%s2829_s3 + $0x188] sm:$0xff]  }
  0x2c   : > { %2083 = vmatprep.subr.bf16.mxu1 %v2328_v1 }
  0x2d   : > { %2040 = vmatmul.mubr.bf16.vlgmr.msra.gmra.mxu0 %v1730_v40  ;;  %v378_v40 = vld [vmem:[%s2556_s9 + $0x4] sm:$0x1] }
  0x2e   : > { %2060 = vmatmul.mubr.bf16.vlgmr.msra.gmra.mxu1 %v1739_v41  ;;  %2064 = vmatpush3.bf16.msra.mxu0 %v2246_v42  ;;  %v380_v41 = vld [vmem:[%s2556_s9 + $0xc] sm:$0x1]  ;;  %v896_v42 = vrot.slane %v894_v13, 5  ;;  %v2277_v13 = vld [vmem:[%s2829_s3 + $0x100] sm:$0xff]  }
  0x2f   : > { %2084 = vmatpush3.bf16.msra.mxu1 %v2247_v43  ;;  %2065 = vmatprep.subr.bf16.mxu0 %v2328_v1  ;;  %v1260_v43 = vrot.slane %v1259_v35, 4  ;;  %v900_v59 = vshll.u32 %v380_v41, 16  ;;  %v1024_v12 = vrot.slane %v380_v41, 5  ;;  %v2294_v35 = vld [vmem:[%s2829_s3 + $0x1c0] sm:$0xff]   ;;  %v2302_v41 = vld [vmem:[%s2829_s3 + $0x208] sm:$0xff]  }
  0x30   : > { %2085 = vmatprep.subr.bf16.mxu1 %v2328_v1  ;;  %2079 = vmatprep.mubr.msk.bf16.mxu0 %vm2329_vm0, %v2328_v1  ;;  %v897_v58 = vor.u32 %v896_v42, %v893_v37  ;;  %v2296_v37 = vld [vmem:[%s2829_s3 + $0x238] sm:$0xff]   ;;  %v2303_v42 = vld [vmem:[%s2829_s3 + $0x200] sm:$0xff]  }
  0x31   : > { %2099 = vmatprep.mubr.msk.bf16.mxu1 %vm2329_vm0, %v2328_v1 }
  0x32   : > { %2066 = vmatpush3.bf16.msra.mxu0 %v2248_v44  ;;  %v2271_v44 = vld [vmem:[%s2829_s3 + $0x118] sm:$0xff]  }
  0x33   : > { %2086 = vmatpush3.bf16.msra.mxu1 %v2249_v45  ;;  %2067 = vmatprep.subr.bf16.mxu0 %v2328_v1  ;;  %v1274_v45 = vrot.slane %v1273_v38, 4  ;;  %v2297_v38 = vld [vmem:[%s2829_s3 + $0x230] sm:$0xff]  }
  0x34   : > { %2087 = vmatprep.subr.bf16.mxu1 %v2328_v1 }
  0x36   : > { %2068 = vmatpush3.bf16.msra.mxu0 %v2250_v46  ;;  %v2272_v46 = vld [vmem:[%s2829_s3 + $0x158] sm:$0xff]  }
  0x37   : > { %2088 = vmatpush3.bf16.msra.mxu1 %v2251_v47  ;;  %2069 = vmatprep.subr.bf16.mxu0 %v2328_v1  ;;  %v1265_v47 = vsel %vm2466_vm3, %v1260_v43, %v1264_v36  ;;  %v1868_v36 = vcombine.low %v2614_v17, %v2616_v18 }
  0x38   : > { %2089 = vmatprep.subr.bf16.mxu1 %v2328_v1 }
  0x3a   : > { %2070 = vmatpush3.bf16.msra.mxu0 %v2252_v48  ;;  %v1902_v48 = vrot.slane %v2614_v17, 9  ;;  %v2298_v17 = vld [vmem:[%s2829_s3 + $0x228] sm:$0xff]  }
  0x3b   : > { %2090 = vmatpush3.bf16.msra.mxu1 %v2253_v49  ;;  %2071 = vmatprep.subr.bf16.mxu0 %v2328_v1  ;;  %v1279_v49 = vsel %vm2466_vm3, %v1274_v45, %v1278_v39  ;;  %v2300_v39 = vld [vmem:[%s2829_s3 + $0x218] sm:$0xff]  }
  0x3c   : > { %2091 = vmatprep.subr.bf16.mxu1 %v2328_v1 }
  0x3e   : > { %2072 = vmatpush3.bf16.msra.mxu0 %v2254_v50  ;;  %v1396_v50 = vrot.slane %v382_v25, 5  ;;  %v2285_v25 = vld [vmem:[%s2829_s3 + $0x1a0] sm:$0xff]  }
  0x3f   : > { %2092 = vmatpush3.bf16.msra.mxu1 %v2255_v51  ;;  %2073 = vmatprep.subr.bf16.mxu0 %v2328_v1  ;;  %v883_v51 = vor.u32 %v2612_v16, %v2605_v14 }
  0x40   : > { %2093 = vmatprep.subr.bf16.mxu1 %v2328_v1 }
  0x42   : > { %2074 = vmatpush3.bf16.msra.mxu0 %v2256_v52  ;;  %v2652_v52 = vcombine.low %v1265_v47, %v1279_v49 }
  0x43   : > { %2094 = vmatpush3.bf16.msra.mxu1 %v2257_v53  ;;  %2075 = vmatprep.subr.bf16.mxu0 %v2328_v1  ;;  %v1903_v53 = vrot.slane %v2616_v18, 9  ;;  %v2299_v18 = vld [vmem:[%s2829_s3 + $0x220] sm:$0xff]  }
  0x44   : > { %2095 = vmatprep.subr.bf16.mxu1 %v2328_v1 }
  0x46   : > { %2076 = vmatpush3.bf16.msra.mxu0 %v2258_v56  ;;  %v886_v56 = vshll.u32 %v378_v40, 16 }
  0x47   : > { %2096 = vmatpush3.bf16.msra.mxu1 %v2259_v60  ;;  %2077 = vmatprep.subr.bf16.mxu0 %v2328_v1  ;;  %v2660_v60 = vsel %vm2542_vm6, %v1902_v48, %v1396_v50 }
  0x48   : > { %2097 = vmatprep.subr.bf16.mxu1 %v2328_v1 }
  0x4a   : > { %2078 = vmatpush3.bf16.msra.mxu0 %v2260_v61  ;;  %v2274_v61 = vld [vmem:[%s2829_s3 + $0x150] sm:$0xff]  }
  0x4b   : > { %2098 = vmatpush3.bf16.msra.mxu1 %v2261_v62  ;;  %2103 = vmatprep.subr.bf16.mxu0 %v2328_v1  ;;  %v2668_v62 = vsel %vm2542_vm6, %v1903_v53, %v1400_v54 }
  0x4c   : > { %2123 = vmatprep.subr.bf16.mxu1 %v2328_v1  ;;  %v1920_v63 = vcombine.low %v2660_v60, %v2668_v62 }
  0x4d   : > { %2080 = vmatmul.mubr.bf16.vlgmr.msra.gmra.mxu0 %v1766_v4  ;;  %v884_v4 = vrot.slane %v883_v51, 4 }
  0x4e   : > { %2104 = vmatpush3.bf16.msra.mxu0 %v2262_v5  ;;  %2100 = vmatmul.mubr.bf16.vlgmr.msra.gmra.mxu1 %v1791_v6  ;;  %v888_v5 = vrot.slane %v886_v56, 5  ;;  %v898_v6 = vrot.slane %v897_v58, 4 }
  0x4f   : > { %2124 = vmatpush3.bf16.msra.mxu1 %v2264_v7  ;;  %2105 = vmatprep.subr.bf16.mxu0 %v2328_v1  ;;  %v902_v7 = vrot.slane %v900_v59, 5 }
  0x50   : > { %2125 = vmatprep.subr.bf16.mxu1 %v2328_v1  ;;  %2119 = vmatprep.mubr.msk.bf16.mxu0 %vm2329_vm0, %v2328_v1  ;;  %v889_v14 = vsel %vm2466_vm3, %v884_v4, %v888_v5 }
  0x51   : > { %2139 = vmatprep.mubr.msk.bf16.mxu1 %vm2329_vm0, %v2328_v1 }
  0x52   : > { %2106 = vmatpush3.bf16.msra.mxu0 %v2265_v10  ;;  %v1020_v10 = vrot.slane %v378_v40, 5  ;;  %v2301_v40 = vld [vmem:[%s2829_s3 + $0x210] sm:$0xff]  }
  0x53   : > { %2126 = vmatpush3.bf16.msra.mxu1 %v2266_v11  ;;  %2107 = vmatprep.subr.bf16.mxu0 %v2328_v1  ;;  %v1826_v11 = vrot.slane %v2574_v3, 9 }
  0x54   : > { %2127 = vmatprep.subr.bf16.mxu1 %v2328_v1  ;;  %v1021_v3 = vsel %vm2542_vm6, %v1825_v9, %v1020_v10 }
  0x55   : > { %v1025_v16 = vsel %vm2542_vm6, %v1826_v11, %v1024_v12 }
  0x56   : > { %2108 = vmatpush3.bf16.msra.mxu0 %v2267_v15  ;;  %v903_v15 = vsel %vm2466_vm3, %v898_v6, %v902_v7  ;;  %v1843_v20 = vcombine.low %v1021_v3, %v1025_v16 }
  0x57   : > { %2128 = vmatpush3.bf16.msra.mxu1 %v2268_v19  ;;  %2109 = vmatprep.subr.bf16.mxu0 %v2328_v1  ;;  %v1816_v19 = vcombine.low %v889_v14, %v903_v15 }
  0x58   : > { %2129 = vmatprep.subr.bf16.mxu1 %v2328_v1 }
  0x5a   : > { %2110 = vmatpush3.bf16.msra.mxu0 %v2269_v23  ;;  %v2283_v23 = vld [vmem:[%s2829_s3 + $0x1a8] sm:$0xff]  }
  0x5b   : > { %2130 = vmatpush3.bf16.msra.mxu1 %v2270_v34  ;;  %2111 = vmatprep.subr.bf16.mxu0 %v2328_v1  ;;  %v2293_v34 = vld [vmem:[%s2829_s3 + $0x180] sm:$0xff]  }
  0x5c   : > { %2131 = vmatprep.subr.bf16.mxu1 %v2328_v1 }
  0x5e   : > { %2112 = vmatpush3.bf16.msra.mxu0 %v2271_v44 }
  0x5f   : > { %2132 = vmatpush3.bf16.msra.mxu1 %v2272_v46  ;;  %2113 = vmatprep.subr.bf16.mxu0 %v2328_v1 }
  0x60   : > { %2133 = vmatprep.subr.bf16.mxu1 %v2328_v1 }
  0x62   : > { %2114 = vmatpush3.bf16.msra.mxu0 %v2273_v55 }
  0x63   : > { %2134 = vmatpush3.bf16.msra.mxu1 %v2274_v61  ;;  %2115 = vmatprep.subr.bf16.mxu0 %v2328_v1 }
  0x64   : > { %2135 = vmatprep.subr.bf16.mxu1 %v2328_v1 }
  0x66   : > { %2116 = vmatpush3.bf16.msra.mxu0 %v2275_v0 }
  0x67   : > { %2136 = vmatpush3.bf16.msra.mxu1 %v2276_v8  ;;  %2117 = vmatprep.subr.bf16.mxu0 %v2328_v1 }
  0x68   : > { %2137 = vmatprep.subr.bf16.mxu1 %v2328_v1 }
  0x6a   : > { %2118 = vmatpush3.bf16.msra.mxu0 %v2277_v13 }
  0x6b   : > { %2138 = vmatpush3.bf16.msra.mxu1 %v2278_v2  ;;  %2143 = vmatprep.subr.bf16.mxu0 %v2328_v1 }
  0x6c   : > { %2163 = vmatprep.subr.bf16.mxu1 %v2328_v1 }
  0x6d   : > { %2120 = vmatmul.mubr.bf16.vlgmr.msra.gmra.mxu0 %v1816_v19 }
  0x6e   : > { %2144 = vmatpush3.bf16.msra.mxu0 %v2279_v31  ;;  %2140 = vmatmul.mubr.bf16.vlgmr.msra.gmra.mxu1 %v1843_v20 }
  0x6f   : > { %2164 = vmatpush3.bf16.msra.mxu1 %v2280_v21  ;;  %2145 = vmatprep.subr.bf16.mxu0 %v2328_v1 }
  0x70   : > { %2165 = vmatprep.subr.bf16.mxu1 %v2328_v1  ;;  %2159 = vmatprep.mubr.msk.bf16.mxu0 %vm2329_vm0, %v2328_v1 }
  0x71   : > { %2179 = vmatprep.mubr.msk.bf16.mxu1 %vm2329_vm0, %v2328_v1 }
  0x72   : > { %2146 = vmatpush3.bf16.msra.mxu0 %v2281_v57 }
  0x73   : > { %2166 = vmatpush3.bf16.msra.mxu1 %v2282_v22  ;;  %2147 = vmatprep.subr.bf16.mxu0 %v2328_v1  ;;  %v1534_v22 = vlaneseq }
  0x74   : > { %2167 = vmatprep.subr.bf16.mxu1 %v2328_v1 }
  0x76   : > { %2148 = vmatpush3.bf16.msra.mxu0 %v2283_v23 }
  0x77   : > { %2168 = vmatpush3.bf16.msra.mxu1 %v2284_v24  ;;  %2149 = vmatprep.subr.bf16.mxu0 %v2328_v1 }
  0x78   : > { %2169 = vmatprep.subr.bf16.mxu1 %v2328_v1 }
  0x7a   : > { %2150 = vmatpush3.bf16.msra.mxu0 %v2285_v25 }
  0x7b   : > { %2170 = vmatpush3.bf16.msra.mxu1 %v2286_v26  ;;  %2151 = vmatprep.subr.bf16.mxu0 %v2328_v1 }
  0x7c   : > { %2171 = vmatprep.subr.bf16.mxu1 %v2328_v1 }
  0x7e   : > { %2152 = vmatpush3.bf16.msra.mxu0 %v2287_v27  ;;  %v1929_v27 = vld [vmem:[%s2830_s4] ss:$0 sm:$0xff] }
  0x7f   : > { %2172 = vmatpush3.bf16.msra.mxu1 %v2288_v28  ;;  %2153 = vmatprep.subr.bf16.mxu0 %v2328_v1  ;;  %v1535_v28 = vshrl.u32 %v1534_v22, 7 }
  0x80   : > { %2173 = vmatprep.subr.bf16.mxu1 %v2328_v1 }
  0x82   : > { %2154 = vmatpush3.bf16.msra.mxu0 %v2289_v29 }
  0x83   : > { %2174 = vmatpush3.bf16.msra.mxu1 %v2290_v30  ;;  %2155 = vmatprep.subr.bf16.mxu0 %v2328_v1  ;;  %v1930_v30 = vld [vmem:[%s2831_s5] ss:$0 sm:$0xff] }
  0x84   : > { %2175 = vmatprep.subr.bf16.mxu1 %v2328_v1 }
  0x86   : > { %2156 = vmatpush3.bf16.msra.mxu0 %v2291_v32 }
  0x87   : > { %2176 = vmatpush3.bf16.msra.mxu1 %v2292_v33  ;;  %2157 = vmatprep.subr.bf16.mxu0 %v2328_v1  ;;  %v1536_v33 = vadd.s32 8, %v1535_v28 }
  0x88   : > { %2177 = vmatprep.subr.bf16.mxu1 %v2328_v1 }
  0x8a   : > { %2158 = vmatpush3.bf16.msra.mxu0 %v2293_v34 }
  0x8b   : > { %2178 = vmatpush3.bf16.msra.mxu1 %v2294_v35  ;;  %2183 = vmatprep.subr.bf16.mxu0 %v2328_v1 }
  0x8d   : > { %2160 = vmatmul.mubr.bf16.vlgmr.msra.gmra.mxu0 %v1868_v36 }
  0x8e   : > { %2184 = vmatpush3.bf16.msra.mxu0 %v2296_v37  ;;  %2180 = vmatmul.mubr.bf16.vlgmr.msra.gmra.mxu1 %v2652_v52 }
  0x8f   : > { %2185 = vmatprep.subr.bf16.mxu0 %v2328_v1  ;;  %2199 = vmatprep.mubr.msk.bf16.mxu0 %vm2329_vm0, %v2328_v1 }
  0x92   : > { %2186 = vmatpush3.bf16.msra.mxu0 %v2297_v38 }
  0x93   : > { %2187 = vmatprep.subr.bf16.mxu0 %v2328_v1 }
  0x96   : > { %2188 = vmatpush3.bf16.msra.mxu0 %v2298_v17  ;;  %v1541_v17 = vand.u32 7, %v1535_v28 }
  0x97   : > { %2189 = vmatprep.subr.bf16.mxu0 %v2328_v1 }
  0x98   : > { %vm1561_vm7 = vcmp.lt.s32.totalorder %v1541_v17, 2 }
  0x9a   : > { %2190 = vmatpush3.bf16.msra.mxu0 %v2299_v18  ;;  %v1548_v18 = vand.u32 7, %v1536_v33 }
  0x9b   : > { %2191 = vmatprep.subr.bf16.mxu0 %v2328_v1 }
  0x9c   : > { %vm1562_vm8 = vcmp.lt.s32.totalorder %v1548_v18, 2 }
  0x9e   : > { %2192 = vmatpush3.bf16.msra.mxu0 %v2300_v39 }
  0x9f   : > { %2193 = vmatprep.subr.bf16.mxu0 %v2328_v1 }
  0xa2   : > { %2194 = vmatpush3.bf16.msra.mxu0 %v2301_v40 }
  0xa3   : > { %2195 = vmatprep.subr.bf16.mxu0 %v2328_v1 }
  0xa6   : > { %2196 = vmatpush3.bf16.msra.mxu0 %v2302_v41 }
  0xa7   : > { %2197 = vmatprep.subr.bf16.mxu0 %v2328_v1 }
  0xaa   : > { %2198 = vmatpush3.bf16.msra.mxu0 %v2303_v42 }
  0xad   : > { %2200 = vmatmul.mubr.bf16.vlgmr.msra.gmra.mxu0 %v1920_v63 }
  0xed   : > { %v535_v43 = vpop.f32.mrf.mxu0 }
  0xee   : > { %v630_v44 = vpop.f32.mrf.mxu1 }
  0xef   : > { %v631_v45 = vadd.f32 %v630_v44, %v535_v43  ;;  %v2041_v46 = vpop.f32.mrf.mxu0 }
  0xf0   : > { %v2061_v47 = vpop.f32.mrf.mxu1 }
  0xf1   : > { %v538_v48 = vpop.f32.mrf.mxu0 }
  0xf2   : > { %v633_v49 = vpop.f32.mrf.mxu1 }
  0xf3   : > { %v634_v50 = vadd.f32 %v633_v49, %v538_v48  ;;  %v2042_v51 = vpop.f32.mrf.mxu0 }
  0xf4   : > { %v2062_v52 = vpop.f32.mrf.mxu1 }
 0x10d   : > { %v753_v53 = vpop.f32.mrf.mxu0 }
 0x10e   : > { %v760_v54 = vadd.f32 %v753_v53, %v631_v45  ;;  %v867_v55 = vpop.f32.mrf.mxu1 }
 0x10f   : > { %v2081_v56 = vpop.f32.mrf.mxu0 }
 0x110   : > { %v874_v1 = vadd.f32 %v867_v55, %v760_v54  ;;  %v2101_v58 = vpop.f32.mrf.mxu1 }
 0x111   : > { %v756_v59 = vpop.f32.mrf.mxu0 }
 0x112   : > { %v761_v61 = vadd.f32 %v756_v59, %v634_v50  ;;  %v870_v60 = vpop.f32.mrf.mxu1 }
 0x113   : > { %v2082_v62 = vpop.f32.mrf.mxu0 }
 0x114   : > { %v875_v63 = vadd.f32 %v870_v60, %v761_v61  ;;  %v2102_v0 = vpop.f32.mrf.mxu1 }
 0x12d   : > { %v1007_v4 = vpop.f32.mrf.mxu0 }
 0x12e   : > { %v1129_v5 = vpop.f32.mrf.mxu1  ;;  %v1014_v31 = vadd.f32 %v1007_v4, %v874_v1 }
 0x12f   : > { %v2121_v6 = vpop.f32.mrf.mxu0 }
 0x130   : > { %v2141_v7 = vpop.f32.mrf.mxu1  ;;  %v1136_v20 = vadd.f32 %v1129_v5, %v1014_v31 }
 0x131   : > { %v1010_v8 = vpop.f32.mrf.mxu0 }
 0x132   : > { %v1132_v9 = vpop.f32.mrf.mxu1  ;;  %v1015_v21 = vadd.f32 %v1010_v8, %v875_v63 }
 0x133   : > { %v2122_v10 = vpop.f32.mrf.mxu0 }
 0x134   : > { %v2142_v11 = vpop.f32.mrf.mxu1  ;;  %v1137_v23 = vadd.f32 %v1132_v9, %v1015_v21 }
 0x14d   : > { %v1243_v12 = vpop.f32.mrf.mxu0 }
 0x14e   : > { %v1383_v13 = vpop.f32.mrf.mxu1  ;;  %v1250_v57 = vadd.f32 %v1243_v12, %v1136_v20 }
 0x14f   : > { %v2161_v14 = vpop.f32.mrf.mxu0 }
 0x150   : > { %v2181_v15 = vpop.f32.mrf.mxu1  ;;  %v1390_v24 = vadd.f32 %v1383_v13, %v1250_v57 }
 0x151   : > { %v1246_v2 = vpop.f32.mrf.mxu0 }
 0x152   : > { %v1386_v3 = vpop.f32.mrf.mxu1  ;;  %v1251_v25 = vadd.f32 %v1246_v2, %v1137_v23 }
 0x153   : > { %v2162_v16 = vpop.f32.mrf.mxu0 }
 0x154   : > { %v2182_v19 = vpop.f32.mrf.mxu1  ;;  %v1391_v34 = vadd.f32 %v1386_v3, %v1251_v25 }
 0x16d   : > { %v1505_v26 = vpop.f32.mrf.mxu0 }
 0x16e   : > { %v1512_v29 = vadd.f32 %v1505_v26, %v1390_v24 }
 0x16f   : > { %v2201_v32 = vpop.f32.mrf.mxu0 }
 0x170   : > { %v1521_v35 = vmul.f32 %v1929_v27, %v1512_v29 }
 0x171   : > { %v1508_v36 = vpop.f32.mrf.mxu0 }
 0x172   : > { %v1530_v37 = vadd.f32 %v1930_v30, %v1521_v35  ;;  %v1513_v38 = vadd.f32 %v1508_v36, %v1391_v34 }
 0x173   : > { %v2202_v39 = vpop.f32.mrf.mxu0 }
 0x174   : > { %v1522_v40 = vmul.f32 %v1929_v27, %v1513_v38  ;;  %v1532_v41 = vmax.f32 %v1530_v37, 0.0 }
 0x176   : > { %v1531_v42 = vadd.f32 %v1930_v30, %v1522_v40  ;;  %v1563_v44 = vsel %vm1561_vm7, %v1532_v41, 0.0 }
 0x178   : > { %v1533_v43 = vmax.f32 %v1531_v42, 0.0 }
 0x17a   : > { %v1564_v45 = vsel %vm1562_vm8, %v1533_v43, 0.0 }
 0x17b   : > { %v1940_v46 = vpack.c.bf16 %v1564_v45, %v1563_v44 }
 0x17d   : > { %1941 = vst [vmem:[%s370_s29] sm:$0xff] %v1940_v46  }
 0x17e PF: > { %s16_s23 = sadd.s32 1, %s2326_s23   ;;  %s2837_s21 = smov %s2322_s22 }
 0x17f   : > { %p13_p5 = scmp.ge.s32.totalorder %s16_s23, 4   ;;  %s2838_s22 = smov %s2840_s24 }
 0x181   :  { %15 = sbr.rel (!%p13_p5) target bundleno = 2 (0x2), region = 88 }

</bundles_post_ra>
